<compile_context>
chip_gen: v7x
topology: tpu7x:2x2x1
jax: 0.10.0
libtpu: 0.0.40
codegen_flags: <defaults>
</compile_context>

<pallas_src>
import functools
import math
from collections import namedtuple

import jax
import jax.numpy as jnp
from jax.experimental import pallas as pl
from jax.experimental.pallas import tpu as pltpu

LANE = 128
SUBLANE = 8
MAX_BLOCK_M = 1024
MIN_BLOCK_M = 256
_K_SLAB_BUDGET = 6 * 1024 * 1024        # bf16 bytes per (A+B) K-slab buffer
_VMEM_LIMIT = 32 * 1024 * 1024

# Model hyper-parameters (static — part of the architecture spec).
IN_CH, HID, CODE, K, POOL = 3, 64, 128, 5, (2, 2)


def _round_up(x, m):
    return ((x + m - 1) // m) * m


def _choose_block_m(m):
    """>=2 M tiles when M is big enough (v7x megacore), blocks up to 1024."""
    m8 = _round_up(m, SUBLANE)
    if m8 < 32:                                    # too small to bother splitting
        return m8
    half = _round_up(m8 // 2, SUBLANE)             # exactly 2 tiles when possible
    if half <= MAX_BLOCK_M:
        return half
    for bm in range(MAX_BLOCK_M, MIN_BLOCK_M - 1, -SUBLANE):
        if m8 % bm == 0:
            return bm
    return MAX_BLOCK_M


def _choose_block_k(k_pad, block_m, oc_pad):
    """Keep the bf16 A+B K-slab under budget; split K (multiple of 128) if needed."""
    bytes_per_k = (block_m + oc_pad) * 2
    max_bk = max(LANE, (_K_SLAB_BUDGET // bytes_per_k) // LANE * LANE)
    if k_pad <= max_bk:
        return k_pad
    for bk in range(max_bk, LANE - 1, -LANE):
        if k_pad % bk == 0:
            return bk
    return LANE


# ----------------------------------------------------------------------------
# Pallas kernels: fused matmul + bias + optional ReLU
# ----------------------------------------------------------------------------
def _mm_fused_kernel(a_ref, b_ref, bias_ref, o_ref, *, apply_relu):
    # Single K tile: no scratch, no init/finalize — straight fused epilogue.
    out = jnp.dot(a_ref[...], b_ref[...], preferred_element_type=jnp.float32)
    out = out + bias_ref[...]                       # f32 epilogue (v5e: no bf16 VPU)
    if apply_relu:
        out = jnp.maximum(out, 0.0)
    o_ref[...] = out.astype(o_ref.dtype)


def _mm_ktiled_kernel(a_ref, b_ref, bias_ref, o_ref, *, apply_relu):
    # K-tiled fallback: accumulate into the resident f32 output block (its
    # index_map ignores the k axis), initialised with the bias at k == 0.
    @pl.when(pl.program_id(1) == 0)
    def _init():
        o_ref[...] = jnp.broadcast_to(bias_ref[...], o_ref.shape)

    o_ref[...] += jnp.dot(a_ref[...], b_ref[...],
                          preferred_element_type=jnp.float32)

    if apply_relu:
        @pl.when(pl.program_id(1) == pl.num_programs(1) - 1)
        def _relu():
            o_ref[...] = jnp.maximum(o_ref[...], 0.0)


def _matmul_bias_act(a, w_prep, bias_prep, oc, apply_relu, out_dtype):
    """a: (M, K) bf16 patches, w_prep: (K_pad, OC_pad) bf16, bias: (1, OC_pad) f32."""
    m, k = a.shape
    k_pad, oc_pad = w_prep.shape

    block_m = _choose_block_m(m)
    m_tiles = -(-m // block_m)
    m_pad = m_tiles * block_m
    block_k = _choose_block_k(k_pad, block_m, oc_pad)
    k_tiles = k_pad // block_k

    a_p = a
    if (m_pad != m) or (k_pad != k):
        a_p = jnp.pad(a, ((0, m_pad - m), (0, k_pad - k)))
    a_p = a_p.astype(jnp.bfloat16)

    if k_tiles == 1:
        out = pl.pallas_call(
            functools.partial(_mm_fused_kernel, apply_relu=apply_relu),
            out_shape=jax.ShapeDtypeStruct((m_pad, oc_pad), out_dtype),
            grid=(m_tiles,),
            in_specs=[
                pl.BlockSpec((block_m, k_pad), lambda i: (i, 0)),
                pl.BlockSpec((k_pad, oc_pad), lambda i: (0, 0)),
                pl.BlockSpec((1, oc_pad), lambda i: (0, 0)),
            ],
            out_specs=pl.BlockSpec((block_m, oc_pad), lambda i: (i, 0)),
            compiler_params=pltpu.CompilerParams(
                dimension_semantics=("parallel",),
                vmem_limit_bytes=_VMEM_LIMIT),
        )(a_p, w_prep, bias_prep)
        return out[:m, :oc]

    out = pl.pallas_call(
        functools.partial(_mm_ktiled_kernel, apply_relu=apply_relu),
        out_shape=jax.ShapeDtypeStruct((m_pad, oc_pad), jnp.float32),
        grid=(m_tiles, k_tiles),
        in_specs=[
            pl.BlockSpec((block_m, block_k), lambda i, kk: (i, kk)),
            pl.BlockSpec((block_k, oc_pad), lambda i, kk: (kk, 0)),
            pl.BlockSpec((1, oc_pad), lambda i, kk: (0, 0)),
        ],
        out_specs=pl.BlockSpec((block_m, oc_pad), lambda i, kk: (i, 0)),
        compiler_params=pltpu.CompilerParams(
            dimension_semantics=("parallel", "arbitrary"),
            vmem_limit_bytes=_VMEM_LIMIT),
    )(a_p, w_prep, bias_prep)
    return out[:m, :oc].astype(out_dtype)


# ----------------------------------------------------------------------------
# Conv glue (NHWC, bf16; im2col is layout plumbing, the matmul is Pallas)
# ----------------------------------------------------------------------------
def _im2col_nhwc(x, kh, kw, stride):
    """x: (N, H, W, C) (already padded) -> (N*OH*OW, KH*KW*C), order (kh, kw, c)."""
    n, h, w, c = x.shape
    oh = (h - kh) // stride + 1
    ow = (w - kw) // stride + 1
    cols = []
    for dy in range(kh):
        for dx in range(kw):
            cols.append(x[:, dy:dy + stride * (oh - 1) + 1:stride,
                            dx:dx + stride * (ow - 1) + 1:stride, :])
    p = jnp.stack(cols, axis=3)                     # (N, OH, OW, KH*KW, C)
    return p.reshape(n * oh * ow, kh * kw * c), oh, ow


def conv2d_prepared(x, w_prep, bias_prep, *, oc, k, stride, padding, relu,
                    out_dtype=jnp.bfloat16):
    """PyTorch-style Conv2d on NHWC bf16 input with pre-laid-out weights."""
    n = x.shape[0]
    if padding:
        x = jnp.pad(x, ((0, 0), (padding, padding), (padding, padding), (0, 0)))
    patches, oh, ow = _im2col_nhwc(x, k, k, stride)
    out = _matmul_bias_act(patches, w_prep, bias_prep, oc, relu, out_dtype)
    return out.reshape(n, oh, ow, oc)


_PhaseGeom = namedtuple("_PhaseGeom", "Q ntap pad_lo pad_hi start length")


def _phase_geom(size, k, s, p, op, r):
    """1-D geometry of output phase r (out index ≡ r mod s) of a ConvTranspose."""
    out_size = (size - 1) * s - 2 * p + k + op
    k0 = (r + p) % s
    ntap = len(range(k0, k, s))
    c0 = (r + p) // s
    q = -(-(out_size - r) // s)                     # ceil((out_size - r)/s)
    lo = c0 - (ntap - 1)
    hi = q + c0 - 1
    pad_lo = max(0, -lo)
    pad_hi = max(0, hi - (size - 1))
    start = lo + pad_lo
    length = q + ntap - 1
    return _PhaseGeom(q, ntap, pad_lo, pad_hi, start, length)


def conv_transpose2d_prepared(x, w_phases, bias_prep, *, oc, k, stride,
                              padding=0, output_padding=0, relu=False,
                              out_dtype=jnp.bfloat16):
    """PyTorch-style ConvTranspose2d via sub-pixel phase decomposition.

    For stride s, output phase (ry, rx) is a plain stride-1 conv of the
    (un-dilated) input with the flipped sub-kernel w[:, :, ky0::s, kx0::s],
    so the ~75% structurally-zero columns of the dilated im2col never exist.
    For stride == 1 this degenerates to the usual flip-conv with pad k-1-p.
    """
    n, h, w, _ = x.shape
    oh = (h - 1) * stride - 2 * padding + k + output_padding
    ow = (w - 1) * stride - 2 * padding + k + output_padding
    full = None if stride == 1 else jnp.zeros((n, oh, ow, oc), out_dtype)
    phase_idx = 0
    for ry in range(stride):
        gy = _phase_geom(h, k, stride, padding, output_padding, ry)
        for rx in range(stride):
            gx = _phase_geom(w, k, stride, padding, output_padding, rx)
            seg = jnp.pad(x, ((0, 0), (gy.pad_lo, gy.pad_hi),
                              (gx.pad_lo, gx.pad_hi), (0, 0)))
            seg = seg[:, gy.start:gy.start + gy.length,
                         gx.start:gx.start + gx.length, :]
            patches, qh, qw = _im2col_nhwc(seg, gy.ntap, gx.ntap, 1)
            o = _matmul_bias_act(patches, w_phases[phase_idx], bias_prep, oc,
                                 relu, out_dtype)
            o = o.reshape(n, qh, qw, oc)
            if stride == 1:
                full = o
            else:
                full = full.at[:, ry::stride, rx::stride, :].set(o)
            phase_idx += 1
    return full


def avg_pool_nhwc(x, pooling=(2, 2)):
    """AvgPool2d in plain XLA (tiny reduction; a Pallas call only adds overhead)."""
    n, h, w, c = x.shape
    ph, pw = pooling
    xr = x.reshape(n, h // ph, ph, w // pw, pw, c).astype(jnp.float32)
    return (xr.sum(axis=(2, 4)) * (1.0 / (ph * pw))).astype(x.dtype)


def frozen_unpool_nhwc(x, bias, pooling=(2, 2), relu=False):
    """decoder_unpool: every weight frozen to 1/(ph*pw), kernel==stride==pooling,
    so the ConvTranspose collapses to (channel-sum / (ph*pw)) nearest-upsampled
    + per-channel bias."""
    ph, pw = pooling
    s = jnp.sum(x.astype(jnp.float32), axis=-1, keepdims=True) * (1.0 / (ph * pw))
    s = jnp.repeat(jnp.repeat(s, ph, axis=1), pw, axis=2)
    out = s + bias.reshape(1, 1, 1, -1).astype(jnp.float32)
    if relu:
        out = jnp.maximum(out, 0.0)
    return out.astype(x.dtype)


# ----------------------------------------------------------------------------
# Parameters: raw (PyTorch layout) init + one-time kernel-ready preparation
# ----------------------------------------------------------------------------
def _uniform(key, shape, bound):
    return jax.random.uniform(key, shape, jnp.float32, -bound, bound)


def init_params(key, in_channels=IN_CH, hid=HID, code=CODE, k=K, pooling=POOL):
    ks = jax.random.split(key, 12)
    p = {}
    b = 1.0 / math.sqrt(in_channels * k * k)
    p["enc_h_w"] = _uniform(ks[0], (hid, in_channels, k, k), b)
    p["enc_h_b"] = _uniform(ks[1], (hid,), b)
    b = 1.0 / math.sqrt(hid * k * k)
    p["enc_o1_w"] = _uniform(ks[2], (code, hid, k, k), b)
    p["enc_o1_b"] = _uniform(ks[3], (code,), b)
    b = 1.0 / math.sqrt(code * k * k)
    p["enc_o2_w"] = _uniform(ks[4], (code, code, k, k), b)
    p["enc_o2_b"] = _uniform(ks[5], (code,), b)
    # ConvTranspose weights use PyTorch layout (IC, OC, K, K)
    p["dec_h2_w"] = _uniform(ks[6], (code, code, k, k), b)
    p["dec_h2_b"] = _uniform(ks[7], (code,), b)
    p["dec_h1_w"] = _uniform(ks[8], (code, hid, k, k), b)
    p["dec_h1_b"] = _uniform(ks[9], (hid,), 1.0 / math.sqrt(hid * k * k))
    # decoder_unpool weight is frozen to 1/(ph*pw) -> exploited analytically
    p["dec_up_b"] = _uniform(ks[10], (hid,),
                             1.0 / math.sqrt(hid * pooling[0] * pooling[1]))
    b = 1.0 / math.sqrt(in_channels * k * k)
    p["dec_o_w"] = _uniform(ks[11], (hid, in_channels, k, k), b)
    p["dec_o_b"] = _uniform(jax.random.fold_in(key, 99), (in_channels,), b)
    return p


def _pad_cast_w(wm):
    kdim, oc = wm.shape
    k_pad = _round_up(kdim, LANE)
    oc_pad = _round_up(max(oc, LANE), LANE)
    return jnp.pad(wm, ((0, k_pad - kdim), (0, oc_pad - oc))).astype(jnp.bfloat16)


def _prep_bias(b):
    oc = b.shape[0]
    oc_pad = _round_up(max(oc, LANE), LANE)
    return jnp.pad(b, (0, oc_pad - oc)).reshape(1, oc_pad).astype(jnp.float32)


def _prep_conv_w(w):
    """Conv2d weight (OC, IC, kh, kw) -> (kh*kw*ic, oc) padded bf16 (im2col order)."""
    oc, ic, kh, kw = w.shape
    wm = w.transpose(2, 3, 1, 0).reshape(kh * kw * ic, oc)
    return _pad_cast_w(wm)


def _prep_convT_w(w, *, stride, padding):
    """ConvTranspose2d weight (IC, OC, k, k) -> list of per-phase padded bf16 mats."""
    ic, oc, k, _ = w.shape
    phases = []
    for ry in range(stride):
        for rx in range(stride):
            ky0 = (ry + padding) % stride
            kx0 = (rx + padding) % stride
            sub = jnp.flip(w[:, :, ky0::stride, kx0::stride], axis=(2, 3))
            ny, nx = sub.shape[2], sub.shape[3]
            wm = sub.transpose(2, 3, 0, 1).reshape(ny * nx * ic, oc)
            phases.append(_pad_cast_w(wm))
    return phases


def prepare_params(raw):
    """One-time weight re-layout (transpose + pad + bf16 cast) — never in forward."""
    p = {}
    p["enc_h_w"] = _prep_conv_w(raw["enc_h_w"]); p["enc_h_b"] = _prep_bias(raw["enc_h_b"])
    p["enc_o1_w"] = _prep_conv_w(raw["enc_o1_w"]); p["enc_o1_b"] = _prep_bias(raw["enc_o1_b"])
    p["enc_o2_w"] = _prep_conv_w(raw["enc_o2_w"]); p["enc_o2_b"] = _prep_bias(raw["enc_o2_b"])
    p["dec_h2_w"] = _prep_convT_w(raw["dec_h2_w"], stride=2, padding=0)
    p["dec_h2_b"] = _prep_bias(raw["dec_h2_b"])
    p["dec_h1_w"] = _prep_convT_w(raw["dec_h1_w"], stride=2, padding=2)
    p["dec_h1_b"] = _prep_bias(raw["dec_h1_b"])
    p["dec_up_b"] = raw["dec_up_b"].astype(jnp.float32)
    p["dec_o_w"] = _prep_convT_w(raw["dec_o_w"], stride=1, padding=0)
    p["dec_o_b"] = _prep_bias(raw["dec_o_b"])
    return p


# ----------------------------------------------------------------------------
# Forward
# ----------------------------------------------------------------------------
def _forward_impl(x, p):
    x = x.transpose(0, 2, 3, 1).astype(jnp.bfloat16)     # NCHW -> NHWC once, bf16
    # encoder
    x = conv2d_prepared(x, p["enc_h_w"], p["enc_h_b"], oc=HID, k=K,
                        stride=1, padding=0, relu=True)
    # Dropout2d -> identity (inference mode)
    x = avg_pool_nhwc(x, POOL)
    x = conv2d_prepared(x, p["enc_o1_w"], p["enc_o1_b"], oc=CODE, k=K,
                        stride=2, padding=2, relu=False)
    x = conv2d_prepared(x, p["enc_o2_w"], p["enc_o2_b"], oc=CODE, k=K,
                        stride=2, padding=0, relu=True)
    # decoder
    x = conv_transpose2d_prepared(x, p["dec_h2_w"], p["dec_h2_b"], oc=CODE, k=K,
                                  stride=2, padding=0, output_padding=0)
    x = conv_transpose2d_prepared(x, p["dec_h1_w"], p["dec_h1_b"], oc=HID, k=K,
                                  stride=2, padding=2, output_padding=1)
    # unpool + (dropout = identity) + ReLU
    x = frozen_unpool_nhwc(x, p["dec_up_b"], POOL, relu=True)
    x = conv_transpose2d_prepared(x, p["dec_o_w"], p["dec_o_b"], oc=IN_CH, k=K,
                                  stride=1, padding=0, output_padding=0,
                                  out_dtype=jnp.float32)
    return x.transpose(0, 3, 1, 2)                        # NHWC -> NCHW once, f32


@jax.jit
def forward(x, p):
    return _forward_impl(x, p)


if __name__ == "__main__":
    key = jax.random.PRNGKey(0)
    k_param, k_x = jax.random.split(key)
    raw_params = init_params(k_param)
    params = prepare_params(raw_params)                   # one-time layout/pad/cast
    x = jax.random.normal(k_x, (2, 3, 32, 32), dtype=jnp.float32)  # N, C, H, W

    out = forward(x, params)
    out = jax.block_until_ready(out)

    assert out.shape == (2, 3, 32, 32), out.shape
    assert out.dtype == jnp.float32, out.dtype
    assert bool(jnp.all(jnp.isfinite(out)))
    print("KERNEL_OK")
</pallas_src>

<mosaic_0001>
module attributes {stable_mosaic.version = 11 : i64} {
  func.func @_mm_fused_kernel(%arg0: i32, %arg1: memref<784x128xbf16, #tpu.memory_space<vmem>>, %arg2: memref<128x128xbf16, #tpu.memory_space<vmem>>, %arg3: memref<1x128xf32, #tpu.memory_space<vmem>>, %arg4: memref<784x128xbf16, #tpu.memory_space<vmem>>) attributes {dimension_semantics = [#tpu.dimension_semantics<parallel>], iteration_bounds = array<i64: 2>, scalar_prefetch = 0 : i64, scratch_operands = 0 : i64, tpu.core_type = #tpu.core_type<tc>, window_params = [{transform_indices = @transform_0, window_bounds = array<i64: 784, 128>}, {pipeline_mode = #tpu.pipeline_mode<synchronous>, transform_indices = @transform_1, window_bounds = array<i64: 128, 128>}, {pipeline_mode = #tpu.pipeline_mode<synchronous>, transform_indices = @transform_2, window_bounds = array<i64: 1, 128>}, {transform_indices = @transform_3, window_bounds = array<i64: 784, 128>}]} {
    %c0 = arith.constant 0 : index
    %c0_0 = arith.constant 0 : index
    %0 = vector.load %arg1[%c0, %c0_0] : memref<784x128xbf16, #tpu.memory_space<vmem>>, vector<784x128xbf16>
    %c0_1 = arith.constant 0 : index
    %c0_2 = arith.constant 0 : index
    %1 = vector.load %arg2[%c0_1, %c0_2] : memref<128x128xbf16, #tpu.memory_space<vmem>>, vector<128x128xbf16>
    %cst = arith.constant dense<0.000000e+00> : vector<784x128xf32>
    %2 = tpu.matmul %0, %1, %cst {dimension_numbers = #tpu.dot_dimension_numbers<[1], [0], [0], [1], [0, 0, 1, 1], [], []>} : vector<784x128xbf16>, vector<128x128xbf16>, vector<784x128xf32> -> vector<784x128xf32>
    %c0_3 = arith.constant 0 : index
    %c0_4 = arith.constant 0 : index
    %3 = vector.load %arg3[%c0_3, %c0_4] : memref<1x128xf32, #tpu.memory_space<vmem>>, vector<1x128xf32>
    %4 = vector.broadcast %3 : vector<1x128xf32> to vector<784x128xf32>
    %5 = arith.addf %2, %4 : vector<784x128xf32>
    %cst_5 = arith.constant 0.000000e+00 : f32
    %6 = vector.broadcast %cst_5 : f32 to vector<784x128xf32>
    %7 = arith.maximumf %5, %6 : vector<784x128xf32>
    %8 = arith.truncf %7 : vector<784x128xf32> to vector<784x128xbf16>
    %c0_6 = arith.constant 0 : index
    %c0_7 = arith.constant 0 : index
    %9 = vector.load %arg4[%c0_6, %c0_7] : memref<784x128xbf16, #tpu.memory_space<vmem>>, vector<784x128xbf16>
    tpu.vector_store %arg4[%c0_6, %c0_7], %8 {strides = array<i32>} : memref<784x128xbf16, #tpu.memory_space<vmem>>, vector<784x128xbf16>,
    return
  }
  func.func @transform_0(%arg0: i32) -> (i32, i32) {
    %c0_i32 = arith.constant 0 : i32
    %c0_i32_0 = arith.constant 0 : i32
    return %arg0, %c0_i32 : i32, i32
  }
  func.func @transform_1(%arg0: i32) -> (i32, i32) {
    %c0_i32 = arith.constant 0 : i32
    %c0_i32_0 = arith.constant 0 : i32
    %c0_i32_1 = arith.constant 0 : i32
    return %c0_i32, %c0_i32_0 : i32, i32
  }
  func.func @transform_2(%arg0: i32) -> (i32, i32) {
    %c0_i32 = arith.constant 0 : i32
    %c0_i32_0 = arith.constant 0 : i32
    %c0_i32_1 = arith.constant 0 : i32
    return %c0_i32, %c0_i32_0 : i32, i32
  }
  func.func @transform_3(%arg0: i32) -> (i32, i32) {
    %c0_i32 = arith.constant 0 : i32
    %c0_i32_0 = arith.constant 0 : i32
    return %arg0, %c0_i32 : i32, i32
  }
}

module attributes {stable_mosaic.version = 11 : i64} {
  func.func @_mm_fused_kernel(%arg0: i32, %arg1: memref<56x1664xbf16, #tpu.memory_space<vmem>>, %arg2: memref<1664x128xbf16, #tpu.memory_space<vmem>>, %arg3: memref<1x128xf32, #tpu.memory_space<vmem>>, %arg4: memref<56x128xbf16, #tpu.memory_space<vmem>>) attributes {dimension_semantics = [#tpu.dimension_semantics<parallel>], iteration_bounds = array<i64: 2>, scalar_prefetch = 0 : i64, scratch_operands = 0 : i64, tpu.core_type = #tpu.core_type<tc>, window_params = [{transform_indices = @transform_0, window_bounds = array<i64: 56, 1664>}, {pipeline_mode = #tpu.pipeline_mode<synchronous>, transform_indices = @transform_1, window_bounds = array<i64: 1664, 128>}, {pipeline_mode = #tpu.pipeline_mode<synchronous>, transform_indices = @transform_2, window_bounds = array<i64: 1, 128>}, {transform_indices = @transform_3, window_bounds = array<i64: 56, 128>}]} {
    %c0 = arith.constant 0 : index
    %c0_0 = arith.constant 0 : index
    %0 = vector.load %arg1[%c0, %c0_0] : memref<56x1664xbf16, #tpu.memory_space<vmem>>, vector<56x1664xbf16>
    %c0_1 = arith.constant 0 : index
    %c0_2 = arith.constant 0 : index
    %1 = vector.load %arg2[%c0_1, %c0_2] : memref<1664x128xbf16, #tpu.memory_space<vmem>>, vector<1664x128xbf16>
    %cst = arith.constant dense<0.000000e+00> : vector<56x128xf32>
    %2 = tpu.matmul %0, %1, %cst {dimension_numbers = #tpu.dot_dimension_numbers<[1], [0], [0], [1], [0, 0, 1, 1], [], []>} : vector<56x1664xbf16>, vector<1664x128xbf16>, vector<56x128xf32> -> vector<56x128xf32>
    %c0_3 = arith.constant 0 : index
    %c0_4 = arith.constant 0 : index
    %3 = vector.load %arg3[%c0_3, %c0_4] : memref<1x128xf32, #tpu.memory_space<vmem>>, vector<1x128xf32>
    %4 = vector.broadcast %3 : vector<1x128xf32> to vector<56x128xf32>
    %5 = arith.addf %2, %4 : vector<56x128xf32>
    %6 = arith.truncf %5 : vector<56x128xf32> to vector<56x128xbf16>
    %c0_5 = arith.constant 0 : index
    %c0_6 = arith.constant 0 : index
    %7 = vector.load %arg4[%c0_5, %c0_6] : memref<56x128xbf16, #tpu.memory_space<vmem>>, vector<56x128xbf16>
    tpu.vector_store %arg4[%c0_5, %c0_6], %6 {strides = array<i32>} : memref<56x128xbf16, #tpu.memory_space<vmem>>, vector<56x128xbf16>,
    return
  }
  func.func @transform_0(%arg0: i32) -> (i32, i32) {
    %c0_i32 = arith.constant 0 : i32
    %c0_i32_0 = arith.constant 0 : i32
    return %arg0, %c0_i32 : i32, i32
  }
  func.func @transform_1(%arg0: i32) -> (i32, i32) {
    %c0_i32 = arith.constant 0 : i32
    %c0_i32_0 = arith.constant 0 : i32
    %c0_i32_1 = arith.constant 0 : i32
    return %c0_i32, %c0_i32_0 : i32, i32
  }
  func.func @transform_2(%arg0: i32) -> (i32, i32) {
    %c0_i32 = arith.constant 0 : i32
    %c0_i32_0 = arith.constant 0 : i32
    %c0_i32_1 = arith.constant 0 : i32
    return %c0_i32, %c0_i32_0 : i32, i32
  }
  func.func @transform_3(%arg0: i32) -> (i32, i32) {
    %c0_i32 = arith.constant 0 : i32
    %c0_i32_0 = arith.constant 0 : i32
    return %arg0, %c0_i32 : i32, i32
  }
}

module attributes {stable_mosaic.version = 11 : i64} {
  func.func @_mm_fused_kernel(%arg0: i32, %arg1: memref<8x3200xbf16, #tpu.memory_space<vmem>>, %arg2: memref<3200x128xbf16, #tpu.memory_space<vmem>>, %arg3: memref<1x128xf32, #tpu.memory_space<vmem>>, %arg4: memref<8x128xbf16, #tpu.memory_space<vmem>>) attributes {dimension_semantics = [#tpu.dimension_semantics<parallel>], iteration_bounds = array<i64: 1>, scalar_prefetch = 0 : i64, scratch_operands = 0 : i64, tpu.core_type = #tpu.core_type<tc>, window_params = [{transform_indices = @transform_0, window_bounds = array<i64: 8, 3200>}, {pipeline_mode = #tpu.pipeline_mode<synchronous>, transform_indices = @transform_1, window_bounds = array<i64: 3200, 128>}, {pipeline_mode = #tpu.pipeline_mode<synchronous>, transform_indices = @transform_2, window_bounds = array<i64: 1, 128>}, {transform_indices = @transform_3, window_bounds = array<i64: 8, 128>}]} {
    %c0 = arith.constant 0 : index
    %c0_0 = arith.constant 0 : index
    %0 = vector.load %arg1[%c0, %c0_0] : memref<8x3200xbf16, #tpu.memory_space<vmem>>, vector<8x3200xbf16>
    %c0_1 = arith.constant 0 : index
    %c0_2 = arith.constant 0 : index
    %1 = vector.load %arg2[%c0_1, %c0_2] : memref<3200x128xbf16, #tpu.memory_space<vmem>>, vector<3200x128xbf16>
    %cst = arith.constant dense<0.000000e+00> : vector<8x128xf32>
    %2 = tpu.matmul %0, %1, %cst {dimension_numbers = #tpu.dot_dimension_numbers<[1], [0], [0], [1], [0, 0, 1, 1], [], []>} : vector<8x3200xbf16>, vector<3200x128xbf16>, vector<8x128xf32> -> vector<8x128xf32>
    %c0_3 = arith.constant 0 : index
    %c0_4 = arith.constant 0 : index
    %3 = vector.load %arg3[%c0_3, %c0_4] : memref<1x128xf32, #tpu.memory_space<vmem>>, vector<1x128xf32>
    %4 = vector.broadcast %3 : vector<1x128xf32> to vector<8x128xf32>
    %5 = arith.addf %2, %4 : vector<8x128xf32>
    %cst_5 = arith.constant 0.000000e+00 : f32
    %6 = vector.broadcast %cst_5 : f32 to vector<8x128xf32>
    %7 = arith.maximumf %5, %6 : vector<8x128xf32>
    %8 = arith.truncf %7 : vector<8x128xf32> to vector<8x128xbf16>
    %c0_6 = arith.constant 0 : index
    %c0_7 = arith.constant 0 : index
    %9 = vector.load %arg4[%c0_6, %c0_7] : memref<8x128xbf16, #tpu.memory_space<vmem>>, vector<8x128xbf16>
    tpu.vector_store %arg4[%c0_6, %c0_7], %8 {strides = array<i32>} : memref<8x128xbf16, #tpu.memory_space<vmem>>, vector<8x128xbf16>,
    return
  }
  func.func @transform_0(%arg0: i32) -> (i32, i32) {
    %c0_i32 = arith.constant 0 : i32
    %c0_i32_0 = arith.constant 0 : i32
    return %arg0, %c0_i32 : i32, i32
  }
  func.func @transform_1(%arg0: i32) -> (i32, i32) {
    %c0_i32 = arith.constant 0 : i32
    %c0_i32_0 = arith.constant 0 : i32
    %c0_i32_1 = arith.constant 0 : i32
    return %c0_i32, %c0_i32_0 : i32, i32
  }
  func.func @transform_2(%arg0: i32) -> (i32, i32) {
    %c0_i32 = arith.constant 0 : i32
    %c0_i32_0 = arith.constant 0 : i32
    %c0_i32_1 = arith.constant 0 : i32
    return %c0_i32, %c0_i32_0 : i32, i32
  }
  func.func @transform_3(%arg0: i32) -> (i32, i32) {
    %c0_i32 = arith.constant 0 : i32
    %c0_i32_0 = arith.constant 0 : i32
    return %arg0, %c0_i32 : i32, i32
  }
}

module attributes {stable_mosaic.version = 11 : i64} {
  func.func @_mm_fused_kernel(%arg0: i32, %arg1: memref<24x512xbf16, #tpu.memory_space<vmem>>, %arg2: memref<512x128xbf16, #tpu.memory_space<vmem>>, %arg3: memref<1x128xf32, #tpu.memory_space<vmem>>, %arg4: memref<24x128xbf16, #tpu.memory_space<vmem>>) attributes {dimension_semantics = [#tpu.dimension_semantics<parallel>], iteration_bounds = array<i64: 1>, scalar_prefetch = 0 : i64, scratch_operands = 0 : i64, tpu.core_type = #tpu.core_type<tc>, window_params = [{transform_indices = @transform_0, window_bounds = array<i64: 24, 512>}, {pipeline_mode = #tpu.pipeline_mode<synchronous>, transform_indices = @transform_1, window_bounds = array<i64: 512, 128>}, {pipeline_mode = #tpu.pipeline_mode<synchronous>, transform_indices = @transform_2, window_bounds = array<i64: 1, 128>}, {transform_indices = @transform_3, window_bounds = array<i64: 24, 128>}]} {
    %c0 = arith.constant 0 : index
    %c0_0 = arith.constant 0 : index
    %0 = vector.load %arg1[%c0, %c0_0] : memref<24x512xbf16, #tpu.memory_space<vmem>>, vector<24x512xbf16>
    %c0_1 = arith.constant 0 : index
    %c0_2 = arith.constant 0 : index
    %1 = vector.load %arg2[%c0_1, %c0_2] : memref<512x128xbf16, #tpu.memory_space<vmem>>, vector<512x128xbf16>
    %cst = arith.constant dense<0.000000e+00> : vector<24x128xf32>
    %2 = tpu.matmul %0, %1, %cst {dimension_numbers = #tpu.dot_dimension_numbers<[1], [0], [0], [1], [0, 0, 1, 1], [], []>} : vector<24x512xbf16>, vector<512x128xbf16>, vector<24x128xf32> -> vector<24x128xf32>
    %c0_3 = arith.constant 0 : index
    %c0_4 = arith.constant 0 : index
    %3 = vector.load %arg3[%c0_3, %c0_4] : memref<1x128xf32, #tpu.memory_space<vmem>>, vector<1x128xf32>
    %4 = vector.broadcast %3 : vector<1x128xf32> to vector<24x128xf32>
    %5 = arith.addf %2, %4 : vector<24x128xf32>
    %6 = arith.truncf %5 : vector<24x128xf32> to vector<24x128xbf16>
    %c0_5 = arith.constant 0 : index
    %c0_6 = arith.constant 0 : index
    %7 = vector.load %arg4[%c0_5, %c0_6] : memref<24x128xbf16, #tpu.memory_space<vmem>>, vector<24x128xbf16>
    tpu.vector_store %arg4[%c0_5, %c0_6], %6 {strides = array<i32>} : memref<24x128xbf16, #tpu.memory_space<vmem>>, vector<24x128xbf16>,
    return
  }
  func.func @transform_0(%arg0: i32) -> (i32, i32) {
    %c0_i32 = arith.constant 0 : i32
    %c0_i32_0 = arith.constant 0 : i32
    return %arg0, %c0_i32 : i32, i32
  }
  func.func @transform_1(%arg0: i32) -> (i32, i32) {
    %c0_i32 = arith.constant 0 : i32
    %c0_i32_0 = arith.constant 0 : i32
    %c0_i32_1 = arith.constant 0 : i32
    return %c0_i32, %c0_i32_0 : i32, i32
  }
  func.func @transform_2(%arg0: i32) -> (i32, i32) {
    %c0_i32 = arith.constant 0 : i32
    %c0_i32_0 = arith.constant 0 : i32
    %c0_i32_1 = arith.constant 0 : i32
    return %c0_i32, %c0_i32_0 : i32, i32
  }
  func.func @transform_3(%arg0: i32) -> (i32, i32) {
    %c0_i32 = arith.constant 0 : i32
    %c0_i32_0 = arith.constant 0 : i32
    return %arg0, %c0_i32 : i32, i32
  }
}

module attributes {stable_mosaic.version = 11 : i64} {
  func.func @_mm_fused_kernel(%arg0: i32, %arg1: memref<24x768xbf16, #tpu.memory_space<vmem>>, %arg2: memref<768x128xbf16, #tpu.memory_space<vmem>>, %arg3: memref<1x128xf32, #tpu.memory_space<vmem>>, %arg4: memref<24x128xbf16, #tpu.memory_space<vmem>>) attributes {dimension_semantics = [#tpu.dimension_semantics<parallel>], iteration_bounds = array<i64: 1>, scalar_prefetch = 0 : i64, scratch_operands = 0 : i64, tpu.core_type = #tpu.core_type<tc>, window_params = [{transform_indices = @transform_0, window_bounds = array<i64: 24, 768>}, {pipeline_mode = #tpu.pipeline_mode<synchronous>, transform_indices = @transform_1, window_bounds = array<i64: 768, 128>}, {pipeline_mode = #tpu.pipeline_mode<synchronous>, transform_indices = @transform_2, window_bounds = array<i64: 1, 128>}, {transform_indices = @transform_3, window_bounds = array<i64: 24, 128>}]} {
    %c0 = arith.constant 0 : index
    %c0_0 = arith.constant 0 : index
    %0 = vector.load %arg1[%c0, %c0_0] : memref<24x768xbf16, #tpu.memory_space<vmem>>, vector<24x768xbf16>
    %c0_1 = arith.constant 0 : index
    %c0_2 = arith.constant 0 : index
    %1 = vector.load %arg2[%c0_1, %c0_2] : memref<768x128xbf16, #tpu.memory_space<vmem>>, vector<768x128xbf16>
    %cst = arith.constant dense<0.000000e+00> : vector<24x128xf32>
    %2 = tpu.matmul %0, %1, %cst {dimension_numbers = #tpu.dot_dimension_numbers<[1], [0], [0], [1], [0, 0, 1, 1], [], []>} : vector<24x768xbf16>, vector<768x128xbf16>, vector<24x128xf32> -> vector<24x128xf32>
    %c0_3 = arith.constant 0 : index
    %c0_4 = arith.constant 0 : index
    %3 = vector.load %arg3[%c0_3, %c0_4] : memref<1x128xf32, #tpu.memory_space<vmem>>, vector<1x128xf32>
    %4 = vector.broadcast %3 : vector<1x128xf32> to vector<24x128xf32>
    %5 = arith.addf %2, %4 : vector<24x128xf32>
    %6 = arith.truncf %5 : vector<24x128xf32> to vector<24x128xbf16>
    %c0_5 = arith.constant 0 : index
    %c0_6 = arith.constant 0 : index
    %7 = vector.load %arg4[%c0_5, %c0_6] : memref<24x128xbf16, #tpu.memory_space<vmem>>, vector<24x128xbf16>
    tpu.vector_store %arg4[%c0_5, %c0_6], %6 {strides = array<i32>} : memref<24x128xbf16, #tpu.memory_space<vmem>>, vector<24x128xbf16>,
    return
  }
  func.func @transform_0(%arg0: i32) -> (i32, i32) {
    %c0_i32 = arith.constant 0 : i32
    %c0_i32_0 = arith.constant 0 : i32
    return %arg0, %c0_i32 : i32, i32
  }
  func.func @transform_1(%arg0: i32) -> (i32, i32) {
    %c0_i32 = arith.constant 0 : i32
    %c0_i32_0 = arith.constant 0 : i32
    %c0_i32_1 = arith.constant 0 : i32
    return %c0_i32, %c0_i32_0 : i32, i32
  }
  func.func @transform_2(%arg0: i32) -> (i32, i32) {
    %c0_i32 = arith.constant 0 : i32
    %c0_i32_0 = arith.constant 0 : i32
    %c0_i32_1 = arith.constant 0 : i32
    return %c0_i32, %c0_i32_0 : i32, i32
  }
  func.func @transform_3(%arg0: i32) -> (i32, i32) {
    %c0_i32 = arith.constant 0 : i32
    %c0_i32_0 = arith.constant 0 : i32
    return %arg0, %c0_i32 : i32, i32
  }
}

module attributes {stable_mosaic.version = 11 : i64} {
  func.func @_mm_fused_kernel(%arg0: i32, %arg1: memref<16x1152xbf16, #tpu.memory_space<vmem>>, %arg2: memref<1152x128xbf16, #tpu.memory_space<vmem>>, %arg3: memref<1x128xf32, #tpu.memory_space<vmem>>, %arg4: memref<16x128xbf16, #tpu.memory_space<vmem>>) attributes {dimension_semantics = [#tpu.dimension_semantics<parallel>], iteration_bounds = array<i64: 2>, scalar_prefetch = 0 : i64, scratch_operands = 0 : i64, tpu.core_type = #tpu.core_type<tc>, window_params = [{transform_indices = @transform_0, window_bounds = array<i64: 16, 1152>}, {pipeline_mode = #tpu.pipeline_mode<synchronous>, transform_indices = @transform_1, window_bounds = array<i64: 1152, 128>}, {pipeline_mode = #tpu.pipeline_mode<synchronous>, transform_indices = @transform_2, window_bounds = array<i64: 1, 128>}, {transform_indices = @transform_3, window_bounds = array<i64: 16, 128>}]} {
    %c0 = arith.constant 0 : index
    %c0_0 = arith.constant 0 : index
    %0 = vector.load %arg1[%c0, %c0_0] : memref<16x1152xbf16, #tpu.memory_space<vmem>>, vector<16x1152xbf16>
    %c0_1 = arith.constant 0 : index
    %c0_2 = arith.constant 0 : index
    %1 = vector.load %arg2[%c0_1, %c0_2] : memref<1152x128xbf16, #tpu.memory_space<vmem>>, vector<1152x128xbf16>
    %cst = arith.constant dense<0.000000e+00> : vector<16x128xf32>
    %2 = tpu.matmul %0, %1, %cst {dimension_numbers = #tpu.dot_dimension_numbers<[1], [0], [0], [1], [0, 0, 1, 1], [], []>} : vector<16x1152xbf16>, vector<1152x128xbf16>, vector<16x128xf32> -> vector<16x128xf32>
    %c0_3 = arith.constant 0 : index
    %c0_4 = arith.constant 0 : index
    %3 = vector.load %arg3[%c0_3, %c0_4] : memref<1x128xf32, #tpu.memory_space<vmem>>, vector<1x128xf32>
    %4 = vector.broadcast %3 : vector<1x128xf32> to vector<16x128xf32>
    %5 = arith.addf %2, %4 : vector<16x128xf32>
    %6 = arith.truncf %5 : vector<16x128xf32> to vector<16x128xbf16>
    %c0_5 = arith.constant 0 : index
    %c0_6 = arith.constant 0 : index
    %7 = vector.load %arg4[%c0_5, %c0_6] : memref<16x128xbf16, #tpu.memory_space<vmem>>, vector<16x128xbf16>
    tpu.vector_store %arg4[%c0_5, %c0_6], %6 {strides = array<i32>} : memref<16x128xbf16, #tpu.memory_space<vmem>>, vector<16x128xbf16>,
    return
  }
  func.func @transform_0(%arg0: i32) -> (i32, i32) {
    %c0_i32 = arith.constant 0 : i32
    %c0_i32_0 = arith.constant 0 : i32
    return %arg0, %c0_i32 : i32, i32
  }
  func.func @transform_1(%arg0: i32) -> (i32, i32) {
    %c0_i32 = arith.constant 0 : i32
    %c0_i32_0 = arith.constant 0 : i32
    %c0_i32_1 = arith.constant 0 : i32
    return %c0_i32, %c0_i32_0 : i32, i32
  }
  func.func @transform_2(%arg0: i32) -> (i32, i32) {
    %c0_i32 = arith.constant 0 : i32
    %c0_i32_0 = arith.constant 0 : i32
    %c0_i32_1 = arith.constant 0 : i32
    return %c0_i32, %c0_i32_0 : i32, i32
  }
  func.func @transform_3(%arg0: i32) -> (i32, i32) {
    %c0_i32 = arith.constant 0 : i32
    %c0_i32_0 = arith.constant 0 : i32
    return %arg0, %c0_i32 : i32, i32
  }
}

module attributes {stable_mosaic.version = 11 : i64} {
  func.func @_mm_fused_kernel(%arg0: i32, %arg1: memref<56x512xbf16, #tpu.memory_space<vmem>>, %arg2: memref<512x128xbf16, #tpu.memory_space<vmem>>, %arg3: memref<1x128xf32, #tpu.memory_space<vmem>>, %arg4: memref<56x128xbf16, #tpu.memory_space<vmem>>) attributes {dimension_semantics = [#tpu.dimension_semantics<parallel>], iteration_bounds = array<i64: 2>, scalar_prefetch = 0 : i64, scratch_operands = 0 : i64, tpu.core_type = #tpu.core_type<tc>, window_params = [{transform_indices = @transform_0, window_bounds = array<i64: 56, 512>}, {pipeline_mode = #tpu.pipeline_mode<synchronous>, transform_indices = @transform_1, window_bounds = array<i64: 512, 128>}, {pipeline_mode = #tpu.pipeline_mode<synchronous>, transform_indices = @transform_2, window_bounds = array<i64: 1, 128>}, {transform_indices = @transform_3, window_bounds = array<i64: 56, 128>}]} {
    %c0 = arith.constant 0 : index
    %c0_0 = arith.constant 0 : index
    %0 = vector.load %arg1[%c0, %c0_0] : memref<56x512xbf16, #tpu.memory_space<vmem>>, vector<56x512xbf16>
    %c0_1 = arith.constant 0 : index
    %c0_2 = arith.constant 0 : index
    %1 = vector.load %arg2[%c0_1, %c0_2] : memref<512x128xbf16, #tpu.memory_space<vmem>>, vector<512x128xbf16>
    %cst = arith.constant dense<0.000000e+00> : vector<56x128xf32>
    %2 = tpu.matmul %0, %1, %cst {dimension_numbers = #tpu.dot_dimension_numbers<[1], [0], [0], [1], [0, 0, 1, 1], [], []>} : vector<56x512xbf16>, vector<512x128xbf16>, vector<56x128xf32> -> vector<56x128xf32>
    %c0_3 = arith.constant 0 : index
    %c0_4 = arith.constant 0 : index
    %3 = vector.load %arg3[%c0_3, %c0_4] : memref<1x128xf32, #tpu.memory_space<vmem>>, vector<1x128xf32>
    %4 = vector.broadcast %3 : vector<1x128xf32> to vector<56x128xf32>
    %5 = arith.addf %2, %4 : vector<56x128xf32>
    %6 = arith.truncf %5 : vector<56x128xf32> to vector<56x128xbf16>
    %c0_5 = arith.constant 0 : index
    %c0_6 = arith.constant 0 : index
    %7 = vector.load %arg4[%c0_5, %c0_6] : memref<56x128xbf16, #tpu.memory_space<vmem>>, vector<56x128xbf16>
    tpu.vector_store %arg4[%c0_5, %c0_6], %6 {strides = array<i32>} : memref<56x128xbf16, #tpu.memory_space<vmem>>, vector<56x128xbf16>,
    return
  }
  func.func @transform_0(%arg0: i32) -> (i32, i32) {
    %c0_i32 = arith.constant 0 : i32
    %c0_i32_0 = arith.constant 0 : i32
    return %arg0, %c0_i32 : i32, i32
  }
  func.func @transform_1(%arg0: i32) -> (i32, i32) {
    %c0_i32 = arith.constant 0 : i32
    %c0_i32_0 = arith.constant 0 : i32
    %c0_i32_1 = arith.constant 0 : i32
    return %c0_i32, %c0_i32_0 : i32, i32
  }
  func.func @transform_2(%arg0: i32) -> (i32, i32) {
    %c0_i32 = arith.constant 0 : i32
    %c0_i32_0 = arith.constant 0 : i32
    %c0_i32_1 = arith.constant 0 : i32
    return %c0_i32, %c0_i32_0 : i32, i32
  }
  func.func @transform_3(%arg0: i32) -> (i32, i32) {
    %c0_i32 = arith.constant 0 : i32
    %c0_i32_0 = arith.constant 0 : i32
    return %arg0, %c0_i32 : i32, i32
  }
}

module attributes {stable_mosaic.version = 11 : i64} {
  func.func @_mm_fused_kernel(%arg0: i32, %arg1: memref<56x768xbf16, #tpu.memory_space<vmem>>, %arg2: memref<768x128xbf16, #tpu.memory_space<vmem>>, %arg3: memref<1x128xf32, #tpu.memory_space<vmem>>, %arg4: memref<56x128xbf16, #tpu.memory_space<vmem>>) attributes {dimension_semantics = [#tpu.dimension_semantics<parallel>], iteration_bounds = array<i64: 2>, scalar_prefetch = 0 : i64, scratch_operands = 0 : i64, tpu.core_type = #tpu.core_type<tc>, window_params = [{transform_indices = @transform_0, window_bounds = array<i64: 56, 768>}, {pipeline_mode = #tpu.pipeline_mode<synchronous>, transform_indices = @transform_1, window_bounds = array<i64: 768, 128>}, {pipeline_mode = #tpu.pipeline_mode<synchronous>, transform_indices = @transform_2, window_bounds = array<i64: 1, 128>}, {transform_indices = @transform_3, window_bounds = array<i64: 56, 128>}]} {
    %c0 = arith.constant 0 : index
    %c0_0 = arith.constant 0 : index
    %0 = vector.load %arg1[%c0, %c0_0] : memref<56x768xbf16, #tpu.memory_space<vmem>>, vector<56x768xbf16>
    %c0_1 = arith.constant 0 : index
    %c0_2 = arith.constant 0 : index
    %1 = vector.load %arg2[%c0_1, %c0_2] : memref<768x128xbf16, #tpu.memory_space<vmem>>, vector<768x128xbf16>
    %cst = arith.constant dense<0.000000e+00> : vector<56x128xf32>
    %2 = tpu.matmul %0, %1, %cst {dimension_numbers = #tpu.dot_dimension_numbers<[1], [0], [0], [1], [0, 0, 1, 1], [], []>} : vector<56x768xbf16>, vector<768x128xbf16>, vector<56x128xf32> -> vector<56x128xf32>
    %c0_3 = arith.constant 0 : index
    %c0_4 = arith.constant 0 : index
    %3 = vector.load %arg3[%c0_3, %c0_4] : memref<1x128xf32, #tpu.memory_space<vmem>>, vector<1x128xf32>
    %4 = vector.broadcast %3 : vector<1x128xf32> to vector<56x128xf32>
    %5 = arith.addf %2, %4 : vector<56x128xf32>
    %6 = arith.truncf %5 : vector<56x128xf32> to vector<56x128xbf16>
    %c0_5 = arith.constant 0 : index
    %c0_6 = arith.constant 0 : index
    %7 = vector.load %arg4[%c0_5, %c0_6] : memref<56x128xbf16, #tpu.memory_space<vmem>>, vector<56x128xbf16>
    tpu.vector_store %arg4[%c0_5, %c0_6], %6 {strides = array<i32>} : memref<56x128xbf16, #tpu.memory_space<vmem>>, vector<56x128xbf16>,
    return
  }
  func.func @transform_0(%arg0: i32) -> (i32, i32) {
    %c0_i32 = arith.constant 0 : i32
    %c0_i32_0 = arith.constant 0 : i32
    return %arg0, %c0_i32 : i32, i32
  }
  func.func @transform_1(%arg0: i32) -> (i32, i32) {
    %c0_i32 = arith.constant 0 : i32
    %c0_i32_0 = arith.constant 0 : i32
    %c0_i32_1 = arith.constant 0 : i32
    return %c0_i32, %c0_i32_0 : i32, i32
  }
  func.func @transform_2(%arg0: i32) -> (i32, i32) {
    %c0_i32 = arith.constant 0 : i32
    %c0_i32_0 = arith.constant 0 : i32
    %c0_i32_1 = arith.constant 0 : i32
    return %c0_i32, %c0_i32_0 : i32, i32
  }
  func.func @transform_3(%arg0: i32) -> (i32, i32) {
    %c0_i32 = arith.constant 0 : i32
    %c0_i32_0 = arith.constant 0 : i32
    return %arg0, %c0_i32 : i32, i32
  }
}

module attributes {stable_mosaic.version = 11 : i64} {
  func.func @_mm_fused_kernel(%arg0: i32, %arg1: memref<56x1152xbf16, #tpu.memory_space<vmem>>, %arg2: memref<1152x128xbf16, #tpu.memory_space<vmem>>, %arg3: memref<1x128xf32, #tpu.memory_space<vmem>>, %arg4: memref<56x128xbf16, #tpu.memory_space<vmem>>) attributes {dimension_semantics = [#tpu.dimension_semantics<parallel>], iteration_bounds = array<i64: 2>, scalar_prefetch = 0 : i64, scratch_operands = 0 : i64, tpu.core_type = #tpu.core_type<tc>, window_params = [{transform_indices = @transform_0, window_bounds = array<i64: 56, 1152>}, {pipeline_mode = #tpu.pipeline_mode<synchronous>, transform_indices = @transform_1, window_bounds = array<i64: 1152, 128>}, {pipeline_mode = #tpu.pipeline_mode<synchronous>, transform_indices = @transform_2, window_bounds = array<i64: 1, 128>}, {transform_indices = @transform_3, window_bounds = array<i64: 56, 128>}]} {
    %c0 = arith.constant 0 : index
    %c0_0 = arith.constant 0 : index
    %0 = vector.load %arg1[%c0, %c0_0] : memref<56x1152xbf16, #tpu.memory_space<vmem>>, vector<56x1152xbf16>
    %c0_1 = arith.constant 0 : index
    %c0_2 = arith.constant 0 : index
    %1 = vector.load %arg2[%c0_1, %c0_2] : memref<1152x128xbf16, #tpu.memory_space<vmem>>, vector<1152x128xbf16>
    %cst = arith.constant dense<0.000000e+00> : vector<56x128xf32>
    %2 = tpu.matmul %0, %1, %cst {dimension_numbers = #tpu.dot_dimension_numbers<[1], [0], [0], [1], [0, 0, 1, 1], [], []>} : vector<56x1152xbf16>, vector<1152x128xbf16>, vector<56x128xf32> -> vector<56x128xf32>
    %c0_3 = arith.constant 0 : index
    %c0_4 = arith.constant 0 : index
    %3 = vector.load %arg3[%c0_3, %c0_4] : memref<1x128xf32, #tpu.memory_space<vmem>>, vector<1x128xf32>
    %4 = vector.broadcast %3 : vector<1x128xf32> to vector<56x128xf32>
    %5 = arith.addf %2, %4 : vector<56x128xf32>
    %6 = arith.truncf %5 : vector<56x128xf32> to vector<56x128xbf16>
    %c0_5 = arith.constant 0 : index
    %c0_6 = arith.constant 0 : index
    %7 = vector.load %arg4[%c0_5, %c0_6] : memref<56x128xbf16, #tpu.memory_space<vmem>>, vector<56x128xbf16>
    tpu.vector_store %arg4[%c0_5, %c0_6], %6 {strides = array<i32>} : memref<56x128xbf16, #tpu.memory_space<vmem>>, vector<56x128xbf16>,
    return
  }
  func.func @transform_0(%arg0: i32) -> (i32, i32) {
    %c0_i32 = arith.constant 0 : i32
    %c0_i32_0 = arith.constant 0 : i32
    return %arg0, %c0_i32 : i32, i32
  }
  func.func @transform_1(%arg0: i32) -> (i32, i32) {
    %c0_i32 = arith.constant 0 : i32
    %c0_i32_0 = arith.constant 0 : i32
    %c0_i32_1 = arith.constant 0 : i32
    return %c0_i32, %c0_i32_0 : i32, i32
  }
  func.func @transform_2(%arg0: i32) -> (i32, i32) {
    %c0_i32 = arith.constant 0 : i32
    %c0_i32_0 = arith.constant 0 : i32
    %c0_i32_1 = arith.constant 0 : i32
    return %c0_i32, %c0_i32_0 : i32, i32
  }
  func.func @transform_3(%arg0: i32) -> (i32, i32) {
    %c0_i32 = arith.constant 0 : i32
    %c0_i32_0 = arith.constant 0 : i32
    return %arg0, %c0_i32 : i32, i32
  }
}

module attributes {stable_mosaic.version = 11 : i64} {
  func.func @_mm_fused_kernel(%arg0: i32, %arg1: memref<1024x1664xbf16, #tpu.memory_space<vmem>>, %arg2: memref<1664x128xbf16, #tpu.memory_space<vmem>>, %arg3: memref<1x128xf32, #tpu.memory_space<vmem>>, %arg4: memref<1024x128xf32, #tpu.memory_space<vmem>>) attributes {dimension_semantics = [#tpu.dimension_semantics<parallel>], iteration_bounds = array<i64: 2>, scalar_prefetch = 0 : i64, scratch_operands = 0 : i64, tpu.core_type = #tpu.core_type<tc>, window_params = [{transform_indices = @transform_0, window_bounds = array<i64: 1024, 1664>}, {pipeline_mode = #tpu.pipeline_mode<synchronous>, transform_indices = @transform_1, window_bounds = array<i64: 1664, 128>}, {pipeline_mode = #tpu.pipeline_mode<synchronous>, transform_indices = @transform_2, window_bounds = array<i64: 1, 128>}, {transform_indices = @transform_3, window_bounds = array<i64: 1024, 128>}]} {
    %c0 = arith.constant 0 : index
    %c0_0 = arith.constant 0 : index
    %0 = vector.load %arg1[%c0, %c0_0] : memref<1024x1664xbf16, #tpu.memory_space<vmem>>, vector<1024x1664xbf16>
    %c0_1 = arith.constant 0 : index
    %c0_2 = arith.constant 0 : index
    %1 = vector.load %arg2[%c0_1, %c0_2] : memref<1664x128xbf16, #tpu.memory_space<vmem>>, vector<1664x128xbf16>
    %cst = arith.constant dense<0.000000e+00> : vector<1024x128xf32>
    %2 = tpu.matmul %0, %1, %cst {dimension_numbers = #tpu.dot_dimension_numbers<[1], [0], [0], [1], [0, 0, 1, 1], [], []>} : vector<1024x1664xbf16>, vector<1664x128xbf16>, vector<1024x128xf32> -> vector<1024x128xf32>
    %c0_3 = arith.constant 0 : index
    %c0_4 = arith.constant 0 : index
    %3 = vector.load %arg3[%c0_3, %c0_4] : memref<1x128xf32, #tpu.memory_space<vmem>>, vector<1x128xf32>
    %4 = vector.broadcast %3 : vector<1x128xf32> to vector<1024x128xf32>
    %5 = arith.addf %2, %4 : vector<1024x128xf32>
    %c0_5 = arith.constant 0 : index
    %c0_6 = arith.constant 0 : index
    %6 = vector.load %arg4[%c0_5, %c0_6] : memref<1024x128xf32, #tpu.memory_space<vmem>>, vector<1024x128xf32>
    tpu.vector_store %arg4[%c0_5, %c0_6], %5 {strides = array<i32>} : memref<1024x128xf32, #tpu.memory_space<vmem>>, vector<1024x128xf32>,
    return
  }
  func.func @transform_0(%arg0: i32) -> (i32, i32) {
    %c0_i32 = arith.constant 0 : i32
    %c0_i32_0 = arith.constant 0 : i32
    return %arg0, %c0_i32 : i32, i32
  }
  func.func @transform_1(%arg0: i32) -> (i32, i32) {
    %c0_i32 = arith.constant 0 : i32
    %c0_i32_0 = arith.constant 0 : i32
    %c0_i32_1 = arith.constant 0 : i32
    return %c0_i32, %c0_i32_0 : i32, i32
  }
  func.func @transform_2(%arg0: i32) -> (i32, i32) {
    %c0_i32 = arith.constant 0 : i32
    %c0_i32_0 = arith.constant 0 : i32
    %c0_i32_1 = arith.constant 0 : i32
    return %c0_i32, %c0_i32_0 : i32, i32
  }
  func.func @transform_3(%arg0: i32) -> (i32, i32) {
    %c0_i32 = arith.constant 0 : i32
    %c0_i32_0 = arith.constant 0 : i32
    return %arg0, %c0_i32 : i32, i32
  }
}

</mosaic_0001>

<bundles_post_ra>
// kernel: forward.12
= control target key start
LH: loop header
LB: loop body
LE: loop exit
PB: predicated region body
PF: predicated region fallthrough
CT: control target
= control target key end

     0   :  { %s2645_s12 = smov 0   ;;  %s3012_s0 = inlined_call_operand.vmem [shape: bf16[1568,128], index: 0, kind: input, shape index: {}]   ;;  %s3013_s1 = inlined_call_operand.vmem [shape: bf16[128,128], index: 1, kind: input, shape index: {}]   ;;  %s3014_s2 = inlined_call_operand.vmem [shape: f32[1,128], index: 2, kind: input, shape index: {}]   ;;  %s3015_s3 = inlined_call_operand.vmem [shape: bf16[1568,128], index: 3, kind: output, shape index: {}]  }
   0x1 LB: > { %s1707_s13 = sadd.s32 4294967295, %s2621_s12   ;;  %p1711_p0 = scmp.ge.s32.totalorder %s2621_s12, 1  ;;  %s2621_s12 = sphi %s2645_s12, %s13_s12  }
   0x2   : > { %p138_p1 = scmp.lt.s32.totalorder %s2621_s12, 3 }
   0x4   : > { %p139_p2 = pnand %p1711_p0, %p138_p1 }
   0x5   : > { %v2558_v0 = vld [vmem:[%s3013_s1] sm:$0xff] (!%p139_p2)   ;;  %v2623_v1 = vmov (!%p139_p2), 0.0   ;;  %v2559_v2 = vld [vmem:[%s3013_s1 + $0x8] sm:$0xff] (!%p139_p2)   ;;  %s162_s18 = smul.u32 (!%p139_p2), 98, %s1707_s13  ;;  %vm2624_vm0 = vmmov (!%p139_p2), 0   ;;  %v2560_v3 = vld [vmem:[%s3013_s1 + $0x10] sm:$0xff] (!%p139_p2)  }
   0x6   : > { %142 = sbr.rel (%p139_p2) target bundleno = 451 (0x1c3), region = 32  ;;  %2320 = vmatprep.subr.bf16.mxu0 (!%p139_p2), %v2623_v1  ;;  %2532 = vmatprep.subr.bf16.mxu1 (!%p139_p2), %v2623_v1  ;;  %v2561_v4 = vld [vmem:[%s3013_s1 + $0x18] sm:$0xff] (!%p139_p2)   ;;  %v2562_v5 = vld [vmem:[%s3013_s1 + $0x20] sm:$0xff] (!%p139_p2)   ;;  %v2563_v6 = vld [vmem:[%s3013_s1 + $0x28] sm:$0xff] (!%p139_p2)  }
   0x7   : > { %2321 = vmatpush3.bf16.msra.mxu0 (!%p139_p2), %v2558_v0  ;;  %2540 = vmatpush3.bf16.msra.mxu1 (!%p139_p2), %v2558_v0  ;;  %p163_p3 = scmp.lt.s32.totalorder (!%p139_p2), %s162_s18, 195  ;;  %v2564_v7 = vld [vmem:[%s3013_s1 + $0x30] sm:$0xff] (!%p139_p2)   ;;  %v2565_v8 = vld [vmem:[%s3013_s1 + $0x38] sm:$0xff] (!%p139_p2)   ;;  %v2853_v58 = vld [vmem:[%s3014_s2] ss:$0 sm:$0xff] (!%p139_p2) }
   0x8   : > { %2322 = vmatprep.subr.bf16.mxu0 (!%p139_p2), %v2623_v1  ;;  %2533 = vmatprep.subr.bf16.mxu1 (!%p139_p2), %v2623_v1 }
   0x9   : > { %2336 = vmatprep.mubr.msk.bf16.mxu0 (!%p139_p2), %vm2624_vm0, %v2623_v1  ;;  %2436 = vmatprep.mubr.msk.bf16.mxu1 (!%p139_p2), %vm2624_vm0, %v2623_v1 }
   0xb   : > { %2323 = vmatpush3.bf16.msra.mxu0 (!%p139_p2), %v2559_v2  ;;  %2541 = vmatpush3.bf16.msra.mxu1 (!%p139_p2), %v2559_v2 }
   0xc   : > { %2324 = vmatprep.subr.bf16.mxu0 (!%p139_p2), %v2623_v1  ;;  %2534 = vmatprep.subr.bf16.mxu1 (!%p139_p2), %v2623_v1 }
   0xd   : > { %s3017_s18 = smov (!%p163_p3, %s162_s18), 195 }
   0xe   : > { %s1712_s21 = sshll.u32 %s3017_s18, 2 }
   0xf   : > { %s2680_s24 = scalar_lea.vmem %s3012_s0, %s1712_s21  ;;  %2325 = vmatpush3.bf16.msra.mxu0 %v2560_v3  ;;  %2542 = vmatpush3.bf16.msra.mxu1 %v2560_v3  ;;  %s2864_s13 = scalar_lea.vmem %s3015_s3, %s1712_s21 }
  0x10   : > { %2326 = vmatprep.subr.bf16.mxu0 %v2623_v1  ;;  %2535 = vmatprep.subr.bf16.mxu1 %v2623_v1  ;;  %v2566_v9 = vld [vmem:[%s2680_s24] sm:$0xff]   ;;  %v2567_v10 = vld [vmem:[%s2680_s24 + $0xc8] sm:$0xff]   ;;  %v2569_v12 = vld [vmem:[%s2680_s24 + $0xd0] sm:$0xff]  }
  0x11   : > { %v2568_v11 = vld [vmem:[%s2680_s24 + $0x8] sm:$0xff]   ;;  %v2570_v13 = vld [vmem:[%s2680_s24 + $0x10] sm:$0xff]   ;;  %v2571_v14 = vld [vmem:[%s2680_s24 + $0xd8] sm:$0xff]  }
  0x12   : > { %v2572_v15 = vld [vmem:[%s2680_s24 + $0x18] sm:$0xff]   ;;  %v2573_v16 = vld [vmem:[%s2680_s24 + $0xe0] sm:$0xff]   ;;  %v2575_v18 = vld [vmem:[%s2680_s24 + $0xe8] sm:$0xff]  }
  0x13   : > { %2327 = vmatpush3.bf16.msra.mxu0 %v2561_v4  ;;  %2543 = vmatpush3.bf16.msra.mxu1 %v2561_v4  ;;  %v2574_v17 = vld [vmem:[%s2680_s24 + $0x20] sm:$0xff]   ;;  %v2576_v19 = vld [vmem:[%s2680_s24 + $0x28] sm:$0xff]   ;;  %v2577_v20 = vld [vmem:[%s2680_s24 + $0xf0] sm:$0xff]  }
  0x14   : > { %2328 = vmatprep.subr.bf16.mxu0 %v2623_v1  ;;  %2536 = vmatprep.subr.bf16.mxu1 %v2623_v1  ;;  %v2578_v21 = vld [vmem:[%s2680_s24 + $0x30] sm:$0xff]   ;;  %v2579_v22 = vld [vmem:[%s2680_s24 + $0xf8] sm:$0xff]   ;;  %v2581_v24 = vld [vmem:[%s2680_s24 + $0x100] sm:$0xff]  }
  0x15   : > { %v2580_v23 = vld [vmem:[%s2680_s24 + $0x38] sm:$0xff]   ;;  %v2582_v25 = vld [vmem:[%s2680_s24 + $0x40] sm:$0xff]   ;;  %v2583_v26 = vld [vmem:[%s2680_s24 + $0x108] sm:$0xff]  }
  0x16   : > { %v2584_v27 = vld [vmem:[%s2680_s24 + $0x48] sm:$0xff]   ;;  %v2585_v28 = vld [vmem:[%s2680_s24 + $0x110] sm:$0xff]   ;;  %v2587_v30 = vld [vmem:[%s2680_s24 + $0x118] sm:$0xff]  }
  0x17   : > { %2329 = vmatpush3.bf16.msra.mxu0 %v2562_v5  ;;  %2544 = vmatpush3.bf16.msra.mxu1 %v2562_v5  ;;  %v2586_v29 = vld [vmem:[%s2680_s24 + $0x50] sm:$0xff]   ;;  %v2588_v31 = vld [vmem:[%s2680_s24 + $0x58] sm:$0xff]   ;;  %v2589_v32 = vld [vmem:[%s2680_s24 + $0x120] sm:$0xff]  }
  0x18   : > { %2330 = vmatprep.subr.bf16.mxu0 %v2623_v1  ;;  %2537 = vmatprep.subr.bf16.mxu1 %v2623_v1  ;;  %v2590_v33 = vld [vmem:[%s2680_s24 + $0x60] sm:$0xff]   ;;  %v2591_v34 = vld [vmem:[%s2680_s24 + $0x128] sm:$0xff]   ;;  %v2593_v36 = vld [vmem:[%s2680_s24 + $0x130] sm:$0xff]  }
  0x19   : > { %v2592_v35 = vld [vmem:[%s2680_s24 + $0x68] sm:$0xff]   ;;  %v2594_v37 = vld [vmem:[%s2680_s24 + $0x70] sm:$0xff]   ;;  %v2595_v38 = vld [vmem:[%s2680_s24 + $0x138] sm:$0xff]  }
  0x1a   : > { %v2596_v39 = vld [vmem:[%s2680_s24 + $0x78] sm:$0xff]   ;;  %v2597_v40 = vld [vmem:[%s2680_s24 + $0x140] sm:$0xff]   ;;  %v2599_v42 = vld [vmem:[%s2680_s24 + $0x148] sm:$0xff]  }
  0x1b   : > { %2331 = vmatpush3.bf16.msra.mxu0 %v2563_v6  ;;  %2545 = vmatpush3.bf16.msra.mxu1 %v2563_v6  ;;  %v2598_v41 = vld [vmem:[%s2680_s24 + $0x80] sm:$0xff]   ;;  %v2600_v43 = vld [vmem:[%s2680_s24 + $0x88] sm:$0xff]   ;;  %v2601_v44 = vld [vmem:[%s2680_s24 + $0x150] sm:$0xff]  }
  0x1c   : > { %2332 = vmatprep.subr.bf16.mxu0 %v2623_v1  ;;  %2538 = vmatprep.subr.bf16.mxu1 %v2623_v1  ;;  %v2602_v45 = vld [vmem:[%s2680_s24 + $0x90] sm:$0xff]   ;;  %v2603_v46 = vld [vmem:[%s2680_s24 + $0x158] sm:$0xff]   ;;  %v2605_v48 = vld [vmem:[%s2680_s24 + $0x160] sm:$0xff]  }
  0x1d   : > { %v2604_v47 = vld [vmem:[%s2680_s24 + $0x98] sm:$0xff]   ;;  %v2606_v49 = vld [vmem:[%s2680_s24 + $0xa0] sm:$0xff]   ;;  %v2607_v50 = vld [vmem:[%s2680_s24 + $0x168] sm:$0xff]  }
  0x1e   : > { %v2608_v51 = vld [vmem:[%s2680_s24 + $0xa8] sm:$0xff]   ;;  %v2609_v52 = vld [vmem:[%s2680_s24 + $0x170] sm:$0xff]   ;;  %v2611_v54 = vld [vmem:[%s2680_s24 + $0x178] sm:$0xff]  }
  0x1f   : > { %2333 = vmatpush3.bf16.msra.mxu0 %v2564_v7  ;;  %2546 = vmatpush3.bf16.msra.mxu1 %v2564_v7  ;;  %v2610_v53 = vld [vmem:[%s2680_s24 + $0xb0] sm:$0xff]   ;;  %v2612_v55 = vld [vmem:[%s2680_s24 + $0xb8] sm:$0xff]   ;;  %v2613_v56 = vld [vmem:[%s2680_s24 + $0x180] sm:$0xff]  }
  0x20   : > { %2334 = vmatprep.subr.bf16.mxu0 %v2623_v1  ;;  %2539 = vmatprep.subr.bf16.mxu1 %v2623_v1  ;;  %v2614_v57 = vld [vmem:[%s2680_s24 + $0xc0] sm:$0xff]  }
  0x23   : > { %2335 = vmatpush3.bf16.msra.mxu0 %v2565_v8  ;;  %2547 = vmatpush3.bf16.msra.mxu1 %v2565_v8 }
  0x26   : > { %2337 = vmatmul.mubr.bf16.vlgmr.msra.gmra.mrb[0].mxu0 %v2566_v9  ;;  %2437 = vmatmul.mubr.bf16.vlgmr.msra.gmra.mrb[0].mxu1 %v2567_v10 }
  0x27   : > { %2340 = vmatprep.mubr.msk.bf16.mxu0 %vm2624_vm0, %v2623_v1  ;;  %2440 = vmatprep.mubr.msk.bf16.mxu1 %vm2624_vm0, %v2623_v1 }
  0x2e   : > { %2341 = vmatmul.mubr.bf16.gmra.mrb[4].mxu0 %v2568_v11  ;;  %2441 = vmatmul.mubr.bf16.gmra.mrb[4].mxu1 %v2569_v12 }
  0x2f   : > { %2344 = vmatprep.mubr.msk.bf16.mxu0 %vm2624_vm0, %v2623_v1  ;;  %2444 = vmatprep.mubr.msk.bf16.mxu1 %vm2624_vm0, %v2623_v1 }
  0x36   : > { %2345 = vmatmul.mubr.bf16.gmra.mrb[8].mxu0 %v2570_v13  ;;  %2445 = vmatmul.mubr.bf16.gmra.mrb[8].mxu1 %v2571_v14 }
  0x37   : > { %2348 = vmatprep.mubr.msk.bf16.mxu0 %vm2624_vm0, %v2623_v1  ;;  %2448 = vmatprep.mubr.msk.bf16.mxu1 %vm2624_vm0, %v2623_v1 }
  0x3e   : > { %2349 = vmatmul.mubr.bf16.gmra.mrb[12].mxu0 %v2572_v15  ;;  %2449 = vmatmul.mubr.bf16.gmra.mrb[12].mxu1 %v2573_v16 }
  0x3f   : > { %2352 = vmatprep.mubr.msk.bf16.mxu0 %vm2624_vm0, %v2623_v1  ;;  %2452 = vmatprep.mubr.msk.bf16.mxu1 %vm2624_vm0, %v2623_v1 }
  0x46   : > { %2353 = vmatmul.mubr.bf16.gmra.mrb[16].mxu0 %v2574_v17  ;;  %2453 = vmatmul.mubr.bf16.gmra.mrb[16].mxu1 %v2575_v18 }
  0x47   : > { %2356 = vmatprep.mubr.msk.bf16.mxu0 %vm2624_vm0, %v2623_v1  ;;  %2456 = vmatprep.mubr.msk.bf16.mxu1 %vm2624_vm0, %v2623_v1 }
  0x4e   : > { %2357 = vmatmul.mubr.bf16.gmra.mrb[20].mxu0 %v2576_v19  ;;  %2457 = vmatmul.mubr.bf16.gmra.mrb[20].mxu1 %v2577_v20 }
  0x4f   : > { %2360 = vmatprep.mubr.msk.bf16.mxu0 %vm2624_vm0, %v2623_v1  ;;  %2460 = vmatprep.mubr.msk.bf16.mxu1 %vm2624_vm0, %v2623_v1 }
  0x56   : > { %2361 = vmatmul.mubr.bf16.gmra.mrb[24].mxu0 %v2578_v21  ;;  %2461 = vmatmul.mubr.bf16.gmra.mrb[24].mxu1 %v2579_v22 }
  0x57   : > { %2364 = vmatprep.mubr.msk.bf16.mxu0 %vm2624_vm0, %v2623_v1  ;;  %2464 = vmatprep.mubr.msk.bf16.mxu1 %vm2624_vm0, %v2623_v1 }
  0x5e   : > { %2365 = vmatmul.mubr.bf16.gmra.mrb[28].mxu0 %v2580_v23  ;;  %2465 = vmatmul.mubr.bf16.gmra.mrb[28].mxu1 %v2581_v24 }
  0x5f   : > { %2368 = vmatprep.mubr.msk.bf16.mxu0 %vm2624_vm0, %v2623_v1  ;;  %2468 = vmatprep.mubr.msk.bf16.mxu1 %vm2624_vm0, %v2623_v1 }
  0x66   : > { %2369 = vmatmul.mubr.bf16.gmra.mrb[32].mxu0 %v2582_v25  ;;  %2469 = vmatmul.mubr.bf16.gmra.mrb[32].mxu1 %v2583_v26 }
  0x67   : > { %2372 = vmatprep.mubr.msk.bf16.mxu0 %vm2624_vm0, %v2623_v1  ;;  %2472 = vmatprep.mubr.msk.bf16.mxu1 %vm2624_vm0, %v2623_v1 }
  0x6e   : > { %2373 = vmatmul.mubr.bf16.gmra.mrb[36].mxu0 %v2584_v27  ;;  %2473 = vmatmul.mubr.bf16.gmra.mrb[36].mxu1 %v2585_v28 }
  0x6f   : > { %2376 = vmatprep.mubr.msk.bf16.mxu0 %vm2624_vm0, %v2623_v1  ;;  %2476 = vmatprep.mubr.msk.bf16.mxu1 %vm2624_vm0, %v2623_v1 }
  0x76   : > { %2377 = vmatmul.mubr.bf16.gmra.mrb[40].mxu0 %v2586_v29  ;;  %2477 = vmatmul.mubr.bf16.gmra.mrb[40].mxu1 %v2587_v30 }
  0x77   : > { %2380 = vmatprep.mubr.msk.bf16.mxu0 %vm2624_vm0, %v2623_v1  ;;  %2480 = vmatprep.mubr.msk.bf16.mxu1 %vm2624_vm0, %v2623_v1 }
  0x7e   : > { %2381 = vmatmul.mubr.bf16.gmra.mrb[44].mxu0 %v2588_v31  ;;  %2481 = vmatmul.mubr.bf16.gmra.mrb[44].mxu1 %v2589_v32 }
  0x7f   : > { %2384 = vmatprep.mubr.msk.bf16.mxu0 %vm2624_vm0, %v2623_v1  ;;  %2484 = vmatprep.mubr.msk.bf16.mxu1 %vm2624_vm0, %v2623_v1 }
  0x86   : > { %2385 = vmatmul.mubr.bf16.gmra.mrb[48].mxu0 %v2590_v33  ;;  %2485 = vmatmul.mubr.bf16.gmra.mrb[48].mxu1 %v2591_v34 }
  0x87   : > { %2388 = vmatprep.mubr.msk.bf16.mxu0 %vm2624_vm0, %v2623_v1  ;;  %2488 = vmatprep.mubr.msk.bf16.mxu1 %vm2624_vm0, %v2623_v1 }
  0x8e   : > { %2389 = vmatmul.mubr.bf16.gmra.mrb[52].mxu0 %v2592_v35  ;;  %2489 = vmatmul.mubr.bf16.gmra.mrb[52].mxu1 %v2593_v36 }
  0x8f   : > { %2392 = vmatprep.mubr.msk.bf16.mxu0 %vm2624_vm0, %v2623_v1  ;;  %2492 = vmatprep.mubr.msk.bf16.mxu1 %vm2624_vm0, %v2623_v1 }
  0x96   : > { %2393 = vmatmul.mubr.bf16.gmra.mrb[56].mxu0 %v2594_v37  ;;  %2493 = vmatmul.mubr.bf16.gmra.mrb[56].mxu1 %v2595_v38 }
  0x97   : > { %2396 = vmatprep.mubr.msk.bf16.mxu0 %vm2624_vm0, %v2623_v1  ;;  %2496 = vmatprep.mubr.msk.bf16.mxu1 %vm2624_vm0, %v2623_v1 }
  0x9e   : > { %2397 = vmatmul.mubr.bf16.gmra.mrb[60].mxu0 %v2596_v39  ;;  %2497 = vmatmul.mubr.bf16.gmra.mrb[60].mxu1 %v2597_v40 }
  0x9f   : > { %2400 = vmatprep.mubr.msk.bf16.mxu0 %vm2624_vm0, %v2623_v1  ;;  %2500 = vmatprep.mubr.msk.bf16.mxu1 %vm2624_vm0, %v2623_v1 }
  0xa6   : > { %2401 = vmatmul.mubr.bf16.gmra.mrb[64].mxu0 %v2598_v41  ;;  %2501 = vmatmul.mubr.bf16.gmra.mrb[64].mxu1 %v2599_v42 }
  0xa7   : > { %2404 = vmatprep.mubr.msk.bf16.mxu0 %vm2624_vm0, %v2623_v1  ;;  %2504 = vmatprep.mubr.msk.bf16.mxu1 %vm2624_vm0, %v2623_v1 }
  0xae   : > { %2405 = vmatmul.mubr.bf16.gmra.mrb[68].mxu0 %v2600_v43  ;;  %2505 = vmatmul.mubr.bf16.gmra.mrb[68].mxu1 %v2601_v44 }
  0xaf   : > { %2408 = vmatprep.mubr.msk.bf16.mxu0 %vm2624_vm0, %v2623_v1  ;;  %2508 = vmatprep.mubr.msk.bf16.mxu1 %vm2624_vm0, %v2623_v1 }
  0xb6   : > { %2409 = vmatmul.mubr.bf16.gmra.mrb[72].mxu0 %v2602_v45  ;;  %2509 = vmatmul.mubr.bf16.gmra.mrb[72].mxu1 %v2603_v46 }
  0xb7   : > { %2412 = vmatprep.mubr.msk.bf16.mxu0 %vm2624_vm0, %v2623_v1  ;;  %2512 = vmatprep.mubr.msk.bf16.mxu1 %vm2624_vm0, %v2623_v1 }
  0xbe   : > { %2413 = vmatmul.mubr.bf16.gmra.mrb[76].mxu0 %v2604_v47  ;;  %2513 = vmatmul.mubr.bf16.gmra.mrb[76].mxu1 %v2605_v48 }
  0xbf   : > { %2416 = vmatprep.mubr.msk.bf16.mxu0 %vm2624_vm0, %v2623_v1  ;;  %2516 = vmatprep.mubr.msk.bf16.mxu1 %vm2624_vm0, %v2623_v1 }
  0xc6   : > { %2417 = vmatmul.mubr.bf16.gmra.mrb[80].mxu0 %v2606_v49  ;;  %2517 = vmatmul.mubr.bf16.gmra.mrb[80].mxu1 %v2607_v50 }
  0xc7   : > { %2420 = vmatprep.mubr.msk.bf16.mxu0 %vm2624_vm0, %v2623_v1  ;;  %2520 = vmatprep.mubr.msk.bf16.mxu1 %vm2624_vm0, %v2623_v1 }
  0xce   : > { %2421 = vmatmul.mubr.bf16.gmra.mrb[84].mxu0 %v2608_v51  ;;  %2521 = vmatmul.mubr.bf16.gmra.mrb[84].mxu1 %v2609_v52 }
  0xcf   : > { %2424 = vmatprep.mubr.msk.bf16.mxu0 %vm2624_vm0, %v2623_v1  ;;  %2524 = vmatprep.mubr.msk.bf16.mxu1 %vm2624_vm0, %v2623_v1 }
  0xd6   : > { %2425 = vmatmul.mubr.bf16.gmra.mrb[88].mxu0 %v2610_v53  ;;  %2525 = vmatmul.mubr.bf16.gmra.mrb[88].mxu1 %v2611_v54 }
  0xd7   : > { %2428 = vmatprep.mubr.msk.bf16.mxu0 %vm2624_vm0, %v2623_v1  ;;  %2528 = vmatprep.mubr.msk.bf16.mxu1 %vm2624_vm0, %v2623_v1 }
  0xde   : > { %2429 = vmatmul.mubr.bf16.gmra.mrb[92].mxu0 %v2612_v55  ;;  %2529 = vmatmul.mubr.bf16.gmra.mrb[92].mxu1 %v2613_v56 }
  0xdf   : > { %2432 = vmatprep.mubr.msk.bf16.mxu0 %vm2624_vm0, %v2623_v1 }
  0xe6   : > { %2433 = vmatmul.mubr.bf16.gmra.mrb[96].mxu0 %v2614_v57 }
  0xf9   : > { %v672_v59 = vpop.f32.mrb[0].mxu0  ;;  %v872_v60 = vpop.f32.mrb[0].mxu1 }
  0xfa   : > { %v673_v61 = vadd.f32 %v2853_v58, %v672_v59  ;;  %v2338_v62 = vpop.f32.mrb[1].mxu0  ;;  %v873_v63 = vadd.f32 %v2853_v58, %v872_v60  ;;  %v2438_v0 = vpop.f32.mrb[1].mxu1 }
  0xfb   : > { %v675_v2 = vpop.f32.mrb[2].mxu0  ;;  %v875_v3 = vpop.f32.mrb[2].mxu1 }
  0xfc   : > { %v676_v1 = vadd.f32 %v2853_v58, %v675_v2  ;;  %v2339_v4 = vpop.f32.mrb[3].mxu0  ;;  %v1113_v5 = vmax.f32 %v873_v63, 0.0  ;;  %v876_v6 = vadd.f32 %v2853_v58, %v875_v3  ;;  %v2439_v7 = vpop.f32.mrb[3].mxu1  ;;  %v1063_v8 = vmax.f32 %v673_v61, 0.0 }
  0xfe   : > { %v1064_v9 = vmax.f32 %v676_v1, 0.0  ;;  %v1114_v10 = vmax.f32 %v876_v6, 0.0 }
 0x100   : > { %v1973_v11 = vpack.c.bf16 %v1064_v9, %v1063_v8  ;;  %v2098_v12 = vpack.c.bf16 %v1114_v10, %v1113_v5 }
 0x101   : > { %v680_v13 = vpop.f32.mrb[4].mxu0  ;;  %v880_v14 = vpop.f32.mrb[4].mxu1 }
 0x102   : > { %1974 = vst [vmem:[%s2864_s13] sm:$0xff] %v1973_v11   ;;  %2239 = vst [vmem:[%s2864_s13 + $0xc8] sm:$0xff] %v2098_v12   ;;  %v681_v15 = vadd.f32 %v2853_v58, %v680_v13  ;;  %v2342_v16 = vpop.f32.mrb[5].mxu0  ;;  %v881_v17 = vadd.f32 %v2853_v58, %v880_v14  ;;  %v2442_v18 = vpop.f32.mrb[5].mxu1 }
 0x103   : > { %v683_v19 = vpop.f32.mrb[6].mxu0  ;;  %v883_v20 = vpop.f32.mrb[6].mxu1 }
 0x104   : > { %v684_v21 = vadd.f32 %v2853_v58, %v683_v19  ;;  %v2343_v22 = vpop.f32.mrb[7].mxu0  ;;  %v1115_v23 = vmax.f32 %v881_v17, 0.0  ;;  %v884_v24 = vadd.f32 %v2853_v58, %v883_v20  ;;  %v2443_v25 = vpop.f32.mrb[7].mxu1  ;;  %v1065_v26 = vmax.f32 %v681_v15, 0.0 }
 0x106   : > { %v1066_v27 = vmax.f32 %v684_v21, 0.0  ;;  %v1116_v28 = vmax.f32 %v884_v24, 0.0 }
 0x108   : > { %v1978_v29 = vpack.c.bf16 %v1066_v27, %v1065_v26  ;;  %v2103_v30 = vpack.c.bf16 %v1116_v28, %v1115_v23 }
 0x109   : > { %v688_v31 = vpop.f32.mrb[8].mxu0  ;;  %v888_v32 = vpop.f32.mrb[8].mxu1 }
 0x10a   : > { %2215 = vst [vmem:[%s2864_s13 + $0x8] sm:$0xff] %v1978_v29   ;;  %2240 = vst [vmem:[%s2864_s13 + $0xd0] sm:$0xff] %v2103_v30   ;;  %v689_v33 = vadd.f32 %v2853_v58, %v688_v31  ;;  %v2346_v34 = vpop.f32.mrb[9].mxu0  ;;  %v889_v35 = vadd.f32 %v2853_v58, %v888_v32  ;;  %v2446_v36 = vpop.f32.mrb[9].mxu1 }
 0x10b   : > { %v691_v37 = vpop.f32.mrb[10].mxu0  ;;  %v891_v38 = vpop.f32.mrb[10].mxu1 }
 0x10c   : > { %v692_v39 = vadd.f32 %v2853_v58, %v691_v37  ;;  %v2347_v40 = vpop.f32.mrb[11].mxu0  ;;  %v1117_v41 = vmax.f32 %v889_v35, 0.0  ;;  %v892_v42 = vadd.f32 %v2853_v58, %v891_v38  ;;  %v2447_v43 = vpop.f32.mrb[11].mxu1  ;;  %v1067_v44 = vmax.f32 %v689_v33, 0.0 }
 0x10e   : > { %v1068_v45 = vmax.f32 %v692_v39, 0.0  ;;  %v1118_v46 = vmax.f32 %v892_v42, 0.0 }
 0x110   : > { %v1983_v47 = vpack.c.bf16 %v1068_v45, %v1067_v44  ;;  %v2108_v48 = vpack.c.bf16 %v1118_v46, %v1117_v41 }
 0x111   : > { %v696_v49 = vpop.f32.mrb[12].mxu0  ;;  %v896_v50 = vpop.f32.mrb[12].mxu1 }
 0x112   : > { %2216 = vst [vmem:[%s2864_s13 + $0x10] sm:$0xff] %v1983_v47   ;;  %2241 = vst [vmem:[%s2864_s13 + $0xd8] sm:$0xff] %v2108_v48   ;;  %v697_v51 = vadd.f32 %v2853_v58, %v696_v49  ;;  %v2350_v52 = vpop.f32.mrb[13].mxu0  ;;  %v897_v53 = vadd.f32 %v2853_v58, %v896_v50  ;;  %v2450_v54 = vpop.f32.mrb[13].mxu1 }
 0x113   : > { %v699_v55 = vpop.f32.mrb[14].mxu0  ;;  %v899_v56 = vpop.f32.mrb[14].mxu1 }
 0x114   : > { %v700_v57 = vadd.f32 %v2853_v58, %v699_v55  ;;  %v2351_v59 = vpop.f32.mrb[15].mxu0  ;;  %v1119_v60 = vmax.f32 %v897_v53, 0.0  ;;  %v900_v61 = vadd.f32 %v2853_v58, %v899_v56  ;;  %v2451_v62 = vpop.f32.mrb[15].mxu1  ;;  %v1069_v63 = vmax.f32 %v697_v51, 0.0 }
 0x116   : > { %v1070_v0 = vmax.f32 %v700_v57, 0.0  ;;  %v1120_v2 = vmax.f32 %v900_v61, 0.0 }
 0x118   : > { %v1988_v3 = vpack.c.bf16 %v1070_v0, %v1069_v63  ;;  %v2113_v1 = vpack.c.bf16 %v1120_v2, %v1119_v60 }
 0x119   : > { %v704_v4 = vpop.f32.mrb[16].mxu0  ;;  %v904_v5 = vpop.f32.mrb[16].mxu1 }
 0x11a   : > { %2217 = vst [vmem:[%s2864_s13 + $0x18] sm:$0xff] %v1988_v3   ;;  %2242 = vst [vmem:[%s2864_s13 + $0xe0] sm:$0xff] %v2113_v1   ;;  %v705_v6 = vadd.f32 %v2853_v58, %v704_v4  ;;  %v2354_v7 = vpop.f32.mrb[17].mxu0  ;;  %v905_v8 = vadd.f32 %v2853_v58, %v904_v5  ;;  %v2454_v9 = vpop.f32.mrb[17].mxu1 }
 0x11b   : > { %v707_v10 = vpop.f32.mrb[18].mxu0  ;;  %v907_v11 = vpop.f32.mrb[18].mxu1 }
 0x11c   : > { %v708_v12 = vadd.f32 %v2853_v58, %v707_v10  ;;  %v2355_v13 = vpop.f32.mrb[19].mxu0  ;;  %v1121_v14 = vmax.f32 %v905_v8, 0.0  ;;  %v908_v15 = vadd.f32 %v2853_v58, %v907_v11  ;;  %v2455_v16 = vpop.f32.mrb[19].mxu1  ;;  %v1071_v17 = vmax.f32 %v705_v6, 0.0 }
 0x11e   : > { %v1072_v18 = vmax.f32 %v708_v12, 0.0  ;;  %v1122_v19 = vmax.f32 %v908_v15, 0.0 }
 0x120   : > { %v1993_v20 = vpack.c.bf16 %v1072_v18, %v1071_v17  ;;  %v2118_v21 = vpack.c.bf16 %v1122_v19, %v1121_v14 }
 0x121   : > { %v712_v22 = vpop.f32.mrb[20].mxu0  ;;  %v912_v23 = vpop.f32.mrb[20].mxu1 }
 0x122   : > { %2218 = vst [vmem:[%s2864_s13 + $0x20] sm:$0xff] %v1993_v20   ;;  %2243 = vst [vmem:[%s2864_s13 + $0xe8] sm:$0xff] %v2118_v21   ;;  %v713_v24 = vadd.f32 %v2853_v58, %v712_v22  ;;  %v2358_v25 = vpop.f32.mrb[21].mxu0  ;;  %v913_v26 = vadd.f32 %v2853_v58, %v912_v23  ;;  %v2458_v27 = vpop.f32.mrb[21].mxu1 }
 0x123   : > { %v715_v28 = vpop.f32.mrb[22].mxu0  ;;  %v915_v29 = vpop.f32.mrb[22].mxu1 }
 0x124   : > { %v716_v30 = vadd.f32 %v2853_v58, %v715_v28  ;;  %v2359_v31 = vpop.f32.mrb[23].mxu0  ;;  %v1123_v32 = vmax.f32 %v913_v26, 0.0  ;;  %v916_v33 = vadd.f32 %v2853_v58, %v915_v29  ;;  %v2459_v34 = vpop.f32.mrb[23].mxu1  ;;  %v1073_v35 = vmax.f32 %v713_v24, 0.0 }
 0x126   : > { %v1074_v36 = vmax.f32 %v716_v30, 0.0  ;;  %v1124_v37 = vmax.f32 %v916_v33, 0.0 }
 0x128   : > { %v1998_v38 = vpack.c.bf16 %v1074_v36, %v1073_v35  ;;  %v2123_v39 = vpack.c.bf16 %v1124_v37, %v1123_v32 }
 0x129   : > { %v720_v40 = vpop.f32.mrb[24].mxu0  ;;  %v920_v41 = vpop.f32.mrb[24].mxu1 }
 0x12a   : > { %2219 = vst [vmem:[%s2864_s13 + $0x28] sm:$0xff] %v1998_v38   ;;  %2244 = vst [vmem:[%s2864_s13 + $0xf0] sm:$0xff] %v2123_v39   ;;  %v721_v42 = vadd.f32 %v2853_v58, %v720_v40  ;;  %v2362_v43 = vpop.f32.mrb[25].mxu0  ;;  %v921_v44 = vadd.f32 %v2853_v58, %v920_v41  ;;  %v2462_v45 = vpop.f32.mrb[25].mxu1 }
 0x12b   : > { %v723_v46 = vpop.f32.mrb[26].mxu0  ;;  %v923_v47 = vpop.f32.mrb[26].mxu1 }
 0x12c   : > { %v724_v48 = vadd.f32 %v2853_v58, %v723_v46  ;;  %v2363_v49 = vpop.f32.mrb[27].mxu0  ;;  %v1125_v50 = vmax.f32 %v921_v44, 0.0  ;;  %v924_v51 = vadd.f32 %v2853_v58, %v923_v47  ;;  %v2463_v52 = vpop.f32.mrb[27].mxu1  ;;  %v1075_v53 = vmax.f32 %v721_v42, 0.0 }
 0x12e   : > { %v1076_v54 = vmax.f32 %v724_v48, 0.0  ;;  %v1126_v55 = vmax.f32 %v924_v51, 0.0 }
 0x130   : > { %v2003_v56 = vpack.c.bf16 %v1076_v54, %v1075_v53  ;;  %v2128_v57 = vpack.c.bf16 %v1126_v55, %v1125_v50 }
 0x131   : > { %v728_v59 = vpop.f32.mrb[28].mxu0  ;;  %v928_v60 = vpop.f32.mrb[28].mxu1 }
 0x132   : > { %2220 = vst [vmem:[%s2864_s13 + $0x30] sm:$0xff] %v2003_v56   ;;  %2245 = vst [vmem:[%s2864_s13 + $0xf8] sm:$0xff] %v2128_v57   ;;  %v729_v61 = vadd.f32 %v2853_v58, %v728_v59  ;;  %v2366_v62 = vpop.f32.mrb[29].mxu0  ;;  %v929_v63 = vadd.f32 %v2853_v58, %v928_v60  ;;  %v2466_v0 = vpop.f32.mrb[29].mxu1 }
 0x133   : > { %v731_v2 = vpop.f32.mrb[30].mxu0  ;;  %v931_v3 = vpop.f32.mrb[30].mxu1 }
 0x134   : > { %v732_v1 = vadd.f32 %v2853_v58, %v731_v2  ;;  %v2367_v4 = vpop.f32.mrb[31].mxu0  ;;  %v1127_v5 = vmax.f32 %v929_v63, 0.0  ;;  %v932_v6 = vadd.f32 %v2853_v58, %v931_v3  ;;  %v2467_v7 = vpop.f32.mrb[31].mxu1  ;;  %v1077_v8 = vmax.f32 %v729_v61, 0.0 }
 0x136   : > { %v1078_v9 = vmax.f32 %v732_v1, 0.0  ;;  %v1128_v10 = vmax.f32 %v932_v6, 0.0 }
 0x138   : > { %v2008_v11 = vpack.c.bf16 %v1078_v9, %v1077_v8  ;;  %v2133_v12 = vpack.c.bf16 %v1128_v10, %v1127_v5 }
 0x139   : > { %v736_v13 = vpop.f32.mrb[32].mxu0  ;;  %v936_v14 = vpop.f32.mrb[32].mxu1 }
 0x13a   : > { %2221 = vst [vmem:[%s2864_s13 + $0x38] sm:$0xff] %v2008_v11   ;;  %2246 = vst [vmem:[%s2864_s13 + $0x100] sm:$0xff] %v2133_v12   ;;  %v737_v15 = vadd.f32 %v2853_v58, %v736_v13  ;;  %v2370_v16 = vpop.f32.mrb[33].mxu0  ;;  %v937_v17 = vadd.f32 %v2853_v58, %v936_v14  ;;  %v2470_v18 = vpop.f32.mrb[33].mxu1 }
 0x13b   : > { %v739_v19 = vpop.f32.mrb[34].mxu0  ;;  %v939_v20 = vpop.f32.mrb[34].mxu1 }
 0x13c   : > { %v740_v21 = vadd.f32 %v2853_v58, %v739_v19  ;;  %v2371_v22 = vpop.f32.mrb[35].mxu0  ;;  %v1129_v23 = vmax.f32 %v937_v17, 0.0  ;;  %v940_v24 = vadd.f32 %v2853_v58, %v939_v20  ;;  %v2471_v25 = vpop.f32.mrb[35].mxu1  ;;  %v1079_v26 = vmax.f32 %v737_v15, 0.0 }
 0x13e   : > { %v1080_v27 = vmax.f32 %v740_v21, 0.0  ;;  %v1130_v28 = vmax.f32 %v940_v24, 0.0 }
 0x140   : > { %v2013_v29 = vpack.c.bf16 %v1080_v27, %v1079_v26  ;;  %v2138_v30 = vpack.c.bf16 %v1130_v28, %v1129_v23 }
 0x141   : > { %v744_v31 = vpop.f32.mrb[36].mxu0  ;;  %v944_v32 = vpop.f32.mrb[36].mxu1 }
 0x142   : > { %2222 = vst [vmem:[%s2864_s13 + $0x40] sm:$0xff] %v2013_v29   ;;  %2247 = vst [vmem:[%s2864_s13 + $0x108] sm:$0xff] %v2138_v30   ;;  %v745_v33 = vadd.f32 %v2853_v58, %v744_v31  ;;  %v2374_v34 = vpop.f32.mrb[37].mxu0  ;;  %v945_v35 = vadd.f32 %v2853_v58, %v944_v32  ;;  %v2474_v36 = vpop.f32.mrb[37].mxu1 }
 0x143   : > { %v747_v37 = vpop.f32.mrb[38].mxu0  ;;  %v947_v38 = vpop.f32.mrb[38].mxu1 }
 0x144   : > { %v748_v39 = vadd.f32 %v2853_v58, %v747_v37  ;;  %v2375_v40 = vpop.f32.mrb[39].mxu0  ;;  %v1131_v41 = vmax.f32 %v945_v35, 0.0  ;;  %v948_v42 = vadd.f32 %v2853_v58, %v947_v38  ;;  %v2475_v43 = vpop.f32.mrb[39].mxu1  ;;  %v1081_v44 = vmax.f32 %v745_v33, 0.0 }
 0x146   : > { %v1082_v45 = vmax.f32 %v748_v39, 0.0  ;;  %v1132_v46 = vmax.f32 %v948_v42, 0.0 }
 0x148   : > { %v2018_v47 = vpack.c.bf16 %v1082_v45, %v1081_v44  ;;  %v2143_v48 = vpack.c.bf16 %v1132_v46, %v1131_v41 }
 0x149   : > { %v752_v49 = vpop.f32.mrb[40].mxu0  ;;  %v952_v50 = vpop.f32.mrb[40].mxu1 }
 0x14a   : > { %2223 = vst [vmem:[%s2864_s13 + $0x48] sm:$0xff] %v2018_v47   ;;  %2248 = vst [vmem:[%s2864_s13 + $0x110] sm:$0xff] %v2143_v48   ;;  %v753_v51 = vadd.f32 %v2853_v58, %v752_v49  ;;  %v2378_v52 = vpop.f32.mrb[41].mxu0  ;;  %v953_v53 = vadd.f32 %v2853_v58, %v952_v50  ;;  %v2478_v54 = vpop.f32.mrb[41].mxu1 }
 0x14b   : > { %v755_v55 = vpop.f32.mrb[42].mxu0  ;;  %v955_v56 = vpop.f32.mrb[42].mxu1 }
 0x14c   : > { %v756_v57 = vadd.f32 %v2853_v58, %v755_v55  ;;  %v2379_v59 = vpop.f32.mrb[43].mxu0  ;;  %v1133_v60 = vmax.f32 %v953_v53, 0.0  ;;  %v956_v61 = vadd.f32 %v2853_v58, %v955_v56  ;;  %v2479_v62 = vpop.f32.mrb[43].mxu1  ;;  %v1083_v63 = vmax.f32 %v753_v51, 0.0 }
 0x14e   : > { %v1084_v0 = vmax.f32 %v756_v57, 0.0  ;;  %v1134_v2 = vmax.f32 %v956_v61, 0.0 }
 0x150   : > { %v2023_v3 = vpack.c.bf16 %v1084_v0, %v1083_v63  ;;  %v2148_v1 = vpack.c.bf16 %v1134_v2, %v1133_v60 }
 0x151   : > { %v760_v4 = vpop.f32.mrb[44].mxu0  ;;  %v960_v5 = vpop.f32.mrb[44].mxu1 }
 0x152   : > { %2224 = vst [vmem:[%s2864_s13 + $0x50] sm:$0xff] %v2023_v3   ;;  %2249 = vst [vmem:[%s2864_s13 + $0x118] sm:$0xff] %v2148_v1   ;;  %v761_v6 = vadd.f32 %v2853_v58, %v760_v4  ;;  %v2382_v7 = vpop.f32.mrb[45].mxu0  ;;  %v961_v8 = vadd.f32 %v2853_v58, %v960_v5  ;;  %v2482_v9 = vpop.f32.mrb[45].mxu1 }
 0x153   : > { %v763_v10 = vpop.f32.mrb[46].mxu0  ;;  %v963_v11 = vpop.f32.mrb[46].mxu1 }
 0x154   : > { %v764_v12 = vadd.f32 %v2853_v58, %v763_v10  ;;  %v2383_v13 = vpop.f32.mrb[47].mxu0  ;;  %v1135_v14 = vmax.f32 %v961_v8, 0.0  ;;  %v964_v15 = vadd.f32 %v2853_v58, %v963_v11  ;;  %v2483_v16 = vpop.f32.mrb[47].mxu1  ;;  %v1085_v17 = vmax.f32 %v761_v6, 0.0 }
 0x156   : > { %v1086_v18 = vmax.f32 %v764_v12, 0.0  ;;  %v1136_v19 = vmax.f32 %v964_v15, 0.0 }
 0x158   : > { %v2028_v20 = vpack.c.bf16 %v1086_v18, %v1085_v17  ;;  %v2153_v21 = vpack.c.bf16 %v1136_v19, %v1135_v14 }
 0x159   : > { %v768_v22 = vpop.f32.mrb[48].mxu0  ;;  %v968_v23 = vpop.f32.mrb[48].mxu1 }
 0x15a   : > { %2225 = vst [vmem:[%s2864_s13 + $0x58] sm:$0xff] %v2028_v20   ;;  %2250 = vst [vmem:[%s2864_s13 + $0x120] sm:$0xff] %v2153_v21   ;;  %v769_v24 = vadd.f32 %v2853_v58, %v768_v22  ;;  %v2386_v25 = vpop.f32.mrb[49].mxu0  ;;  %v969_v26 = vadd.f32 %v2853_v58, %v968_v23  ;;  %v2486_v27 = vpop.f32.mrb[49].mxu1 }
 0x15b   : > { %v771_v28 = vpop.f32.mrb[50].mxu0  ;;  %v971_v29 = vpop.f32.mrb[50].mxu1 }
 0x15c   : > { %v772_v30 = vadd.f32 %v2853_v58, %v771_v28  ;;  %v2387_v31 = vpop.f32.mrb[51].mxu0  ;;  %v1137_v32 = vmax.f32 %v969_v26, 0.0  ;;  %v972_v33 = vadd.f32 %v2853_v58, %v971_v29  ;;  %v2487_v34 = vpop.f32.mrb[51].mxu1  ;;  %v1087_v35 = vmax.f32 %v769_v24, 0.0 }
 0x15e   : > { %v1088_v36 = vmax.f32 %v772_v30, 0.0  ;;  %v1138_v37 = vmax.f32 %v972_v33, 0.0 }
 0x160   : > { %v2033_v38 = vpack.c.bf16 %v1088_v36, %v1087_v35  ;;  %v2158_v39 = vpack.c.bf16 %v1138_v37, %v1137_v32 }
 0x161   : > { %v776_v40 = vpop.f32.mrb[52].mxu0  ;;  %v976_v41 = vpop.f32.mrb[52].mxu1 }
 0x162   : > { %2226 = vst [vmem:[%s2864_s13 + $0x60] sm:$0xff] %v2033_v38   ;;  %2251 = vst [vmem:[%s2864_s13 + $0x128] sm:$0xff] %v2158_v39   ;;  %v777_v42 = vadd.f32 %v2853_v58, %v776_v40  ;;  %v2390_v43 = vpop.f32.mrb[53].mxu0  ;;  %v977_v44 = vadd.f32 %v2853_v58, %v976_v41  ;;  %v2490_v45 = vpop.f32.mrb[53].mxu1 }
 0x163   : > { %v779_v46 = vpop.f32.mrb[54].mxu0  ;;  %v979_v47 = vpop.f32.mrb[54].mxu1 }
 0x164   : > { %v780_v48 = vadd.f32 %v2853_v58, %v779_v46  ;;  %v2391_v49 = vpop.f32.mrb[55].mxu0  ;;  %v1139_v50 = vmax.f32 %v977_v44, 0.0  ;;  %v980_v51 = vadd.f32 %v2853_v58, %v979_v47  ;;  %v2491_v52 = vpop.f32.mrb[55].mxu1  ;;  %v1089_v53 = vmax.f32 %v777_v42, 0.0 }
 0x166   : > { %v1090_v54 = vmax.f32 %v780_v48, 0.0  ;;  %v1140_v55 = vmax.f32 %v980_v51, 0.0 }
 0x168   : > { %v2038_v56 = vpack.c.bf16 %v1090_v54, %v1089_v53  ;;  %v2163_v57 = vpack.c.bf16 %v1140_v55, %v1139_v50 }
 0x169   : > { %v784_v59 = vpop.f32.mrb[56].mxu0  ;;  %v984_v60 = vpop.f32.mrb[56].mxu1 }
 0x16a   : > { %2227 = vst [vmem:[%s2864_s13 + $0x68] sm:$0xff] %v2038_v56   ;;  %2252 = vst [vmem:[%s2864_s13 + $0x130] sm:$0xff] %v2163_v57   ;;  %v785_v61 = vadd.f32 %v2853_v58, %v784_v59  ;;  %v2394_v62 = vpop.f32.mrb[57].mxu0  ;;  %v985_v63 = vadd.f32 %v2853_v58, %v984_v60  ;;  %v2494_v0 = vpop.f32.mrb[57].mxu1 }
 0x16b   : > { %v787_v2 = vpop.f32.mrb[58].mxu0  ;;  %v987_v3 = vpop.f32.mrb[58].mxu1 }
 0x16c   : > { %v788_v1 = vadd.f32 %v2853_v58, %v787_v2  ;;  %v2395_v4 = vpop.f32.mrb[59].mxu0  ;;  %v1141_v5 = vmax.f32 %v985_v63, 0.0  ;;  %v988_v6 = vadd.f32 %v2853_v58, %v987_v3  ;;  %v2495_v7 = vpop.f32.mrb[59].mxu1  ;;  %v1091_v8 = vmax.f32 %v785_v61, 0.0 }
 0x16e   : > { %v1092_v9 = vmax.f32 %v788_v1, 0.0  ;;  %v1142_v10 = vmax.f32 %v988_v6, 0.0 }
 0x170   : > { %v2043_v11 = vpack.c.bf16 %v1092_v9, %v1091_v8  ;;  %v2168_v12 = vpack.c.bf16 %v1142_v10, %v1141_v5 }
 0x171   : > { %v792_v13 = vpop.f32.mrb[60].mxu0  ;;  %v992_v14 = vpop.f32.mrb[60].mxu1 }
 0x172   : > { %2228 = vst [vmem:[%s2864_s13 + $0x70] sm:$0xff] %v2043_v11   ;;  %2253 = vst [vmem:[%s2864_s13 + $0x138] sm:$0xff] %v2168_v12   ;;  %v793_v15 = vadd.f32 %v2853_v58, %v792_v13  ;;  %v2398_v16 = vpop.f32.mrb[61].mxu0  ;;  %v993_v17 = vadd.f32 %v2853_v58, %v992_v14  ;;  %v2498_v18 = vpop.f32.mrb[61].mxu1 }
 0x173   : > { %v795_v19 = vpop.f32.mrb[62].mxu0  ;;  %v995_v20 = vpop.f32.mrb[62].mxu1 }
 0x174   : > { %v796_v21 = vadd.f32 %v2853_v58, %v795_v19  ;;  %v2399_v22 = vpop.f32.mrb[63].mxu0  ;;  %v1143_v23 = vmax.f32 %v993_v17, 0.0  ;;  %v996_v24 = vadd.f32 %v2853_v58, %v995_v20  ;;  %v2499_v25 = vpop.f32.mrb[63].mxu1  ;;  %v1093_v26 = vmax.f32 %v793_v15, 0.0 }
 0x176   : > { %v1094_v27 = vmax.f32 %v796_v21, 0.0  ;;  %v1144_v28 = vmax.f32 %v996_v24, 0.0 }
 0x178   : > { %v2048_v29 = vpack.c.bf16 %v1094_v27, %v1093_v26  ;;  %v2173_v30 = vpack.c.bf16 %v1144_v28, %v1143_v23 }
 0x179   : > { %v800_v31 = vpop.f32.mrb[64].mxu0  ;;  %v1000_v32 = vpop.f32.mrb[64].mxu1 }
 0x17a   : > { %2229 = vst [vmem:[%s2864_s13 + $0x78] sm:$0xff] %v2048_v29   ;;  %2254 = vst [vmem:[%s2864_s13 + $0x140] sm:$0xff] %v2173_v30   ;;  %v801_v33 = vadd.f32 %v2853_v58, %v800_v31  ;;  %v2402_v34 = vpop.f32.mrb[65].mxu0  ;;  %v1001_v35 = vadd.f32 %v2853_v58, %v1000_v32  ;;  %v2502_v36 = vpop.f32.mrb[65].mxu1 }
 0x17b   : > { %v803_v37 = vpop.f32.mrb[66].mxu0  ;;  %v1003_v38 = vpop.f32.mrb[66].mxu1 }
 0x17c   : > { %v804_v39 = vadd.f32 %v2853_v58, %v803_v37  ;;  %v2403_v40 = vpop.f32.mrb[67].mxu0  ;;  %v1145_v41 = vmax.f32 %v1001_v35, 0.0  ;;  %v1004_v42 = vadd.f32 %v2853_v58, %v1003_v38  ;;  %v2503_v43 = vpop.f32.mrb[67].mxu1  ;;  %v1095_v44 = vmax.f32 %v801_v33, 0.0 }
 0x17e   : > { %v1096_v45 = vmax.f32 %v804_v39, 0.0  ;;  %v1146_v46 = vmax.f32 %v1004_v42, 0.0 }
 0x180   : > { %v2053_v47 = vpack.c.bf16 %v1096_v45, %v1095_v44  ;;  %v2178_v48 = vpack.c.bf16 %v1146_v46, %v1145_v41 }
 0x181   : > { %v808_v49 = vpop.f32.mrb[68].mxu0  ;;  %v1008_v50 = vpop.f32.mrb[68].mxu1 }
 0x182   : > { %2230 = vst [vmem:[%s2864_s13 + $0x80] sm:$0xff] %v2053_v47   ;;  %2255 = vst [vmem:[%s2864_s13 + $0x148] sm:$0xff] %v2178_v48   ;;  %v809_v51 = vadd.f32 %v2853_v58, %v808_v49  ;;  %v2406_v52 = vpop.f32.mrb[69].mxu0  ;;  %v1009_v53 = vadd.f32 %v2853_v58, %v1008_v50  ;;  %v2506_v54 = vpop.f32.mrb[69].mxu1 }
 0x183   : > { %v811_v55 = vpop.f32.mrb[70].mxu0  ;;  %v1011_v56 = vpop.f32.mrb[70].mxu1 }
 0x184   : > { %v812_v57 = vadd.f32 %v2853_v58, %v811_v55  ;;  %v2407_v59 = vpop.f32.mrb[71].mxu0  ;;  %v1147_v60 = vmax.f32 %v1009_v53, 0.0  ;;  %v1012_v61 = vadd.f32 %v2853_v58, %v1011_v56  ;;  %v2507_v62 = vpop.f32.mrb[71].mxu1  ;;  %v1097_v63 = vmax.f32 %v809_v51, 0.0 }
 0x186   : > { %v1098_v0 = vmax.f32 %v812_v57, 0.0  ;;  %v1148_v2 = vmax.f32 %v1012_v61, 0.0 }
 0x188   : > { %v2058_v3 = vpack.c.bf16 %v1098_v0, %v1097_v63  ;;  %v2183_v1 = vpack.c.bf16 %v1148_v2, %v1147_v60 }
 0x189   : > { %v816_v4 = vpop.f32.mrb[72].mxu0  ;;  %v1016_v5 = vpop.f32.mrb[72].mxu1 }
 0x18a   : > { %2231 = vst [vmem:[%s2864_s13 + $0x88] sm:$0xff] %v2058_v3   ;;  %2256 = vst [vmem:[%s2864_s13 + $0x150] sm:$0xff] %v2183_v1   ;;  %v817_v6 = vadd.f32 %v2853_v58, %v816_v4  ;;  %v2410_v7 = vpop.f32.mrb[73].mxu0  ;;  %v1017_v8 = vadd.f32 %v2853_v58, %v1016_v5  ;;  %v2510_v9 = vpop.f32.mrb[73].mxu1 }
 0x18b   : > { %v819_v10 = vpop.f32.mrb[74].mxu0  ;;  %v1019_v11 = vpop.f32.mrb[74].mxu1 }
 0x18c   : > { %v820_v12 = vadd.f32 %v2853_v58, %v819_v10  ;;  %v2411_v13 = vpop.f32.mrb[75].mxu0  ;;  %v1149_v14 = vmax.f32 %v1017_v8, 0.0  ;;  %v1020_v15 = vadd.f32 %v2853_v58, %v1019_v11  ;;  %v2511_v16 = vpop.f32.mrb[75].mxu1  ;;  %v1099_v17 = vmax.f32 %v817_v6, 0.0 }
 0x18e   : > { %v1100_v18 = vmax.f32 %v820_v12, 0.0  ;;  %v1150_v19 = vmax.f32 %v1020_v15, 0.0 }
 0x190   : > { %v2063_v20 = vpack.c.bf16 %v1100_v18, %v1099_v17  ;;  %v2188_v21 = vpack.c.bf16 %v1150_v19, %v1149_v14 }
 0x191   : > { %v824_v22 = vpop.f32.mrb[76].mxu0  ;;  %v1024_v23 = vpop.f32.mrb[76].mxu1 }
 0x192   : > { %2232 = vst [vmem:[%s2864_s13 + $0x90] sm:$0xff] %v2063_v20   ;;  %2257 = vst [vmem:[%s2864_s13 + $0x158] sm:$0xff] %v2188_v21   ;;  %v825_v24 = vadd.f32 %v2853_v58, %v824_v22  ;;  %v2414_v25 = vpop.f32.mrb[77].mxu0  ;;  %v1025_v26 = vadd.f32 %v2853_v58, %v1024_v23  ;;  %v2514_v27 = vpop.f32.mrb[77].mxu1 }
 0x193   : > { %v827_v28 = vpop.f32.mrb[78].mxu0  ;;  %v1027_v29 = vpop.f32.mrb[78].mxu1 }
 0x194   : > { %v828_v30 = vadd.f32 %v2853_v58, %v827_v28  ;;  %v2415_v31 = vpop.f32.mrb[79].mxu0  ;;  %v1151_v32 = vmax.f32 %v1025_v26, 0.0  ;;  %v1028_v33 = vadd.f32 %v2853_v58, %v1027_v29  ;;  %v2515_v34 = vpop.f32.mrb[79].mxu1  ;;  %v1101_v35 = vmax.f32 %v825_v24, 0.0 }
 0x196   : > { %v1102_v36 = vmax.f32 %v828_v30, 0.0  ;;  %v1152_v37 = vmax.f32 %v1028_v33, 0.0 }
 0x198   : > { %v2068_v38 = vpack.c.bf16 %v1102_v36, %v1101_v35  ;;  %v2193_v39 = vpack.c.bf16 %v1152_v37, %v1151_v32 }
 0x199   : > { %v832_v40 = vpop.f32.mrb[80].mxu0  ;;  %v1032_v41 = vpop.f32.mrb[80].mxu1 }
 0x19a   : > { %2233 = vst [vmem:[%s2864_s13 + $0x98] sm:$0xff] %v2068_v38   ;;  %2258 = vst [vmem:[%s2864_s13 + $0x160] sm:$0xff] %v2193_v39   ;;  %v833_v42 = vadd.f32 %v2853_v58, %v832_v40  ;;  %v2418_v43 = vpop.f32.mrb[81].mxu0  ;;  %v1033_v44 = vadd.f32 %v2853_v58, %v1032_v41  ;;  %v2518_v45 = vpop.f32.mrb[81].mxu1 }
 0x19b   : > { %v835_v46 = vpop.f32.mrb[82].mxu0  ;;  %v1035_v47 = vpop.f32.mrb[82].mxu1 }
 0x19c   : > { %v836_v48 = vadd.f32 %v2853_v58, %v835_v46  ;;  %v2419_v49 = vpop.f32.mrb[83].mxu0  ;;  %v1153_v50 = vmax.f32 %v1033_v44, 0.0  ;;  %v1036_v51 = vadd.f32 %v2853_v58, %v1035_v47  ;;  %v2519_v52 = vpop.f32.mrb[83].mxu1  ;;  %v1103_v53 = vmax.f32 %v833_v42, 0.0 }
 0x19e   : > { %v1104_v54 = vmax.f32 %v836_v48, 0.0  ;;  %v1154_v55 = vmax.f32 %v1036_v51, 0.0 }
 0x1a0   : > { %v2073_v56 = vpack.c.bf16 %v1104_v54, %v1103_v53  ;;  %v2198_v57 = vpack.c.bf16 %v1154_v55, %v1153_v50 }
 0x1a1   : > { %v840_v59 = vpop.f32.mrb[84].mxu0  ;;  %v1040_v60 = vpop.f32.mrb[84].mxu1 }
 0x1a2   : > { %2234 = vst [vmem:[%s2864_s13 + $0xa0] sm:$0xff] %v2073_v56   ;;  %2259 = vst [vmem:[%s2864_s13 + $0x168] sm:$0xff] %v2198_v57   ;;  %v841_v61 = vadd.f32 %v2853_v58, %v840_v59  ;;  %v2422_v62 = vpop.f32.mrb[85].mxu0  ;;  %v1041_v63 = vadd.f32 %v2853_v58, %v1040_v60  ;;  %v2522_v0 = vpop.f32.mrb[85].mxu1 }
 0x1a3   : > { %v843_v2 = vpop.f32.mrb[86].mxu0  ;;  %v1043_v3 = vpop.f32.mrb[86].mxu1 }
 0x1a4   : > { %v844_v1 = vadd.f32 %v2853_v58, %v843_v2  ;;  %v2423_v4 = vpop.f32.mrb[87].mxu0  ;;  %v1155_v5 = vmax.f32 %v1041_v63, 0.0  ;;  %v1044_v6 = vadd.f32 %v2853_v58, %v1043_v3  ;;  %v2523_v7 = vpop.f32.mrb[87].mxu1  ;;  %v1105_v8 = vmax.f32 %v841_v61, 0.0 }
 0x1a6   : > { %v1106_v9 = vmax.f32 %v844_v1, 0.0  ;;  %v1156_v10 = vmax.f32 %v1044_v6, 0.0 }
 0x1a8   : > { %v2078_v11 = vpack.c.bf16 %v1106_v9, %v1105_v8  ;;  %v2203_v12 = vpack.c.bf16 %v1156_v10, %v1155_v5 }
 0x1a9   : > { %v848_v13 = vpop.f32.mrb[88].mxu0  ;;  %v1048_v14 = vpop.f32.mrb[88].mxu1 }
 0x1aa   : > { %2235 = vst [vmem:[%s2864_s13 + $0xa8] sm:$0xff] %v2078_v11   ;;  %2260 = vst [vmem:[%s2864_s13 + $0x170] sm:$0xff] %v2203_v12   ;;  %v849_v15 = vadd.f32 %v2853_v58, %v848_v13  ;;  %v2426_v16 = vpop.f32.mrb[89].mxu0  ;;  %v1049_v17 = vadd.f32 %v2853_v58, %v1048_v14  ;;  %v2526_v18 = vpop.f32.mrb[89].mxu1 }
 0x1ab   : > { %v851_v19 = vpop.f32.mrb[90].mxu0  ;;  %v1051_v20 = vpop.f32.mrb[90].mxu1 }
 0x1ac   : > { %v852_v21 = vadd.f32 %v2853_v58, %v851_v19  ;;  %v2427_v22 = vpop.f32.mrb[91].mxu0  ;;  %v1157_v23 = vmax.f32 %v1049_v17, 0.0  ;;  %v1052_v24 = vadd.f32 %v2853_v58, %v1051_v20  ;;  %v2527_v25 = vpop.f32.mrb[91].mxu1  ;;  %v1107_v26 = vmax.f32 %v849_v15, 0.0 }
 0x1ae   : > { %v1108_v27 = vmax.f32 %v852_v21, 0.0  ;;  %v1158_v28 = vmax.f32 %v1052_v24, 0.0 }
 0x1b0   : > { %v2083_v29 = vpack.c.bf16 %v1108_v27, %v1107_v26  ;;  %v2208_v30 = vpack.c.bf16 %v1158_v28, %v1157_v23 }
 0x1b1   : > { %v856_v31 = vpop.f32.mrb[92].mxu0  ;;  %v1056_v32 = vpop.f32.mrb[92].mxu1 }
 0x1b2   : > { %2236 = vst [vmem:[%s2864_s13 + $0xb0] sm:$0xff] %v2083_v29   ;;  %2261 = vst [vmem:[%s2864_s13 + $0x178] sm:$0xff] %v2208_v30   ;;  %v857_v33 = vadd.f32 %v2853_v58, %v856_v31  ;;  %v2430_v34 = vpop.f32.mrb[93].mxu0  ;;  %v1057_v35 = vadd.f32 %v2853_v58, %v1056_v32  ;;  %v2530_v36 = vpop.f32.mrb[93].mxu1 }
 0x1b3   : > { %v859_v37 = vpop.f32.mrb[94].mxu0  ;;  %v1059_v38 = vpop.f32.mrb[94].mxu1 }
 0x1b4   : > { %v860_v39 = vadd.f32 %v2853_v58, %v859_v37  ;;  %v2431_v40 = vpop.f32.mrb[95].mxu0  ;;  %v1159_v41 = vmax.f32 %v1057_v35, 0.0  ;;  %v1060_v42 = vadd.f32 %v2853_v58, %v1059_v38  ;;  %v2531_v43 = vpop.f32.mrb[95].mxu1  ;;  %v1109_v44 = vmax.f32 %v857_v33, 0.0 }
 0x1b6   : > { %v1110_v45 = vmax.f32 %v860_v39, 0.0  ;;  %v1160_v46 = vmax.f32 %v1060_v42, 0.0 }
 0x1b8   : > { %v2088_v47 = vpack.c.bf16 %v1110_v45, %v1109_v44  ;;  %v2213_v48 = vpack.c.bf16 %v1160_v46, %v1159_v41 }
 0x1b9   : > { %v864_v49 = vpop.f32.mrb[96].mxu0 }
 0x1ba   : > { %2237 = vst [vmem:[%s2864_s13 + $0xb8] sm:$0xff] %v2088_v47   ;;  %2262 = vst [vmem:[%s2864_s13 + $0x180] sm:$0xff] %v2213_v48   ;;  %v865_v50 = vadd.f32 %v2853_v58, %v864_v49  ;;  %v2434_v51 = vpop.f32.mrb[97].mxu0 }
 0x1bb   : > { %v867_v52 = vpop.f32.mrb[98].mxu0 }
 0x1bc   : > { %v868_v53 = vadd.f32 %v2853_v58, %v867_v52  ;;  %v2435_v54 = vpop.f32.mrb[99].mxu0  ;;  %v1111_v55 = vmax.f32 %v865_v50, 0.0 }
 0x1be   : > { %v1112_v56 = vmax.f32 %v868_v53, 0.0 }
 0x1c0   : > { %v2093_v57 = vpack.c.bf16 %v1112_v56, %v1111_v55 }
 0x1c2   : > { %2238 = vst [vmem:[%s2864_s13 + $0xc0] sm:$0xff] %v2093_v57  }
 0x1c3 PF: > { %s13_s12 = sadd.s32 1, %s2621_s12  }
 0x1c4   : > { %p10_p4 = scmp.ge.s32.totalorder %s13_s12, 4  }
 0x1c6   :  { %12 = sbr.rel (!%p10_p4) target bundleno = 1 (0x1), region = 62 }

// kernel: forward.13
= control target key start
LH: loop header
LB: loop body
LE: loop exit
PB: predicated region body
PF: predicated region fallthrough
CT: control target
= control target key end

     0   :  { %s2550_s12 = smov 0   ;;  %s2936_s0 = inlined_call_operand.vmem [shape: bf16[112,1664], index: 0, kind: input, shape index: {}]   ;;  %s2937_s1 = inlined_call_operand.vmem [shape: bf16[1664,128], index: 1, kind: input, shape index: {}]   ;;  %s2938_s2 = inlined_call_operand.vmem [shape: f32[1,128], index: 2, kind: input, shape index: {}]   ;;  %s2939_s3 = inlined_call_operand.vmem [shape: bf16[112,128], index: 3, kind: output, shape index: {}]  }
   0x1 LB: > { %s1850_s13 = sadd.s32 4294967295, %s2528_s12   ;;  %p1854_p0 = scmp.ge.s32.totalorder %s2528_s12, 1  ;;  %s2528_s12 = sphi %s2550_s12, %s13_s12  }
   0x2   : > { %p139_p1 = scmp.lt.s32.totalorder %s2528_s12, 3 }
   0x4   : > { %p140_p2 = pnand %p1854_p0, %p139_p1 }
   0x5   : > { %v2348_v0 = vld [vmem:[%s2937_s1 + $0x40] sm:$0xff] (!%p140_p2)   ;;  %v2352_v4 = vld [vmem:[%s2937_s1 + $0x48] sm:$0xff] (!%p140_p2)   ;;  %v2356_v8 = vld [vmem:[%s2937_s1 + $0x50] sm:$0xff] (!%p140_p2)   ;;  %s164_s17 = smul.u32 (!%p140_p2), 7, %s1850_s13 }
   0x6   : > { %143 = sbr.rel (%p140_p2) target bundleno = 357 (0x165), region = 32  ;;  %v2349_v1 = vld [vmem:[%s2937_s1 + $0xc0] sm:$0xff] (!%p140_p2)   ;;  %2047 = vmatprep.subr.bf16.mxu0 (!%p140_p2), %v2348_v0  ;;  %v2353_v5 = vld [vmem:[%s2937_s1 + $0xc8] sm:$0xff] (!%p140_p2)   ;;  %v2357_v9 = vld [vmem:[%s2937_s1 + $0xd0] sm:$0xff] (!%p140_p2)  }
   0x7   : > { %v2350_v2 = vld [vmem:[%s2937_s1] sm:$0xff] (!%p140_p2)   ;;  %2087 = vmatprep.subr.bf16.mxu1 (!%p140_p2), %v2349_v1  ;;  %v2354_v6 = vld [vmem:[%s2937_s1 + $0x8] sm:$0xff] (!%p140_p2)   ;;  %v2358_v10 = vld [vmem:[%s2937_s1 + $0x10] sm:$0xff] (!%p140_p2)   ;;  %p165_p3 = scmp.lt.s32.totalorder (!%p140_p2), %s164_s17, 13 }
   0x8   : > { %v2351_v3 = vld [vmem:[%s2937_s1 + $0x80] sm:$0xff] (!%p140_p2)   ;;  %2048 = vmatpush3.bf16.msra.mxu0 (!%p140_p2), %v2350_v2  ;;  %v2355_v7 = vld [vmem:[%s2937_s1 + $0x88] sm:$0xff] (!%p140_p2)   ;;  %v2359_v11 = vld [vmem:[%s2937_s1 + $0x90] sm:$0xff] (!%p140_p2)  }
   0x9   : > { %2088 = vmatpush3.bf16.msra.mxu1 (!%p140_p2), %v2351_v3  ;;  %2049 = vmatprep.subr.bf16.mxu0 (!%p140_p2), %v2352_v4  ;;  %v2360_v12 = vld [vmem:[%s2937_s1 + $0x58] sm:$0xff] (!%p140_p2)   ;;  %v2364_v16 = vld [vmem:[%s2937_s1 + $0x60] sm:$0xff] (!%p140_p2)   ;;  %v2368_v20 = vld [vmem:[%s2937_s1 + $0x68] sm:$0xff] (!%p140_p2)  }
   0xa   : > { %2089 = vmatprep.subr.bf16.mxu1 (!%p140_p2), %v2353_v5  ;;  %v2361_v13 = vld [vmem:[%s2937_s1 + $0xd8] sm:$0xff] (!%p140_p2)   ;;  %v2365_v17 = vld [vmem:[%s2937_s1 + $0xe0] sm:$0xff] (!%p140_p2)   ;;  %v2369_v21 = vld [vmem:[%s2937_s1 + $0xe8] sm:$0xff] (!%p140_p2)  }
   0xb   : > { %v2362_v14 = vld [vmem:[%s2937_s1 + $0x18] sm:$0xff] (!%p140_p2)   ;;  %v2366_v18 = vld [vmem:[%s2937_s1 + $0x20] sm:$0xff] (!%p140_p2)   ;;  %v2370_v22 = vld [vmem:[%s2937_s1 + $0x28] sm:$0xff] (!%p140_p2)  }
   0xc   : > { %2050 = vmatpush3.bf16.msra.mxu0 (!%p140_p2), %v2354_v6  ;;  %v2363_v15 = vld [vmem:[%s2937_s1 + $0x98] sm:$0xff] (!%p140_p2)   ;;  %v2367_v19 = vld [vmem:[%s2937_s1 + $0xa0] sm:$0xff] (!%p140_p2)   ;;  %v2371_v23 = vld [vmem:[%s2937_s1 + $0xa8] sm:$0xff] (!%p140_p2)  }
   0xd   : > { %2090 = vmatpush3.bf16.msra.mxu1 %v2355_v7  ;;  %2051 = vmatprep.subr.bf16.mxu0 %v2356_v8  ;;  %s2941_s17 = smov (!%p165_p3, %s164_s17), 13  ;;  %v2372_v24 = vld [vmem:[%s2937_s1 + $0x70] sm:$0xff]   ;;  %v2376_v28 = vld [vmem:[%s2937_s1 + $0x78] sm:$0xff]   ;;  %v2386_v36 = vld [vmem:[%s2937_s1 + $0x140] sm:$0xff]  }
   0xe   : > { %2091 = vmatprep.subr.bf16.mxu1 %v2357_v9  ;;  %v2373_v25 = vld [vmem:[%s2937_s1 + $0xf0] sm:$0xff]   ;;  %s2339_s16 = smul.u32 52, %s2941_s17  ;;  %v2377_v29 = vld [vmem:[%s2937_s1 + $0xf8] sm:$0xff]   ;;  %v2387_v37 = vld [vmem:[%s2937_s1 + $0x1c0] sm:$0xff]  }
   0xf   : > { %v2374_v26 = vld [vmem:[%s2937_s1 + $0x30] sm:$0xff]   ;;  %v2378_v30 = vld [vmem:[%s2937_s1 + $0x38] sm:$0xff]   ;;  %v2388_v38 = vld [vmem:[%s2937_s1 + $0x100] sm:$0xff]  }
  0x10   : > { %2052 = vmatpush3.bf16.msra.mxu0 %v2358_v10  ;;  %v2375_v27 = vld [vmem:[%s2937_s1 + $0xb0] sm:$0xff]   ;;  %s2656_s27 = scalar_lea.vmem %s2936_s0, %s2339_s16  ;;  %v2379_v31 = vld [vmem:[%s2937_s1 + $0xb8] sm:$0xff]   ;;  %v2389_v39 = vld [vmem:[%s2937_s1 + $0x180] sm:$0xff]  }
  0x11   : > { %2092 = vmatpush3.bf16.msra.mxu1 %v2359_v11  ;;  %2053 = vmatprep.subr.bf16.mxu0 %v2360_v12  ;;  %v2380_v32 = vld [vmem:[%s2656_s27] ss:$52 sps:$4 sm:$0xff]   ;;  %v2382_v33 = vld [vmem:[%s2656_s27 + $0x4] ss:$52 sps:$4 sm:$0xff]   ;;  %v2383_v34 = vld [vmem:[%s2656_s27 + $0x8] ss:$52 sps:$4 sm:$0xff]  }
  0x12   : > { %2093 = vmatprep.subr.bf16.mxu1 %v2361_v13  ;;  %v2385_v35 = vld [vmem:[%s2656_s27 + $0xc] ss:$52 sps:$4 sm:$0xff]   ;;  %1342 = vmatprep.mubr.bf16.mxu0 %v2382_v33  ;;  %v2396_v45 = vld [vmem:[%s2656_s27 + $0x74] ss:$52 sps:$4 sm:$0xff]   ;;  %v2399_v47 = vld [vmem:[%s2656_s27 + $0x70] ss:$52 sps:$4 sm:$0xff]  }
  0x13   : > { %1406 = vmatprep.mubr.bf16.mxu1 %v2385_v35  ;;  %v2390_v40 = vld [vmem:[%s2937_s1 + $0x148] sm:$0xff]   ;;  %v2400_v48 = vld [vmem:[%s2937_s1 + $0x150] sm:$0xff]   ;;  %v2404_v52 = vld [vmem:[%s2937_s1 + $0x158] sm:$0xff]  }
  0x14   : > { %2054 = vmatpush3.bf16.msra.mxu0 %v2362_v14  ;;  %v2391_v41 = vld [vmem:[%s2937_s1 + $0x1c8] sm:$0xff]   ;;  %v2401_v49 = vld [vmem:[%s2937_s1 + $0x1d0] sm:$0xff]   ;;  %v2405_v53 = vld [vmem:[%s2937_s1 + $0x1d8] sm:$0xff]  }
  0x15   : > { %2094 = vmatpush3.bf16.msra.mxu1 %v2363_v15  ;;  %2055 = vmatprep.subr.bf16.mxu0 %v2364_v16  ;;  %v2392_v42 = vld [vmem:[%s2937_s1 + $0x108] sm:$0xff]   ;;  %v2402_v50 = vld [vmem:[%s2937_s1 + $0x110] sm:$0xff]   ;;  %v2406_v54 = vld [vmem:[%s2937_s1 + $0x118] sm:$0xff]  }
  0x16   : > { %2095 = vmatprep.subr.bf16.mxu1 %v2365_v17  ;;  %v2393_v43 = vld [vmem:[%s2937_s1 + $0x188] sm:$0xff]   ;;  %v2403_v51 = vld [vmem:[%s2937_s1 + $0x190] sm:$0xff]   ;;  %v2407_v55 = vld [vmem:[%s2937_s1 + $0x198] sm:$0xff]  }
  0x17   : > { %v2394_v44 = vld [vmem:[%s2656_s27 + $0x6c] ss:$52 sps:$4 sm:$0xff]   ;;  %v2398_v46 = vld [vmem:[%s2656_s27 + $0x68] ss:$52 sps:$4 sm:$0xff]   ;;  %v2412_v58 = vld [vmem:[%s2656_s27 + $0xd0] ss:$52 sps:$4 sm:$0xff]  }
  0x18   : > { %2056 = vmatpush3.bf16.msra.mxu0 %v2366_v18  ;;  %v2408_v56 = vld [vmem:[%s2656_s27 + $0xd4] ss:$52 sps:$4 sm:$0xff]   ;;  %v2410_v57 = vld [vmem:[%s2656_s27 + $0xdc] ss:$52 sps:$4 sm:$0xff]   ;;  %v2413_v59 = vld [vmem:[%s2656_s27 + $0xd8] ss:$52 sps:$4 sm:$0xff]  }
  0x19   : > { %2096 = vmatpush3.bf16.msra.mxu1 %v2367_v19  ;;  %2057 = vmatprep.subr.bf16.mxu0 %v2368_v20  ;;  %v2414_v60 = vld [vmem:[%s2937_s1 + $0x160] sm:$0xff]   ;;  %v2418_v0 = vld [vmem:[%s2937_s1 + $0x168] sm:$0xff]   ;;  %v220_v4 = vld [vmem:[%s2656_s27 + $0x138] sm:$0xff] }
  0x1a   : > { %2097 = vmatprep.subr.bf16.mxu1 %v2369_v21  ;;  %v2415_v61 = vld [vmem:[%s2937_s1 + $0x1e0] sm:$0xff]   ;;  %v2419_v1 = vld [vmem:[%s2937_s1 + $0x1e8] sm:$0xff]   ;;  %v1898_v6 = vcombine.high %v220_v4, %v220_v4  ;;  %v1897_v8 = vcombine.low %v220_v4, %v220_v4  ;;  %v2426_v10 = vld [vmem:[%s2937_s1 + $0x170] sm:$0xff]  }
  0x1b   : > { %v2416_v62 = vld [vmem:[%s2937_s1 + $0x120] sm:$0xff]   ;;  %v2420_v2 = vld [vmem:[%s2937_s1 + $0x128] sm:$0xff]   ;;  %v2427_v11 = vld [vmem:[%s2937_s1 + $0x1f0] sm:$0xff]  }
  0x1c   : > { %2058 = vmatpush3.bf16.msra.mxu0 %v2370_v22  ;;  %v2417_v63 = vld [vmem:[%s2937_s1 + $0x1a0] sm:$0xff]   ;;  %v2421_v3 = vld [vmem:[%s2937_s1 + $0x1a8] sm:$0xff]   ;;  %v2428_v12 = vld [vmem:[%s2937_s1 + $0x130] sm:$0xff]  }
  0x1d   : > { %2098 = vmatpush3.bf16.msra.mxu1 %v2371_v23  ;;  %2059 = vmatprep.subr.bf16.mxu0 %v2372_v24  ;;  %v221_v5 = vld [vmem:[%s2656_s27 + $0x140] sm:$0xff]  ;;  %v2429_v13 = vld [vmem:[%s2937_s1 + $0x1b0] sm:$0xff]   ;;  %v2430_v14 = vld [vmem:[%s2937_s1 + $0x178] sm:$0xff]  }
  0x1e   : > { %2099 = vmatprep.subr.bf16.mxu1 %v2373_v25  ;;  %v1900_v7 = vcombine.high %v221_v5, %v221_v5  ;;  %v1899_v9 = vcombine.low %v221_v5, %v221_v5  ;;  %v2431_v15 = vld [vmem:[%s2937_s1 + $0x1f8] sm:$0xff]   ;;  %v2434_v18 = vld [vmem:[%s2656_s27 + $0x10] ss:$52 sps:$4 sm:$0xff]   ;;  %v2436_v19 = vld [vmem:[%s2656_s27 + $0x14] ss:$52 sps:$4 sm:$0xff]  }
  0x1f   : > { %v2432_v16 = vld [vmem:[%s2937_s1 + $0x138] sm:$0xff]   ;;  %v2440_v22 = vld [vmem:[%s2937_s1 + $0x240] sm:$0xff]   ;;  %v2455_v35 = vld [vmem:[%s2937_s1 + $0x2d0] sm:$0xff]  }
  0x20   : > { %2060 = vmatpush3.bf16.msra.mxu0 %v2374_v26  ;;  %v2433_v17 = vld [vmem:[%s2937_s1 + $0x1b8] sm:$0xff]   ;;  %v2441_v23 = vld [vmem:[%s2937_s1 + $0x2c0] sm:$0xff]   ;;  %v2444_v26 = vld [vmem:[%s2937_s1 + $0x248] sm:$0xff]  }
  0x21   : > { %2100 = vmatpush3.bf16.msra.mxu1 %v2375_v27  ;;  %2061 = vmatprep.subr.bf16.mxu0 %v2376_v28  ;;  %v2437_v20 = vld [vmem:[%s2656_s27 + $0x18] ss:$52 sps:$4 sm:$0xff]   ;;  %v2439_v21 = vld [vmem:[%s2656_s27 + $0x1c] ss:$52 sps:$4 sm:$0xff]   ;;  %v2442_v24 = vld [vmem:[%s2937_s1 + $0x200] sm:$0xff]  }
  0x22   : > { %2101 = vmatprep.subr.bf16.mxu1 %v2377_v29  ;;  %v2443_v25 = vld [vmem:[%s2937_s1 + $0x280] sm:$0xff]   ;;  %v2445_v27 = vld [vmem:[%s2937_s1 + $0x2c8] sm:$0xff]  }
  0x23   : > { %v2446_v28 = vld [vmem:[%s2937_s1 + $0x208] sm:$0xff]   ;;  %v2453_v33 = vld [vmem:[%s2656_s27 + $0x80] ss:$52 sps:$4 sm:$0xff]   ;;  %v2490_v5 = vld [vmem:[%s2656_s27 + $0x24] ss:$52 sps:$4 sm:$0xff]  }
  0x24   : > { %2062 = vmatpush3.bf16.msra.mxu0 %v2378_v30  ;;  %v2447_v29 = vld [vmem:[%s2937_s1 + $0x288] sm:$0xff]   ;;  %v2448_v30 = vld [vmem:[%s2656_s27 + $0x7c] ss:$52 sps:$4 sm:$0xff]   ;;  %v2488_v4 = vld [vmem:[%s2656_s27 + $0x20] ss:$52 sps:$4 sm:$0xff]  }
  0x25   : > { %2102 = vmatpush3.bf16.msra.mxu1 %v2379_v31  ;;  %2127 = vmatprep.subr.bf16.mxu0 %v2386_v36  ;;  %v2450_v31 = vld [vmem:[%s2656_s27 + $0x84] ss:$52 sps:$4 sm:$0xff]   ;;  %v2456_v36 = vld [vmem:[%s2937_s1 + $0x210] sm:$0xff]  }
  0x26   : > { %2167 = vmatprep.subr.bf16.mxu1 %v2387_v37  ;;  %v2457_v37 = vld [vmem:[%s2937_s1 + $0x290] sm:$0xff]  }
  0x27   : > { %1343 = vmatmul.mubr.bf16.vlgmr.msra.gmra.mrb[0].mxu0 %v2380_v32  ;;  %v2452_v32 = vld [vmem:[%s2656_s27 + $0x78] ss:$52 sps:$4 sm:$0xff]  }
  0x28   : > { %1407 = vmatmul.mubr.bf16.vlgmr.msra.gmra.mrb[0].mxu1 %v2383_v34  ;;  %2128 = vmatpush3.bf16.msra.mxu0 %v2388_v38  ;;  %v2454_v34 = vld [vmem:[%s2937_s1 + $0x250] sm:$0xff]   ;;  %v2458_v38 = vld [vmem:[%s2937_s1 + $0x258] sm:$0xff]  }
  0x29   : > { %2168 = vmatpush3.bf16.msra.mxu1 %v2389_v39  ;;  %2129 = vmatprep.subr.bf16.mxu0 %v2390_v40  ;;  %v2459_v39 = vld [vmem:[%s2937_s1 + $0x2d8] sm:$0xff]  }
  0x2a   : > { %2169 = vmatprep.subr.bf16.mxu1 %v2391_v41  ;;  %1350 = vmatprep.mubr.bf16.mxu0 %v2394_v44  ;;  %v2460_v40 = vld [vmem:[%s2937_s1 + $0x218] sm:$0xff]   ;;  %v2466_v44 = vld [vmem:[%s2656_s27 + $0xe0] ss:$52 sps:$4 sm:$0xff]  }
  0x2b   : > { %1414 = vmatprep.mubr.bf16.mxu1 %v2396_v45  ;;  %v2461_v41 = vld [vmem:[%s2937_s1 + $0x298] sm:$0xff]  }
  0x2c   : > { %2130 = vmatpush3.bf16.msra.mxu0 %v2392_v42  ;;  %v2462_v42 = vld [vmem:[%s2656_s27 + $0xe4] ss:$52 sps:$4 sm:$0xff]   ;;  %v2467_v45 = vld [vmem:[%s2656_s27 + $0xe8] ss:$52 sps:$4 sm:$0xff]  }
  0x2d   : > { %2170 = vmatpush3.bf16.msra.mxu1 %v2393_v43  ;;  %2131 = vmatprep.subr.bf16.mxu0 %v2400_v48  ;;  %v2464_v43 = vld [vmem:[%s2656_s27 + $0xec] ss:$52 sps:$4 sm:$0xff]  }
  0x2e   : > { %2171 = vmatprep.subr.bf16.mxu1 %v2401_v49  ;;  %v2470_v48 = vld [vmem:[%s2937_s1 + $0x220] sm:$0xff]  }
  0x2f   : > { %1351 = vmatmul.mubr.bf16.gmra.mrb[4].mxu0 %v2398_v46  ;;  %v2468_v46 = vld [vmem:[%s2937_s1 + $0x260] sm:$0xff]  }
  0x30   : > { %1415 = vmatmul.mubr.bf16.gmra.mrb[4].mxu1 %v2399_v47  ;;  %2132 = vmatpush3.bf16.msra.mxu0 %v2402_v50  ;;  %v2469_v47 = vld [vmem:[%s2937_s1 + $0x2e0] sm:$0xff]   ;;  %v2472_v50 = vld [vmem:[%s2937_s1 + $0x268] sm:$0xff]  }
  0x31   : > { %2172 = vmatpush3.bf16.msra.mxu1 %v2403_v51  ;;  %2133 = vmatprep.subr.bf16.mxu0 %v2404_v52  ;;  %v2471_v49 = vld [vmem:[%s2937_s1 + $0x2a0] sm:$0xff]   ;;  %v2473_v51 = vld [vmem:[%s2937_s1 + $0x2e8] sm:$0xff]  }
  0x32   : > { %2173 = vmatprep.subr.bf16.mxu1 %v2405_v53  ;;  %1358 = vmatprep.mubr.bf16.mxu0 %v2408_v56  ;;  %v2474_v52 = vld [vmem:[%s2937_s1 + $0x228] sm:$0xff]   ;;  %v223_v56 = vld [vmem:[%s2656_s27 + $0x150] sm:$0xff] }
  0x33   : > { %1422 = vmatprep.mubr.bf16.mxu1 %v2410_v57  ;;  %v2475_v53 = vld [vmem:[%s2937_s1 + $0x2a8] sm:$0xff]  }
  0x34   : > { %2134 = vmatpush3.bf16.msra.mxu0 %v2406_v54  ;;  %v222_v54 = vld [vmem:[%s2656_s27 + $0x148] sm:$0xff] }
  0x35   : > { %2174 = vmatpush3.bf16.msra.mxu1 %v2407_v55  ;;  %2135 = vmatprep.subr.bf16.mxu0 %v2414_v60  ;;  %v1902_v55 = vcombine.high %v222_v54, %v222_v54  ;;  %v1901_v57 = vcombine.low %v222_v54, %v222_v54  ;;  %v2480_v60 = vld [vmem:[%s2937_s1 + $0x270] sm:$0xff]  }
  0x36   : > { %2175 = vmatprep.subr.bf16.mxu1 %v2415_v61  ;;  %v2481_v61 = vld [vmem:[%s2937_s1 + $0x2f0] sm:$0xff]  }
  0x37   : > { %1359 = vmatmul.mubr.bf16.gmra.mrb[8].mxu0 %v2412_v58  ;;  %v1904_v58 = vcombine.high %v223_v56, %v223_v56 }
  0x38   : > { %1423 = vmatmul.mubr.bf16.gmra.mrb[8].mxu1 %v2413_v59  ;;  %2136 = vmatpush3.bf16.msra.mxu0 %v2416_v62  ;;  %v1903_v59 = vcombine.low %v223_v56, %v223_v56  ;;  %v2482_v62 = vld [vmem:[%s2937_s1 + $0x230] sm:$0xff]  }
  0x39   : > { %2176 = vmatpush3.bf16.msra.mxu1 %v2417_v63  ;;  %2137 = vmatprep.subr.bf16.mxu0 %v2418_v0  ;;  %v2483_v63 = vld [vmem:[%s2937_s1 + $0x2b0] sm:$0xff]   ;;  %v2484_v0 = vld [vmem:[%s2937_s1 + $0x278] sm:$0xff]  }
  0x3a   : > { %2177 = vmatprep.subr.bf16.mxu1 %v2419_v1  ;;  %1366 = vmatprep.mubr.bf16.mxu0 %v1898_v6  ;;  %v2485_v1 = vld [vmem:[%s2937_s1 + $0x2f8] sm:$0xff]  }
  0x3b   : > { %1430 = vmatprep.mubr.bf16.mxu1 %v1900_v7  ;;  %v2491_v6 = vld [vmem:[%s2656_s27 + $0x28] ss:$52 sps:$4 sm:$0xff]   ;;  %v2493_v7 = vld [vmem:[%s2656_s27 + $0x2c] ss:$52 sps:$4 sm:$0xff]  }
  0x3c   : > { %2138 = vmatpush3.bf16.msra.mxu0 %v2420_v2  ;;  %v2486_v2 = vld [vmem:[%s2937_s1 + $0x238] sm:$0xff]  }
  0x3d   : > { %2178 = vmatpush3.bf16.msra.mxu1 %v2421_v3  ;;  %2139 = vmatprep.subr.bf16.mxu0 %v2426_v10  ;;  %v2487_v3 = vld [vmem:[%s2937_s1 + $0x2b8] sm:$0xff]   ;;  %v2496_v10 = vld [vmem:[%s2656_s27 + $0x8c] ss:$52 sps:$4 sm:$0xff]  }
  0x3e   : > { %2179 = vmatprep.subr.bf16.mxu1 %v2427_v11  ;;  %v2498_v11 = vld [vmem:[%s2656_s27 + $0x94] ss:$52 sps:$4 sm:$0xff]  }
  0x3f   : > { %1367 = vmatmul.mubr.bf16.gmra.mrb[12].mxu0 %v1897_v8  ;;  %v2494_v8 = vld [vmem:[%s2937_s1 + $0x300] sm:$0xff]  }
  0x40   : > { %1431 = vmatmul.mubr.bf16.gmra.mrb[12].mxu1 %v1899_v9  ;;  %2140 = vmatpush3.bf16.msra.mxu0 %v2428_v12  ;;  %v2495_v9 = vld [vmem:[%s2937_s1 + $0x308] sm:$0xff]  }
  0x41   : > { %2180 = vmatpush3.bf16.msra.mxu1 %v2429_v13  ;;  %2141 = vmatprep.subr.bf16.mxu0 %v2430_v14  ;;  %v2500_v12 = vld [vmem:[%s2656_s27 + $0x88] ss:$52 sps:$4 sm:$0xff]   ;;  %v2502_v13 = vld [vmem:[%s2937_s1 + $0x310] sm:$0xff]  }
  0x42   : > { %2181 = vmatprep.subr.bf16.mxu1 %v2431_v15  ;;  %1470 = vmatprep.mubr.bf16.mxu0 %v2436_v19  ;;  %v2501_v14 = vld [vmem:[%s2656_s27 + $0x90] ss:$52 sps:$4 sm:$0xff]   ;;  %v2504_v15 = vld [vmem:[%s2656_s27 + $0xf4] ss:$52 sps:$4 sm:$0xff]   ;;  %v224_v19 = vld [vmem:[%s2656_s27 + $0x158] sm:$0xff] }
  0x43   : > { %1534 = vmatprep.mubr.bf16.mxu1 %v2439_v21  ;;  %v2508_v21 = vld [vmem:[%s2656_s27 + $0xf0] ss:$52 sps:$4 sm:$0xff]  }
  0x44   : > { %2142 = vmatpush3.bf16.msra.mxu0 %v2432_v16  ;;  %v2503_v16 = vld [vmem:[%s2937_s1 + $0x318] sm:$0xff]  }
  0x45   : > { %2182 = vmatpush3.bf16.msra.mxu1 %v2433_v17  ;;  %2207 = vmatprep.subr.bf16.mxu0 %v2440_v22  ;;  %v2506_v17 = vld [vmem:[%s2656_s27 + $0xfc] ss:$52 sps:$4 sm:$0xff]   ;;  %v2509_v22 = vld [vmem:[%s2656_s27 + $0xf8] ss:$52 sps:$4 sm:$0xff]  }
  0x46   : > { %2247 = vmatprep.subr.bf16.mxu1 %v2441_v23  ;;  %v1906_v23 = vcombine.high %v224_v19, %v224_v19 }
  0x47   : > { %1471 = vmatmul.mubr.bf16.vlgmr.msra.gmra.mrb[16].mxu0 %v2434_v18  ;;  %v2510_v18 = vld [vmem:[%s2937_s1 + $0x320] sm:$0xff]  }
  0x48   : > { %1535 = vmatmul.mubr.bf16.vlgmr.msra.gmra.mrb[16].mxu1 %v2437_v20  ;;  %2208 = vmatpush3.bf16.msra.mxu0 %v2442_v24  ;;  %v225_v20 = vld [vmem:[%s2656_s27 + $0x160] sm:$0xff] }
  0x49   : > { %2248 = vmatpush3.bf16.msra.mxu1 %v2443_v25  ;;  %2209 = vmatprep.subr.bf16.mxu0 %v2444_v26  ;;  %v1908_v24 = vcombine.high %v225_v20, %v225_v20  ;;  %v2511_v25 = vld [vmem:[%s2937_s1 + $0x328] sm:$0xff]   ;;  %v2516_v26 = vld [vmem:[%s2937_s1 + $0x330] sm:$0xff]  }
  0x4a   : > { %2249 = vmatprep.subr.bf16.mxu1 %v2445_v27  ;;  %1478 = vmatprep.mubr.bf16.mxu0 %v2448_v30  ;;  %v1905_v27 = vcombine.low %v224_v19, %v224_v19  ;;  %v2519_v30 = vld [vmem:[%s2656_s27 + $0x100] ss:$52 sps:$4 sm:$0xff]  }
  0x4b   : > { %1542 = vmatprep.mubr.bf16.mxu1 %v2450_v31  ;;  %v2517_v31 = vld [vmem:[%s2937_s1 + $0x338] sm:$0xff]  }
  0x4c   : > { %2210 = vmatpush3.bf16.msra.mxu0 %v2446_v28  ;;  %v1907_v28 = vcombine.low %v225_v20, %v225_v20 }
  0x4d   : > { %2250 = vmatpush3.bf16.msra.mxu1 %v2447_v29  ;;  %2211 = vmatprep.subr.bf16.mxu0 %v2454_v34  ;;  %v2518_v29 = vld [vmem:[%s2656_s27 + $0x30] ss:$52 sps:$4 sm:$0xff]  }
  0x4e   : > { %2251 = vmatprep.subr.bf16.mxu1 %v2455_v35 }
  0x4f   : > { %1479 = vmatmul.mubr.bf16.gmra.mrb[20].mxu0 %v2452_v32  ;;  %v2520_v32 = vld [vmem:[%s2656_s27 + $0x98] ss:$52 sps:$4 sm:$0xff]  }
  0x50   : > { %1543 = vmatmul.mubr.bf16.gmra.mrb[20].mxu1 %v2453_v33  ;;  %2212 = vmatpush3.bf16.msra.mxu0 %v2456_v36  ;;  %v2521_v33 = vld [vmem:[%s2656_s27 + $0x168] ss:$0 sps:$4 sm:$0xff]   ;;  %v1857_v36 = vld [vmem:[%s2938_s2] ss:$0 sm:$0xff]  ;;  %s1856_s27 = sshll.u32 %s2941_s17, 2 }
  0x51   : > { %2252 = vmatpush3.bf16.msra.mxu1 %v2457_v37  ;;  %2213 = vmatprep.subr.bf16.mxu0 %v2458_v38  ;;  %s175_s9 = scalar_lea.vmem %s2939_s3, %s1856_s27 }
  0x52   : > { %2253 = vmatprep.subr.bf16.mxu1 %v2459_v39  ;;  %1486 = vmatprep.mubr.bf16.mxu0 %v2462_v42 }
  0x53   : > { %1550 = vmatprep.mubr.bf16.mxu1 %v2464_v43 }
  0x54   : > { %2214 = vmatpush3.bf16.msra.mxu0 %v2460_v40 }
  0x55   : > { %2254 = vmatpush3.bf16.msra.mxu1 %v2461_v41  ;;  %2215 = vmatprep.subr.bf16.mxu0 %v2468_v46 }
  0x56   : > { %2255 = vmatprep.subr.bf16.mxu1 %v2469_v47 }
  0x57   : > { %1487 = vmatmul.mubr.bf16.gmra.mrb[24].mxu0 %v2466_v44 }
  0x58   : > { %1551 = vmatmul.mubr.bf16.gmra.mrb[24].mxu1 %v2467_v45  ;;  %2216 = vmatpush3.bf16.msra.mxu0 %v2470_v48 }
  0x59   : > { %2256 = vmatpush3.bf16.msra.mxu1 %v2471_v49  ;;  %2217 = vmatprep.subr.bf16.mxu0 %v2472_v50 }
  0x5a   : > { %2257 = vmatprep.subr.bf16.mxu1 %v2473_v51  ;;  %1494 = vmatprep.mubr.bf16.mxu0 %v1902_v55 }
  0x5b   : > { %1558 = vmatprep.mubr.bf16.mxu1 %v1904_v58 }
  0x5c   : > { %2218 = vmatpush3.bf16.msra.mxu0 %v2474_v52 }
  0x5d   : > { %2258 = vmatpush3.bf16.msra.mxu1 %v2475_v53  ;;  %2219 = vmatprep.subr.bf16.mxu0 %v2480_v60 }
  0x5e   : > { %2259 = vmatprep.subr.bf16.mxu1 %v2481_v61 }
  0x5f   : > { %1495 = vmatmul.mubr.bf16.gmra.mrb[28].mxu0 %v1901_v57 }
  0x60   : > { %1559 = vmatmul.mubr.bf16.gmra.mrb[28].mxu1 %v1903_v59  ;;  %2220 = vmatpush3.bf16.msra.mxu0 %v2482_v62 }
  0x61   : > { %2260 = vmatpush3.bf16.msra.mxu1 %v2483_v63  ;;  %2221 = vmatprep.subr.bf16.mxu0 %v2484_v0 }
  0x62   : > { %2261 = vmatprep.subr.bf16.mxu1 %v2485_v1  ;;  %1598 = vmatprep.mubr.bf16.mxu0 %v2490_v5 }
  0x63   : > { %1662 = vmatprep.mubr.bf16.mxu1 %v2493_v7 }
  0x64   : > { %2222 = vmatpush3.bf16.msra.mxu0 %v2486_v2 }
  0x65   : > { %2262 = vmatpush3.bf16.msra.mxu1 %v2487_v3  ;;  %2299 = vmatprep.subr.bf16.mxu0 %v2494_v8 }
  0x66   : > { %2323 = vmatprep.subr.bf16.mxu1 %v2494_v8 }
  0x67   : > { %1599 = vmatmul.mubr.bf16.vlgmr.msra.gmra.mrb[32].mxu0 %v2488_v4 }
  0x68   : > { %1663 = vmatmul.mubr.bf16.vlgmr.msra.gmra.mrb[32].mxu1 %v2491_v6  ;;  %2300 = vmatpush3.bf16.msra.mxu0 %v2494_v8 }
  0x69   : > { %2331 = vmatpush3.bf16.msra.mxu1 %v2494_v8  ;;  %2301 = vmatprep.subr.bf16.mxu0 %v2495_v9 }
  0x6a   : > { %2324 = vmatprep.subr.bf16.mxu1 %v2495_v9  ;;  %1606 = vmatprep.mubr.bf16.mxu0 %v2496_v10 }
  0x6b   : > { %1670 = vmatprep.mubr.bf16.mxu1 %v2498_v11 }
  0x6c   : > { %2302 = vmatpush3.bf16.msra.mxu0 %v2495_v9 }
  0x6d   : > { %2332 = vmatpush3.bf16.msra.mxu1 %v2495_v9  ;;  %2303 = vmatprep.subr.bf16.mxu0 %v2502_v13 }
  0x6e   : > { %2325 = vmatprep.subr.bf16.mxu1 %v2502_v13 }
  0x6f   : > { %1607 = vmatmul.mubr.bf16.gmra.mrb[36].mxu0 %v2500_v12 }
  0x70   : > { %1671 = vmatmul.mubr.bf16.gmra.mrb[36].mxu1 %v2501_v14  ;;  %1614 = vmatprep.mubr.bf16.mxu0 %v2504_v15 }
  0x71   : > { %2304 = vmatpush3.bf16.msra.mxu0 %v2502_v13  ;;  %1678 = vmatprep.mubr.bf16.mxu1 %v2506_v17 }
  0x72   : > { %2333 = vmatpush3.bf16.msra.mxu1 %v2502_v13  ;;  %2305 = vmatprep.subr.bf16.mxu0 %v2503_v16 }
  0x73   : > { %2326 = vmatprep.subr.bf16.mxu1 %v2503_v16 }
  0x75   : > { %2306 = vmatpush3.bf16.msra.mxu0 %v2503_v16 }
  0x76   : > { %2334 = vmatpush3.bf16.msra.mxu1 %v2503_v16  ;;  %2307 = vmatprep.subr.bf16.mxu0 %v2510_v18 }
  0x77   : > { %1615 = vmatmul.mubr.bf16.gmra.mrb[40].mxu0 %v2508_v21  ;;  %2327 = vmatprep.subr.bf16.mxu1 %v2510_v18 }
  0x78   : > { %1679 = vmatmul.mubr.bf16.gmra.mrb[40].mxu1 %v2509_v22  ;;  %1622 = vmatprep.mubr.bf16.mxu0 %v1906_v23 }
  0x79   : > { %2308 = vmatpush3.bf16.msra.mxu0 %v2510_v18  ;;  %1686 = vmatprep.mubr.bf16.mxu1 %v1908_v24 }
  0x7a   : > { %2335 = vmatpush3.bf16.msra.mxu1 %v2510_v18  ;;  %2309 = vmatprep.subr.bf16.mxu0 %v2511_v25 }
  0x7b   : > { %2328 = vmatprep.subr.bf16.mxu1 %v2511_v25 }
  0x7d   : > { %2310 = vmatpush3.bf16.msra.mxu0 %v2511_v25 }
  0x7e   : > { %2336 = vmatpush3.bf16.msra.mxu1 %v2511_v25  ;;  %2311 = vmatprep.subr.bf16.mxu0 %v2516_v26 }
  0x7f   : > { %1623 = vmatmul.mubr.bf16.gmra.mrb[44].mxu0 %v1905_v27  ;;  %2329 = vmatprep.subr.bf16.mxu1 %v2516_v26 }
  0x80   : > { %1687 = vmatmul.mubr.bf16.gmra.mrb[44].mxu1 %v1907_v28  ;;  %2315 = vmatprep.mubr.bf16.mxu0 %v2518_v29 }
  0x81   : > { %2312 = vmatpush3.bf16.msra.mxu0 %v2516_v26  ;;  %2319 = vmatprep.mubr.bf16.mxu1 %v2519_v30 }
  0x82   : > { %2337 = vmatpush3.bf16.msra.mxu1 %v2516_v26  ;;  %2313 = vmatprep.subr.bf16.mxu0 %v2517_v31 }
  0x83   : > { %2330 = vmatprep.subr.bf16.mxu1 %v2517_v31 }
  0x85   : > { %2314 = vmatpush3.bf16.msra.mxu0 %v2517_v31 }
  0x86   : > { %2338 = vmatpush3.bf16.msra.mxu1 %v2517_v31 }
  0x88   : > { %2316 = vmatmul.mubr.bf16.vlgmr.msra.gmra.mrb[48].mxu0 %v2520_v32 }
  0x89   : > { %2320 = vmatmul.mubr.bf16.vlgmr.msra.gmra.mrb[48].mxu1 %v2521_v33 }
  0xfa   : > { %v2063_v34 = vpop.f32.mrb[0].mxu0 }
  0xfb   : > { %v2103_v35 = vpop.f32.mrb[0].mxu1  ;;  %v2064_v37 = vpop.f32.mrb[1].mxu0 }
  0xfc   : > { %v2065_v38 = vadd.f32 %v2064_v37, %v2063_v34  ;;  %v2104_v39 = vpop.f32.mrb[1].mxu1  ;;  %v2066_v40 = vpop.f32.mrb[2].mxu0 }
  0xfd   : > { %v2105_v41 = vadd.f32 %v2104_v39, %v2103_v35  ;;  %v2106_v42 = vpop.f32.mrb[2].mxu1  ;;  %v2067_v43 = vpop.f32.mrb[3].mxu0 }
  0xfe   : > { %v1345_v44 = vadd.f32 %v2065_v38, %v1857_v36  ;;  %v2068_v45 = vadd.f32 %v2067_v43, %v2066_v40  ;;  %v2107_v46 = vpop.f32.mrb[3].mxu1 }
  0xff   : > { %v2108_v47 = vadd.f32 %v2107_v46, %v2106_v42 }
 0x100   : > { %v1409_v48 = vadd.f32 %v2105_v41, %v1345_v44  ;;  %v1348_v49 = vadd.f32 %v2068_v45, %v1857_v36 }
 0x102   : > { %v1412_v50 = vadd.f32 %v2108_v47, %v1348_v49  ;;  %v2069_v51 = vpop.f32.mrb[4].mxu0 }
 0x103   : > { %v2109_v52 = vpop.f32.mrb[4].mxu1  ;;  %v2070_v53 = vpop.f32.mrb[5].mxu0 }
 0x104   : > { %v2071_v54 = vadd.f32 %v2070_v53, %v2069_v51  ;;  %v2110_v55 = vpop.f32.mrb[5].mxu1  ;;  %v2072_v56 = vpop.f32.mrb[6].mxu0 }
 0x105   : > { %v2111_v57 = vadd.f32 %v2110_v55, %v2109_v52  ;;  %v2112_v58 = vpop.f32.mrb[6].mxu1  ;;  %v2073_v59 = vpop.f32.mrb[7].mxu0 }
 0x106   : > { %v1353_v60 = vadd.f32 %v2071_v54, %v1857_v36  ;;  %v2074_v61 = vadd.f32 %v2073_v59, %v2072_v56  ;;  %v2113_v62 = vpop.f32.mrb[7].mxu1 }
 0x107   : > { %v2114_v63 = vadd.f32 %v2113_v62, %v2112_v58 }
 0x108   : > { %v1417_v0 = vadd.f32 %v2111_v57, %v1353_v60  ;;  %v1356_v1 = vadd.f32 %v2074_v61, %v1857_v36 }
 0x10a   : > { %v1420_v2 = vadd.f32 %v2114_v63, %v1356_v1  ;;  %v2075_v3 = vpop.f32.mrb[8].mxu0 }
 0x10b   : > { %v2115_v4 = vpop.f32.mrb[8].mxu1  ;;  %v2076_v5 = vpop.f32.mrb[9].mxu0 }
 0x10c   : > { %v2077_v6 = vadd.f32 %v2076_v5, %v2075_v3  ;;  %v2116_v7 = vpop.f32.mrb[9].mxu1  ;;  %v2078_v8 = vpop.f32.mrb[10].mxu0 }
 0x10d   : > { %v2117_v9 = vadd.f32 %v2116_v7, %v2115_v4  ;;  %v2118_v10 = vpop.f32.mrb[10].mxu1  ;;  %v2079_v11 = vpop.f32.mrb[11].mxu0 }
 0x10e   : > { %v1361_v12 = vadd.f32 %v2077_v6, %v1857_v36  ;;  %v2080_v13 = vadd.f32 %v2079_v11, %v2078_v8  ;;  %v2119_v14 = vpop.f32.mrb[11].mxu1 }
 0x10f   : > { %v2120_v15 = vadd.f32 %v2119_v14, %v2118_v10 }
 0x110   : > { %v1425_v16 = vadd.f32 %v2117_v9, %v1361_v12  ;;  %v1364_v17 = vadd.f32 %v2080_v13, %v1857_v36 }
 0x112   : > { %v1428_v18 = vadd.f32 %v2120_v15, %v1364_v17  ;;  %v2081_v19 = vpop.f32.mrb[12].mxu0 }
 0x113   : > { %v2121_v20 = vpop.f32.mrb[12].mxu1  ;;  %v2082_v21 = vpop.f32.mrb[13].mxu0 }
 0x114   : > { %v2122_v22 = vpop.f32.mrb[13].mxu1  ;;  %v2083_v23 = vadd.f32 %v2082_v21, %v2081_v19  ;;  %v2084_v25 = vpop.f32.mrb[14].mxu0 }
 0x115   : > { %v2123_v24 = vadd.f32 %v2122_v22, %v2121_v20  ;;  %v2124_v26 = vpop.f32.mrb[14].mxu1  ;;  %v2085_v27 = vpop.f32.mrb[15].mxu0 }
 0x116   : > { %v2125_v28 = vpop.f32.mrb[15].mxu1  ;;  %v1369_v29 = vadd.f32 %v2083_v23, %v1857_v36 }
 0x118   : > { %v1433_v30 = vadd.f32 %v2123_v24, %v1369_v29 }
 0x11a   : > { %v2143_v31 = vpop.f32.mrb[16].mxu0 }
 0x11b   : > { %v2183_v32 = vpop.f32.mrb[16].mxu1  ;;  %v2144_v33 = vpop.f32.mrb[17].mxu0 }
 0x11c   : > { %v2145_v34 = vadd.f32 %v2144_v33, %v2143_v31  ;;  %v2184_v35 = vpop.f32.mrb[17].mxu1  ;;  %v2146_v37 = vpop.f32.mrb[18].mxu0 }
 0x11d   : > { %v2185_v38 = vadd.f32 %v2184_v35, %v2183_v32  ;;  %v2186_v39 = vpop.f32.mrb[18].mxu1  ;;  %v2147_v40 = vpop.f32.mrb[19].mxu0 }
 0x11e   : > { %v1473_v41 = vadd.f32 %v2145_v34, %v1409_v48  ;;  %v2148_v42 = vadd.f32 %v2147_v40, %v2146_v37  ;;  %v2187_v43 = vpop.f32.mrb[19].mxu1 }
 0x11f   : > { %v2188_v44 = vadd.f32 %v2187_v43, %v2186_v39 }
 0x120   : > { %v1537_v45 = vadd.f32 %v2185_v38, %v1473_v41  ;;  %v1476_v46 = vadd.f32 %v2148_v42, %v1412_v50 }
 0x122   : > { %v1540_v47 = vadd.f32 %v2188_v44, %v1476_v46  ;;  %v2149_v49 = vpop.f32.mrb[20].mxu0 }
 0x123   : > { %v2189_v51 = vpop.f32.mrb[20].mxu1  ;;  %v2150_v36 = vpop.f32.mrb[21].mxu0 }
 0x124   : > { %v2151_v52 = vadd.f32 %v2150_v36, %v2149_v49  ;;  %v2190_v53 = vpop.f32.mrb[21].mxu1  ;;  %v2152_v54 = vpop.f32.mrb[22].mxu0 }
 0x125   : > { %v2191_v55 = vadd.f32 %v2190_v53, %v2189_v51  ;;  %v2192_v56 = vpop.f32.mrb[22].mxu1  ;;  %v2153_v57 = vpop.f32.mrb[23].mxu0 }
 0x126   : > { %v1481_v58 = vadd.f32 %v2151_v52, %v1417_v0  ;;  %v2154_v59 = vadd.f32 %v2153_v57, %v2152_v54  ;;  %v2193_v60 = vpop.f32.mrb[23].mxu1 }
 0x127   : > { %v2194_v61 = vadd.f32 %v2193_v60, %v2192_v56 }
 0x128   : > { %v1545_v48 = vadd.f32 %v2191_v55, %v1481_v58  ;;  %v1484_v62 = vadd.f32 %v2154_v59, %v1420_v2 }
 0x12a   : > { %v1548_v63 = vadd.f32 %v2194_v61, %v1484_v62  ;;  %v2155_v1 = vpop.f32.mrb[24].mxu0 }
 0x12b   : > { %v2195_v3 = vpop.f32.mrb[24].mxu1  ;;  %v2156_v50 = vpop.f32.mrb[25].mxu0 }
 0x12c   : > { %v2196_v4 = vpop.f32.mrb[25].mxu1  ;;  %v2157_v5 = vadd.f32 %v2156_v50, %v2155_v1  ;;  %v2158_v7 = vpop.f32.mrb[26].mxu0 }
 0x12d   : > { %v2197_v6 = vadd.f32 %v2196_v4, %v2195_v3  ;;  %v2198_v8 = vpop.f32.mrb[26].mxu1  ;;  %v2159_v9 = vpop.f32.mrb[27].mxu0 }
 0x12e   : > { %v2199_v10 = vpop.f32.mrb[27].mxu1  ;;  %v1489_v11 = vadd.f32 %v2157_v5, %v1425_v16  ;;  %v2160_v12 = vadd.f32 %v2159_v9, %v2158_v7 }
 0x12f   : > { %v2200_v13 = vadd.f32 %v2199_v10, %v2198_v8 }
 0x130   : > { %v1553_v0 = vadd.f32 %v2197_v6, %v1489_v11  ;;  %v1492_v14 = vadd.f32 %v2160_v12, %v1428_v18 }
 0x132   : > { %v1556_v15 = vadd.f32 %v2200_v13, %v1492_v14  ;;  %v2161_v17 = vpop.f32.mrb[28].mxu0 }
 0x133   : > { %v2201_v19 = vpop.f32.mrb[28].mxu1  ;;  %v2162_v2 = vpop.f32.mrb[29].mxu0 }
 0x134   : > { %v2163_v20 = vadd.f32 %v2162_v2, %v2161_v17  ;;  %v2202_v21 = vpop.f32.mrb[29].mxu1  ;;  %v2164_v22 = vpop.f32.mrb[30].mxu0 }
 0x135   : > { %v2203_v23 = vadd.f32 %v2202_v21, %v2201_v19  ;;  %v2204_v24 = vpop.f32.mrb[30].mxu1  ;;  %v2165_v25 = vpop.f32.mrb[31].mxu0 }
 0x136   : > { %v1497_v26 = vadd.f32 %v2163_v20, %v1433_v30  ;;  %v2205_v27 = vpop.f32.mrb[31].mxu1 }
 0x138   : > { %v1561_v28 = vadd.f32 %v2203_v23, %v1497_v26 }
 0x13a   : > { %v2223_v29 = vpop.f32.mrb[32].mxu0 }
 0x13b   : > { %v2263_v31 = vpop.f32.mrb[32].mxu1  ;;  %v2224_v16 = vpop.f32.mrb[33].mxu0 }
 0x13c   : > { %v2225_v32 = vadd.f32 %v2224_v16, %v2223_v29  ;;  %v2264_v33 = vpop.f32.mrb[33].mxu1  ;;  %v2226_v34 = vpop.f32.mrb[34].mxu0 }
 0x13d   : > { %v2265_v18 = vadd.f32 %v2264_v33, %v2263_v31  ;;  %v2266_v35 = vpop.f32.mrb[34].mxu1  ;;  %v2227_v37 = vpop.f32.mrb[35].mxu0 }
 0x13e   : > { %v1601_v38 = vadd.f32 %v2225_v32, %v1537_v45  ;;  %v2228_v39 = vadd.f32 %v2227_v37, %v2226_v34  ;;  %v2267_v40 = vpop.f32.mrb[35].mxu1 }
 0x13f   : > { %v2268_v41 = vadd.f32 %v2267_v40, %v2266_v35 }
 0x140   : > { %v1604_v42 = vadd.f32 %v2228_v39, %v1540_v47  ;;  %v1665_v43 = vadd.f32 %v2265_v18, %v1601_v38 }
 0x142   : > { %v2229_v44 = vpop.f32.mrb[36].mxu0  ;;  %v1668_v46 = vadd.f32 %v2268_v41, %v1604_v42 }
 0x143   : > { %v2269_v30 = vpop.f32.mrb[36].mxu1  ;;  %v2230_v49 = vpop.f32.mrb[37].mxu0 }
 0x144   : > { %v2231_v51 = vadd.f32 %v2230_v49, %v2229_v44  ;;  %v2270_v36 = vpop.f32.mrb[37].mxu1  ;;  %v2232_v52 = vpop.f32.mrb[38].mxu0 }
 0x145   : > { %v2271_v53 = vadd.f32 %v2270_v36, %v2269_v30  ;;  %v2272_v54 = vpop.f32.mrb[38].mxu1  ;;  %v2233_v55 = vpop.f32.mrb[39].mxu0 }
 0x146   : > { %v1609_v56 = vadd.f32 %v2231_v51, %v1545_v48  ;;  %v2234_v57 = vadd.f32 %v2233_v55, %v2232_v52  ;;  %v2273_v58 = vpop.f32.mrb[39].mxu1 }
 0x147   : > { %v2274_v59 = vadd.f32 %v2273_v58, %v2272_v54 }
 0x148   : > { %v1612_v45 = vadd.f32 %v2234_v57, %v1548_v63  ;;  %v1673_v60 = vadd.f32 %v2271_v53, %v1609_v56 }
 0x14a   : > { %v2235_v61 = vpop.f32.mrb[40].mxu0  ;;  %v1676_v62 = vadd.f32 %v2274_v59, %v1612_v45 }
 0x14b   : > { %v2275_v47 = vpop.f32.mrb[40].mxu1  ;;  %v2236_v1 = vpop.f32.mrb[41].mxu0 }
 0x14c   : > { %v2237_v3 = vadd.f32 %v2236_v1, %v2235_v61  ;;  %v2276_v50 = vpop.f32.mrb[41].mxu1  ;;  %v2238_v4 = vpop.f32.mrb[42].mxu0 }
 0x14d   : > { %v2277_v5 = vadd.f32 %v2276_v50, %v2275_v47  ;;  %v2278_v6 = vpop.f32.mrb[42].mxu1  ;;  %v2239_v7 = vpop.f32.mrb[43].mxu0 }
 0x14e   : > { %v1617_v8 = vadd.f32 %v2237_v3, %v1553_v0  ;;  %v2240_v9 = vadd.f32 %v2239_v7, %v2238_v4  ;;  %v2279_v10 = vpop.f32.mrb[43].mxu1 }
 0x14f   : > { %v2280_v11 = vadd.f32 %v2279_v10, %v2278_v6 }
 0x150   : > { %v1620_v48 = vadd.f32 %v2240_v9, %v1556_v15  ;;  %v1681_v12 = vadd.f32 %v2277_v5, %v1617_v8 }
 0x152   : > { %v2241_v13 = vpop.f32.mrb[44].mxu0  ;;  %v1684_v63 = vadd.f32 %v2280_v11, %v1620_v48 }
 0x153   : > { %v2281_v14 = vpop.f32.mrb[44].mxu1  ;;  %v2242_v17 = vpop.f32.mrb[45].mxu0 }
 0x154   : > { %v2243_v19 = vadd.f32 %v2242_v17, %v2241_v13  ;;  %v2282_v2 = vpop.f32.mrb[45].mxu1  ;;  %v2244_v20 = vpop.f32.mrb[46].mxu0 }
 0x155   : > { %v2283_v21 = vadd.f32 %v2282_v2, %v2281_v14  ;;  %v2284_v22 = vpop.f32.mrb[46].mxu1  ;;  %v2245_v23 = vpop.f32.mrb[47].mxu0 }
 0x156   : > { %v1625_v24 = vadd.f32 %v2243_v19, %v1561_v28  ;;  %v2285_v25 = vpop.f32.mrb[47].mxu1 }
 0x158   : > { %v1689_v26 = vadd.f32 %v2283_v21, %v1625_v24 }
 0x15b   : > { %v2317_v0 = vpop.f32.mrb[48].mxu0 }
 0x15c   : > { %v1737_v27 = vadd.f32 %v2317_v0, %v1673_v60  ;;  %v2321_v29 = vpop.f32.mrb[48].mxu1  ;;  %v1728_v15 = vpop.f32.mrb[49].mxu0 }
 0x15d   : > { %v1753_v31 = vadd.f32 %v2321_v29, %v1689_v26  ;;  %v1729_v16 = vadd.f32 %v1728_v15, %v1665_v43  ;;  %v1744_v32 = vpop.f32.mrb[49].mxu1  ;;  %v2318_v33 = vpop.f32.mrb[50].mxu0 }
 0x15e   : > { %v1745_v34 = vadd.f32 %v1744_v32, %v1681_v12  ;;  %v1740_v18 = vadd.f32 %v2318_v33, %v1676_v62  ;;  %v2322_v35 = vpop.f32.mrb[50].mxu1  ;;  %v1731_v37 = vpop.f32.mrb[51].mxu0 }
 0x15f   : > { %v2029_v28 = vpack.c.bf16 %v1753_v31, %v1753_v31  ;;  %v1732_v38 = vadd.f32 %v1731_v37, %v1668_v46  ;;  %v1747_v39 = vpop.f32.mrb[51].mxu1 }
 0x160   : > { %v2038_v40 = vpack.c.bf16 %v1740_v18, %v1737_v27  ;;  %v1748_v41 = vadd.f32 %v1747_v39, %v1684_v63 }
 0x161   : > { %1793 = vst [vmem:[%s175_s9 + $0x18] sm:$0xf] %v2029_v28  ;;  %v2033_v42 = vpack.c.bf16 %v1732_v38, %v1729_v16 }
 0x162   : > { %2045 = vst [vmem:[%s175_s9 + $0x8] sm:$0xff] %v2038_v40   ;;  %v2043_v44 = vpack.c.bf16 %v1748_v41, %v1745_v34 }
 0x163   : > { %2034 = vst [vmem:[%s175_s9] sm:$0xff] %v2033_v42  }
 0x164   : > { %2046 = vst [vmem:[%s175_s9 + $0x10] sm:$0xff] %v2043_v44  }
 0x165 PF: > { %s13_s12 = sadd.s32 1, %s2528_s12  }
 0x166   : > { %p10_p4 = scmp.ge.s32.totalorder %s13_s12, 4  }
 0x168   :  { %12 = sbr.rel (!%p10_p4) target bundleno = 1 (0x1), region = 62 }

// kernel: forward.14
= control target key start
LH: loop header
LB: loop body
LE: loop exit
PB: predicated region body
PF: predicated region fallthrough
CT: control target
= control target key end

     0   :  { %vm2997_vm0 = vmmov 0   ;;  %s3663_s1 = inlined_call_operand.vmem [shape: bf16[3200,128], index: 1, kind: input, shape index: {}]   ;;  %s3664_s0 = inlined_call_operand.vmem [shape: bf16[8,3200], index: 0, kind: input, shape index: {}]   ;;  %s3665_s2 = inlined_call_operand.vmem [shape: f32[1,128], index: 2, kind: input, shape index: {}]   ;;  %s3666_s3 = inlined_call_operand.vmem [shape: bf16[8,128], index: 3, kind: output, shape index: {}]  }
   0x1   :  { %v2771_v0 = vld [vmem:[%s3663_s1 + $0x40] sm:$0xff]   ;;  %v2775_v4 = vld [vmem:[%s3663_s1 + $0x48] sm:$0xff]   ;;  %v2779_v8 = vld [vmem:[%s3663_s1 + $0x50] sm:$0xff]  }
   0x2   :  { %v2772_v1 = vld [vmem:[%s3663_s1] sm:$0xff]   ;;  %2476 = vmatprep.subr.bf16.mxu0 %v2771_v0  ;;  %v2776_v5 = vld [vmem:[%s3663_s1 + $0x8] sm:$0xff]   ;;  %v2780_v9 = vld [vmem:[%s3663_s1 + $0x10] sm:$0xff]  }
   0x3   :  { %v2773_v2 = vld [vmem:[%s3663_s1 + $0xc0] sm:$0xff]   ;;  %2477 = vmatpush3.bf16.msra.mxu0 %v2772_v1  ;;  %v2777_v6 = vld [vmem:[%s3663_s1 + $0xc8] sm:$0xff]   ;;  %v2781_v10 = vld [vmem:[%s3663_s1 + $0xd0] sm:$0xff]  }
   0x4   :  { %v2774_v3 = vld [vmem:[%s3663_s1 + $0x80] sm:$0xff]   ;;  %2498 = vmatprep.subr.bf16.mxu1 %v2773_v2  ;;  %2478 = vmatprep.subr.bf16.mxu0 %v2775_v4  ;;  %v2778_v7 = vld [vmem:[%s3663_s1 + $0x88] sm:$0xff]   ;;  %v2782_v11 = vld [vmem:[%s3663_s1 + $0x90] sm:$0xff]  }
   0x5   :  { %2499 = vmatpush3.bf16.msra.mxu1 %v2774_v3  ;;  %v2783_v12 = vld [vmem:[%s3663_s1 + $0x58] sm:$0xff]   ;;  %v2787_v16 = vld [vmem:[%s3663_s1 + $0x60] sm:$0xff]   ;;  %v2791_v20 = vld [vmem:[%s3663_s1 + $0x68] sm:$0xff]  }
   0x6   :  { %2500 = vmatprep.subr.bf16.mxu1 %v2777_v6  ;;  %v2784_v13 = vld [vmem:[%s3663_s1 + $0x18] sm:$0xff]   ;;  %v2788_v17 = vld [vmem:[%s3663_s1 + $0x20] sm:$0xff]   ;;  %v2792_v21 = vld [vmem:[%s3663_s1 + $0x28] sm:$0xff]  }
   0x7   :  { %2479 = vmatpush3.bf16.msra.mxu0 %v2776_v5  ;;  %v2785_v14 = vld [vmem:[%s3663_s1 + $0xd8] sm:$0xff]   ;;  %v2789_v18 = vld [vmem:[%s3663_s1 + $0xe0] sm:$0xff]   ;;  %v2793_v22 = vld [vmem:[%s3663_s1 + $0xe8] sm:$0xff]  }
   0x8   :  { %2480 = vmatprep.subr.bf16.mxu0 %v2779_v8  ;;  %v2786_v15 = vld [vmem:[%s3663_s1 + $0x98] sm:$0xff]   ;;  %v2790_v19 = vld [vmem:[%s3663_s1 + $0xa0] sm:$0xff]   ;;  %v2794_v23 = vld [vmem:[%s3663_s1 + $0xa8] sm:$0xff]  }
   0x9   :  { %2501 = vmatpush3.bf16.msra.mxu1 %v2778_v7  ;;  %v2795_v24 = vld [vmem:[%s3663_s1 + $0x70] sm:$0xff]   ;;  %v2799_v28 = vld [vmem:[%s3663_s1 + $0x78] sm:$0xff]   ;;  %v15_v31 = vld [vmem:[%s3664_s0] sm:$0xff] }
   0xa   :  { %2502 = vmatprep.subr.bf16.mxu1 %v2781_v10  ;;  %v2796_v25 = vld [vmem:[%s3663_s1 + $0x30] sm:$0xff]   ;;  %v2800_v29 = vld [vmem:[%s3663_s1 + $0x38] sm:$0xff]   ;;  %v2251_v32 = vcombine.low %v15_v31, %v15_v31  ;;  %v2252_v33 = vcombine.high %v15_v31, %v15_v31  ;;  %v2805_v35 = vld [vmem:[%s3663_s1 + $0x140] sm:$0xff]  }
   0xb   :  { %2481 = vmatpush3.bf16.msra.mxu0 %v2780_v9  ;;  %v2797_v26 = vld [vmem:[%s3663_s1 + $0xf0] sm:$0xff]   ;;  %v2801_v30 = vld [vmem:[%s3663_s1 + $0xf8] sm:$0xff]   ;;  %v16_v36 = vld [vmem:[%s3664_s0 + $0x8] sm:$0xff] }
   0xc   :  { %2482 = vmatprep.subr.bf16.mxu0 %v2783_v12  ;;  %v2798_v27 = vld [vmem:[%s3663_s1 + $0xb0] sm:$0xff]   ;;  %v2804_v34 = vld [vmem:[%s3663_s1 + $0xb8] sm:$0xff]   ;;  %1755 = vmatprep.mubr.bf16.mxu0 %v2252_v33  ;;  %v2253_v37 = vcombine.low %v16_v36, %v16_v36  ;;  %v2254_v38 = vcombine.high %v16_v36, %v16_v36  ;;  %v2808_v39 = vld [vmem:[%s3663_s1 + $0x100] sm:$0xff]  }
   0xd   :  { %2503 = vmatpush3.bf16.msra.mxu1 %v2782_v11  ;;  %v2809_v40 = vld [vmem:[%s3663_s1 + $0x1c0] sm:$0xff]   ;;  %v2811_v42 = vld [vmem:[%s3663_s1 + $0x148] sm:$0xff]   ;;  %v2815_v46 = vld [vmem:[%s3663_s1 + $0x150] sm:$0xff]  }
   0xe   :  { %2504 = vmatprep.subr.bf16.mxu1 %v2785_v14  ;;  %1795 = vmatprep.mubr.bf16.mxu1 %v2254_v38  ;;  %v2810_v41 = vld [vmem:[%s3663_s1 + $0x180] sm:$0xff]   ;;  %v2812_v43 = vld [vmem:[%s3663_s1 + $0x108] sm:$0xff]   ;;  %v2816_v47 = vld [vmem:[%s3663_s1 + $0x110] sm:$0xff]  }
   0xf   :  { %2483 = vmatpush3.bf16.msra.mxu0 %v2784_v13  ;;  %v2813_v44 = vld [vmem:[%s3663_s1 + $0x1c8] sm:$0xff]   ;;  %v2817_v48 = vld [vmem:[%s3663_s1 + $0x1d0] sm:$0xff]   ;;  %v2819_v50 = vld [vmem:[%s3663_s1 + $0x158] sm:$0xff]  }
  0x10   :  { %2484 = vmatprep.subr.bf16.mxu0 %v2787_v16  ;;  %v2814_v45 = vld [vmem:[%s3663_s1 + $0x188] sm:$0xff]   ;;  %v2818_v49 = vld [vmem:[%s3663_s1 + $0x190] sm:$0xff]   ;;  %v2820_v51 = vld [vmem:[%s3663_s1 + $0x118] sm:$0xff]  }
  0x11   :  { %2505 = vmatpush3.bf16.msra.mxu1 %v2786_v15  ;;  %v2821_v52 = vld [vmem:[%s3663_s1 + $0x1d8] sm:$0xff]   ;;  %v2823_v54 = vld [vmem:[%s3663_s1 + $0x160] sm:$0xff]   ;;  %v2827_v58 = vld [vmem:[%s3663_s1 + $0x168] sm:$0xff]  }
  0x12   :  { %2506 = vmatprep.subr.bf16.mxu1 %v2789_v18  ;;  %v2822_v53 = vld [vmem:[%s3663_s1 + $0x198] sm:$0xff]   ;;  %v2824_v55 = vld [vmem:[%s3663_s1 + $0x120] sm:$0xff]   ;;  %v2828_v59 = vld [vmem:[%s3663_s1 + $0x128] sm:$0xff]  }
  0x13   :  { %2485 = vmatpush3.bf16.msra.mxu0 %v2788_v17  ;;  %v2825_v56 = vld [vmem:[%s3663_s1 + $0x1e0] sm:$0xff]   ;;  %v2829_v60 = vld [vmem:[%s3663_s1 + $0x1e8] sm:$0xff]   ;;  %v2831_v62 = vld [vmem:[%s3663_s1 + $0x170] sm:$0xff]  }
  0x14   :  { %2486 = vmatprep.subr.bf16.mxu0 %v2791_v20  ;;  %v2826_v57 = vld [vmem:[%s3663_s1 + $0x1a0] sm:$0xff]   ;;  %v2830_v61 = vld [vmem:[%s3663_s1 + $0x1a8] sm:$0xff]   ;;  %v2832_v63 = vld [vmem:[%s3663_s1 + $0x130] sm:$0xff]  }
  0x15   :  { %2507 = vmatpush3.bf16.msra.mxu1 %v2790_v19  ;;  %v2833_v0 = vld [vmem:[%s3663_s1 + $0x1f0] sm:$0xff]   ;;  %v2835_v2 = vld [vmem:[%s3663_s1 + $0x178] sm:$0xff]   ;;  %v2841_v9 = vld [vmem:[%s3663_s1 + $0x240] sm:$0xff]  }
  0x16   :  { %2508 = vmatprep.subr.bf16.mxu1 %v2793_v22  ;;  %v2834_v1 = vld [vmem:[%s3663_s1 + $0x1b0] sm:$0xff]   ;;  %v2836_v3 = vld [vmem:[%s3663_s1 + $0x138] sm:$0xff]   ;;  %v2844_v13 = vld [vmem:[%s3663_s1 + $0x200] sm:$0xff]  }
  0x17   :  { %2487 = vmatpush3.bf16.msra.mxu0 %v2792_v21  ;;  %v2837_v4 = vld [vmem:[%s3663_s1 + $0x1f8] sm:$0xff]   ;;  %v17_v5 = vld [vmem:[%s3664_s0 + $0x10] sm:$0xff]  ;;  %v2845_v14 = vld [vmem:[%s3663_s1 + $0x2c0] sm:$0xff]  }
  0x18   :  { %2488 = vmatprep.subr.bf16.mxu0 %v2795_v24  ;;  %v2255_v6 = vcombine.low %v17_v5, %v17_v5  ;;  %v2256_v7 = vcombine.high %v17_v5, %v17_v5  ;;  %v2840_v8 = vld [vmem:[%s3663_s1 + $0x1b8] sm:$0xff]   ;;  %v2846_v15 = vld [vmem:[%s3663_s1 + $0x280] sm:$0xff]   ;;  %v2847_v16 = vld [vmem:[%s3663_s1 + $0x248] sm:$0xff]  }
  0x19   :  { %2509 = vmatpush3.bf16.msra.mxu1 %v2794_v23  ;;  %v18_v10 = vld [vmem:[%s3664_s0 + $0x18] sm:$0xff]  ;;  %v2848_v17 = vld [vmem:[%s3663_s1 + $0x208] sm:$0xff]   ;;  %v2851_v20 = vld [vmem:[%s3663_s1 + $0x250] sm:$0xff]  }
  0x1a   :  { %2510 = vmatprep.subr.bf16.mxu1 %v2797_v26  ;;  %v2257_v11 = vcombine.low %v18_v10, %v18_v10  ;;  %v2258_v12 = vcombine.high %v18_v10, %v18_v10  ;;  %v2849_v18 = vld [vmem:[%s3663_s1 + $0x2c8] sm:$0xff]   ;;  %v2852_v21 = vld [vmem:[%s3663_s1 + $0x210] sm:$0xff]   ;;  %v2855_v24 = vld [vmem:[%s3663_s1 + $0x258] sm:$0xff]  }
  0x1b   :  { %2489 = vmatpush3.bf16.msra.mxu0 %v2796_v25  ;;  %v2850_v19 = vld [vmem:[%s3663_s1 + $0x288] sm:$0xff]   ;;  %v2853_v22 = vld [vmem:[%s3663_s1 + $0x2d0] sm:$0xff]   ;;  %v2856_v25 = vld [vmem:[%s3663_s1 + $0x218] sm:$0xff]  }
  0x1c   :  { %2490 = vmatprep.subr.bf16.mxu0 %v2799_v28  ;;  %v2854_v23 = vld [vmem:[%s3663_s1 + $0x290] sm:$0xff]   ;;  %v2857_v26 = vld [vmem:[%s3663_s1 + $0x2d8] sm:$0xff]   ;;  %v2859_v28 = vld [vmem:[%s3663_s1 + $0x260] sm:$0xff]  }
  0x1d   :  { %2511 = vmatpush3.bf16.msra.mxu1 %v2798_v27  ;;  %v2858_v27 = vld [vmem:[%s3663_s1 + $0x298] sm:$0xff]   ;;  %v2862_v31 = vld [vmem:[%s3663_s1 + $0x2a0] sm:$0xff]   ;;  %v2864_v33 = vld [vmem:[%s3663_s1 + $0x228] sm:$0xff]  }
  0x1e   :  { %2512 = vmatprep.subr.bf16.mxu1 %v2801_v30  ;;  %v2861_v30 = vld [vmem:[%s3663_s1 + $0x2e0] sm:$0xff]   ;;  %v2867_v36 = vld [vmem:[%s3663_s1 + $0x270] sm:$0xff]  }
  0x1f   :  { %2491 = vmatpush3.bf16.msra.mxu0 %v2800_v29  ;;  %v2860_v29 = vld [vmem:[%s3663_s1 + $0x220] sm:$0xff]   ;;  %v2869_v38 = vld [vmem:[%s3663_s1 + $0x2f0] sm:$0xff]  }
  0x20   :  { %2520 = vmatprep.subr.bf16.mxu0 %v2805_v35  ;;  %v2866_v35 = vld [vmem:[%s3663_s1 + $0x2a8] sm:$0xff]   ;;  %v2898_v5 = vld [vmem:[%s3663_s1 + $0x3a0] sm:$0xff]   ;;  %v2903_v10 = vld [vmem:[%s3663_s1 + $0x370] sm:$0xff]  }
  0x21   :  { %2513 = vmatpush3.bf16.msra.mxu1 %v2804_v34  ;;  %v2865_v34 = vld [vmem:[%s3663_s1 + $0x2e8] sm:$0xff]  }
  0x22   :  { %1756 = vmatmul.mubr.bf16.vlgmr.msra.gmra.mrb[0].mxu0 %v2251_v32  ;;  %2542 = vmatprep.subr.bf16.mxu1 %v2809_v40  ;;  %v2863_v32 = vld [vmem:[%s3663_s1 + $0x268] sm:$0xff]   ;;  %v2871_v40 = vld [vmem:[%s3663_s1 + $0x278] sm:$0xff]  }
  0x23   :  { %2521 = vmatpush3.bf16.msra.mxu0 %v2808_v39  ;;  %1835 = vmatprep.mubr.bf16.mxu0 %v2256_v7  ;;  %v2870_v39 = vld [vmem:[%s3663_s1 + $0x2b0] sm:$0xff]   ;;  %v2900_v7 = vld [vmem:[%s3663_s1 + $0x328] sm:$0xff]  }
  0x24   :  { %1796 = vmatmul.mubr.bf16.vlgmr.msra.gmra.mrb[0].mxu1 %v2253_v37  ;;  %2522 = vmatprep.subr.bf16.mxu0 %v2811_v42  ;;  %v2868_v37 = vld [vmem:[%s3663_s1 + $0x230] sm:$0xff]   ;;  %v2873_v42 = vld [vmem:[%s3663_s1 + $0x2f8] sm:$0xff]  }
  0x25   :  { %2543 = vmatpush3.bf16.msra.mxu1 %v2810_v41  ;;  %1875 = vmatprep.mubr.bf16.mxu1 %v2258_v12  ;;  %v2872_v41 = vld [vmem:[%s3663_s1 + $0x238] sm:$0xff]   ;;  %v2905_v12 = vld [vmem:[%s3663_s1 + $0x3f0] sm:$0xff]  }
  0x26   :  { %2544 = vmatprep.subr.bf16.mxu1 %v2813_v44 }
  0x27   :  { %2523 = vmatpush3.bf16.msra.mxu0 %v2812_v43  ;;  %v19_v43 = vld [vmem:[%s3664_s0 + $0x20] sm:$0xff] }
  0x28   :  { %2524 = vmatprep.subr.bf16.mxu0 %v2815_v46  ;;  %v2259_v44 = vcombine.low %v19_v43, %v19_v43  ;;  %v2876_v46 = vld [vmem:[%s3663_s1 + $0x2b8] sm:$0xff]  }
  0x29   :  { %2545 = vmatpush3.bf16.msra.mxu1 %v2814_v45  ;;  %v2260_v45 = vcombine.high %v19_v43, %v19_v43  ;;  %v2934_v43 = vld [vmem:[%s3663_s1 + $0x4a0] sm:$0xff]  }
  0x2a   :  { %2546 = vmatprep.subr.bf16.mxu1 %v2817_v48  ;;  %v20_v48 = vld [vmem:[%s3664_s0 + $0x28] sm:$0xff] }
  0x2b   :  { %2525 = vmatpush3.bf16.msra.mxu0 %v2816_v47  ;;  %v2877_v47 = vld [vmem:[%s3663_s1 + $0x340] sm:$0xff]  }
  0x2c   :  { %2526 = vmatprep.subr.bf16.mxu0 %v2819_v50  ;;  %v2262_v50 = vcombine.high %v20_v48, %v20_v48 }
  0x2d   :  { %2547 = vmatpush3.bf16.msra.mxu1 %v2818_v49  ;;  %v2261_v49 = vcombine.low %v20_v48, %v20_v48  ;;  %v2939_v48 = vld [vmem:[%s3663_s1 + $0x470] sm:$0xff]  }
  0x2e   :  { %2548 = vmatprep.subr.bf16.mxu1 %v2821_v52  ;;  %v2881_v52 = vld [vmem:[%s3663_s1 + $0x3c0] sm:$0xff]  }
  0x2f   :  { %2527 = vmatpush3.bf16.msra.mxu0 %v2820_v51  ;;  %v2880_v51 = vld [vmem:[%s3663_s1 + $0x300] sm:$0xff]  }
  0x30   :  { %2528 = vmatprep.subr.bf16.mxu0 %v2823_v54  ;;  %v2883_v54 = vld [vmem:[%s3663_s1 + $0x348] sm:$0xff]  }
  0x31   :  { %2549 = vmatpush3.bf16.msra.mxu1 %v2822_v53  ;;  %v2882_v53 = vld [vmem:[%s3663_s1 + $0x380] sm:$0xff]  }
  0x32   :  { %2550 = vmatprep.subr.bf16.mxu1 %v2825_v56  ;;  %v2885_v56 = vld [vmem:[%s3663_s1 + $0x3c8] sm:$0xff]  }
  0x33   :  { %2529 = vmatpush3.bf16.msra.mxu0 %v2824_v55  ;;  %v2884_v55 = vld [vmem:[%s3663_s1 + $0x308] sm:$0xff]  }
  0x34   :  { %2530 = vmatprep.subr.bf16.mxu0 %v2827_v58  ;;  %v2887_v58 = vld [vmem:[%s3663_s1 + $0x350] sm:$0xff]  }
  0x35   :  { %2551 = vmatpush3.bf16.msra.mxu1 %v2826_v57  ;;  %v2886_v57 = vld [vmem:[%s3663_s1 + $0x388] sm:$0xff]  }
  0x36   :  { %2552 = vmatprep.subr.bf16.mxu1 %v2829_v60  ;;  %v2889_v60 = vld [vmem:[%s3663_s1 + $0x3d0] sm:$0xff]  }
  0x37   :  { %2531 = vmatpush3.bf16.msra.mxu0 %v2828_v59  ;;  %v2888_v59 = vld [vmem:[%s3663_s1 + $0x310] sm:$0xff]  }
  0x38   :  { %2532 = vmatprep.subr.bf16.mxu0 %v2831_v62  ;;  %v2891_v62 = vld [vmem:[%s3663_s1 + $0x358] sm:$0xff]  }
  0x39   :  { %2553 = vmatpush3.bf16.msra.mxu1 %v2830_v61  ;;  %v2890_v61 = vld [vmem:[%s3663_s1 + $0x390] sm:$0xff]  }
  0x3a   :  { %2554 = vmatprep.subr.bf16.mxu1 %v2833_v0  ;;  %v2893_v0 = vld [vmem:[%s3663_s1 + $0x3d8] sm:$0xff]  }
  0x3b   :  { %2533 = vmatpush3.bf16.msra.mxu0 %v2832_v63  ;;  %v2892_v63 = vld [vmem:[%s3663_s1 + $0x318] sm:$0xff]  }
  0x3c   :  { %2534 = vmatprep.subr.bf16.mxu0 %v2835_v2  ;;  %v2895_v2 = vld [vmem:[%s3663_s1 + $0x360] sm:$0xff]  }
  0x3d   :  { %2555 = vmatpush3.bf16.msra.mxu1 %v2834_v1  ;;  %v2894_v1 = vld [vmem:[%s3663_s1 + $0x398] sm:$0xff]  }
  0x3e   :  { %2556 = vmatprep.subr.bf16.mxu1 %v2837_v4  ;;  %v2897_v4 = vld [vmem:[%s3663_s1 + $0x3e0] sm:$0xff]  }
  0x3f   :  { %2535 = vmatpush3.bf16.msra.mxu0 %v2836_v3  ;;  %v2896_v3 = vld [vmem:[%s3663_s1 + $0x320] sm:$0xff]  }
  0x40   :  { %2564 = vmatprep.subr.bf16.mxu0 %v2841_v9  ;;  %v2902_v9 = vld [vmem:[%s3663_s1 + $0x3a8] sm:$0xff]  }
  0x41   :  { %2557 = vmatpush3.bf16.msra.mxu1 %v2840_v8  ;;  %v2901_v8 = vld [vmem:[%s3663_s1 + $0x3e8] sm:$0xff]  }
  0x42   :  { %1836 = vmatmul.mubr.bf16.vlgmr.msra.gmra.mrb[4].mxu0 %v2255_v6  ;;  %2586 = vmatprep.subr.bf16.mxu1 %v2845_v14  ;;  %v2899_v6 = vld [vmem:[%s3663_s1 + $0x368] sm:$0xff]   ;;  %v2907_v14 = vld [vmem:[%s3663_s1 + $0x378] sm:$0xff]  }
  0x43   :  { %2565 = vmatpush3.bf16.msra.mxu0 %v2844_v13  ;;  %1915 = vmatprep.mubr.bf16.mxu0 %v2260_v45  ;;  %v2906_v13 = vld [vmem:[%s3663_s1 + $0x3b0] sm:$0xff]   ;;  %v2936_v45 = vld [vmem:[%s3663_s1 + $0x428] sm:$0xff]  }
  0x44   :  { %1876 = vmatmul.mubr.bf16.vlgmr.msra.gmra.mrb[4].mxu1 %v2257_v11  ;;  %2566 = vmatprep.subr.bf16.mxu0 %v2847_v16  ;;  %v2904_v11 = vld [vmem:[%s3663_s1 + $0x330] sm:$0xff]   ;;  %v2909_v16 = vld [vmem:[%s3663_s1 + $0x3f8] sm:$0xff]  }
  0x45   :  { %2587 = vmatpush3.bf16.msra.mxu1 %v2846_v15  ;;  %1955 = vmatprep.mubr.bf16.mxu1 %v2262_v50  ;;  %v2908_v15 = vld [vmem:[%s3663_s1 + $0x338] sm:$0xff]   ;;  %v2941_v50 = vld [vmem:[%s3663_s1 + $0x4f0] sm:$0xff]  }
  0x46   :  { %2588 = vmatprep.subr.bf16.mxu1 %v2849_v18 }
  0x47   :  { %2567 = vmatpush3.bf16.msra.mxu0 %v2848_v17  ;;  %v21_v17 = vld [vmem:[%s3664_s0 + $0x30] sm:$0xff] }
  0x48   :  { %2568 = vmatprep.subr.bf16.mxu0 %v2851_v20  ;;  %v2263_v18 = vcombine.low %v21_v17, %v21_v17  ;;  %v2912_v20 = vld [vmem:[%s3663_s1 + $0x3b8] sm:$0xff]  }
  0x49   :  { %2589 = vmatpush3.bf16.msra.mxu1 %v2850_v19  ;;  %v2264_v19 = vcombine.high %v21_v17, %v21_v17  ;;  %v2970_v17 = vld [vmem:[%s3663_s1 + $0x5a0] sm:$0xff]  }
  0x4a   :  { %2590 = vmatprep.subr.bf16.mxu1 %v2853_v22  ;;  %v22_v22 = vld [vmem:[%s3664_s0 + $0x38] sm:$0xff] }
  0x4b   :  { %2569 = vmatpush3.bf16.msra.mxu0 %v2852_v21  ;;  %v2913_v21 = vld [vmem:[%s3663_s1 + $0x440] sm:$0xff]  }
  0x4c   :  { %2570 = vmatprep.subr.bf16.mxu0 %v2855_v24  ;;  %v2266_v24 = vcombine.high %v22_v22, %v22_v22 }
  0x4d   :  { %2591 = vmatpush3.bf16.msra.mxu1 %v2854_v23  ;;  %v2265_v23 = vcombine.low %v22_v22, %v22_v22  ;;  %v2975_v22 = vld [vmem:[%s3663_s1 + $0x570] sm:$0xff]  }
  0x4e   :  { %2592 = vmatprep.subr.bf16.mxu1 %v2857_v26  ;;  %v2917_v26 = vld [vmem:[%s3663_s1 + $0x4c0] sm:$0xff]  }
  0x4f   :  { %2571 = vmatpush3.bf16.msra.mxu0 %v2856_v25  ;;  %v2916_v25 = vld [vmem:[%s3663_s1 + $0x400] sm:$0xff]  }
  0x50   :  { %2572 = vmatprep.subr.bf16.mxu0 %v2859_v28  ;;  %v2919_v28 = vld [vmem:[%s3663_s1 + $0x448] sm:$0xff]  }
  0x51   :  { %2593 = vmatpush3.bf16.msra.mxu1 %v2858_v27  ;;  %v2918_v27 = vld [vmem:[%s3663_s1 + $0x480] sm:$0xff]  }
  0x52   :  { %2594 = vmatprep.subr.bf16.mxu1 %v2861_v30  ;;  %v2921_v30 = vld [vmem:[%s3663_s1 + $0x4c8] sm:$0xff]  }
  0x53   :  { %2573 = vmatpush3.bf16.msra.mxu0 %v2860_v29  ;;  %v2920_v29 = vld [vmem:[%s3663_s1 + $0x408] sm:$0xff]  }
  0x54   :  { %2574 = vmatprep.subr.bf16.mxu0 %v2863_v32  ;;  %v2923_v32 = vld [vmem:[%s3663_s1 + $0x450] sm:$0xff]  }
  0x55   :  { %2595 = vmatpush3.bf16.msra.mxu1 %v2862_v31  ;;  %v2922_v31 = vld [vmem:[%s3663_s1 + $0x488] sm:$0xff]  }
  0x56   :  { %2596 = vmatprep.subr.bf16.mxu1 %v2865_v34  ;;  %v2925_v34 = vld [vmem:[%s3663_s1 + $0x4d0] sm:$0xff]  }
  0x57   :  { %2575 = vmatpush3.bf16.msra.mxu0 %v2864_v33  ;;  %v2924_v33 = vld [vmem:[%s3663_s1 + $0x410] sm:$0xff]  }
  0x58   :  { %2576 = vmatprep.subr.bf16.mxu0 %v2867_v36  ;;  %v2927_v36 = vld [vmem:[%s3663_s1 + $0x458] sm:$0xff]  }
  0x59   :  { %2597 = vmatpush3.bf16.msra.mxu1 %v2866_v35  ;;  %v2926_v35 = vld [vmem:[%s3663_s1 + $0x490] sm:$0xff]  }
  0x5a   :  { %2598 = vmatprep.subr.bf16.mxu1 %v2869_v38  ;;  %v2929_v38 = vld [vmem:[%s3663_s1 + $0x4d8] sm:$0xff]  }
  0x5b   :  { %2577 = vmatpush3.bf16.msra.mxu0 %v2868_v37  ;;  %v2928_v37 = vld [vmem:[%s3663_s1 + $0x418] sm:$0xff]  }
  0x5c   :  { %2578 = vmatprep.subr.bf16.mxu0 %v2871_v40  ;;  %v2931_v40 = vld [vmem:[%s3663_s1 + $0x460] sm:$0xff]  }
  0x5d   :  { %2599 = vmatpush3.bf16.msra.mxu1 %v2870_v39  ;;  %v2930_v39 = vld [vmem:[%s3663_s1 + $0x498] sm:$0xff]  }
  0x5e   :  { %2600 = vmatprep.subr.bf16.mxu1 %v2873_v42  ;;  %v2933_v42 = vld [vmem:[%s3663_s1 + $0x4e0] sm:$0xff]  }
  0x5f   :  { %2579 = vmatpush3.bf16.msra.mxu0 %v2872_v41  ;;  %v2932_v41 = vld [vmem:[%s3663_s1 + $0x420] sm:$0xff]  }
  0x60   :  { %2608 = vmatprep.subr.bf16.mxu0 %v2877_v47  ;;  %v2938_v47 = vld [vmem:[%s3663_s1 + $0x4a8] sm:$0xff]  }
  0x61   :  { %2601 = vmatpush3.bf16.msra.mxu1 %v2876_v46  ;;  %v2937_v46 = vld [vmem:[%s3663_s1 + $0x4e8] sm:$0xff]  }
  0x62   :  { %1916 = vmatmul.mubr.bf16.vlgmr.msra.gmra.mrb[8].mxu0 %v2259_v44  ;;  %2630 = vmatprep.subr.bf16.mxu1 %v2881_v52  ;;  %v2935_v44 = vld [vmem:[%s3663_s1 + $0x468] sm:$0xff]   ;;  %v2943_v52 = vld [vmem:[%s3663_s1 + $0x478] sm:$0xff]  }
  0x63   :  { %2609 = vmatpush3.bf16.msra.mxu0 %v2880_v51  ;;  %1995 = vmatprep.mubr.bf16.mxu0 %v2264_v19  ;;  %v2942_v51 = vld [vmem:[%s3663_s1 + $0x4b0] sm:$0xff]   ;;  %v2972_v19 = vld [vmem:[%s3663_s1 + $0x528] sm:$0xff]  }
  0x64   :  { %1956 = vmatmul.mubr.bf16.vlgmr.msra.gmra.mrb[8].mxu1 %v2261_v49  ;;  %2610 = vmatprep.subr.bf16.mxu0 %v2883_v54  ;;  %v2940_v49 = vld [vmem:[%s3663_s1 + $0x430] sm:$0xff]   ;;  %v2945_v54 = vld [vmem:[%s3663_s1 + $0x4f8] sm:$0xff]  }
  0x65   :  { %2631 = vmatpush3.bf16.msra.mxu1 %v2882_v53  ;;  %2035 = vmatprep.mubr.bf16.mxu1 %v2266_v24  ;;  %v2944_v53 = vld [vmem:[%s3663_s1 + $0x438] sm:$0xff]   ;;  %v2977_v24 = vld [vmem:[%s3663_s1 + $0x5f0] sm:$0xff]  }
  0x66   :  { %2632 = vmatprep.subr.bf16.mxu1 %v2885_v56 }
  0x67   :  { %2611 = vmatpush3.bf16.msra.mxu0 %v2884_v55  ;;  %v23_v55 = vld [vmem:[%s3664_s0 + $0x40] sm:$0xff] }
  0x68   :  { %2612 = vmatprep.subr.bf16.mxu0 %v2887_v58  ;;  %v2267_v56 = vcombine.low %v23_v55, %v23_v55  ;;  %v2948_v58 = vld [vmem:[%s3663_s1 + $0x4b8] sm:$0xff]  }
  0x69   :  { %2633 = vmatpush3.bf16.msra.mxu1 %v2886_v57  ;;  %v2268_v57 = vcombine.high %v23_v55, %v23_v55 }
  0x6a   :  { %2634 = vmatprep.subr.bf16.mxu1 %v2889_v60  ;;  %v24_v60 = vld [vmem:[%s3664_s0 + $0x48] sm:$0xff] }
  0x6b   :  { %2613 = vmatpush3.bf16.msra.mxu0 %v2888_v59  ;;  %v2949_v59 = vld [vmem:[%s3663_s1 + $0x540] sm:$0xff]  }
  0x6c   :  { %2614 = vmatprep.subr.bf16.mxu0 %v2891_v62  ;;  %v2270_v62 = vcombine.high %v24_v60, %v24_v60 }
  0x6d   :  { %2635 = vmatpush3.bf16.msra.mxu1 %v2890_v61  ;;  %v2269_v61 = vcombine.low %v24_v60, %v24_v60 }
  0x6e   :  { %2636 = vmatprep.subr.bf16.mxu1 %v2893_v0  ;;  %v2953_v0 = vld [vmem:[%s3663_s1 + $0x5c0] sm:$0xff]  }
  0x6f   :  { %2615 = vmatpush3.bf16.msra.mxu0 %v2892_v63  ;;  %v2952_v63 = vld [vmem:[%s3663_s1 + $0x500] sm:$0xff]  }
  0x70   :  { %2616 = vmatprep.subr.bf16.mxu0 %v2895_v2  ;;  %v2955_v2 = vld [vmem:[%s3663_s1 + $0x548] sm:$0xff]  }
  0x71   :  { %2637 = vmatpush3.bf16.msra.mxu1 %v2894_v1  ;;  %v2954_v1 = vld [vmem:[%s3663_s1 + $0x580] sm:$0xff]  }
  0x72   :  { %2638 = vmatprep.subr.bf16.mxu1 %v2897_v4  ;;  %v2957_v4 = vld [vmem:[%s3663_s1 + $0x5c8] sm:$0xff]  }
  0x73   :  { %2617 = vmatpush3.bf16.msra.mxu0 %v2896_v3  ;;  %v2956_v3 = vld [vmem:[%s3663_s1 + $0x508] sm:$0xff]  }
  0x74   :  { %2618 = vmatprep.subr.bf16.mxu0 %v2899_v6  ;;  %v2959_v6 = vld [vmem:[%s3663_s1 + $0x550] sm:$0xff]  }
  0x75   :  { %2639 = vmatpush3.bf16.msra.mxu1 %v2898_v5  ;;  %v2958_v5 = vld [vmem:[%s3663_s1 + $0x588] sm:$0xff]  }
  0x76   :  { %2640 = vmatprep.subr.bf16.mxu1 %v2901_v8  ;;  %v2961_v8 = vld [vmem:[%s3663_s1 + $0x5d0] sm:$0xff]  }
  0x77   :  { %2619 = vmatpush3.bf16.msra.mxu0 %v2900_v7  ;;  %v2960_v7 = vld [vmem:[%s3663_s1 + $0x510] sm:$0xff]  }
  0x78   :  { %2620 = vmatprep.subr.bf16.mxu0 %v2903_v10  ;;  %v2963_v10 = vld [vmem:[%s3663_s1 + $0x558] sm:$0xff]  }
  0x79   :  { %2641 = vmatpush3.bf16.msra.mxu1 %v2902_v9  ;;  %v2962_v9 = vld [vmem:[%s3663_s1 + $0x590] sm:$0xff]  }
  0x7a   :  { %2642 = vmatprep.subr.bf16.mxu1 %v2905_v12  ;;  %v2965_v12 = vld [vmem:[%s3663_s1 + $0x5d8] sm:$0xff]  }
  0x7b   :  { %2621 = vmatpush3.bf16.msra.mxu0 %v2904_v11  ;;  %v2964_v11 = vld [vmem:[%s3663_s1 + $0x518] sm:$0xff]  }
  0x7c   :  { %2622 = vmatprep.subr.bf16.mxu0 %v2907_v14  ;;  %v2967_v14 = vld [vmem:[%s3663_s1 + $0x560] sm:$0xff]  }
  0x7d   :  { %2643 = vmatpush3.bf16.msra.mxu1 %v2906_v13  ;;  %v2966_v13 = vld [vmem:[%s3663_s1 + $0x598] sm:$0xff]  }
  0x7e   :  { %2644 = vmatprep.subr.bf16.mxu1 %v2909_v16  ;;  %v2969_v16 = vld [vmem:[%s3663_s1 + $0x5e0] sm:$0xff]  }
  0x7f   :  { %2623 = vmatpush3.bf16.msra.mxu0 %v2908_v15  ;;  %v2968_v15 = vld [vmem:[%s3663_s1 + $0x520] sm:$0xff]  }
  0x80   :  { %2652 = vmatprep.subr.bf16.mxu0 %v2913_v21  ;;  %v2974_v21 = vld [vmem:[%s3663_s1 + $0x5a8] sm:$0xff]  }
  0x81   :  { %2645 = vmatpush3.bf16.msra.mxu1 %v2912_v20  ;;  %v2973_v20 = vld [vmem:[%s3663_s1 + $0x5e8] sm:$0xff]  }
  0x82   :  { %1996 = vmatmul.mubr.bf16.vlgmr.msra.gmra.mrb[12].mxu0 %v2263_v18  ;;  %2674 = vmatprep.subr.bf16.mxu1 %v2917_v26  ;;  %v2971_v18 = vld [vmem:[%s3663_s1 + $0x568] sm:$0xff]   ;;  %v2979_v26 = vld [vmem:[%s3663_s1 + $0x578] sm:$0xff]  }
  0x83   :  { %2653 = vmatpush3.bf16.msra.mxu0 %v2916_v25  ;;  %2075 = vmatprep.mubr.bf16.mxu0 %v2268_v57  ;;  %v2978_v25 = vld [vmem:[%s3663_s1 + $0x5b0] sm:$0xff]  }
  0x84   :  { %2036 = vmatmul.mubr.bf16.vlgmr.msra.gmra.mrb[12].mxu1 %v2265_v23  ;;  %2654 = vmatprep.subr.bf16.mxu0 %v2919_v28  ;;  %v2976_v23 = vld [vmem:[%s3663_s1 + $0x530] sm:$0xff]   ;;  %v2981_v28 = vld [vmem:[%s3663_s1 + $0x5f8] sm:$0xff]  }
  0x85   :  { %2675 = vmatpush3.bf16.msra.mxu1 %v2918_v27  ;;  %2115 = vmatprep.mubr.bf16.mxu1 %v2270_v62  ;;  %v2980_v27 = vld [vmem:[%s3663_s1 + $0x538] sm:$0xff]  }
  0x86   :  { %2676 = vmatprep.subr.bf16.mxu1 %v2921_v30 }
  0x87   :  { %2655 = vmatpush3.bf16.msra.mxu0 %v2920_v29  ;;  %v25_v29 = vld [vmem:[%s3664_s0 + $0x50] sm:$0xff] }
  0x88   :  { %2656 = vmatprep.subr.bf16.mxu0 %v2923_v32  ;;  %v2271_v30 = vcombine.low %v25_v29, %v25_v29  ;;  %v2984_v32 = vld [vmem:[%s3663_s1 + $0x5b8] sm:$0xff]  }
  0x89   :  { %2677 = vmatpush3.bf16.msra.mxu1 %v2922_v31  ;;  %v2272_v31 = vcombine.high %v25_v29, %v25_v29 }
  0x8a   :  { %2678 = vmatprep.subr.bf16.mxu1 %v2925_v34  ;;  %v2996_v34 = vmov 0.0  }
  0x8b   :  { %2657 = vmatpush3.bf16.msra.mxu0 %v2924_v33  ;;  %v26_v33 = vld [vmem:[%s3664_s0 + $0x58] sm:$0xff] }
  0x8c   :  { %2658 = vmatprep.subr.bf16.mxu0 %v2927_v36  ;;  %v2274_v36 = vcombine.high %v26_v33, %v26_v33 }
  0x8d   :  { %2679 = vmatpush3.bf16.msra.mxu1 %v2926_v35  ;;  %v2273_v35 = vcombine.low %v26_v33, %v26_v33 }
  0x8e   :  { %2680 = vmatprep.subr.bf16.mxu1 %v2929_v38  ;;  %v2988_v38 = vld [vmem:[%s3663_s1 + $0x608] sm:$0xff]  }
  0x8f   :  { %2659 = vmatpush3.bf16.msra.mxu0 %v2928_v37  ;;  %v2987_v37 = vld [vmem:[%s3663_s1 + $0x600] sm:$0xff]  }
  0x90   :  { %2660 = vmatprep.subr.bf16.mxu0 %v2931_v40  ;;  %v2990_v40 = vld [vmem:[%s3663_s1 + $0x618] sm:$0xff]  }
  0x91   :  { %2681 = vmatpush3.bf16.msra.mxu1 %v2930_v39  ;;  %v2989_v39 = vld [vmem:[%s3663_s1 + $0x610] sm:$0xff]  }
  0x92   :  { %2682 = vmatprep.subr.bf16.mxu1 %v2933_v42  ;;  %v2992_v42 = vld [vmem:[%s3663_s1 + $0x628] sm:$0xff]  }
  0x93   :  { %2661 = vmatpush3.bf16.msra.mxu0 %v2932_v41  ;;  %v2991_v41 = vld [vmem:[%s3663_s1 + $0x620] sm:$0xff]  }
  0x94   :  { %2662 = vmatprep.subr.bf16.mxu0 %v2935_v44  ;;  %v2994_v44 = vld [vmem:[%s3663_s1 + $0x638] sm:$0xff]  }
  0x95   :  { %2683 = vmatpush3.bf16.msra.mxu1 %v2934_v43  ;;  %v2993_v43 = vld [vmem:[%s3663_s1 + $0x630] sm:$0xff]  }
  0x96   :  { %2684 = vmatprep.subr.bf16.mxu1 %v2937_v46 }
  0x97   :  { %2663 = vmatpush3.bf16.msra.mxu0 %v2936_v45  ;;  %v2995_v45 = vld [vmem:[%s3664_s0 + $0x60] ss:$0 sps:$4 sm:$0xff]  }
  0x98   :  { %2664 = vmatprep.subr.bf16.mxu0 %v2939_v48 }
  0x99   :  { %2685 = vmatpush3.bf16.msra.mxu1 %v2938_v47  ;;  %v2250_v47 = vld [vmem:[%s3665_s2] ss:$0 sm:$0xff] }
  0x9a   :  { %2686 = vmatprep.subr.bf16.mxu1 %v2941_v50 }
  0x9b   :  { %2665 = vmatpush3.bf16.msra.mxu0 %v2940_v49 }
  0x9c   :  { %2666 = vmatprep.subr.bf16.mxu0 %v2943_v52 }
  0x9d   :  { %2687 = vmatpush3.bf16.msra.mxu1 %v2942_v51 }
  0x9e   :  { %2688 = vmatprep.subr.bf16.mxu1 %v2945_v54 }
  0x9f   :  { %2667 = vmatpush3.bf16.msra.mxu0 %v2944_v53 }
  0xa0   :  { %2696 = vmatprep.subr.bf16.mxu0 %v2949_v59 }
  0xa1   :  { %2689 = vmatpush3.bf16.msra.mxu1 %v2948_v58 }
  0xa2   :  { %2076 = vmatmul.mubr.bf16.vlgmr.msra.gmra.mrb[16].mxu0 %v2267_v56  ;;  %2718 = vmatprep.subr.bf16.mxu1 %v2953_v0 }
  0xa3   :  { %2697 = vmatpush3.bf16.msra.mxu0 %v2952_v63  ;;  %2155 = vmatprep.mubr.bf16.mxu0 %v2272_v31 }
  0xa4   :  { %2116 = vmatmul.mubr.bf16.vlgmr.msra.gmra.mrb[16].mxu1 %v2269_v61  ;;  %2698 = vmatprep.subr.bf16.mxu0 %v2955_v2 }
  0xa5   :  { %2719 = vmatpush3.bf16.msra.mxu1 %v2954_v1  ;;  %2195 = vmatprep.mubr.bf16.mxu1 %v2274_v36 }
  0xa6   :  { %2720 = vmatprep.subr.bf16.mxu1 %v2957_v4 }
  0xa7   :  { %2699 = vmatpush3.bf16.msra.mxu0 %v2956_v3 }
  0xa8   :  { %2700 = vmatprep.subr.bf16.mxu0 %v2959_v6 }
  0xa9   :  { %2721 = vmatpush3.bf16.msra.mxu1 %v2958_v5 }
  0xaa   :  { %2722 = vmatprep.subr.bf16.mxu1 %v2961_v8 }
  0xab   :  { %2701 = vmatpush3.bf16.msra.mxu0 %v2960_v7 }
  0xac   :  { %2702 = vmatprep.subr.bf16.mxu0 %v2963_v10 }
  0xad   :  { %2723 = vmatpush3.bf16.msra.mxu1 %v2962_v9 }
  0xae   :  { %2724 = vmatprep.subr.bf16.mxu1 %v2965_v12 }
  0xaf   :  { %2703 = vmatpush3.bf16.msra.mxu0 %v2964_v11 }
  0xb0   :  { %2704 = vmatprep.subr.bf16.mxu0 %v2967_v14 }
  0xb1   :  { %2725 = vmatpush3.bf16.msra.mxu1 %v2966_v13 }
  0xb2   :  { %2726 = vmatprep.subr.bf16.mxu1 %v2969_v16 }
  0xb3   :  { %2705 = vmatpush3.bf16.msra.mxu0 %v2968_v15 }
  0xb4   :  { %2706 = vmatprep.subr.bf16.mxu0 %v2971_v18 }
  0xb5   :  { %2727 = vmatpush3.bf16.msra.mxu1 %v2970_v17 }
  0xb6   :  { %2728 = vmatprep.subr.bf16.mxu1 %v2973_v20 }
  0xb7   :  { %2707 = vmatpush3.bf16.msra.mxu0 %v2972_v19 }
  0xb8   :  { %2708 = vmatprep.subr.bf16.mxu0 %v2975_v22 }
  0xb9   :  { %2729 = vmatpush3.bf16.msra.mxu1 %v2974_v21 }
  0xba   :  { %2730 = vmatprep.subr.bf16.mxu1 %v2977_v24 }
  0xbb   :  { %2709 = vmatpush3.bf16.msra.mxu0 %v2976_v23 }
  0xbc   :  { %2710 = vmatprep.subr.bf16.mxu0 %v2979_v26 }
  0xbd   :  { %2731 = vmatpush3.bf16.msra.mxu1 %v2978_v25 }
  0xbe   :  { %2732 = vmatprep.subr.bf16.mxu1 %v2981_v28 }
  0xbf   :  { %2711 = vmatpush3.bf16.msra.mxu0 %v2980_v27 }
  0xc0   :  { %2749 = vmatprep.subr.bf16.mxu0 %v2996_v34 }
  0xc1   :  { %2733 = vmatpush3.bf16.msra.mxu1 %v2984_v32 }
  0xc2   :  { %2156 = vmatmul.mubr.bf16.vlgmr.msra.gmra.mrb[20].mxu0 %v2271_v30 }
  0xc3   :  { %2750 = vmatpush3.bf16.msra.mxu0 %v2987_v37  ;;  %2765 = vmatprep.mubr.msk.bf16.mxu0 %vm2997_vm0, %v2996_v34 }
  0xc4   :  { %2196 = vmatmul.mubr.bf16.vlgmr.msra.gmra.mrb[20].mxu1 %v2273_v35  ;;  %2751 = vmatprep.subr.bf16.mxu0 %v2996_v34 }
  0xc7   :  { %2752 = vmatpush3.bf16.msra.mxu0 %v2988_v38 }
  0xc8   :  { %2753 = vmatprep.subr.bf16.mxu0 %v2996_v34 }
  0xcb   :  { %2754 = vmatpush3.bf16.msra.mxu0 %v2989_v39 }
  0xcc   :  { %2755 = vmatprep.subr.bf16.mxu0 %v2996_v34 }
  0xcf   :  { %2756 = vmatpush3.bf16.msra.mxu0 %v2990_v40 }
  0xd0   :  { %2757 = vmatprep.subr.bf16.mxu0 %v2996_v34 }
  0xd3   :  { %2758 = vmatpush3.bf16.msra.mxu0 %v2991_v41 }
  0xd4   :  { %2759 = vmatprep.subr.bf16.mxu0 %v2996_v34 }
  0xd7   :  { %2760 = vmatpush3.bf16.msra.mxu0 %v2992_v42 }
  0xd8   :  { %2761 = vmatprep.subr.bf16.mxu0 %v2996_v34 }
  0xdb   :  { %2762 = vmatpush3.bf16.msra.mxu0 %v2993_v43 }
  0xdc   :  { %2763 = vmatprep.subr.bf16.mxu0 %v2996_v34 }
  0xdf   :  { %2764 = vmatpush3.bf16.msra.mxu0 %v2994_v44 }
  0xe2   :  { %2766 = vmatmul.mubr.bf16.vlgmr.msra.gmra.mrb[24].mxu0 %v2995_v45 }
  0xf5   :  { %v2492_v46 = vpop.f32.mrb[0].mxu0 }
  0xf6   :  { %v2493_v48 = vpop.f32.mrb[1].mxu0 }
  0xf7   :  { %v2494_v49 = vadd.f32 %v2493_v48, %v2492_v46  ;;  %v2495_v50 = vpop.f32.mrb[2].mxu0  ;;  %v2514_v51 = vpop.f32.mrb[0].mxu1 }
  0xf8   :  { %v2496_v52 = vpop.f32.mrb[3].mxu0  ;;  %v2515_v53 = vpop.f32.mrb[1].mxu1 }
  0xf9   :  { %v1758_v54 = vadd.f32 %v2494_v49, %v2250_v47  ;;  %v2516_v55 = vadd.f32 %v2515_v53, %v2514_v51  ;;  %v2517_v56 = vpop.f32.mrb[2].mxu1 }
  0xfa   :  { %v2518_v57 = vpop.f32.mrb[3].mxu1 }
  0xfb   :  { %v1798_v58 = vadd.f32 %v2516_v55, %v1758_v54 }
 0x115   :  { %v2536_v59 = vpop.f32.mrb[4].mxu0 }
 0x116   :  { %v2537_v60 = vpop.f32.mrb[5].mxu0 }
 0x117   :  { %v2538_v61 = vadd.f32 %v2537_v60, %v2536_v59  ;;  %v2539_v62 = vpop.f32.mrb[6].mxu0  ;;  %v2558_v63 = vpop.f32.mrb[4].mxu1 }
 0x118   :  { %v2540_v0 = vpop.f32.mrb[7].mxu0  ;;  %v2559_v2 = vpop.f32.mrb[5].mxu1 }
 0x119   :  { %v1838_v1 = vadd.f32 %v2538_v61, %v1798_v58  ;;  %v2560_v3 = vadd.f32 %v2559_v2, %v2558_v63  ;;  %v2561_v4 = vpop.f32.mrb[6].mxu1 }
 0x11a   :  { %v2562_v5 = vpop.f32.mrb[7].mxu1 }
 0x11b   :  { %v1878_v6 = vadd.f32 %v2560_v3, %v1838_v1 }
 0x135   :  { %v2580_v7 = vpop.f32.mrb[8].mxu0 }
 0x136   :  { %v2581_v8 = vpop.f32.mrb[9].mxu0 }
 0x137   :  { %v2582_v9 = vadd.f32 %v2581_v8, %v2580_v7  ;;  %v2583_v10 = vpop.f32.mrb[10].mxu0  ;;  %v2602_v11 = vpop.f32.mrb[8].mxu1 }
 0x138   :  { %v2584_v12 = vpop.f32.mrb[11].mxu0  ;;  %v2603_v13 = vpop.f32.mrb[9].mxu1 }
 0x139   :  { %v1918_v14 = vadd.f32 %v2582_v9, %v1878_v6  ;;  %v2604_v15 = vadd.f32 %v2603_v13, %v2602_v11  ;;  %v2605_v16 = vpop.f32.mrb[10].mxu1 }
 0x13a   :  { %v2606_v17 = vpop.f32.mrb[11].mxu1 }
 0x13b   :  { %v1958_v18 = vadd.f32 %v2604_v15, %v1918_v14 }
 0x155   :  { %v2624_v19 = vpop.f32.mrb[12].mxu0 }
 0x156   :  { %v2625_v20 = vpop.f32.mrb[13].mxu0 }
 0x157   :  { %v2626_v21 = vadd.f32 %v2625_v20, %v2624_v19  ;;  %v2627_v22 = vpop.f32.mrb[14].mxu0  ;;  %v2646_v23 = vpop.f32.mrb[12].mxu1 }
 0x158   :  { %v2628_v24 = vpop.f32.mrb[15].mxu0  ;;  %v2647_v25 = vpop.f32.mrb[13].mxu1 }
 0x159   :  { %v1998_v26 = vadd.f32 %v2626_v21, %v1958_v18  ;;  %v2648_v27 = vadd.f32 %v2647_v25, %v2646_v23  ;;  %v2649_v28 = vpop.f32.mrb[14].mxu1 }
 0x15a   :  { %v2650_v29 = vpop.f32.mrb[15].mxu1 }
 0x15b   :  { %v2038_v30 = vadd.f32 %v2648_v27, %v1998_v26 }
 0x175   :  { %v2668_v31 = vpop.f32.mrb[16].mxu0 }
 0x176   :  { %v2669_v32 = vpop.f32.mrb[17].mxu0 }
 0x177   :  { %v2670_v33 = vadd.f32 %v2669_v32, %v2668_v31  ;;  %v2671_v34 = vpop.f32.mrb[18].mxu0  ;;  %v2690_v35 = vpop.f32.mrb[16].mxu1 }
 0x178   :  { %v2672_v36 = vpop.f32.mrb[19].mxu0  ;;  %v2691_v38 = vpop.f32.mrb[17].mxu1 }
 0x179   :  { %v2078_v37 = vadd.f32 %v2670_v33, %v2038_v30  ;;  %v2692_v39 = vadd.f32 %v2691_v38, %v2690_v35  ;;  %v2693_v40 = vpop.f32.mrb[18].mxu1 }
 0x17a   :  { %v2694_v41 = vpop.f32.mrb[19].mxu1 }
 0x17b   :  { %v2118_v42 = vadd.f32 %v2692_v39, %v2078_v37 }
 0x195   :  { %v2712_v43 = vpop.f32.mrb[20].mxu0 }
 0x196   :  { %v2713_v44 = vpop.f32.mrb[21].mxu0 }
 0x197   :  { %v2714_v45 = vadd.f32 %v2713_v44, %v2712_v43  ;;  %v2715_v46 = vpop.f32.mrb[22].mxu0  ;;  %v2734_v47 = vpop.f32.mrb[20].mxu1 }
 0x198   :  { %v2716_v48 = vpop.f32.mrb[23].mxu0  ;;  %v2735_v49 = vpop.f32.mrb[21].mxu1 }
 0x199   :  { %v2158_v50 = vadd.f32 %v2714_v45, %v2118_v42  ;;  %v2736_v51 = vadd.f32 %v2735_v49, %v2734_v47  ;;  %v2737_v52 = vpop.f32.mrb[22].mxu1 }
 0x19a   :  { %v2738_v53 = vpop.f32.mrb[23].mxu1 }
 0x19b   :  { %v2198_v54 = vadd.f32 %v2736_v51, %v2158_v50 }
 0x1b5   :  { %v2237_v55 = vpop.f32.mrb[24].mxu0 }
 0x1b6   :  { %v2238_v56 = vadd.f32 %v2237_v55, %v2198_v54  ;;  %v2767_v57 = vpop.f32.mrb[25].mxu0 }
 0x1b7   :  { %v2240_v58 = vpop.f32.mrb[26].mxu0 }
 0x1b8   :  { %v2243_v59 = vmax.f32 %v2238_v56, 0.0  ;;  %v2768_v60 = vpop.f32.mrb[27].mxu0 }
 0x1ba   :  { %v2244_v61 = vpack.c.bf16 %v2243_v59, %v2243_v59 }
 0x1bc   :  { %2245 = vst [vmem:[%s3666_s3] sm:$0xf] %v2244_v61 }

// kernel: forward.18
= control target key start
LH: loop header
LB: loop body
LE: loop exit
PB: predicated region body
PF: predicated region fallthrough
CT: control target
= control target key end

     0   :  { %s727_s1 = inlined_call_operand.vmem [shape: bf16[512,128], index: 1, kind: input, shape index: {}]   ;;  %s728_s0 = inlined_call_operand.vmem [shape: bf16[24,512], index: 0, kind: input, shape index: {}]   ;;  %s729_s2 = inlined_call_operand.vmem [shape: f32[1,128], index: 2, kind: input, shape index: {}]   ;;  %s730_s3 = inlined_call_operand.vmem [shape: bf16[24,128], index: 3, kind: output, shape index: {}]  }
   0x1   :  { %v542_v0 = vld [vmem:[%s727_s1 + $0x40] sm:$0xff]   ;;  %v546_v4 = vld [vmem:[%s727_s1 + $0x48] sm:$0xff]   ;;  %v550_v8 = vld [vmem:[%s727_s1 + $0x50] sm:$0xff]  }
   0x2   :  { %v543_v1 = vld [vmem:[%s727_s1 + $0xc0] sm:$0xff]   ;;  %486 = vmatprep.subr.bf16.mxu0 %v542_v0  ;;  %v547_v5 = vld [vmem:[%s727_s1 + $0xc8] sm:$0xff]   ;;  %v551_v9 = vld [vmem:[%s727_s1 + $0xd0] sm:$0xff]  }
   0x3   :  { %v544_v2 = vld [vmem:[%s727_s1] sm:$0xff]   ;;  %514 = vmatprep.subr.bf16.mxu1 %v543_v1  ;;  %v548_v6 = vld [vmem:[%s727_s1 + $0x8] sm:$0xff]   ;;  %v552_v10 = vld [vmem:[%s727_s1 + $0x10] sm:$0xff]  }
   0x4   :  { %v545_v3 = vld [vmem:[%s727_s1 + $0x80] sm:$0xff]   ;;  %487 = vmatpush3.bf16.msra.mxu0 %v544_v2  ;;  %v549_v7 = vld [vmem:[%s727_s1 + $0x88] sm:$0xff]   ;;  %v553_v11 = vld [vmem:[%s727_s1 + $0x90] sm:$0xff]  }
   0x5   :  { %515 = vmatpush3.bf16.msra.mxu1 %v545_v3  ;;  %488 = vmatprep.subr.bf16.mxu0 %v546_v4  ;;  %v554_v12 = vld [vmem:[%s727_s1 + $0x58] sm:$0xff]   ;;  %v558_v16 = vld [vmem:[%s727_s1 + $0x60] sm:$0xff]   ;;  %v562_v20 = vld [vmem:[%s727_s1 + $0x68] sm:$0xff]  }
   0x6   :  { %516 = vmatprep.subr.bf16.mxu1 %v547_v5  ;;  %v555_v13 = vld [vmem:[%s727_s1 + $0xd8] sm:$0xff]   ;;  %v559_v17 = vld [vmem:[%s727_s1 + $0xe0] sm:$0xff]   ;;  %v563_v21 = vld [vmem:[%s727_s1 + $0xe8] sm:$0xff]  }
   0x7   :  { %v556_v14 = vld [vmem:[%s727_s1 + $0x18] sm:$0xff]   ;;  %v560_v18 = vld [vmem:[%s727_s1 + $0x20] sm:$0xff]   ;;  %v564_v22 = vld [vmem:[%s727_s1 + $0x28] sm:$0xff]  }
   0x8   :  { %489 = vmatpush3.bf16.msra.mxu0 %v548_v6  ;;  %v557_v15 = vld [vmem:[%s727_s1 + $0x98] sm:$0xff]   ;;  %v561_v19 = vld [vmem:[%s727_s1 + $0xa0] sm:$0xff]   ;;  %v565_v23 = vld [vmem:[%s727_s1 + $0xa8] sm:$0xff]  }
   0x9   :  { %517 = vmatpush3.bf16.msra.mxu1 %v549_v7  ;;  %490 = vmatprep.subr.bf16.mxu0 %v550_v8  ;;  %v566_v24 = vld [vmem:[%s727_s1 + $0x70] sm:$0xff]   ;;  %v570_v28 = vld [vmem:[%s727_s1 + $0x78] sm:$0xff]   ;;  %v19_v36 = vld [vmem:[%s728_s0 + $0x20] sm:$0xff] }
   0xa   :  { %518 = vmatprep.subr.bf16.mxu1 %v551_v9  ;;  %v567_v25 = vld [vmem:[%s727_s1 + $0xf0] sm:$0xff]   ;;  %v571_v29 = vld [vmem:[%s727_s1 + $0xf8] sm:$0xff]   ;;  %v440_v37 = vcombine.high %v19_v36, %v19_v36  ;;  %v20_v38 = vld [vmem:[%s728_s0 + $0x28] sm:$0xff]  ;;  %v439_v40 = vcombine.low %v19_v36, %v19_v36 }
   0xb   :  { %v568_v26 = vld [vmem:[%s727_s1 + $0x30] sm:$0xff]   ;;  %v572_v30 = vld [vmem:[%s727_s1 + $0x38] sm:$0xff]   ;;  %v442_v39 = vcombine.high %v20_v38, %v20_v38  ;;  %v441_v41 = vcombine.low %v20_v38, %v20_v38  ;;  %v434_v44 = vld [vmem:[%s729_s2] ss:$0 sm:$0xff] }
   0xc   :  { %491 = vmatpush3.bf16.msra.mxu0 %v552_v10  ;;  %v569_v27 = vld [vmem:[%s727_s1 + $0xb0] sm:$0xff]   ;;  %v573_v31 = vld [vmem:[%s727_s1 + $0xb8] sm:$0xff]  }
   0xd   :  { %519 = vmatpush3.bf16.msra.mxu1 %v553_v11  ;;  %492 = vmatprep.subr.bf16.mxu0 %v554_v12  ;;  %v574_v32 = vld [vmem:[%s728_s0] ss:$16 sps:$4 sm:$0xff]   ;;  %v576_v33 = vld [vmem:[%s728_s0 + $0x4] ss:$16 sps:$4 sm:$0xff]   ;;  %v577_v34 = vld [vmem:[%s728_s0 + $0x8] ss:$16 sps:$4 sm:$0xff]  }
   0xe   :  { %520 = vmatprep.subr.bf16.mxu1 %v555_v13  ;;  %v579_v35 = vld [vmem:[%s728_s0 + $0xc] ss:$16 sps:$4 sm:$0xff]   ;;  %350 = vmatprep.mubr.bf16.mxu0 %v576_v33 }
   0xf   :  { %398 = vmatprep.mubr.bf16.mxu1 %v579_v35 }
  0x10   :  { %493 = vmatpush3.bf16.msra.mxu0 %v556_v14 }
  0x11   :  { %521 = vmatpush3.bf16.msra.mxu1 %v557_v15  ;;  %494 = vmatprep.subr.bf16.mxu0 %v558_v16 }
  0x12   :  { %522 = vmatprep.subr.bf16.mxu1 %v559_v17 }
  0x14   :  { %495 = vmatpush3.bf16.msra.mxu0 %v560_v18 }
  0x15   :  { %523 = vmatpush3.bf16.msra.mxu1 %v561_v19  ;;  %496 = vmatprep.subr.bf16.mxu0 %v562_v20 }
  0x16   :  { %524 = vmatprep.subr.bf16.mxu1 %v563_v21 }
  0x18   :  { %497 = vmatpush3.bf16.msra.mxu0 %v564_v22 }
  0x19   :  { %525 = vmatpush3.bf16.msra.mxu1 %v565_v23  ;;  %498 = vmatprep.subr.bf16.mxu0 %v566_v24 }
  0x1a   :  { %526 = vmatprep.subr.bf16.mxu1 %v567_v25 }
  0x1c   :  { %499 = vmatpush3.bf16.msra.mxu0 %v568_v26 }
  0x1d   :  { %527 = vmatpush3.bf16.msra.mxu1 %v569_v27  ;;  %500 = vmatprep.subr.bf16.mxu0 %v570_v28 }
  0x1e   :  { %528 = vmatprep.subr.bf16.mxu1 %v571_v29 }
  0x20   :  { %501 = vmatpush3.bf16.msra.mxu0 %v572_v30 }
  0x21   :  { %529 = vmatpush3.bf16.msra.mxu1 %v573_v31 }
  0x23   :  { %351 = vmatmul.mubr.bf16.vlgmr.msra.gmra.mrb[0].mxu0 %v574_v32 }
  0x24   :  { %399 = vmatmul.mubr.bf16.vlgmr.msra.gmra.mrb[0].mxu1 %v577_v34  ;;  %358 = vmatprep.mubr.bf16.mxu0 %v440_v37 }
  0x25   :  { %406 = vmatprep.mubr.bf16.mxu1 %v442_v39 }
  0x2b   :  { %359 = vmatmul.mubr.bf16.gmra.mrb[4].mxu0 %v439_v40 }
  0x2c   :  { %407 = vmatmul.mubr.bf16.gmra.mrb[4].mxu1 %v441_v41 }
  0xf6   :  { %v502_v42 = vpop.f32.mrb[0].mxu0 }
  0xf7   :  { %v530_v43 = vpop.f32.mrb[0].mxu1  ;;  %v503_v45 = vpop.f32.mrb[1].mxu0 }
  0xf8   :  { %v504_v46 = vadd.f32 %v503_v45, %v502_v42  ;;  %v531_v47 = vpop.f32.mrb[1].mxu1  ;;  %v505_v48 = vpop.f32.mrb[2].mxu0 }
  0xf9   :  { %v532_v49 = vadd.f32 %v531_v47, %v530_v43  ;;  %v533_v50 = vpop.f32.mrb[2].mxu1  ;;  %v506_v51 = vpop.f32.mrb[3].mxu0 }
  0xfa   :  { %v353_v52 = vadd.f32 %v504_v46, %v434_v44  ;;  %v507_v53 = vadd.f32 %v506_v51, %v505_v48  ;;  %v534_v54 = vpop.f32.mrb[3].mxu1 }
  0xfb   :  { %v535_v55 = vadd.f32 %v534_v54, %v533_v50 }
  0xfc   :  { %v401_v56 = vadd.f32 %v532_v49, %v353_v52  ;;  %v356_v57 = vadd.f32 %v507_v53, %v434_v44 }
  0xfe   :  { %v404_v58 = vadd.f32 %v535_v55, %v356_v57  ;;  %v508_v59 = vpop.f32.mrb[4].mxu0 }
  0xff   :  { %v536_v60 = vpop.f32.mrb[4].mxu1  ;;  %v509_v61 = vpop.f32.mrb[5].mxu0 }
 0x100   :  { %v484_v62 = vpack.c.bf16 %v404_v58, %v401_v56  ;;  %v510_v63 = vadd.f32 %v509_v61, %v508_v59  ;;  %v537_v0 = vpop.f32.mrb[5].mxu1  ;;  %v511_v1 = vpop.f32.mrb[6].mxu0 }
 0x101   :  { %v538_v2 = vadd.f32 %v537_v0, %v536_v60  ;;  %v539_v3 = vpop.f32.mrb[6].mxu1  ;;  %v512_v4 = vpop.f32.mrb[7].mxu0 }
 0x102   :  { %v361_v5 = vadd.f32 %v510_v63, %v434_v44  ;;  %485 = vst [vmem:[%s730_s3] sm:$0xff] %v484_v62   ;;  %v540_v6 = vpop.f32.mrb[7].mxu1 }
 0x104   :  { %v409_v7 = vadd.f32 %v538_v2, %v361_v5 }
 0x106   :  { %v480_v8 = vpack.c.bf16 %v409_v7, %v409_v7 }
 0x108   :  { %429 = vst [vmem:[%s730_s3 + $0x8] sm:$0xf] %v480_v8 }

// kernel: forward.17
= control target key start
LH: loop header
LB: loop body
LE: loop exit
PB: predicated region body
PF: predicated region fallthrough
CT: control target
= control target key end

     0   :  { %s1065_s1 = inlined_call_operand.vmem [shape: bf16[768,128], index: 1, kind: input, shape index: {}]   ;;  %s1066_s0 = inlined_call_operand.vmem [shape: bf16[24,768], index: 0, kind: input, shape index: {}]   ;;  %s1067_s2 = inlined_call_operand.vmem [shape: f32[1,128], index: 2, kind: input, shape index: {}]   ;;  %s1068_s3 = inlined_call_operand.vmem [shape: bf16[24,128], index: 3, kind: output, shape index: {}]  }
   0x1   :  { %v802_v0 = vld [vmem:[%s1065_s1 + $0x40] sm:$0xff]   ;;  %v806_v4 = vld [vmem:[%s1065_s1 + $0x48] sm:$0xff]   ;;  %v810_v8 = vld [vmem:[%s1065_s1 + $0x50] sm:$0xff]  }
   0x2   :  { %v803_v1 = vld [vmem:[%s1065_s1 + $0xc0] sm:$0xff]   ;;  %702 = vmatprep.subr.bf16.mxu0 %v802_v0  ;;  %v807_v5 = vld [vmem:[%s1065_s1 + $0xc8] sm:$0xff]   ;;  %v811_v9 = vld [vmem:[%s1065_s1 + $0xd0] sm:$0xff]  }
   0x3   :  { %v804_v2 = vld [vmem:[%s1065_s1] sm:$0xff]   ;;  %730 = vmatprep.subr.bf16.mxu1 %v803_v1  ;;  %v808_v6 = vld [vmem:[%s1065_s1 + $0x8] sm:$0xff]   ;;  %v812_v10 = vld [vmem:[%s1065_s1 + $0x10] sm:$0xff]  }
   0x4   :  { %v805_v3 = vld [vmem:[%s1065_s1 + $0x80] sm:$0xff]   ;;  %703 = vmatpush3.bf16.msra.mxu0 %v804_v2  ;;  %v809_v7 = vld [vmem:[%s1065_s1 + $0x88] sm:$0xff]   ;;  %v813_v11 = vld [vmem:[%s1065_s1 + $0x90] sm:$0xff]  }
   0x5   :  { %731 = vmatpush3.bf16.msra.mxu1 %v805_v3  ;;  %704 = vmatprep.subr.bf16.mxu0 %v806_v4  ;;  %v814_v12 = vld [vmem:[%s1065_s1 + $0x58] sm:$0xff]   ;;  %v818_v16 = vld [vmem:[%s1065_s1 + $0x60] sm:$0xff]   ;;  %v822_v20 = vld [vmem:[%s1065_s1 + $0x68] sm:$0xff]  }
   0x6   :  { %732 = vmatprep.subr.bf16.mxu1 %v807_v5  ;;  %v815_v13 = vld [vmem:[%s1065_s1 + $0xd8] sm:$0xff]   ;;  %v819_v17 = vld [vmem:[%s1065_s1 + $0xe0] sm:$0xff]   ;;  %v823_v21 = vld [vmem:[%s1065_s1 + $0xe8] sm:$0xff]  }
   0x7   :  { %v816_v14 = vld [vmem:[%s1065_s1 + $0x18] sm:$0xff]   ;;  %v820_v18 = vld [vmem:[%s1065_s1 + $0x20] sm:$0xff]   ;;  %v824_v22 = vld [vmem:[%s1065_s1 + $0x28] sm:$0xff]  }
   0x8   :  { %705 = vmatpush3.bf16.msra.mxu0 %v808_v6  ;;  %v817_v15 = vld [vmem:[%s1065_s1 + $0x98] sm:$0xff]   ;;  %v821_v19 = vld [vmem:[%s1065_s1 + $0xa0] sm:$0xff]   ;;  %v825_v23 = vld [vmem:[%s1065_s1 + $0xa8] sm:$0xff]  }
   0x9   :  { %733 = vmatpush3.bf16.msra.mxu1 %v809_v7  ;;  %706 = vmatprep.subr.bf16.mxu0 %v810_v8  ;;  %v826_v24 = vld [vmem:[%s1065_s1 + $0x70] sm:$0xff]   ;;  %v830_v28 = vld [vmem:[%s1065_s1 + $0x78] sm:$0xff]   ;;  %v837_v34 = vld [vmem:[%s1066_s0 + $0x8] ss:$24 sps:$4 sm:$0xff]  }
   0xa   :  { %734 = vmatprep.subr.bf16.mxu1 %v811_v9  ;;  %v827_v25 = vld [vmem:[%s1065_s1 + $0xf0] sm:$0xff]   ;;  %v831_v29 = vld [vmem:[%s1065_s1 + $0xf8] sm:$0xff]   ;;  %v839_v35 = vld [vmem:[%s1066_s0 + $0xc] ss:$24 sps:$4 sm:$0xff]  }
   0xb   :  { %v828_v26 = vld [vmem:[%s1065_s1 + $0x30] sm:$0xff]   ;;  %v832_v30 = vld [vmem:[%s1065_s1 + $0x38] sm:$0xff]   ;;  %v840_v36 = vld [vmem:[%s1065_s1 + $0x140] sm:$0xff]   ;;  %546 = vmatprep.mubr.bf16.mxu1 %v839_v35 }
   0xc   :  { %707 = vmatpush3.bf16.msra.mxu0 %v812_v10  ;;  %v829_v27 = vld [vmem:[%s1065_s1 + $0xb0] sm:$0xff]   ;;  %v833_v31 = vld [vmem:[%s1065_s1 + $0xb8] sm:$0xff]   ;;  %v841_v37 = vld [vmem:[%s1065_s1 + $0x100] sm:$0xff]  }
   0xd   :  { %735 = vmatpush3.bf16.msra.mxu1 %v813_v11  ;;  %708 = vmatprep.subr.bf16.mxu0 %v814_v12  ;;  %v834_v32 = vld [vmem:[%s1066_s0] ss:$24 sps:$4 sm:$0xff]   ;;  %v836_v33 = vld [vmem:[%s1066_s0 + $0x4] ss:$24 sps:$4 sm:$0xff]   ;;  %v842_v38 = vld [vmem:[%s1065_s1 + $0x148] sm:$0xff]  }
   0xe   :  { %736 = vmatprep.subr.bf16.mxu1 %v815_v13  ;;  %498 = vmatprep.mubr.bf16.mxu0 %v836_v33  ;;  %v843_v39 = vld [vmem:[%s1065_s1 + $0x108] sm:$0xff]   ;;  %v844_v40 = vld [vmem:[%s1065_s1 + $0x150] sm:$0xff]   ;;  %v846_v42 = vld [vmem:[%s1065_s1 + $0x158] sm:$0xff]  }
   0xf   :  { %v845_v41 = vld [vmem:[%s1065_s1 + $0x110] sm:$0xff]   ;;  %v847_v44 = vld [vmem:[%s1065_s1 + $0x118] sm:$0xff]   ;;  %v848_v47 = vld [vmem:[%s1065_s1 + $0x160] sm:$0xff]  }
  0x10   :  { %709 = vmatpush3.bf16.msra.mxu0 %v816_v14  ;;  %v21_v43 = vld [vmem:[%s1066_s0 + $0x30] sm:$0xff]  ;;  %v22_v48 = vld [vmem:[%s1066_s0 + $0x38] sm:$0xff]  ;;  %v849_v51 = vld [vmem:[%s1065_s1 + $0x120] sm:$0xff]  }
  0x11   :  { %737 = vmatpush3.bf16.msra.mxu1 %v817_v15  ;;  %710 = vmatprep.subr.bf16.mxu0 %v818_v16  ;;  %v638_v45 = vcombine.high %v21_v43, %v21_v43  ;;  %v637_v46 = vcombine.low %v21_v43, %v21_v43  ;;  %v640_v49 = vcombine.high %v22_v48, %v22_v48  ;;  %v851_v52 = vld [vmem:[%s1065_s1 + $0x168] sm:$0xff]   ;;  %v23_v54 = vld [vmem:[%s1066_s0 + $0x40] sm:$0xff]  ;;  %v856_v57 = vld [vmem:[%s1065_s1 + $0x170] sm:$0xff]  }
  0x12   :  { %738 = vmatprep.subr.bf16.mxu1 %v819_v17  ;;  %v639_v50 = vcombine.low %v22_v48, %v22_v48  ;;  %v862_v53 = vld [vmem:[%s1066_s0 + $0x14] ss:$24 sps:$4 sm:$0xff]   ;;  %v642_v55 = vcombine.high %v23_v54, %v23_v54  ;;  %v858_v59 = vld [vmem:[%s1065_s1 + $0x178] sm:$0xff]   ;;  %v860_v61 = vld [vmem:[%s1066_s0 + $0x10] ss:$24 sps:$4 sm:$0xff]   ;;  %v641_v62 = vcombine.low %v23_v54, %v23_v54 }
  0x13   :  { %v853_v56 = vld [vmem:[%s1065_s1 + $0x128] sm:$0xff]   ;;  %v857_v58 = vld [vmem:[%s1065_s1 + $0x130] sm:$0xff]   ;;  %v859_v60 = vld [vmem:[%s1065_s1 + $0x138] sm:$0xff]  }
  0x14   :  { %711 = vmatpush3.bf16.msra.mxu0 %v820_v18  ;;  %v630_v1 = vld [vmem:[%s1067_s2] ss:$0 sm:$0xff] }
  0x15   :  { %739 = vmatpush3.bf16.msra.mxu1 %v821_v19  ;;  %712 = vmatprep.subr.bf16.mxu0 %v822_v20 }
  0x16   :  { %740 = vmatprep.subr.bf16.mxu1 %v823_v21 }
  0x18   :  { %713 = vmatpush3.bf16.msra.mxu0 %v824_v22 }
  0x19   :  { %741 = vmatpush3.bf16.msra.mxu1 %v825_v23  ;;  %714 = vmatprep.subr.bf16.mxu0 %v826_v24 }
  0x1a   :  { %742 = vmatprep.subr.bf16.mxu1 %v827_v25 }
  0x1c   :  { %715 = vmatpush3.bf16.msra.mxu0 %v828_v26 }
  0x1d   :  { %743 = vmatpush3.bf16.msra.mxu1 %v829_v27  ;;  %716 = vmatprep.subr.bf16.mxu0 %v830_v28 }
  0x1e   :  { %744 = vmatprep.subr.bf16.mxu1 %v831_v29 }
  0x20   :  { %717 = vmatpush3.bf16.msra.mxu0 %v832_v30 }
  0x21   :  { %745 = vmatpush3.bf16.msra.mxu1 %v833_v31  ;;  %758 = vmatprep.subr.bf16.mxu0 %v840_v36 }
  0x22   :  { %786 = vmatprep.subr.bf16.mxu1 %v840_v36 }
  0x23   :  { %499 = vmatmul.mubr.bf16.vlgmr.msra.gmra.mrb[0].mxu0 %v834_v32 }
  0x24   :  { %547 = vmatmul.mubr.bf16.vlgmr.msra.gmra.mrb[0].mxu1 %v837_v34  ;;  %759 = vmatpush3.bf16.msra.mxu0 %v841_v37 }
  0x25   :  { %794 = vmatpush3.bf16.msra.mxu1 %v841_v37  ;;  %760 = vmatprep.subr.bf16.mxu0 %v842_v38 }
  0x26   :  { %787 = vmatprep.subr.bf16.mxu1 %v842_v38  ;;  %506 = vmatprep.mubr.bf16.mxu0 %v638_v45 }
  0x27   :  { %554 = vmatprep.mubr.bf16.mxu1 %v640_v49 }
  0x28   :  { %761 = vmatpush3.bf16.msra.mxu0 %v843_v39 }
  0x29   :  { %795 = vmatpush3.bf16.msra.mxu1 %v843_v39  ;;  %762 = vmatprep.subr.bf16.mxu0 %v844_v40 }
  0x2a   :  { %788 = vmatprep.subr.bf16.mxu1 %v844_v40 }
  0x2b   :  { %507 = vmatmul.mubr.bf16.gmra.mrb[4].mxu0 %v637_v46 }
  0x2c   :  { %763 = vmatpush3.bf16.msra.mxu0 %v845_v41  ;;  %555 = vmatmul.mubr.bf16.gmra.mrb[4].mxu1 %v639_v50 }
  0x2d   :  { %796 = vmatpush3.bf16.msra.mxu1 %v845_v41  ;;  %764 = vmatprep.subr.bf16.mxu0 %v846_v42 }
  0x2e   :  { %789 = vmatprep.subr.bf16.mxu1 %v846_v42  ;;  %594 = vmatprep.mubr.bf16.mxu0 %v862_v53 }
  0x2f   :  { %602 = vmatprep.mubr.bf16.mxu1 %v642_v55 }
  0x30   :  { %765 = vmatpush3.bf16.msra.mxu0 %v847_v44 }
  0x31   :  { %797 = vmatpush3.bf16.msra.mxu1 %v847_v44  ;;  %766 = vmatprep.subr.bf16.mxu0 %v848_v47 }
  0x32   :  { %790 = vmatprep.subr.bf16.mxu1 %v848_v47 }
  0x34   :  { %767 = vmatpush3.bf16.msra.mxu0 %v849_v51 }
  0x35   :  { %798 = vmatpush3.bf16.msra.mxu1 %v849_v51  ;;  %768 = vmatprep.subr.bf16.mxu0 %v851_v52 }
  0x36   :  { %791 = vmatprep.subr.bf16.mxu1 %v851_v52 }
  0x38   :  { %769 = vmatpush3.bf16.msra.mxu0 %v853_v56 }
  0x39   :  { %799 = vmatpush3.bf16.msra.mxu1 %v853_v56  ;;  %770 = vmatprep.subr.bf16.mxu0 %v856_v57 }
  0x3a   :  { %792 = vmatprep.subr.bf16.mxu1 %v856_v57 }
  0x3c   :  { %771 = vmatpush3.bf16.msra.mxu0 %v857_v58 }
  0x3d   :  { %800 = vmatpush3.bf16.msra.mxu1 %v857_v58  ;;  %772 = vmatprep.subr.bf16.mxu0 %v858_v59 }
  0x3e   :  { %793 = vmatprep.subr.bf16.mxu1 %v858_v59 }
  0x40   :  { %773 = vmatpush3.bf16.msra.mxu0 %v859_v60 }
  0x41   :  { %801 = vmatpush3.bf16.msra.mxu1 %v859_v60 }
  0x43   :  { %595 = vmatmul.mubr.bf16.vlgmr.msra.gmra.mrb[8].mxu0 %v860_v61 }
  0x44   :  { %603 = vmatmul.mubr.bf16.vlgmr.msra.gmra.mrb[8].mxu1 %v641_v62 }
  0xf6   :  { %v718_v63 = vpop.f32.mrb[0].mxu0 }
  0xf7   :  { %v746_v0 = vpop.f32.mrb[0].mxu1  ;;  %v719_v2 = vpop.f32.mrb[1].mxu0 }
  0xf8   :  { %v720_v3 = vadd.f32 %v719_v2, %v718_v63  ;;  %v747_v4 = vpop.f32.mrb[1].mxu1  ;;  %v721_v5 = vpop.f32.mrb[2].mxu0 }
  0xf9   :  { %v748_v6 = vadd.f32 %v747_v4, %v746_v0  ;;  %v749_v7 = vpop.f32.mrb[2].mxu1  ;;  %v722_v8 = vpop.f32.mrb[3].mxu0 }
  0xfa   :  { %v501_v9 = vadd.f32 %v720_v3, %v630_v1  ;;  %v723_v10 = vadd.f32 %v722_v8, %v721_v5  ;;  %v750_v11 = vpop.f32.mrb[3].mxu1 }
  0xfb   :  { %v751_v12 = vadd.f32 %v750_v11, %v749_v7 }
  0xfc   :  { %v549_v13 = vadd.f32 %v748_v6, %v501_v9  ;;  %v504_v14 = vadd.f32 %v723_v10, %v630_v1 }
  0xfe   :  { %v552_v15 = vadd.f32 %v751_v12, %v504_v14  ;;  %v724_v16 = vpop.f32.mrb[4].mxu0 }
  0xff   :  { %v725_v17 = vpop.f32.mrb[5].mxu0  ;;  %v752_v20 = vpop.f32.mrb[4].mxu1 }
 0x100   :  { %v726_v18 = vadd.f32 %v725_v17, %v724_v16  ;;  %v727_v19 = vpop.f32.mrb[6].mxu0  ;;  %v753_v23 = vpop.f32.mrb[5].mxu1 }
 0x101   :  { %v728_v21 = vpop.f32.mrb[7].mxu0  ;;  %v754_v24 = vadd.f32 %v753_v23, %v752_v20  ;;  %v755_v25 = vpop.f32.mrb[6].mxu1 }
 0x102   :  { %v509_v22 = vadd.f32 %v726_v18, %v630_v1  ;;  %v756_v26 = vpop.f32.mrb[7].mxu1 }
 0x104   :  { %v557_v27 = vadd.f32 %v754_v24, %v509_v22 }
 0x116   :  { %v774_v28 = vpop.f32.mrb[8].mxu0 }
 0x117   :  { %v780_v29 = vpop.f32.mrb[8].mxu1  ;;  %v775_v30 = vpop.f32.mrb[9].mxu0 }
 0x118   :  { %v776_v31 = vadd.f32 %v775_v30, %v774_v28  ;;  %v781_v32 = vpop.f32.mrb[9].mxu1  ;;  %v777_v33 = vpop.f32.mrb[10].mxu0 }
 0x119   :  { %v782_v34 = vadd.f32 %v781_v32, %v780_v29  ;;  %v783_v35 = vpop.f32.mrb[10].mxu1  ;;  %v778_v36 = vpop.f32.mrb[11].mxu0 }
 0x11a   :  { %v597_v37 = vadd.f32 %v776_v31, %v549_v13  ;;  %v779_v38 = vadd.f32 %v778_v36, %v777_v33  ;;  %v784_v39 = vpop.f32.mrb[11].mxu1 }
 0x11b   :  { %v605_v40 = vadd.f32 %v782_v34, %v557_v27 }
 0x11c   :  { %v600_v41 = vadd.f32 %v779_v38, %v552_v15 }
 0x11d   :  { %v696_v42 = vpack.c.bf16 %v605_v40, %v605_v40 }
 0x11e   :  { %v700_v43 = vpack.c.bf16 %v600_v41, %v597_v37 }
 0x11f   :  { %625 = vst [vmem:[%s1068_s3 + $0x8] sm:$0xf] %v696_v42 }
 0x120   :  { %701 = vst [vmem:[%s1068_s3] sm:$0xff] %v700_v43  }

// kernel: forward.15
= control target key start
LH: loop header
LB: loop body
LE: loop exit
PB: predicated region body
PF: predicated region fallthrough
CT: control target
= control target key end

     0   :  { %s1433_s12 = smov 0   ;;  %s1686_s0 = inlined_call_operand.vmem [shape: bf16[32,1152], index: 0, kind: input, shape index: {}]   ;;  %s1687_s1 = inlined_call_operand.vmem [shape: bf16[1152,128], index: 1, kind: input, shape index: {}]   ;;  %s1688_s2 = inlined_call_operand.vmem [shape: f32[1,128], index: 2, kind: input, shape index: {}]   ;;  %s1689_s3 = inlined_call_operand.vmem [shape: bf16[32,128], index: 3, kind: output, shape index: {}]  }
   0x1 LB: > { %s1088_s13 = sadd.s32 4294967295, %s1409_s12   ;;  %p1092_p0 = scmp.ge.s32.totalorder %s1409_s12, 1  ;;  %s1409_s12 = sphi %s1433_s12, %s13_s12  }
   0x2   : > { %p139_p1 = scmp.lt.s32.totalorder %s1409_s12, 3 }
   0x4   : > { %p140_p2 = pnand %p1092_p0, %p139_p1 }
   0x5   : > { %v1318_v0 = vld [vmem:[%s1687_s1 + $0x40] sm:$0xff] (!%p140_p2)   ;;  %v1322_v4 = vld [vmem:[%s1687_s1 + $0x48] sm:$0xff] (!%p140_p2)   ;;  %v1326_v8 = vld [vmem:[%s1687_s1 + $0x50] sm:$0xff] (!%p140_p2)   ;;  %s1093_s17 = sshll.u32 (!%p140_p2), %s1088_s13, 1  ;;  %vm1412_vm0 = vmmov (!%p140_p2), 0  }
   0x6   : > { %143 = sbr.rel (%p140_p2) target bundleno = 321 (0x141), region = 32  ;;  %v1319_v1 = vld [vmem:[%s1687_s1] sm:$0xff] (!%p140_p2)   ;;  %1190 = vmatprep.subr.bf16.mxu0 (!%p140_p2), %v1318_v0  ;;  %v1323_v5 = vld [vmem:[%s1687_s1 + $0x8] sm:$0xff] (!%p140_p2)   ;;  %v1327_v9 = vld [vmem:[%s1687_s1 + $0x10] sm:$0xff] (!%p140_p2)   ;;  %p165_p3 = scmp.lt.s32.totalorder (!%p140_p2), %s1093_s17, 3 }
   0x7   : > { %v1320_v2 = vld [vmem:[%s1687_s1 + $0xc0] sm:$0xff] (!%p140_p2)   ;;  %1191 = vmatpush3.bf16.msra.mxu0 (!%p140_p2), %v1319_v1  ;;  %v1324_v6 = vld [vmem:[%s1687_s1 + $0xc8] sm:$0xff] (!%p140_p2)   ;;  %v1328_v10 = vld [vmem:[%s1687_s1 + $0xd0] sm:$0xff] (!%p140_p2)  }
   0x8   : > { %v1321_v3 = vld [vmem:[%s1687_s1 + $0x80] sm:$0xff] (!%p140_p2)   ;;  %1212 = vmatprep.subr.bf16.mxu1 (!%p140_p2), %v1320_v2  ;;  %1192 = vmatprep.subr.bf16.mxu0 (!%p140_p2), %v1322_v4  ;;  %v1325_v7 = vld [vmem:[%s1687_s1 + $0x88] sm:$0xff] (!%p140_p2)   ;;  %v1329_v11 = vld [vmem:[%s1687_s1 + $0x90] sm:$0xff] (!%p140_p2)  }
   0x9   : > { %1213 = vmatpush3.bf16.msra.mxu1 (!%p140_p2), %v1321_v3  ;;  %v1330_v12 = vld [vmem:[%s1687_s1 + $0x58] sm:$0xff] (!%p140_p2)   ;;  %v1334_v16 = vld [vmem:[%s1687_s1 + $0x60] sm:$0xff] (!%p140_p2)   ;;  %v1338_v20 = vld [vmem:[%s1687_s1 + $0x68] sm:$0xff] (!%p140_p2)  }
   0xa   : > { %1214 = vmatprep.subr.bf16.mxu1 (!%p140_p2), %v1324_v6  ;;  %v1331_v13 = vld [vmem:[%s1687_s1 + $0x18] sm:$0xff] (!%p140_p2)   ;;  %v1335_v17 = vld [vmem:[%s1687_s1 + $0x20] sm:$0xff] (!%p140_p2)   ;;  %v1339_v21 = vld [vmem:[%s1687_s1 + $0x28] sm:$0xff] (!%p140_p2)   ;;  %v1411_v6 = vmov (!%p140_p2), 0.0  }
   0xb   : > { %1193 = vmatpush3.bf16.msra.mxu0 (!%p140_p2), %v1323_v5  ;;  %v1332_v14 = vld [vmem:[%s1687_s1 + $0xd8] sm:$0xff] (!%p140_p2)   ;;  %v1336_v18 = vld [vmem:[%s1687_s1 + $0xe0] sm:$0xff] (!%p140_p2)   ;;  %v1340_v22 = vld [vmem:[%s1687_s1 + $0xe8] sm:$0xff] (!%p140_p2)  }
   0xc   : > { %1194 = vmatprep.subr.bf16.mxu0 (!%p140_p2), %v1326_v8  ;;  %v1333_v15 = vld [vmem:[%s1687_s1 + $0x98] sm:$0xff] (!%p140_p2)   ;;  %v1337_v19 = vld [vmem:[%s1687_s1 + $0xa0] sm:$0xff] (!%p140_p2)   ;;  %v1341_v23 = vld [vmem:[%s1687_s1 + $0xa8] sm:$0xff] (!%p140_p2)  }
   0xd   : > { %1215 = vmatpush3.bf16.msra.mxu1 %v1325_v7  ;;  %s1691_s17 = smov (!%p165_p3, %s1093_s17), 3  ;;  %v1342_v24 = vld [vmem:[%s1687_s1 + $0x70] sm:$0xff]   ;;  %v1346_v28 = vld [vmem:[%s1687_s1 + $0x78] sm:$0xff]   ;;  %v1353_v34 = vld [vmem:[%s1687_s1 + $0x140] sm:$0xff]  }
   0xe   : > { %1216 = vmatprep.subr.bf16.mxu1 %v1328_v10  ;;  %s1307_s14 = smul.u32 36, %s1691_s17  ;;  %v1343_v25 = vld [vmem:[%s1687_s1 + $0x30] sm:$0xff]   ;;  %v1347_v29 = vld [vmem:[%s1687_s1 + $0x38] sm:$0xff]   ;;  %v1357_v37 = vld [vmem:[%s1687_s1 + $0x100] sm:$0xff]  }
   0xf   : > { %1195 = vmatpush3.bf16.msra.mxu0 %v1327_v9  ;;  %v1344_v26 = vld [vmem:[%s1687_s1 + $0xf0] sm:$0xff]   ;;  %v1348_v30 = vld [vmem:[%s1687_s1 + $0xf8] sm:$0xff]   ;;  %v1358_v38 = vld [vmem:[%s1687_s1 + $0x1c0] sm:$0xff]  }
  0x10   : > { %1196 = vmatprep.subr.bf16.mxu0 %v1330_v12  ;;  %v1345_v27 = vld [vmem:[%s1687_s1 + $0xb0] sm:$0xff]   ;;  %s1536_s13 = scalar_lea.vmem %s1686_s0, %s1307_s14  ;;  %v1352_v33 = vld [vmem:[%s1687_s1 + $0xb8] sm:$0xff]   ;;  %v1359_v39 = vld [vmem:[%s1687_s1 + $0x180] sm:$0xff]  }
  0x11   : > { %1217 = vmatpush3.bf16.msra.mxu1 %v1329_v11  ;;  %v1349_v31 = vld [vmem:[%s1536_s13] ss:$36 sps:$4 sm:$0xff]   ;;  %v1354_v35 = vld [vmem:[%s1536_s13 + $0x8] ss:$36 sps:$4 sm:$0xff]   ;;  %v1364_v44 = vld [vmem:[%s1687_s1 + $0x150] sm:$0xff]  }
  0x12   : > { %1218 = vmatprep.subr.bf16.mxu1 %v1332_v14  ;;  %v1351_v32 = vld [vmem:[%s1536_s13 + $0x4] ss:$36 sps:$4 sm:$0xff]   ;;  %v1356_v36 = vld [vmem:[%s1536_s13 + $0xc] ss:$36 sps:$4 sm:$0xff]   ;;  %v1368_v48 = vld [vmem:[%s1687_s1 + $0x158] sm:$0xff]  }
  0x13   : > { %1197 = vmatpush3.bf16.msra.mxu0 %v1331_v13  ;;  %849 = vmatprep.mubr.bf16.mxu0 %v1351_v32  ;;  %v1360_v40 = vld [vmem:[%s1687_s1 + $0x148] sm:$0xff]   ;;  %v1365_v45 = vld [vmem:[%s1687_s1 + $0x110] sm:$0xff]   ;;  %v1369_v49 = vld [vmem:[%s1687_s1 + $0x118] sm:$0xff]  }
  0x14   : > { %1198 = vmatprep.subr.bf16.mxu0 %v1334_v16  ;;  %890 = vmatprep.mubr.bf16.mxu1 %v1356_v36  ;;  %v1361_v41 = vld [vmem:[%s1687_s1 + $0x108] sm:$0xff]   ;;  %v1366_v46 = vld [vmem:[%s1687_s1 + $0x1d0] sm:$0xff]   ;;  %v1370_v50 = vld [vmem:[%s1687_s1 + $0x1d8] sm:$0xff]  }
  0x15   : > { %1219 = vmatpush3.bf16.msra.mxu1 %v1333_v15  ;;  %v1362_v42 = vld [vmem:[%s1687_s1 + $0x1c8] sm:$0xff]   ;;  %v1367_v47 = vld [vmem:[%s1687_s1 + $0x190] sm:$0xff]   ;;  %v1371_v51 = vld [vmem:[%s1687_s1 + $0x198] sm:$0xff]  }
  0x16   : > { %1220 = vmatprep.subr.bf16.mxu1 %v1336_v18  ;;  %v1363_v43 = vld [vmem:[%s1687_s1 + $0x188] sm:$0xff]   ;;  %v1372_v52 = vld [vmem:[%s1687_s1 + $0x160] sm:$0xff]   ;;  %v1380_v60 = vld [vmem:[%s1687_s1 + $0x170] sm:$0xff]  }
  0x17   : > { %1199 = vmatpush3.bf16.msra.mxu0 %v1335_v17  ;;  %v1373_v53 = vld [vmem:[%s1687_s1 + $0x120] sm:$0xff]   ;;  %v1376_v56 = vld [vmem:[%s1687_s1 + $0x168] sm:$0xff]   ;;  %v1381_v61 = vld [vmem:[%s1687_s1 + $0x130] sm:$0xff]  }
  0x18   : > { %1200 = vmatprep.subr.bf16.mxu0 %v1338_v20  ;;  %v1374_v54 = vld [vmem:[%s1687_s1 + $0x1e0] sm:$0xff]   ;;  %v1377_v57 = vld [vmem:[%s1687_s1 + $0x128] sm:$0xff]   ;;  %v1382_v62 = vld [vmem:[%s1687_s1 + $0x1f0] sm:$0xff]  }
  0x19   : > { %1221 = vmatpush3.bf16.msra.mxu1 %v1337_v19  ;;  %v1375_v55 = vld [vmem:[%s1687_s1 + $0x1a0] sm:$0xff]   ;;  %v1378_v58 = vld [vmem:[%s1687_s1 + $0x1e8] sm:$0xff]   ;;  %v1383_v63 = vld [vmem:[%s1687_s1 + $0x1b0] sm:$0xff]  }
  0x1a   : > { %1222 = vmatprep.subr.bf16.mxu1 %v1340_v22  ;;  %v1379_v59 = vld [vmem:[%s1687_s1 + $0x1a8] sm:$0xff]   ;;  %v1384_v0 = vld [vmem:[%s1687_s1 + $0x178] sm:$0xff]   ;;  %v1387_v3 = vld [vmem:[%s1536_s13 + $0x10] ss:$36 sps:$4 sm:$0xff]  }
  0x1b   : > { %1201 = vmatpush3.bf16.msra.mxu0 %v1339_v21  ;;  %v1385_v1 = vld [vmem:[%s1687_s1 + $0x138] sm:$0xff]   ;;  %v1394_v9 = vld [vmem:[%s1687_s1 + $0x200] sm:$0xff]   ;;  %v1395_v10 = vld [vmem:[%s1687_s1 + $0x208] sm:$0xff]  }
  0x1c   : > { %1202 = vmatprep.subr.bf16.mxu0 %v1342_v24  ;;  %v1386_v2 = vld [vmem:[%s1687_s1 + $0x1f8] sm:$0xff]   ;;  %v1396_v11 = vld [vmem:[%s1687_s1 + $0x210] sm:$0xff]   ;;  %v1398_v13 = vld [vmem:[%s1687_s1 + $0x220] sm:$0xff]  }
  0x1d   : > { %1223 = vmatpush3.bf16.msra.mxu1 %v1341_v23  ;;  %v1389_v4 = vld [vmem:[%s1536_s13 + $0x14] ss:$36 sps:$4 sm:$0xff]   ;;  %v1393_v8 = vld [vmem:[%s1536_s13 + $0x1c] ss:$36 sps:$4 sm:$0xff]   ;;  %v1399_v14 = vld [vmem:[%s1687_s1 + $0x228] sm:$0xff]  }
  0x1e   : > { %1224 = vmatprep.subr.bf16.mxu1 %v1344_v26  ;;  %v1390_v5 = vld [vmem:[%s1687_s1 + $0x1b8] sm:$0xff]   ;;  %v1400_v15 = vld [vmem:[%s1687_s1 + $0x230] sm:$0xff]   ;;  %v1402_v17 = vld [vmem:[%s1536_s13 + $0x20] ss:$36 sps:$4 sm:$0xff]  }
  0x1f   : > { %1203 = vmatpush3.bf16.msra.mxu0 %v1343_v25  ;;  %v1391_v7 = vld [vmem:[%s1536_s13 + $0x18] ss:$36 sps:$4 sm:$0xff]   ;;  %v1097_v19 = vld [vmem:[%s1688_s2] ss:$0 sm:$0xff]  ;;  %s1096_s13 = sshll.u32 %s1691_s17, 2 }
  0x20   : > { %1204 = vmatprep.subr.bf16.mxu0 %v1346_v28  ;;  %v1397_v12 = vld [vmem:[%s1687_s1 + $0x218] sm:$0xff]   ;;  %s175_s20 = scalar_lea.vmem %s1689_s3, %s1096_s13 }
  0x21   : > { %1225 = vmatpush3.bf16.msra.mxu1 %v1345_v27  ;;  %v1401_v16 = vld [vmem:[%s1687_s1 + $0x238] sm:$0xff]  }
  0x22   : > { %1226 = vmatprep.subr.bf16.mxu1 %v1348_v30 }
  0x23   : > { %1205 = vmatpush3.bf16.msra.mxu0 %v1347_v29 }
  0x24   : > { %1234 = vmatprep.subr.bf16.mxu0 %v1353_v34 }
  0x25   : > { %1227 = vmatpush3.bf16.msra.mxu1 %v1352_v33 }
  0x26   : > { %850 = vmatmul.mubr.bf16.vlgmr.msra.gmra.mrb[0].mxu0 %v1349_v31  ;;  %1256 = vmatprep.subr.bf16.mxu1 %v1358_v38 }
  0x27   : > { %1235 = vmatpush3.bf16.msra.mxu0 %v1357_v37  ;;  %931 = vmatprep.mubr.bf16.mxu0 %v1389_v4 }
  0x28   : > { %891 = vmatmul.mubr.bf16.vlgmr.msra.gmra.mrb[0].mxu1 %v1354_v35  ;;  %1236 = vmatprep.subr.bf16.mxu0 %v1360_v40 }
  0x29   : > { %1257 = vmatpush3.bf16.msra.mxu1 %v1359_v39  ;;  %972 = vmatprep.mubr.bf16.mxu1 %v1393_v8 }
  0x2a   : > { %1258 = vmatprep.subr.bf16.mxu1 %v1362_v42 }
  0x2b   : > { %1237 = vmatpush3.bf16.msra.mxu0 %v1361_v41 }
  0x2c   : > { %1238 = vmatprep.subr.bf16.mxu0 %v1364_v44 }
  0x2d   : > { %1259 = vmatpush3.bf16.msra.mxu1 %v1363_v43 }
  0x2e   : > { %1260 = vmatprep.subr.bf16.mxu1 %v1366_v46 }
  0x2f   : > { %1239 = vmatpush3.bf16.msra.mxu0 %v1365_v45 }
  0x30   : > { %1240 = vmatprep.subr.bf16.mxu0 %v1368_v48 }
  0x31   : > { %1261 = vmatpush3.bf16.msra.mxu1 %v1367_v47 }
  0x32   : > { %1262 = vmatprep.subr.bf16.mxu1 %v1370_v50 }
  0x33   : > { %1241 = vmatpush3.bf16.msra.mxu0 %v1369_v49 }
  0x34   : > { %1242 = vmatprep.subr.bf16.mxu0 %v1372_v52 }
  0x35   : > { %1263 = vmatpush3.bf16.msra.mxu1 %v1371_v51 }
  0x36   : > { %1264 = vmatprep.subr.bf16.mxu1 %v1374_v54 }
  0x37   : > { %1243 = vmatpush3.bf16.msra.mxu0 %v1373_v53 }
  0x38   : > { %1244 = vmatprep.subr.bf16.mxu0 %v1376_v56 }
  0x39   : > { %1265 = vmatpush3.bf16.msra.mxu1 %v1375_v55 }
  0x3a   : > { %1266 = vmatprep.subr.bf16.mxu1 %v1378_v58 }
  0x3b   : > { %1245 = vmatpush3.bf16.msra.mxu0 %v1377_v57 }
  0x3c   : > { %1246 = vmatprep.subr.bf16.mxu0 %v1380_v60 }
  0x3d   : > { %1267 = vmatpush3.bf16.msra.mxu1 %v1379_v59 }
  0x3e   : > { %1268 = vmatprep.subr.bf16.mxu1 %v1382_v62 }
  0x3f   : > { %1247 = vmatpush3.bf16.msra.mxu0 %v1381_v61 }
  0x40   : > { %1248 = vmatprep.subr.bf16.mxu0 %v1384_v0 }
  0x41   : > { %1269 = vmatpush3.bf16.msra.mxu1 %v1383_v63 }
  0x42   : > { %1270 = vmatprep.subr.bf16.mxu1 %v1386_v2 }
  0x43   : > { %1249 = vmatpush3.bf16.msra.mxu0 %v1385_v1 }
  0x44   : > { %1287 = vmatprep.subr.bf16.mxu0 %v1411_v6 }
  0x45   : > { %1271 = vmatpush3.bf16.msra.mxu1 %v1390_v5 }
  0x46   : > { %932 = vmatmul.mubr.bf16.vlgmr.msra.gmra.mrb[4].mxu0 %v1387_v3 }
  0x47   : > { %1303 = vmatprep.mubr.msk.bf16.mxu0 %vm1412_vm0, %v1411_v6  ;;  %1288 = vmatpush3.bf16.msra.mxu0 %v1394_v9 }
  0x48   : > { %973 = vmatmul.mubr.bf16.vlgmr.msra.gmra.mrb[4].mxu1 %v1391_v7  ;;  %1289 = vmatprep.subr.bf16.mxu0 %v1411_v6 }
  0x4b   : > { %1290 = vmatpush3.bf16.msra.mxu0 %v1395_v10 }
  0x4c   : > { %1291 = vmatprep.subr.bf16.mxu0 %v1411_v6 }
  0x4f   : > { %1292 = vmatpush3.bf16.msra.mxu0 %v1396_v11 }
  0x50   : > { %1293 = vmatprep.subr.bf16.mxu0 %v1411_v6 }
  0x53   : > { %1294 = vmatpush3.bf16.msra.mxu0 %v1397_v12 }
  0x54   : > { %1295 = vmatprep.subr.bf16.mxu0 %v1411_v6 }
  0x57   : > { %1296 = vmatpush3.bf16.msra.mxu0 %v1398_v13 }
  0x58   : > { %1297 = vmatprep.subr.bf16.mxu0 %v1411_v6 }
  0x5b   : > { %1298 = vmatpush3.bf16.msra.mxu0 %v1399_v14 }
  0x5c   : > { %1299 = vmatprep.subr.bf16.mxu0 %v1411_v6 }
  0x5f   : > { %1300 = vmatpush3.bf16.msra.mxu0 %v1400_v15 }
  0x60   : > { %1301 = vmatprep.subr.bf16.mxu0 %v1411_v6 }
  0x63   : > { %1302 = vmatpush3.bf16.msra.mxu0 %v1401_v16 }
  0x66   : > { %1304 = vmatmul.mubr.bf16.vlgmr.msra.gmra.mrb[8].mxu0 %v1402_v17 }
  0xf9   : > { %v1206_v18 = vpop.f32.mrb[0].mxu0 }
  0xfa   : > { %v1207_v20 = vpop.f32.mrb[1].mxu0 }
  0xfb   : > { %v1208_v21 = vadd.f32 %v1207_v20, %v1206_v18  ;;  %v1209_v22 = vpop.f32.mrb[2].mxu0  ;;  %v1228_v23 = vpop.f32.mrb[0].mxu1 }
  0xfc   : > { %v1210_v24 = vpop.f32.mrb[3].mxu0  ;;  %v1229_v27 = vpop.f32.mrb[1].mxu1 }
  0xfd   : > { %v852_v25 = vadd.f32 %v1208_v21, %v1097_v19  ;;  %v1211_v26 = vadd.f32 %v1210_v24, %v1209_v22  ;;  %v1230_v28 = vadd.f32 %v1229_v27, %v1228_v23  ;;  %v1231_v29 = vpop.f32.mrb[2].mxu1 }
  0xfe   : > { %v1232_v31 = vpop.f32.mrb[3].mxu1 }
  0xff   : > { %v855_v30 = vadd.f32 %v1211_v26, %v1097_v19  ;;  %v893_v32 = vadd.f32 %v1230_v28, %v852_v25  ;;  %v1233_v33 = vadd.f32 %v1232_v31, %v1231_v29 }
 0x101   : > { %v896_v34 = vadd.f32 %v1233_v33, %v855_v30 }
 0x119   : > { %v1250_v35 = vpop.f32.mrb[4].mxu0 }
 0x11a   : > { %v1251_v36 = vpop.f32.mrb[5].mxu0 }
 0x11b   : > { %v1252_v37 = vadd.f32 %v1251_v36, %v1250_v35  ;;  %v1253_v38 = vpop.f32.mrb[6].mxu0  ;;  %v1272_v39 = vpop.f32.mrb[4].mxu1 }
 0x11c   : > { %v1254_v40 = vpop.f32.mrb[7].mxu0  ;;  %v1273_v43 = vpop.f32.mrb[5].mxu1 }
 0x11d   : > { %v934_v41 = vadd.f32 %v1252_v37, %v893_v32  ;;  %v1255_v42 = vadd.f32 %v1254_v40, %v1253_v38  ;;  %v1274_v44 = vadd.f32 %v1273_v43, %v1272_v39  ;;  %v1275_v45 = vpop.f32.mrb[6].mxu1 }
 0x11e   : > { %v1276_v47 = vpop.f32.mrb[7].mxu1 }
 0x11f   : > { %v937_v46 = vadd.f32 %v1255_v42, %v896_v34  ;;  %v1277_v48 = vadd.f32 %v1276_v47, %v1275_v45  ;;  %v975_v49 = vadd.f32 %v1274_v44, %v934_v41 }
 0x121   : > { %v978_v50 = vadd.f32 %v1277_v48, %v937_v46 }
 0x139   : > { %v1015_v51 = vpop.f32.mrb[8].mxu0 }
 0x13a   : > { %v1016_v52 = vadd.f32 %v1015_v51, %v975_v49  ;;  %v1305_v53 = vpop.f32.mrb[9].mxu0 }
 0x13b   : > { %v1018_v54 = vpop.f32.mrb[10].mxu0 }
 0x13c   : > { %v1019_v55 = vadd.f32 %v1018_v54, %v978_v50  ;;  %v1306_v56 = vpop.f32.mrb[11].mxu0 }
 0x13e   : > { %v1188_v57 = vpack.c.bf16 %v1019_v55, %v1016_v52 }
 0x140   : > { %1189 = vst [vmem:[%s175_s20] sm:$0xff] %v1188_v57  }
 0x141 PF: > { %s13_s12 = sadd.s32 1, %s1409_s12  }
 0x142   : > { %p10_p4 = scmp.ge.s32.totalorder %s13_s12, 4  }
 0x144   :  { %12 = sbr.rel (!%p10_p4) target bundleno = 1 (0x1), region = 62 }

// kernel: forward.22
= control target key start
LH: loop header
LB: loop body
LE: loop exit
PB: predicated region body
PF: predicated region fallthrough
CT: control target
= control target key end

     0   :  { %s1010_s12 = smov 0   ;;  %s1147_s0 = inlined_call_operand.vmem [shape: bf16[112,512], index: 0, kind: input, shape index: {}]   ;;  %s1148_s1 = inlined_call_operand.vmem [shape: bf16[512,128], index: 1, kind: input, shape index: {}]   ;;  %s1149_s2 = inlined_call_operand.vmem [shape: f32[1,128], index: 2, kind: input, shape index: {}]   ;;  %s1150_s3 = inlined_call_operand.vmem [shape: bf16[112,128], index: 3, kind: output, shape index: {}]  }
   0x1 LB: > { %s749_s13 = sadd.s32 4294967295, %s988_s12   ;;  %p753_p0 = scmp.ge.s32.totalorder %s988_s12, 1  ;;  %s988_s12 = sphi %s1010_s12, %s13_s12  }
   0x2   : > { %p139_p1 = scmp.lt.s32.totalorder %s988_s12, 3 }
   0x4   : > { %p140_p2 = pnand %p753_p0, %p139_p1 }
   0x5   : > { %v928_v0 = vld [vmem:[%s1148_s1 + $0x40] sm:$0xff] (!%p140_p2)   ;;  %v932_v4 = vld [vmem:[%s1148_s1 + $0x48] sm:$0xff] (!%p140_p2)   ;;  %v936_v8 = vld [vmem:[%s1148_s1 + $0x50] sm:$0xff] (!%p140_p2)   ;;  %s164_s19 = smul.u32 (!%p140_p2), 7, %s749_s13 }
   0x6   : > { %143 = sbr.rel (%p140_p2) target bundleno = 285 (0x11d), region = 32  ;;  %v929_v1 = vld [vmem:[%s1148_s1 + $0xc0] sm:$0xff] (!%p140_p2)   ;;  %840 = vmatprep.subr.bf16.mxu0 (!%p140_p2), %v928_v0  ;;  %v933_v5 = vld [vmem:[%s1148_s1 + $0xc8] sm:$0xff] (!%p140_p2)   ;;  %v937_v9 = vld [vmem:[%s1148_s1 + $0xd0] sm:$0xff] (!%p140_p2)  }
   0x7   : > { %v930_v2 = vld [vmem:[%s1148_s1] sm:$0xff] (!%p140_p2)   ;;  %880 = vmatprep.subr.bf16.mxu1 (!%p140_p2), %v929_v1  ;;  %v934_v6 = vld [vmem:[%s1148_s1 + $0x8] sm:$0xff] (!%p140_p2)   ;;  %v938_v10 = vld [vmem:[%s1148_s1 + $0x10] sm:$0xff] (!%p140_p2)   ;;  %p165_p3 = scmp.lt.s32.totalorder (!%p140_p2), %s164_s19, 13 }
   0x8   : > { %v931_v3 = vld [vmem:[%s1148_s1 + $0x80] sm:$0xff] (!%p140_p2)   ;;  %841 = vmatpush3.bf16.msra.mxu0 (!%p140_p2), %v930_v2  ;;  %v935_v7 = vld [vmem:[%s1148_s1 + $0x88] sm:$0xff] (!%p140_p2)   ;;  %v939_v11 = vld [vmem:[%s1148_s1 + $0x90] sm:$0xff] (!%p140_p2)  }
   0x9   : > { %881 = vmatpush3.bf16.msra.mxu1 (!%p140_p2), %v931_v3  ;;  %842 = vmatprep.subr.bf16.mxu0 (!%p140_p2), %v932_v4  ;;  %v940_v12 = vld [vmem:[%s1148_s1 + $0x58] sm:$0xff] (!%p140_p2)   ;;  %v944_v16 = vld [vmem:[%s1148_s1 + $0x60] sm:$0xff] (!%p140_p2)   ;;  %v948_v20 = vld [vmem:[%s1148_s1 + $0x68] sm:$0xff] (!%p140_p2)  }
   0xa   : > { %882 = vmatprep.subr.bf16.mxu1 (!%p140_p2), %v933_v5  ;;  %v941_v13 = vld [vmem:[%s1148_s1 + $0xd8] sm:$0xff] (!%p140_p2)   ;;  %v945_v17 = vld [vmem:[%s1148_s1 + $0xe0] sm:$0xff] (!%p140_p2)   ;;  %v949_v21 = vld [vmem:[%s1148_s1 + $0xe8] sm:$0xff] (!%p140_p2)  }
   0xb   : > { %v942_v14 = vld [vmem:[%s1148_s1 + $0x18] sm:$0xff] (!%p140_p2)   ;;  %v946_v18 = vld [vmem:[%s1148_s1 + $0x20] sm:$0xff] (!%p140_p2)   ;;  %v950_v22 = vld [vmem:[%s1148_s1 + $0x28] sm:$0xff] (!%p140_p2)  }
   0xc   : > { %843 = vmatpush3.bf16.msra.mxu0 (!%p140_p2), %v934_v6  ;;  %v943_v15 = vld [vmem:[%s1148_s1 + $0x98] sm:$0xff] (!%p140_p2)   ;;  %v947_v19 = vld [vmem:[%s1148_s1 + $0xa0] sm:$0xff] (!%p140_p2)   ;;  %v951_v23 = vld [vmem:[%s1148_s1 + $0xa8] sm:$0xff] (!%p140_p2)  }
   0xd   : > { %883 = vmatpush3.bf16.msra.mxu1 %v935_v7  ;;  %844 = vmatprep.subr.bf16.mxu0 %v936_v8  ;;  %s1152_s19 = smov (!%p165_p3, %s164_s19), 13  ;;  %v952_v24 = vld [vmem:[%s1148_s1 + $0x70] sm:$0xff]   ;;  %v956_v28 = vld [vmem:[%s1148_s1 + $0x78] sm:$0xff]   ;;  %v1125_v52 = vld [vmem:[%s1149_s2] ss:$0 sm:$0xff] }
   0xe   : > { %884 = vmatprep.subr.bf16.mxu1 %v937_v9  ;;  %v953_v25 = vld [vmem:[%s1148_s1 + $0xf0] sm:$0xff]   ;;  %s815_s18 = sshll.u32 %s1152_s19, 4  ;;  %v957_v29 = vld [vmem:[%s1148_s1 + $0xf8] sm:$0xff]   ;;  %s756_s7 = sshll.u32 %s1152_s19, 2 }
   0xf   : > { %v954_v26 = vld [vmem:[%s1148_s1 + $0x30] sm:$0xff]   ;;  %s169_s13 = scalar_lea.vmem %s1147_s0, %s815_s18  ;;  %v958_v30 = vld [vmem:[%s1148_s1 + $0x38] sm:$0xff]   ;;  %s1133_s10 = scalar_lea.vmem %s1150_s3, %s756_s7 }
  0x10   : > { %845 = vmatpush3.bf16.msra.mxu0 %v938_v10  ;;  %v955_v27 = vld [vmem:[%s1148_s1 + $0xb0] sm:$0xff]   ;;  %v959_v31 = vld [vmem:[%s1148_s1 + $0xb8] sm:$0xff]   ;;  %v190_v42 = vld [vmem:[%s169_s13 + $0x60] sm:$0xff] }
  0x11   : > { %885 = vmatpush3.bf16.msra.mxu1 %v939_v11  ;;  %846 = vmatprep.subr.bf16.mxu0 %v940_v12  ;;  %v960_v32 = vld [vmem:[%s169_s13] ss:$16 sps:$4 sm:$0xff]   ;;  %v962_v33 = vld [vmem:[%s169_s13 + $0x4] ss:$16 sps:$4 sm:$0xff]   ;;  %v963_v34 = vld [vmem:[%s169_s13 + $0x8] ss:$16 sps:$4 sm:$0xff]   ;;  %v771_v46 = vcombine.high %v190_v42, %v190_v42  ;;  %v770_v48 = vcombine.low %v190_v42, %v190_v42 }
  0x12   : > { %886 = vmatprep.subr.bf16.mxu1 %v941_v13  ;;  %v965_v35 = vld [vmem:[%s169_s13 + $0xc] ss:$16 sps:$4 sm:$0xff]   ;;  %561 = vmatprep.mubr.bf16.mxu0 %v962_v33  ;;  %v966_v36 = vld [vmem:[%s169_s13 + $0x24] ss:$16 sps:$4 sm:$0xff]   ;;  %v970_v38 = vld [vmem:[%s169_s13 + $0x20] ss:$16 sps:$4 sm:$0xff]  }
  0x13   : > { %625 = vmatprep.mubr.bf16.mxu1 %v965_v35  ;;  %v968_v37 = vld [vmem:[%s169_s13 + $0x2c] ss:$16 sps:$4 sm:$0xff]   ;;  %v971_v39 = vld [vmem:[%s169_s13 + $0x28] ss:$16 sps:$4 sm:$0xff]   ;;  %v972_v40 = vld [vmem:[%s169_s13 + $0x44] ss:$16 sps:$4 sm:$0xff]  }
  0x14   : > { %847 = vmatpush3.bf16.msra.mxu0 %v942_v14  ;;  %v974_v41 = vld [vmem:[%s169_s13 + $0x4c] ss:$16 sps:$4 sm:$0xff]   ;;  %v976_v44 = vld [vmem:[%s169_s13 + $0x40] ss:$16 sps:$4 sm:$0xff]   ;;  %v977_v45 = vld [vmem:[%s169_s13 + $0x48] ss:$16 sps:$4 sm:$0xff]  }
  0x15   : > { %887 = vmatpush3.bf16.msra.mxu1 %v943_v15  ;;  %848 = vmatprep.subr.bf16.mxu0 %v944_v16  ;;  %v191_v43 = vld [vmem:[%s169_s13 + $0x68] sm:$0xff] }
  0x16   : > { %888 = vmatprep.subr.bf16.mxu1 %v945_v17  ;;  %v773_v47 = vcombine.high %v191_v43, %v191_v43  ;;  %v772_v49 = vcombine.low %v191_v43, %v191_v43 }
  0x18   : > { %849 = vmatpush3.bf16.msra.mxu0 %v946_v18 }
  0x19   : > { %889 = vmatpush3.bf16.msra.mxu1 %v947_v19  ;;  %850 = vmatprep.subr.bf16.mxu0 %v948_v20 }
  0x1a   : > { %890 = vmatprep.subr.bf16.mxu1 %v949_v21 }
  0x1c   : > { %851 = vmatpush3.bf16.msra.mxu0 %v950_v22 }
  0x1d   : > { %891 = vmatpush3.bf16.msra.mxu1 %v951_v23  ;;  %852 = vmatprep.subr.bf16.mxu0 %v952_v24 }
  0x1e   : > { %892 = vmatprep.subr.bf16.mxu1 %v953_v25 }
  0x20   : > { %853 = vmatpush3.bf16.msra.mxu0 %v954_v26 }
  0x21   : > { %893 = vmatpush3.bf16.msra.mxu1 %v955_v27  ;;  %854 = vmatprep.subr.bf16.mxu0 %v956_v28 }
  0x22   : > { %894 = vmatprep.subr.bf16.mxu1 %v957_v29 }
  0x24   : > { %855 = vmatpush3.bf16.msra.mxu0 %v958_v30 }
  0x25   : > { %895 = vmatpush3.bf16.msra.mxu1 %v959_v31 }
  0x27   : > { %562 = vmatmul.mubr.bf16.vlgmr.msra.gmra.mrb[0].mxu0 %v960_v32 }
  0x28   : > { %626 = vmatmul.mubr.bf16.vlgmr.msra.gmra.mrb[0].mxu1 %v963_v34  ;;  %569 = vmatprep.mubr.bf16.mxu0 %v966_v36 }
  0x29   : > { %633 = vmatprep.mubr.bf16.mxu1 %v968_v37 }
  0x2f   : > { %570 = vmatmul.mubr.bf16.gmra.mrb[4].mxu0 %v970_v38 }
  0x30   : > { %634 = vmatmul.mubr.bf16.gmra.mrb[4].mxu1 %v971_v39  ;;  %577 = vmatprep.mubr.bf16.mxu0 %v972_v40 }
  0x31   : > { %641 = vmatprep.mubr.bf16.mxu1 %v974_v41 }
  0x37   : > { %578 = vmatmul.mubr.bf16.gmra.mrb[8].mxu0 %v976_v44 }
  0x38   : > { %642 = vmatmul.mubr.bf16.gmra.mrb[8].mxu1 %v977_v45  ;;  %585 = vmatprep.mubr.bf16.mxu0 %v771_v46 }
  0x39   : > { %649 = vmatprep.mubr.bf16.mxu1 %v773_v47 }
  0x3f   : > { %586 = vmatmul.mubr.bf16.gmra.mrb[12].mxu0 %v770_v48 }
  0x40   : > { %650 = vmatmul.mubr.bf16.gmra.mrb[12].mxu1 %v772_v49 }
  0xfa   : > { %v856_v50 = vpop.f32.mrb[0].mxu0 }
  0xfb   : > { %v896_v51 = vpop.f32.mrb[0].mxu1  ;;  %v857_v53 = vpop.f32.mrb[1].mxu0 }
  0xfc   : > { %v858_v54 = vadd.f32 %v857_v53, %v856_v50  ;;  %v897_v55 = vpop.f32.mrb[1].mxu1  ;;  %v859_v56 = vpop.f32.mrb[2].mxu0 }
  0xfd   : > { %v898_v57 = vadd.f32 %v897_v55, %v896_v51  ;;  %v899_v58 = vpop.f32.mrb[2].mxu1  ;;  %v860_v59 = vpop.f32.mrb[3].mxu0 }
  0xfe   : > { %v564_v60 = vadd.f32 %v858_v54, %v1125_v52  ;;  %v861_v61 = vadd.f32 %v860_v59, %v859_v56  ;;  %v900_v62 = vpop.f32.mrb[3].mxu1 }
  0xff   : > { %v901_v63 = vadd.f32 %v900_v62, %v899_v58 }
 0x100   : > { %v628_v0 = vadd.f32 %v898_v57, %v564_v60  ;;  %v567_v1 = vadd.f32 %v861_v61, %v1125_v52 }
 0x102   : > { %v631_v2 = vadd.f32 %v901_v63, %v567_v1  ;;  %v862_v3 = vpop.f32.mrb[4].mxu0 }
 0x103   : > { %v902_v4 = vpop.f32.mrb[4].mxu1  ;;  %v863_v5 = vpop.f32.mrb[5].mxu0 }
 0x104   : > { %v826_v6 = vpack.c.bf16 %v631_v2, %v628_v0  ;;  %v864_v7 = vadd.f32 %v863_v5, %v862_v3  ;;  %v903_v8 = vpop.f32.mrb[5].mxu1  ;;  %v865_v9 = vpop.f32.mrb[6].mxu0 }
 0x105   : > { %v904_v10 = vadd.f32 %v903_v8, %v902_v4  ;;  %v905_v11 = vpop.f32.mrb[6].mxu1  ;;  %v866_v12 = vpop.f32.mrb[7].mxu0 }
 0x106   : > { %827 = vst [vmem:[%s1133_s10] sm:$0xff] %v826_v6   ;;  %v572_v13 = vadd.f32 %v864_v7, %v1125_v52  ;;  %v867_v14 = vadd.f32 %v866_v12, %v865_v9  ;;  %v906_v15 = vpop.f32.mrb[7].mxu1 }
 0x107   : > { %v907_v16 = vadd.f32 %v906_v15, %v905_v11 }
 0x108   : > { %v636_v17 = vadd.f32 %v904_v10, %v572_v13  ;;  %v575_v18 = vadd.f32 %v867_v14, %v1125_v52 }
 0x10a   : > { %v639_v19 = vadd.f32 %v907_v16, %v575_v18  ;;  %v868_v20 = vpop.f32.mrb[8].mxu0 }
 0x10b   : > { %v908_v21 = vpop.f32.mrb[8].mxu1  ;;  %v869_v22 = vpop.f32.mrb[9].mxu0 }
 0x10c   : > { %v831_v23 = vpack.c.bf16 %v639_v19, %v636_v17  ;;  %v870_v24 = vadd.f32 %v869_v22, %v868_v20  ;;  %v909_v25 = vpop.f32.mrb[9].mxu1  ;;  %v871_v26 = vpop.f32.mrb[10].mxu0 }
 0x10d   : > { %v910_v27 = vadd.f32 %v909_v25, %v908_v21  ;;  %v911_v28 = vpop.f32.mrb[10].mxu1  ;;  %v872_v29 = vpop.f32.mrb[11].mxu0 }
 0x10e   : > { %838 = vst [vmem:[%s1133_s10 + $0x8] sm:$0xff] %v831_v23   ;;  %v580_v30 = vadd.f32 %v870_v24, %v1125_v52  ;;  %v873_v31 = vadd.f32 %v872_v29, %v871_v26  ;;  %v912_v32 = vpop.f32.mrb[11].mxu1 }
 0x10f   : > { %v913_v33 = vadd.f32 %v912_v32, %v911_v28 }
 0x110   : > { %v644_v34 = vadd.f32 %v910_v27, %v580_v30  ;;  %v583_v35 = vadd.f32 %v873_v31, %v1125_v52 }
 0x112   : > { %v647_v36 = vadd.f32 %v913_v33, %v583_v35  ;;  %v874_v37 = vpop.f32.mrb[12].mxu0 }
 0x113   : > { %v914_v38 = vpop.f32.mrb[12].mxu1  ;;  %v875_v39 = vpop.f32.mrb[13].mxu0 }
 0x114   : > { %v836_v40 = vpack.c.bf16 %v647_v36, %v644_v34  ;;  %v876_v41 = vadd.f32 %v875_v39, %v874_v37  ;;  %v915_v42 = vpop.f32.mrb[13].mxu1  ;;  %v877_v43 = vpop.f32.mrb[14].mxu0 }
 0x115   : > { %v916_v44 = vadd.f32 %v915_v42, %v914_v38  ;;  %v917_v45 = vpop.f32.mrb[14].mxu1  ;;  %v878_v46 = vpop.f32.mrb[15].mxu0 }
 0x116   : > { %839 = vst [vmem:[%s1133_s10 + $0x10] sm:$0xff] %v836_v40   ;;  %v588_v47 = vadd.f32 %v876_v41, %v1125_v52  ;;  %v918_v48 = vpop.f32.mrb[15].mxu1 }
 0x118   : > { %v652_v49 = vadd.f32 %v916_v44, %v588_v47 }
 0x11a   : > { %v822_v50 = vpack.c.bf16 %v652_v49, %v652_v49 }
 0x11c   : > { %692 = vst [vmem:[%s1133_s10 + $0x18] sm:$0xf] %v822_v50 }
 0x11d PF: > { %s13_s12 = sadd.s32 1, %s988_s12  }
 0x11e   : > { %p10_p4 = scmp.ge.s32.totalorder %s13_s12, 4  }
 0x120   :  { %12 = sbr.rel (!%p10_p4) target bundleno = 1 (0x1), region = 62 }

// kernel: forward.21
= control target key start
LH: loop header
LB: loop body
LE: loop exit
PB: predicated region body
PF: predicated region fallthrough
CT: control target
= control target key end

     0   :  { %s1352_s12 = smov 0   ;;  %s1548_s0 = inlined_call_operand.vmem [shape: bf16[112,768], index: 0, kind: input, shape index: {}]   ;;  %s1549_s1 = inlined_call_operand.vmem [shape: bf16[768,128], index: 1, kind: input, shape index: {}]   ;;  %s1550_s2 = inlined_call_operand.vmem [shape: f32[1,128], index: 2, kind: input, shape index: {}]   ;;  %s1551_s3 = inlined_call_operand.vmem [shape: bf16[112,128], index: 3, kind: output, shape index: {}]  }
   0x1 LB: > { %s985_s13 = sadd.s32 4294967295, %s1330_s12   ;;  %p989_p0 = scmp.ge.s32.totalorder %s1330_s12, 1  ;;  %s1330_s12 = sphi %s1352_s12, %s13_s12  }
   0x2   : > { %p139_p1 = scmp.lt.s32.totalorder %s1330_s12, 3 }
   0x4   : > { %p140_p2 = pnand %p989_p0, %p139_p1 }
   0x5   : > { %v1243_v0 = vld [vmem:[%s1549_s1 + $0x40] sm:$0xff] (!%p140_p2)   ;;  %v1247_v4 = vld [vmem:[%s1549_s1 + $0x48] sm:$0xff] (!%p140_p2)   ;;  %v1251_v8 = vld [vmem:[%s1549_s1 + $0x50] sm:$0xff] (!%p140_p2)   ;;  %s164_s17 = smul.u32 (!%p140_p2), 7, %s985_s13 }
   0x6   : > { %143 = sbr.rel (%p140_p2) target bundleno = 302 (0x12e), region = 32  ;;  %v1244_v1 = vld [vmem:[%s1549_s1 + $0xc0] sm:$0xff] (!%p140_p2)   ;;  %1098 = vmatprep.subr.bf16.mxu0 (!%p140_p2), %v1243_v0  ;;  %v1248_v5 = vld [vmem:[%s1549_s1 + $0xc8] sm:$0xff] (!%p140_p2)   ;;  %v1252_v9 = vld [vmem:[%s1549_s1 + $0xd0] sm:$0xff] (!%p140_p2)  }
   0x7   : > { %v1245_v2 = vld [vmem:[%s1549_s1] sm:$0xff] (!%p140_p2)   ;;  %1138 = vmatprep.subr.bf16.mxu1 (!%p140_p2), %v1244_v1  ;;  %v1249_v6 = vld [vmem:[%s1549_s1 + $0x8] sm:$0xff] (!%p140_p2)   ;;  %v1253_v10 = vld [vmem:[%s1549_s1 + $0x10] sm:$0xff] (!%p140_p2)   ;;  %p165_p3 = scmp.lt.s32.totalorder (!%p140_p2), %s164_s17, 13 }
   0x8   : > { %v1246_v3 = vld [vmem:[%s1549_s1 + $0x80] sm:$0xff] (!%p140_p2)   ;;  %1099 = vmatpush3.bf16.msra.mxu0 (!%p140_p2), %v1245_v2  ;;  %v1250_v7 = vld [vmem:[%s1549_s1 + $0x88] sm:$0xff] (!%p140_p2)   ;;  %v1254_v11 = vld [vmem:[%s1549_s1 + $0x90] sm:$0xff] (!%p140_p2)  }
   0x9   : > { %1139 = vmatpush3.bf16.msra.mxu1 (!%p140_p2), %v1246_v3  ;;  %1100 = vmatprep.subr.bf16.mxu0 (!%p140_p2), %v1247_v4  ;;  %v1255_v12 = vld [vmem:[%s1549_s1 + $0x58] sm:$0xff] (!%p140_p2)   ;;  %v1259_v16 = vld [vmem:[%s1549_s1 + $0x60] sm:$0xff] (!%p140_p2)   ;;  %v1263_v20 = vld [vmem:[%s1549_s1 + $0x68] sm:$0xff] (!%p140_p2)  }
   0xa   : > { %1140 = vmatprep.subr.bf16.mxu1 (!%p140_p2), %v1248_v5  ;;  %v1256_v13 = vld [vmem:[%s1549_s1 + $0xd8] sm:$0xff] (!%p140_p2)   ;;  %v1260_v17 = vld [vmem:[%s1549_s1 + $0xe0] sm:$0xff] (!%p140_p2)   ;;  %v1264_v21 = vld [vmem:[%s1549_s1 + $0xe8] sm:$0xff] (!%p140_p2)  }
   0xb   : > { %v1257_v14 = vld [vmem:[%s1549_s1 + $0x18] sm:$0xff] (!%p140_p2)   ;;  %v1261_v18 = vld [vmem:[%s1549_s1 + $0x20] sm:$0xff] (!%p140_p2)   ;;  %v1265_v22 = vld [vmem:[%s1549_s1 + $0x28] sm:$0xff] (!%p140_p2)  }
   0xc   : > { %1101 = vmatpush3.bf16.msra.mxu0 (!%p140_p2), %v1249_v6  ;;  %v1258_v15 = vld [vmem:[%s1549_s1 + $0x98] sm:$0xff] (!%p140_p2)   ;;  %v1262_v19 = vld [vmem:[%s1549_s1 + $0xa0] sm:$0xff] (!%p140_p2)   ;;  %v1266_v23 = vld [vmem:[%s1549_s1 + $0xa8] sm:$0xff] (!%p140_p2)  }
   0xd   : > { %1141 = vmatpush3.bf16.msra.mxu1 %v1250_v7  ;;  %1102 = vmatprep.subr.bf16.mxu0 %v1251_v8  ;;  %s1553_s17 = smov (!%p165_p3, %s164_s17), 13  ;;  %v1267_v24 = vld [vmem:[%s1549_s1 + $0x70] sm:$0xff]   ;;  %v1271_v28 = vld [vmem:[%s1549_s1 + $0x78] sm:$0xff]   ;;  %v1281_v36 = vld [vmem:[%s1549_s1 + $0x140] sm:$0xff]  }
   0xe   : > { %1142 = vmatprep.subr.bf16.mxu1 %v1252_v9  ;;  %v1268_v25 = vld [vmem:[%s1549_s1 + $0xf0] sm:$0xff]   ;;  %s1234_s16 = smul.u32 24, %s1553_s17  ;;  %v1272_v29 = vld [vmem:[%s1549_s1 + $0xf8] sm:$0xff]   ;;  %v1282_v37 = vld [vmem:[%s1549_s1 + $0x100] sm:$0xff]  }
   0xf   : > { %v1269_v26 = vld [vmem:[%s1549_s1 + $0x30] sm:$0xff]   ;;  %v1273_v30 = vld [vmem:[%s1549_s1 + $0x38] sm:$0xff]   ;;  %v1283_v38 = vld [vmem:[%s1549_s1 + $0x148] sm:$0xff]  }
  0x10   : > { %1103 = vmatpush3.bf16.msra.mxu0 %v1253_v10  ;;  %v1270_v27 = vld [vmem:[%s1549_s1 + $0xb0] sm:$0xff]   ;;  %s1458_s27 = scalar_lea.vmem %s1548_s0, %s1234_s16  ;;  %v1274_v31 = vld [vmem:[%s1549_s1 + $0xb8] sm:$0xff]   ;;  %v1284_v39 = vld [vmem:[%s1549_s1 + $0x108] sm:$0xff]  }
  0x11   : > { %1143 = vmatpush3.bf16.msra.mxu1 %v1254_v11  ;;  %1104 = vmatprep.subr.bf16.mxu0 %v1255_v12  ;;  %v1275_v32 = vld [vmem:[%s1458_s27] ss:$24 sps:$4 sm:$0xff]   ;;  %v1277_v33 = vld [vmem:[%s1458_s27 + $0x4] ss:$24 sps:$4 sm:$0xff]   ;;  %v1285_v40 = vld [vmem:[%s1458_s27 + $0x34] ss:$24 sps:$4 sm:$0xff]  }
  0x12   : > { %1144 = vmatprep.subr.bf16.mxu1 %v1256_v13  ;;  %v1278_v34 = vld [vmem:[%s1458_s27 + $0x8] ss:$24 sps:$4 sm:$0xff]   ;;  %v1280_v35 = vld [vmem:[%s1458_s27 + $0xc] ss:$24 sps:$4 sm:$0xff]   ;;  %733 = vmatprep.mubr.bf16.mxu0 %v1277_v33  ;;  %v1287_v41 = vld [vmem:[%s1458_s27 + $0x3c] ss:$24 sps:$4 sm:$0xff]  }
  0x13   : > { %797 = vmatprep.mubr.bf16.mxu1 %v1280_v35  ;;  %v1289_v42 = vld [vmem:[%s1458_s27 + $0x30] ss:$24 sps:$4 sm:$0xff]   ;;  %v1293_v46 = vld [vmem:[%s1549_s1 + $0x158] sm:$0xff]   ;;  %v1297_v49 = vld [vmem:[%s1458_s27 + $0x6c] ss:$24 sps:$4 sm:$0xff]  }
  0x14   : > { %1105 = vmatpush3.bf16.msra.mxu0 %v1257_v14  ;;  %v1290_v43 = vld [vmem:[%s1458_s27 + $0x38] ss:$24 sps:$4 sm:$0xff]   ;;  %v1295_v48 = vld [vmem:[%s1458_s27 + $0x64] ss:$24 sps:$4 sm:$0xff]   ;;  %v1300_v52 = vld [vmem:[%s1458_s27 + $0x68] ss:$24 sps:$4 sm:$0xff]  }
  0x15   : > { %1145 = vmatpush3.bf16.msra.mxu1 %v1258_v15  ;;  %1106 = vmatprep.subr.bf16.mxu0 %v1259_v16  ;;  %v1291_v44 = vld [vmem:[%s1549_s1 + $0x150] sm:$0xff]   ;;  %v1294_v47 = vld [vmem:[%s1549_s1 + $0x118] sm:$0xff]   ;;  %v1301_v51 = vld [vmem:[%s1549_s1 + $0x160] sm:$0xff]  }
  0x16   : > { %1146 = vmatprep.subr.bf16.mxu1 %v1260_v17  ;;  %v1292_v45 = vld [vmem:[%s1549_s1 + $0x110] sm:$0xff]   ;;  %v1299_v50 = vld [vmem:[%s1458_s27 + $0x60] ss:$24 sps:$4 sm:$0xff]   ;;  %v1303_v54 = vld [vmem:[%s1549_s1 + $0x168] sm:$0xff]  }
  0x17   : > { %v1302_v53 = vld [vmem:[%s1549_s1 + $0x120] sm:$0xff]   ;;  %v196_v55 = vld [vmem:[%s1458_s27 + $0x90] sm:$0xff]  ;;  %v197_v56 = vld [vmem:[%s1458_s27 + $0x98] sm:$0xff] }
  0x18   : > { %1107 = vmatpush3.bf16.msra.mxu0 %v1261_v18  ;;  %v1012_v57 = vcombine.high %v196_v55, %v196_v55  ;;  %v1014_v58 = vcombine.high %v197_v56, %v197_v56  ;;  %v1304_v59 = vld [vmem:[%s1549_s1 + $0x128] sm:$0xff]   ;;  %v1309_v60 = vld [vmem:[%s1549_s1 + $0x170] sm:$0xff]   ;;  %v1011_v61 = vcombine.low %v196_v55, %v196_v55  ;;  %v1013_v62 = vcombine.low %v197_v56, %v197_v56  ;;  %v1311_v1 = vld [vmem:[%s1549_s1 + $0x178] sm:$0xff]  }
  0x19   : > { %1147 = vmatpush3.bf16.msra.mxu1 %v1262_v19  ;;  %1108 = vmatprep.subr.bf16.mxu0 %v1263_v20  ;;  %v1310_v63 = vld [vmem:[%s1549_s1 + $0x130] sm:$0xff]   ;;  %v1312_v3 = vld [vmem:[%s1549_s1 + $0x138] sm:$0xff]   ;;  %v198_v4 = vld [vmem:[%s1458_s27 + $0xa0] sm:$0xff] }
  0x1a   : > { %1148 = vmatprep.subr.bf16.mxu1 %v1264_v21  ;;  %v1315_v0 = vld [vmem:[%s1458_s27 + $0x14] ss:$24 sps:$4 sm:$0xff]   ;;  %v1313_v5 = vld [vmem:[%s1458_s27 + $0x10] ss:$24 sps:$4 sm:$0xff]   ;;  %v1319_v7 = vld [vmem:[%s1458_s27 + $0x44] ss:$24 sps:$4 sm:$0xff]   ;;  %v1016_v8 = vcombine.high %v198_v4, %v198_v4  ;;  %v1015_v10 = vcombine.low %v198_v4, %v198_v4 }
  0x1b   : > { %v1318_v2 = vld [vmem:[%s1458_s27 + $0x74] ss:$24 sps:$4 sm:$0xff]   ;;  %v1316_v6 = vld [vmem:[%s1458_s27 + $0x70] ss:$24 sps:$4 sm:$0xff]   ;;  %v1322_v9 = vld [vmem:[%s1458_s27 + $0x40] ss:$24 sps:$4 sm:$0xff]  }
  0x1c   : > { %1109 = vmatpush3.bf16.msra.mxu0 %v1265_v22  ;;  %v992_v13 = vld [vmem:[%s1550_s2] ss:$0 sm:$0xff]  ;;  %s991_s27 = sshll.u32 %s1553_s17, 2 }
  0x1d   : > { %1149 = vmatpush3.bf16.msra.mxu1 %v1266_v23  ;;  %1110 = vmatprep.subr.bf16.mxu0 %v1267_v24  ;;  %s175_s20 = scalar_lea.vmem %s1551_s3, %s991_s27 }
  0x1e   : > { %1150 = vmatprep.subr.bf16.mxu1 %v1268_v25 }
  0x20   : > { %1111 = vmatpush3.bf16.msra.mxu0 %v1269_v26 }
  0x21   : > { %1151 = vmatpush3.bf16.msra.mxu1 %v1270_v27  ;;  %1112 = vmatprep.subr.bf16.mxu0 %v1271_v28 }
  0x22   : > { %1152 = vmatprep.subr.bf16.mxu1 %v1272_v29 }
  0x24   : > { %1113 = vmatpush3.bf16.msra.mxu0 %v1273_v30 }
  0x25   : > { %1153 = vmatpush3.bf16.msra.mxu1 %v1274_v31  ;;  %1178 = vmatprep.subr.bf16.mxu0 %v1281_v36 }
  0x26   : > { %1218 = vmatprep.subr.bf16.mxu1 %v1281_v36 }
  0x27   : > { %734 = vmatmul.mubr.bf16.vlgmr.msra.gmra.mrb[0].mxu0 %v1275_v32 }
  0x28   : > { %798 = vmatmul.mubr.bf16.vlgmr.msra.gmra.mrb[0].mxu1 %v1278_v34  ;;  %1179 = vmatpush3.bf16.msra.mxu0 %v1282_v37 }
  0x29   : > { %1226 = vmatpush3.bf16.msra.mxu1 %v1282_v37  ;;  %1180 = vmatprep.subr.bf16.mxu0 %v1283_v38 }
  0x2a   : > { %1219 = vmatprep.subr.bf16.mxu1 %v1283_v38  ;;  %741 = vmatprep.mubr.bf16.mxu0 %v1285_v40 }
  0x2b   : > { %805 = vmatprep.mubr.bf16.mxu1 %v1287_v41 }
  0x2c   : > { %1181 = vmatpush3.bf16.msra.mxu0 %v1284_v39 }
  0x2d   : > { %1227 = vmatpush3.bf16.msra.mxu1 %v1284_v39  ;;  %1182 = vmatprep.subr.bf16.mxu0 %v1291_v44 }
  0x2e   : > { %1220 = vmatprep.subr.bf16.mxu1 %v1291_v44 }
  0x2f   : > { %742 = vmatmul.mubr.bf16.gmra.mrb[4].mxu0 %v1289_v42 }
  0x30   : > { %806 = vmatmul.mubr.bf16.gmra.mrb[4].mxu1 %v1290_v43  ;;  %1183 = vmatpush3.bf16.msra.mxu0 %v1292_v45 }
  0x31   : > { %1228 = vmatpush3.bf16.msra.mxu1 %v1292_v45  ;;  %1184 = vmatprep.subr.bf16.mxu0 %v1293_v46 }
  0x32   : > { %1221 = vmatprep.subr.bf16.mxu1 %v1293_v46  ;;  %749 = vmatprep.mubr.bf16.mxu0 %v1295_v48 }
  0x33   : > { %813 = vmatprep.mubr.bf16.mxu1 %v1297_v49 }
  0x34   : > { %1185 = vmatpush3.bf16.msra.mxu0 %v1294_v47 }
  0x35   : > { %1229 = vmatpush3.bf16.msra.mxu1 %v1294_v47  ;;  %1186 = vmatprep.subr.bf16.mxu0 %v1301_v51 }
  0x36   : > { %1222 = vmatprep.subr.bf16.mxu1 %v1301_v51 }
  0x37   : > { %750 = vmatmul.mubr.bf16.gmra.mrb[8].mxu0 %v1299_v50 }
  0x38   : > { %814 = vmatmul.mubr.bf16.gmra.mrb[8].mxu1 %v1300_v52  ;;  %1187 = vmatpush3.bf16.msra.mxu0 %v1302_v53 }
  0x39   : > { %1230 = vmatpush3.bf16.msra.mxu1 %v1302_v53  ;;  %1188 = vmatprep.subr.bf16.mxu0 %v1303_v54 }
  0x3a   : > { %1223 = vmatprep.subr.bf16.mxu1 %v1303_v54  ;;  %757 = vmatprep.mubr.bf16.mxu0 %v1012_v57 }
  0x3b   : > { %821 = vmatprep.mubr.bf16.mxu1 %v1014_v58 }
  0x3c   : > { %1189 = vmatpush3.bf16.msra.mxu0 %v1304_v59 }
  0x3d   : > { %1231 = vmatpush3.bf16.msra.mxu1 %v1304_v59  ;;  %1190 = vmatprep.subr.bf16.mxu0 %v1309_v60 }
  0x3e   : > { %1224 = vmatprep.subr.bf16.mxu1 %v1309_v60 }
  0x3f   : > { %758 = vmatmul.mubr.bf16.gmra.mrb[12].mxu0 %v1011_v61 }
  0x40   : > { %822 = vmatmul.mubr.bf16.gmra.mrb[12].mxu1 %v1013_v62  ;;  %861 = vmatprep.mubr.bf16.mxu0 %v1315_v0 }
  0x41   : > { %1191 = vmatpush3.bf16.msra.mxu0 %v1310_v63  ;;  %877 = vmatprep.mubr.bf16.mxu1 %v1318_v2 }
  0x42   : > { %1232 = vmatpush3.bf16.msra.mxu1 %v1310_v63  ;;  %1192 = vmatprep.subr.bf16.mxu0 %v1311_v1 }
  0x43   : > { %1225 = vmatprep.subr.bf16.mxu1 %v1311_v1 }
  0x45   : > { %1193 = vmatpush3.bf16.msra.mxu0 %v1312_v3 }
  0x46   : > { %1233 = vmatpush3.bf16.msra.mxu1 %v1312_v3 }
  0x48   : > { %862 = vmatmul.mubr.bf16.vlgmr.msra.gmra.mrb[16].mxu0 %v1313_v5 }
  0x49   : > { %878 = vmatmul.mubr.bf16.vlgmr.msra.gmra.mrb[16].mxu1 %v1316_v6  ;;  %869 = vmatprep.mubr.bf16.mxu0 %v1319_v7 }
  0x4a   : > { %885 = vmatprep.mubr.bf16.mxu1 %v1016_v8 }
  0x50   : > { %870 = vmatmul.mubr.bf16.gmra.mrb[20].mxu0 %v1322_v9 }
  0x51   : > { %886 = vmatmul.mubr.bf16.gmra.mrb[20].mxu1 %v1015_v10 }
  0xfa   : > { %v1114_v11 = vpop.f32.mrb[0].mxu0 }
  0xfb   : > { %v1154_v12 = vpop.f32.mrb[0].mxu1  ;;  %v1115_v14 = vpop.f32.mrb[1].mxu0 }
  0xfc   : > { %v1116_v15 = vadd.f32 %v1115_v14, %v1114_v11  ;;  %v1155_v16 = vpop.f32.mrb[1].mxu1  ;;  %v1117_v17 = vpop.f32.mrb[2].mxu0 }
  0xfd   : > { %v1156_v18 = vadd.f32 %v1155_v16, %v1154_v12  ;;  %v1157_v19 = vpop.f32.mrb[2].mxu1  ;;  %v1118_v20 = vpop.f32.mrb[3].mxu0 }
  0xfe   : > { %v736_v21 = vadd.f32 %v1116_v15, %v992_v13  ;;  %v1119_v22 = vadd.f32 %v1118_v20, %v1117_v17  ;;  %v1158_v23 = vpop.f32.mrb[3].mxu1 }
  0xff   : > { %v1159_v24 = vadd.f32 %v1158_v23, %v1157_v19 }
 0x100   : > { %v800_v25 = vadd.f32 %v1156_v18, %v736_v21  ;;  %v739_v26 = vadd.f32 %v1119_v22, %v992_v13 }
 0x102   : > { %v803_v27 = vadd.f32 %v1159_v24, %v739_v26  ;;  %v1120_v28 = vpop.f32.mrb[4].mxu0 }
 0x103   : > { %v1160_v29 = vpop.f32.mrb[4].mxu1  ;;  %v1121_v30 = vpop.f32.mrb[5].mxu0 }
 0x104   : > { %v1122_v31 = vadd.f32 %v1121_v30, %v1120_v28  ;;  %v1161_v32 = vpop.f32.mrb[5].mxu1  ;;  %v1123_v33 = vpop.f32.mrb[6].mxu0 }
 0x105   : > { %v1162_v34 = vadd.f32 %v1161_v32, %v1160_v29  ;;  %v1163_v35 = vpop.f32.mrb[6].mxu1  ;;  %v1124_v36 = vpop.f32.mrb[7].mxu0 }
 0x106   : > { %v744_v37 = vadd.f32 %v1122_v31, %v992_v13  ;;  %v1125_v38 = vadd.f32 %v1124_v36, %v1123_v33  ;;  %v1164_v39 = vpop.f32.mrb[7].mxu1 }
 0x107   : > { %v1165_v40 = vadd.f32 %v1164_v39, %v1163_v35 }
 0x108   : > { %v808_v41 = vadd.f32 %v1162_v34, %v744_v37  ;;  %v747_v42 = vadd.f32 %v1125_v38, %v992_v13 }
 0x10a   : > { %v1538_v43 = vadd.f32 %v1165_v40, %v747_v42  ;;  %v1126_v44 = vpop.f32.mrb[8].mxu0 }
 0x10b   : > { %v1166_v45 = vpop.f32.mrb[8].mxu1  ;;  %v1127_v46 = vpop.f32.mrb[9].mxu0 }
 0x10c   : > { %v1128_v47 = vadd.f32 %v1127_v46, %v1126_v44  ;;  %v1167_v48 = vpop.f32.mrb[9].mxu1  ;;  %v1129_v49 = vpop.f32.mrb[10].mxu0 }
 0x10d   : > { %v1168_v50 = vadd.f32 %v1167_v48, %v1166_v45  ;;  %v1169_v51 = vpop.f32.mrb[10].mxu1  ;;  %v1130_v52 = vpop.f32.mrb[11].mxu0 }
 0x10e   : > { %v752_v53 = vadd.f32 %v1128_v47, %v992_v13  ;;  %v1131_v54 = vadd.f32 %v1130_v52, %v1129_v49  ;;  %v1170_v55 = vpop.f32.mrb[11].mxu1 }
 0x10f   : > { %v1171_v56 = vadd.f32 %v1170_v55, %v1169_v51 }
 0x110   : > { %v816_v57 = vadd.f32 %v1168_v50, %v752_v53  ;;  %v755_v58 = vadd.f32 %v1131_v54, %v992_v13 }
 0x112   : > { %v819_v59 = vadd.f32 %v1171_v56, %v755_v58  ;;  %v1132_v60 = vpop.f32.mrb[12].mxu0 }
 0x113   : > { %v1172_v61 = vpop.f32.mrb[12].mxu1  ;;  %v1133_v62 = vpop.f32.mrb[13].mxu0 }
 0x114   : > { %v1134_v63 = vadd.f32 %v1133_v62, %v1132_v60  ;;  %v1173_v0 = vpop.f32.mrb[13].mxu1  ;;  %v1135_v1 = vpop.f32.mrb[14].mxu0 }
 0x115   : > { %v1174_v2 = vadd.f32 %v1173_v0, %v1172_v61  ;;  %v1175_v3 = vpop.f32.mrb[14].mxu1  ;;  %v1136_v4 = vpop.f32.mrb[15].mxu0 }
 0x116   : > { %v760_v5 = vadd.f32 %v1134_v63, %v992_v13  ;;  %v1176_v6 = vpop.f32.mrb[15].mxu1 }
 0x118   : > { %v824_v7 = vadd.f32 %v1174_v2, %v760_v5 }
 0x11b   : > { %v1194_v8 = vpop.f32.mrb[16].mxu0 }
 0x11c   : > { %v1206_v9 = vpop.f32.mrb[16].mxu1  ;;  %v1195_v10 = vpop.f32.mrb[17].mxu0 }
 0x11d   : > { %v1196_v11 = vadd.f32 %v1195_v10, %v1194_v8  ;;  %v1207_v12 = vpop.f32.mrb[17].mxu1  ;;  %v1197_v14 = vpop.f32.mrb[18].mxu0 }
 0x11e   : > { %v1208_v15 = vadd.f32 %v1207_v12, %v1206_v9  ;;  %v1209_v16 = vpop.f32.mrb[18].mxu1  ;;  %v1198_v17 = vpop.f32.mrb[19].mxu0 }
 0x11f   : > { %v864_v18 = vadd.f32 %v1196_v11, %v800_v25  ;;  %v1199_v19 = vadd.f32 %v1198_v17, %v1197_v14  ;;  %v1210_v20 = vpop.f32.mrb[19].mxu1 }
 0x120   : > { %v880_v21 = vadd.f32 %v1208_v15, %v816_v57  ;;  %v1211_v22 = vadd.f32 %v1210_v20, %v1209_v16 }
 0x121   : > { %v867_v23 = vadd.f32 %v1199_v19, %v803_v27 }
 0x122   : > { %v883_v13 = vadd.f32 %v1211_v22, %v819_v59 }
 0x123   : > { %v1084_v24 = vpack.c.bf16 %v867_v23, %v864_v18  ;;  %v1200_v26 = vpop.f32.mrb[20].mxu0 }
 0x124   : > { %v1094_v28 = vpack.c.bf16 %v883_v13, %v880_v21  ;;  %v1212_v29 = vpop.f32.mrb[20].mxu1  ;;  %v1201_v30 = vpop.f32.mrb[21].mxu0 }
 0x125   : > { %1085 = vst [vmem:[%s175_s20] sm:$0xff] %v1084_v24   ;;  %v1202_v31 = vadd.f32 %v1201_v30, %v1200_v26  ;;  %v1213_v32 = vpop.f32.mrb[21].mxu1  ;;  %v1203_v25 = vpop.f32.mrb[22].mxu0 }
 0x126   : > { %1097 = vst [vmem:[%s175_s20 + $0x10] sm:$0xff] %v1094_v28   ;;  %v1214_v33 = vadd.f32 %v1213_v32, %v1212_v29  ;;  %v1215_v34 = vpop.f32.mrb[22].mxu1  ;;  %v1204_v35 = vpop.f32.mrb[23].mxu0 }
 0x127   : > { %v872_v36 = vadd.f32 %v1202_v31, %v808_v41  ;;  %v1205_v27 = vadd.f32 %v1204_v35, %v1203_v25  ;;  %v1216_v37 = vpop.f32.mrb[23].mxu1 }
 0x128   : > { %v888_v38 = vadd.f32 %v1214_v33, %v824_v7 }
 0x129   : > { %v875_v39 = vadd.f32 %v1205_v27, %v1538_v43 }
 0x12a   : > { %v1080_v40 = vpack.c.bf16 %v888_v38, %v888_v38 }
 0x12b   : > { %v1089_v42 = vpack.c.bf16 %v875_v39, %v872_v36 }
 0x12c   : > { %928 = vst [vmem:[%s175_s20 + $0x18] sm:$0xf] %v1080_v40 }
 0x12d   : > { %1096 = vst [vmem:[%s175_s20 + $0x8] sm:$0xff] %v1089_v42  }
 0x12e PF: > { %s13_s12 = sadd.s32 1, %s1330_s12  }
 0x12f   : > { %p10_p4 = scmp.ge.s32.totalorder %s13_s12, 4  }
 0x131   :  { %12 = sbr.rel (!%p10_p4) target bundleno = 1 (0x1), region = 62 }

// kernel: forward.19
= control target key start
LH: loop header
LB: loop body
LE: loop exit
PB: predicated region body
PF: predicated region fallthrough
CT: control target
= control target key end

     0   :  { %s1896_s12 = smov 0   ;;  %s2172_s0 = inlined_call_operand.vmem [shape: bf16[112,1152], index: 0, kind: input, shape index: {}]   ;;  %s2173_s1 = inlined_call_operand.vmem [shape: bf16[1152,128], index: 1, kind: input, shape index: {}]   ;;  %s2174_s2 = inlined_call_operand.vmem [shape: f32[1,128], index: 2, kind: input, shape index: {}]   ;;  %s2175_s3 = inlined_call_operand.vmem [shape: bf16[112,128], index: 3, kind: output, shape index: {}]  }
   0x1 LB: > { %s1378_s13 = sadd.s32 4294967295, %s1874_s12   ;;  %p1382_p0 = scmp.ge.s32.totalorder %s1874_s12, 1  ;;  %s1874_s12 = sphi %s1896_s12, %s13_s12  }
   0x2   : > { %p139_p1 = scmp.lt.s32.totalorder %s1874_s12, 3 }
   0x4   : > { %p140_p2 = pnand %p1382_p0, %p139_p1 }
   0x5   : > { %v1748_v0 = vld [vmem:[%s2173_s1 + $0x40] sm:$0xff] (!%p140_p2)   ;;  %v1752_v4 = vld [vmem:[%s2173_s1 + $0x48] sm:$0xff] (!%p140_p2)   ;;  %v1756_v8 = vld [vmem:[%s2173_s1 + $0x50] sm:$0xff] (!%p140_p2)   ;;  %s164_s17 = smul.u32 (!%p140_p2), 7, %s1378_s13 }
   0x6   : > { %143 = sbr.rel (%p140_p2) target bundleno = 325 (0x145), region = 32  ;;  %v1749_v1 = vld [vmem:[%s2173_s1 + $0xc0] sm:$0xff] (!%p140_p2)   ;;  %1527 = vmatprep.subr.bf16.mxu0 (!%p140_p2), %v1748_v0  ;;  %v1753_v5 = vld [vmem:[%s2173_s1 + $0xc8] sm:$0xff] (!%p140_p2)   ;;  %v1757_v9 = vld [vmem:[%s2173_s1 + $0xd0] sm:$0xff] (!%p140_p2)  }
   0x7   : > { %v1750_v2 = vld [vmem:[%s2173_s1] sm:$0xff] (!%p140_p2)   ;;  %1567 = vmatprep.subr.bf16.mxu1 (!%p140_p2), %v1749_v1  ;;  %v1754_v6 = vld [vmem:[%s2173_s1 + $0x8] sm:$0xff] (!%p140_p2)   ;;  %v1758_v10 = vld [vmem:[%s2173_s1 + $0x10] sm:$0xff] (!%p140_p2)   ;;  %p165_p3 = scmp.lt.s32.totalorder (!%p140_p2), %s164_s17, 13 }
   0x8   : > { %v1751_v3 = vld [vmem:[%s2173_s1 + $0x80] sm:$0xff] (!%p140_p2)   ;;  %1528 = vmatpush3.bf16.msra.mxu0 (!%p140_p2), %v1750_v2  ;;  %v1755_v7 = vld [vmem:[%s2173_s1 + $0x88] sm:$0xff] (!%p140_p2)   ;;  %v1759_v11 = vld [vmem:[%s2173_s1 + $0x90] sm:$0xff] (!%p140_p2)  }
   0x9   : > { %1568 = vmatpush3.bf16.msra.mxu1 (!%p140_p2), %v1751_v3  ;;  %1529 = vmatprep.subr.bf16.mxu0 (!%p140_p2), %v1752_v4  ;;  %v1760_v12 = vld [vmem:[%s2173_s1 + $0x58] sm:$0xff] (!%p140_p2)   ;;  %v1764_v16 = vld [vmem:[%s2173_s1 + $0x60] sm:$0xff] (!%p140_p2)   ;;  %v1768_v20 = vld [vmem:[%s2173_s1 + $0x68] sm:$0xff] (!%p140_p2)  }
   0xa   : > { %1569 = vmatprep.subr.bf16.mxu1 (!%p140_p2), %v1753_v5  ;;  %v1761_v13 = vld [vmem:[%s2173_s1 + $0xd8] sm:$0xff] (!%p140_p2)   ;;  %v1765_v17 = vld [vmem:[%s2173_s1 + $0xe0] sm:$0xff] (!%p140_p2)   ;;  %v1769_v21 = vld [vmem:[%s2173_s1 + $0xe8] sm:$0xff] (!%p140_p2)  }
   0xb   : > { %v1762_v14 = vld [vmem:[%s2173_s1 + $0x18] sm:$0xff] (!%p140_p2)   ;;  %v1766_v18 = vld [vmem:[%s2173_s1 + $0x20] sm:$0xff] (!%p140_p2)   ;;  %v1770_v22 = vld [vmem:[%s2173_s1 + $0x28] sm:$0xff] (!%p140_p2)  }
   0xc   : > { %1530 = vmatpush3.bf16.msra.mxu0 (!%p140_p2), %v1754_v6  ;;  %v1763_v15 = vld [vmem:[%s2173_s1 + $0x98] sm:$0xff] (!%p140_p2)   ;;  %v1767_v19 = vld [vmem:[%s2173_s1 + $0xa0] sm:$0xff] (!%p140_p2)   ;;  %v1771_v23 = vld [vmem:[%s2173_s1 + $0xa8] sm:$0xff] (!%p140_p2)  }
   0xd   : > { %1570 = vmatpush3.bf16.msra.mxu1 %v1755_v7  ;;  %1531 = vmatprep.subr.bf16.mxu0 %v1756_v8  ;;  %s2177_s17 = smov (!%p165_p3, %s164_s17), 13  ;;  %v1772_v24 = vld [vmem:[%s2173_s1 + $0x70] sm:$0xff]   ;;  %v1776_v28 = vld [vmem:[%s2173_s1 + $0x78] sm:$0xff]   ;;  %v1786_v36 = vld [vmem:[%s2173_s1 + $0x140] sm:$0xff]  }
   0xe   : > { %1571 = vmatprep.subr.bf16.mxu1 %v1757_v9  ;;  %v1773_v25 = vld [vmem:[%s2173_s1 + $0xf0] sm:$0xff]   ;;  %s1739_s16 = smul.u32 36, %s2177_s17  ;;  %v1777_v29 = vld [vmem:[%s2173_s1 + $0xf8] sm:$0xff]   ;;  %v1787_v37 = vld [vmem:[%s2173_s1 + $0x1c0] sm:$0xff]  }
   0xf   : > { %v1774_v26 = vld [vmem:[%s2173_s1 + $0x30] sm:$0xff]   ;;  %v1778_v30 = vld [vmem:[%s2173_s1 + $0x38] sm:$0xff]   ;;  %v1788_v38 = vld [vmem:[%s2173_s1 + $0x100] sm:$0xff]  }
  0x10   : > { %1532 = vmatpush3.bf16.msra.mxu0 %v1758_v10  ;;  %v1775_v27 = vld [vmem:[%s2173_s1 + $0xb0] sm:$0xff]   ;;  %s2002_s27 = scalar_lea.vmem %s2172_s0, %s1739_s16  ;;  %v1779_v31 = vld [vmem:[%s2173_s1 + $0xb8] sm:$0xff]   ;;  %v1789_v39 = vld [vmem:[%s2173_s1 + $0x180] sm:$0xff]  }
  0x11   : > { %1572 = vmatpush3.bf16.msra.mxu1 %v1759_v11  ;;  %1533 = vmatprep.subr.bf16.mxu0 %v1760_v12  ;;  %v1780_v32 = vld [vmem:[%s2002_s27] ss:$36 sps:$4 sm:$0xff]   ;;  %v1783_v34 = vld [vmem:[%s2002_s27 + $0x8] ss:$36 sps:$4 sm:$0xff]   ;;  %v1796_v45 = vld [vmem:[%s2002_s27 + $0x54] ss:$36 sps:$4 sm:$0xff]  }
  0x12   : > { %1573 = vmatprep.subr.bf16.mxu1 %v1761_v13  ;;  %v1782_v33 = vld [vmem:[%s2002_s27 + $0x4] ss:$36 sps:$4 sm:$0xff]   ;;  %v1785_v35 = vld [vmem:[%s2002_s27 + $0xc] ss:$36 sps:$4 sm:$0xff]   ;;  %v1804_v52 = vld [vmem:[%s2173_s1 + $0x158] sm:$0xff]  }
  0x13   : > { %998 = vmatprep.mubr.bf16.mxu0 %v1782_v33  ;;  %1062 = vmatprep.mubr.bf16.mxu1 %v1785_v35  ;;  %v1790_v40 = vld [vmem:[%s2173_s1 + $0x148] sm:$0xff]   ;;  %v1799_v47 = vld [vmem:[%s2002_s27 + $0x50] ss:$36 sps:$4 sm:$0xff]   ;;  %v1805_v53 = vld [vmem:[%s2173_s1 + $0x1d8] sm:$0xff]  }
  0x14   : > { %1534 = vmatpush3.bf16.msra.mxu0 %v1762_v14  ;;  %v1791_v41 = vld [vmem:[%s2173_s1 + $0x1c8] sm:$0xff]   ;;  %v1800_v48 = vld [vmem:[%s2173_s1 + $0x150] sm:$0xff]   ;;  %v1806_v54 = vld [vmem:[%s2173_s1 + $0x118] sm:$0xff]  }
  0x15   : > { %1574 = vmatpush3.bf16.msra.mxu1 %v1763_v15  ;;  %1535 = vmatprep.subr.bf16.mxu0 %v1764_v16  ;;  %v1792_v42 = vld [vmem:[%s2173_s1 + $0x108] sm:$0xff]   ;;  %v1801_v49 = vld [vmem:[%s2173_s1 + $0x1d0] sm:$0xff]   ;;  %v1807_v55 = vld [vmem:[%s2173_s1 + $0x198] sm:$0xff]  }
  0x16   : > { %1575 = vmatprep.subr.bf16.mxu1 %v1765_v17  ;;  %v1793_v43 = vld [vmem:[%s2173_s1 + $0x188] sm:$0xff]   ;;  %v1802_v50 = vld [vmem:[%s2173_s1 + $0x110] sm:$0xff]   ;;  %v1810_v57 = vld [vmem:[%s2002_s27 + $0x9c] ss:$36 sps:$4 sm:$0xff]  }
  0x17   : > { %v1794_v44 = vld [vmem:[%s2002_s27 + $0x4c] ss:$36 sps:$4 sm:$0xff]   ;;  %v1808_v56 = vld [vmem:[%s2002_s27 + $0x94] ss:$36 sps:$4 sm:$0xff]   ;;  %v1814_v60 = vld [vmem:[%s2173_s1 + $0x160] sm:$0xff]  }
  0x18   : > { %1536 = vmatpush3.bf16.msra.mxu0 %v1766_v18  ;;  %v1798_v46 = vld [vmem:[%s2002_s27 + $0x48] ss:$36 sps:$4 sm:$0xff]   ;;  %v1803_v51 = vld [vmem:[%s2173_s1 + $0x190] sm:$0xff]   ;;  %v1813_v59 = vld [vmem:[%s2002_s27 + $0x98] ss:$36 sps:$4 sm:$0xff]  }
  0x19   : > { %1576 = vmatpush3.bf16.msra.mxu1 %v1767_v19  ;;  %1537 = vmatprep.subr.bf16.mxu0 %v1768_v20  ;;  %v1812_v58 = vld [vmem:[%s2002_s27 + $0x90] ss:$36 sps:$4 sm:$0xff]   ;;  %v1815_v61 = vld [vmem:[%s2173_s1 + $0x1e0] sm:$0xff]   ;;  %v1818_v0 = vld [vmem:[%s2173_s1 + $0x168] sm:$0xff]  }
  0x1a   : > { %1577 = vmatprep.subr.bf16.mxu1 %v1769_v21  ;;  %v1816_v62 = vld [vmem:[%s2173_s1 + $0x120] sm:$0xff]   ;;  %v1819_v1 = vld [vmem:[%s2173_s1 + $0x1e8] sm:$0xff]   ;;  %v208_v4 = vld [vmem:[%s2002_s27 + $0xd8] sm:$0xff] }
  0x1b   : > { %v1817_v63 = vld [vmem:[%s2173_s1 + $0x1a0] sm:$0xff]   ;;  %v1820_v2 = vld [vmem:[%s2173_s1 + $0x128] sm:$0xff]   ;;  %v1414_v6 = vcombine.high %v208_v4, %v208_v4  ;;  %v1413_v8 = vcombine.low %v208_v4, %v208_v4  ;;  %v1826_v10 = vld [vmem:[%s2173_s1 + $0x170] sm:$0xff]  }
  0x1c   : > { %1538 = vmatpush3.bf16.msra.mxu0 %v1770_v22  ;;  %v1821_v3 = vld [vmem:[%s2173_s1 + $0x1a8] sm:$0xff]   ;;  %v209_v5 = vld [vmem:[%s2002_s27 + $0xe0] sm:$0xff]  ;;  %v1827_v11 = vld [vmem:[%s2173_s1 + $0x1f0] sm:$0xff]  }
  0x1d   : > { %1578 = vmatpush3.bf16.msra.mxu1 %v1771_v23  ;;  %1539 = vmatprep.subr.bf16.mxu0 %v1772_v24  ;;  %v1416_v7 = vcombine.high %v209_v5, %v209_v5  ;;  %v1415_v9 = vcombine.low %v209_v5, %v209_v5  ;;  %v1828_v12 = vld [vmem:[%s2173_s1 + $0x130] sm:$0xff]   ;;  %v1830_v14 = vld [vmem:[%s2173_s1 + $0x178] sm:$0xff]   ;;  %v1840_v22 = vld [vmem:[%s2173_s1 + $0x200] sm:$0xff]  }
  0x1e   : > { %1579 = vmatprep.subr.bf16.mxu1 %v1773_v25  ;;  %v1829_v13 = vld [vmem:[%s2173_s1 + $0x1b0] sm:$0xff]   ;;  %v1831_v15 = vld [vmem:[%s2173_s1 + $0x1f8] sm:$0xff]   ;;  %v1841_v23 = vld [vmem:[%s2173_s1 + $0x208] sm:$0xff]  }
  0x1f   : > { %v1832_v16 = vld [vmem:[%s2173_s1 + $0x138] sm:$0xff]   ;;  %v1834_v18 = vld [vmem:[%s2002_s27 + $0x10] ss:$36 sps:$4 sm:$0xff]   ;;  %v1844_v25 = vld [vmem:[%s2002_s27 + $0x64] ss:$36 sps:$4 sm:$0xff]  }
  0x20   : > { %1540 = vmatpush3.bf16.msra.mxu0 %v1774_v26  ;;  %v1833_v17 = vld [vmem:[%s2173_s1 + $0x1b8] sm:$0xff]   ;;  %v210_v33 = vld [vmem:[%s2002_s27 + $0xe8] sm:$0xff]  ;;  %v1854_v35 = vld [vmem:[%s2002_s27 + $0xa0] ss:$36 sps:$4 sm:$0xff]  }
  0x21   : > { %1580 = vmatpush3.bf16.msra.mxu1 %v1775_v27  ;;  %1541 = vmatprep.subr.bf16.mxu0 %v1776_v28  ;;  %v1836_v19 = vld [vmem:[%s2002_s27 + $0x14] ss:$36 sps:$4 sm:$0xff]   ;;  %v1839_v21 = vld [vmem:[%s2002_s27 + $0x1c] ss:$36 sps:$4 sm:$0xff]  }
  0x22   : > { %1581 = vmatprep.subr.bf16.mxu1 %v1777_v29  ;;  %v1837_v20 = vld [vmem:[%s2002_s27 + $0x18] ss:$36 sps:$4 sm:$0xff]   ;;  %v1848_v27 = vld [vmem:[%s2173_s1 + $0x210] sm:$0xff]   ;;  %v1847_v28 = vld [vmem:[%s2002_s27 + $0x60] ss:$36 sps:$4 sm:$0xff]  }
  0x23   : > { %v1842_v24 = vld [vmem:[%s2002_s27 + $0x5c] ss:$36 sps:$4 sm:$0xff]   ;;  %v1850_v29 = vld [vmem:[%s2002_s27 + $0xa4] ss:$36 sps:$4 sm:$0xff]  }
  0x24   : > { %1542 = vmatpush3.bf16.msra.mxu0 %v1778_v30  ;;  %v1846_v26 = vld [vmem:[%s2002_s27 + $0x58] ss:$36 sps:$4 sm:$0xff]   ;;  %v1852_v30 = vld [vmem:[%s2002_s27 + $0xac] ss:$36 sps:$4 sm:$0xff]  }
  0x25   : > { %1582 = vmatpush3.bf16.msra.mxu1 %v1779_v31  ;;  %1607 = vmatprep.subr.bf16.mxu0 %v1786_v36  ;;  %v1849_v31 = vld [vmem:[%s2173_s1 + $0x218] sm:$0xff]   ;;  %v1855_v36 = vld [vmem:[%s2002_s27 + $0xa8] ss:$36 sps:$4 sm:$0xff]  }
  0x26   : > { %1647 = vmatprep.subr.bf16.mxu1 %v1787_v37  ;;  %v1418_v37 = vcombine.high %v210_v33, %v210_v33 }
  0x27   : > { %999 = vmatmul.mubr.bf16.vlgmr.msra.gmra.mrb[0].mxu0 %v1780_v32  ;;  %v1856_v32 = vld [vmem:[%s2173_s1 + $0x220] sm:$0xff]  }
  0x28   : > { %1063 = vmatmul.mubr.bf16.vlgmr.msra.gmra.mrb[0].mxu1 %v1783_v34  ;;  %1608 = vmatpush3.bf16.msra.mxu0 %v1788_v38  ;;  %v211_v34 = vld [vmem:[%s2002_s27 + $0xf0] sm:$0xff] }
  0x29   : > { %1648 = vmatpush3.bf16.msra.mxu1 %v1789_v39  ;;  %1609 = vmatprep.subr.bf16.mxu0 %v1790_v40  ;;  %v1420_v38 = vcombine.high %v211_v34, %v211_v34  ;;  %v1857_v39 = vld [vmem:[%s2173_s1 + $0x228] sm:$0xff]   ;;  %v1862_v40 = vld [vmem:[%s2173_s1 + $0x230] sm:$0xff]  }
  0x2a   : > { %1649 = vmatprep.subr.bf16.mxu1 %v1791_v41  ;;  %1006 = vmatprep.mubr.bf16.mxu0 %v1794_v44  ;;  %v1417_v41 = vcombine.low %v210_v33, %v210_v33  ;;  %v1865_v44 = vld [vmem:[%s2002_s27 + $0xb0] ss:$36 sps:$4 sm:$0xff]  }
  0x2b   : > { %1070 = vmatprep.mubr.bf16.mxu1 %v1796_v45  ;;  %v1863_v45 = vld [vmem:[%s2173_s1 + $0x238] sm:$0xff]  }
  0x2c   : > { %1610 = vmatpush3.bf16.msra.mxu0 %v1792_v42  ;;  %v1419_v42 = vcombine.low %v211_v34, %v211_v34 }
  0x2d   : > { %1650 = vmatpush3.bf16.msra.mxu1 %v1793_v43  ;;  %1611 = vmatprep.subr.bf16.mxu0 %v1800_v48  ;;  %v1864_v43 = vld [vmem:[%s2002_s27 + $0x20] ss:$36 sps:$4 sm:$0xff]  }
  0x2e   : > { %1651 = vmatprep.subr.bf16.mxu1 %v1801_v49 }
  0x2f   : > { %1007 = vmatmul.mubr.bf16.gmra.mrb[4].mxu0 %v1798_v46  ;;  %v1866_v46 = vld [vmem:[%s2002_s27 + $0x68] ss:$36 sps:$4 sm:$0xff]  }
  0x30   : > { %1071 = vmatmul.mubr.bf16.gmra.mrb[4].mxu1 %v1799_v47  ;;  %1612 = vmatpush3.bf16.msra.mxu0 %v1802_v50  ;;  %v1867_v47 = vld [vmem:[%s2002_s27 + $0xf8] ss:$0 sps:$4 sm:$0xff]   ;;  %v1385_v50 = vld [vmem:[%s2174_s2] ss:$0 sm:$0xff]  ;;  %s1384_s27 = sshll.u32 %s2177_s17, 2 }
  0x31   : > { %1652 = vmatpush3.bf16.msra.mxu1 %v1803_v51  ;;  %1613 = vmatprep.subr.bf16.mxu0 %v1804_v52  ;;  %s175_s20 = scalar_lea.vmem %s2175_s3, %s1384_s27 }
  0x32   : > { %1653 = vmatprep.subr.bf16.mxu1 %v1805_v53  ;;  %1014 = vmatprep.mubr.bf16.mxu0 %v1808_v56 }
  0x33   : > { %1078 = vmatprep.mubr.bf16.mxu1 %v1810_v57 }
  0x34   : > { %1614 = vmatpush3.bf16.msra.mxu0 %v1806_v54 }
  0x35   : > { %1654 = vmatpush3.bf16.msra.mxu1 %v1807_v55  ;;  %1615 = vmatprep.subr.bf16.mxu0 %v1814_v60 }
  0x36   : > { %1655 = vmatprep.subr.bf16.mxu1 %v1815_v61 }
  0x37   : > { %1015 = vmatmul.mubr.bf16.gmra.mrb[8].mxu0 %v1812_v58 }
  0x38   : > { %1079 = vmatmul.mubr.bf16.gmra.mrb[8].mxu1 %v1813_v59  ;;  %1616 = vmatpush3.bf16.msra.mxu0 %v1816_v62 }
  0x39   : > { %1656 = vmatpush3.bf16.msra.mxu1 %v1817_v63  ;;  %1617 = vmatprep.subr.bf16.mxu0 %v1818_v0 }
  0x3a   : > { %1657 = vmatprep.subr.bf16.mxu1 %v1819_v1  ;;  %1022 = vmatprep.mubr.bf16.mxu0 %v1414_v6 }
  0x3b   : > { %1086 = vmatprep.mubr.bf16.mxu1 %v1416_v7 }
  0x3c   : > { %1618 = vmatpush3.bf16.msra.mxu0 %v1820_v2 }
  0x3d   : > { %1658 = vmatpush3.bf16.msra.mxu1 %v1821_v3  ;;  %1619 = vmatprep.subr.bf16.mxu0 %v1826_v10 }
  0x3e   : > { %1659 = vmatprep.subr.bf16.mxu1 %v1827_v11 }
  0x3f   : > { %1023 = vmatmul.mubr.bf16.gmra.mrb[12].mxu0 %v1413_v8 }
  0x40   : > { %1087 = vmatmul.mubr.bf16.gmra.mrb[12].mxu1 %v1415_v9  ;;  %1620 = vmatpush3.bf16.msra.mxu0 %v1828_v12 }
  0x41   : > { %1660 = vmatpush3.bf16.msra.mxu1 %v1829_v13  ;;  %1621 = vmatprep.subr.bf16.mxu0 %v1830_v14 }
  0x42   : > { %1661 = vmatprep.subr.bf16.mxu1 %v1831_v15  ;;  %1126 = vmatprep.mubr.bf16.mxu0 %v1836_v19 }
  0x43   : > { %1190 = vmatprep.mubr.bf16.mxu1 %v1839_v21 }
  0x44   : > { %1622 = vmatpush3.bf16.msra.mxu0 %v1832_v16 }
  0x45   : > { %1662 = vmatpush3.bf16.msra.mxu1 %v1833_v17  ;;  %1699 = vmatprep.subr.bf16.mxu0 %v1840_v22 }
  0x46   : > { %1723 = vmatprep.subr.bf16.mxu1 %v1840_v22 }
  0x47   : > { %1127 = vmatmul.mubr.bf16.vlgmr.msra.gmra.mrb[16].mxu0 %v1834_v18 }
  0x48   : > { %1191 = vmatmul.mubr.bf16.vlgmr.msra.gmra.mrb[16].mxu1 %v1837_v20  ;;  %1700 = vmatpush3.bf16.msra.mxu0 %v1840_v22 }
  0x49   : > { %1731 = vmatpush3.bf16.msra.mxu1 %v1840_v22  ;;  %1701 = vmatprep.subr.bf16.mxu0 %v1841_v23 }
  0x4a   : > { %1724 = vmatprep.subr.bf16.mxu1 %v1841_v23  ;;  %1134 = vmatprep.mubr.bf16.mxu0 %v1842_v24 }
  0x4b   : > { %1198 = vmatprep.mubr.bf16.mxu1 %v1844_v25 }
  0x4c   : > { %1702 = vmatpush3.bf16.msra.mxu0 %v1841_v23 }
  0x4d   : > { %1732 = vmatpush3.bf16.msra.mxu1 %v1841_v23  ;;  %1703 = vmatprep.subr.bf16.mxu0 %v1848_v27 }
  0x4e   : > { %1725 = vmatprep.subr.bf16.mxu1 %v1848_v27 }
  0x4f   : > { %1135 = vmatmul.mubr.bf16.gmra.mrb[20].mxu0 %v1846_v26 }
  0x50   : > { %1199 = vmatmul.mubr.bf16.gmra.mrb[20].mxu1 %v1847_v28  ;;  %1142 = vmatprep.mubr.bf16.mxu0 %v1850_v29 }
  0x51   : > { %1704 = vmatpush3.bf16.msra.mxu0 %v1848_v27  ;;  %1206 = vmatprep.mubr.bf16.mxu1 %v1852_v30 }
  0x52   : > { %1733 = vmatpush3.bf16.msra.mxu1 %v1848_v27  ;;  %1705 = vmatprep.subr.bf16.mxu0 %v1849_v31 }
  0x53   : > { %1726 = vmatprep.subr.bf16.mxu1 %v1849_v31 }
  0x55   : > { %1706 = vmatpush3.bf16.msra.mxu0 %v1849_v31 }
  0x56   : > { %1734 = vmatpush3.bf16.msra.mxu1 %v1849_v31  ;;  %1707 = vmatprep.subr.bf16.mxu0 %v1856_v32 }
  0x57   : > { %1143 = vmatmul.mubr.bf16.gmra.mrb[24].mxu0 %v1854_v35  ;;  %1727 = vmatprep.subr.bf16.mxu1 %v1856_v32 }
  0x58   : > { %1207 = vmatmul.mubr.bf16.gmra.mrb[24].mxu1 %v1855_v36  ;;  %1150 = vmatprep.mubr.bf16.mxu0 %v1418_v37 }
  0x59   : > { %1708 = vmatpush3.bf16.msra.mxu0 %v1856_v32  ;;  %1214 = vmatprep.mubr.bf16.mxu1 %v1420_v38 }
  0x5a   : > { %1735 = vmatpush3.bf16.msra.mxu1 %v1856_v32  ;;  %1709 = vmatprep.subr.bf16.mxu0 %v1857_v39 }
  0x5b   : > { %1728 = vmatprep.subr.bf16.mxu1 %v1857_v39 }
  0x5d   : > { %1710 = vmatpush3.bf16.msra.mxu0 %v1857_v39 }
  0x5e   : > { %1736 = vmatpush3.bf16.msra.mxu1 %v1857_v39  ;;  %1711 = vmatprep.subr.bf16.mxu0 %v1862_v40 }
  0x5f   : > { %1151 = vmatmul.mubr.bf16.gmra.mrb[28].mxu0 %v1417_v41  ;;  %1729 = vmatprep.subr.bf16.mxu1 %v1862_v40 }
  0x60   : > { %1215 = vmatmul.mubr.bf16.gmra.mrb[28].mxu1 %v1419_v42  ;;  %1715 = vmatprep.mubr.bf16.mxu0 %v1864_v43 }
  0x61   : > { %1712 = vmatpush3.bf16.msra.mxu0 %v1862_v40  ;;  %1719 = vmatprep.mubr.bf16.mxu1 %v1865_v44 }
  0x62   : > { %1737 = vmatpush3.bf16.msra.mxu1 %v1862_v40  ;;  %1713 = vmatprep.subr.bf16.mxu0 %v1863_v45 }
  0x63   : > { %1730 = vmatprep.subr.bf16.mxu1 %v1863_v45 }
  0x65   : > { %1714 = vmatpush3.bf16.msra.mxu0 %v1863_v45 }
  0x66   : > { %1738 = vmatpush3.bf16.msra.mxu1 %v1863_v45 }
  0x68   : > { %1716 = vmatmul.mubr.bf16.vlgmr.msra.gmra.mrb[32].mxu0 %v1866_v46 }
  0x69   : > { %1720 = vmatmul.mubr.bf16.vlgmr.msra.gmra.mrb[32].mxu1 %v1867_v47 }
  0xfa   : > { %v1543_v48 = vpop.f32.mrb[0].mxu0 }
  0xfb   : > { %v1583_v49 = vpop.f32.mrb[0].mxu1  ;;  %v1544_v51 = vpop.f32.mrb[1].mxu0 }
  0xfc   : > { %v1545_v52 = vadd.f32 %v1544_v51, %v1543_v48  ;;  %v1584_v53 = vpop.f32.mrb[1].mxu1  ;;  %v1546_v54 = vpop.f32.mrb[2].mxu0 }
  0xfd   : > { %v1585_v55 = vadd.f32 %v1584_v53, %v1583_v49  ;;  %v1586_v56 = vpop.f32.mrb[2].mxu1  ;;  %v1547_v57 = vpop.f32.mrb[3].mxu0 }
  0xfe   : > { %v1001_v58 = vadd.f32 %v1545_v52, %v1385_v50  ;;  %v1548_v59 = vadd.f32 %v1547_v57, %v1546_v54  ;;  %v1587_v60 = vpop.f32.mrb[3].mxu1 }
  0xff   : > { %v1588_v61 = vadd.f32 %v1587_v60, %v1586_v56 }
 0x100   : > { %v1065_v62 = vadd.f32 %v1585_v55, %v1001_v58  ;;  %v1004_v63 = vadd.f32 %v1548_v59, %v1385_v50 }
 0x102   : > { %v1068_v0 = vadd.f32 %v1588_v61, %v1004_v63  ;;  %v1549_v1 = vpop.f32.mrb[4].mxu0 }
 0x103   : > { %v1589_v2 = vpop.f32.mrb[4].mxu1  ;;  %v1550_v3 = vpop.f32.mrb[5].mxu0 }
 0x104   : > { %v1551_v4 = vadd.f32 %v1550_v3, %v1549_v1  ;;  %v1590_v5 = vpop.f32.mrb[5].mxu1  ;;  %v1552_v6 = vpop.f32.mrb[6].mxu0 }
 0x105   : > { %v1591_v7 = vadd.f32 %v1590_v5, %v1589_v2  ;;  %v1592_v8 = vpop.f32.mrb[6].mxu1  ;;  %v1553_v9 = vpop.f32.mrb[7].mxu0 }
 0x106   : > { %v1009_v10 = vadd.f32 %v1551_v4, %v1385_v50  ;;  %v1554_v11 = vadd.f32 %v1553_v9, %v1552_v6  ;;  %v1593_v12 = vpop.f32.mrb[7].mxu1 }
 0x107   : > { %v1594_v13 = vadd.f32 %v1593_v12, %v1592_v8 }
 0x108   : > { %v1073_v14 = vadd.f32 %v1591_v7, %v1009_v10  ;;  %v1012_v15 = vadd.f32 %v1554_v11, %v1385_v50 }
 0x10a   : > { %v1076_v16 = vadd.f32 %v1594_v13, %v1012_v15  ;;  %v1555_v17 = vpop.f32.mrb[8].mxu0 }
 0x10b   : > { %v1595_v18 = vpop.f32.mrb[8].mxu1  ;;  %v1556_v19 = vpop.f32.mrb[9].mxu0 }
 0x10c   : > { %v1557_v20 = vadd.f32 %v1556_v19, %v1555_v17  ;;  %v1596_v21 = vpop.f32.mrb[9].mxu1  ;;  %v1558_v22 = vpop.f32.mrb[10].mxu0 }
 0x10d   : > { %v1597_v23 = vadd.f32 %v1596_v21, %v1595_v18  ;;  %v1598_v24 = vpop.f32.mrb[10].mxu1  ;;  %v1559_v25 = vpop.f32.mrb[11].mxu0 }
 0x10e   : > { %v1017_v26 = vadd.f32 %v1557_v20, %v1385_v50  ;;  %v1560_v27 = vadd.f32 %v1559_v25, %v1558_v22  ;;  %v1599_v28 = vpop.f32.mrb[11].mxu1 }
 0x10f   : > { %v1600_v29 = vadd.f32 %v1599_v28, %v1598_v24 }
 0x110   : > { %v1081_v30 = vadd.f32 %v1597_v23, %v1017_v26  ;;  %v1020_v31 = vadd.f32 %v1560_v27, %v1385_v50 }
 0x112   : > { %v1084_v32 = vadd.f32 %v1600_v29, %v1020_v31  ;;  %v1561_v33 = vpop.f32.mrb[12].mxu0 }
 0x113   : > { %v1601_v34 = vpop.f32.mrb[12].mxu1  ;;  %v1562_v35 = vpop.f32.mrb[13].mxu0 }
 0x114   : > { %v1602_v36 = vpop.f32.mrb[13].mxu1  ;;  %v1563_v37 = vadd.f32 %v1562_v35, %v1561_v33  ;;  %v1564_v39 = vpop.f32.mrb[14].mxu0 }
 0x115   : > { %v1603_v38 = vadd.f32 %v1602_v36, %v1601_v34  ;;  %v1604_v40 = vpop.f32.mrb[14].mxu1  ;;  %v1565_v41 = vpop.f32.mrb[15].mxu0 }
 0x116   : > { %v1605_v42 = vpop.f32.mrb[15].mxu1  ;;  %v1025_v43 = vadd.f32 %v1563_v37, %v1385_v50 }
 0x118   : > { %v1089_v44 = vadd.f32 %v1603_v38, %v1025_v43 }
 0x11a   : > { %v1623_v45 = vpop.f32.mrb[16].mxu0 }
 0x11b   : > { %v1663_v46 = vpop.f32.mrb[16].mxu1  ;;  %v1624_v47 = vpop.f32.mrb[17].mxu0 }
 0x11c   : > { %v1625_v48 = vadd.f32 %v1624_v47, %v1623_v45  ;;  %v1664_v49 = vpop.f32.mrb[17].mxu1  ;;  %v1626_v51 = vpop.f32.mrb[18].mxu0 }
 0x11d   : > { %v1665_v52 = vadd.f32 %v1664_v49, %v1663_v46  ;;  %v1666_v53 = vpop.f32.mrb[18].mxu1  ;;  %v1627_v54 = vpop.f32.mrb[19].mxu0 }
 0x11e   : > { %v1129_v55 = vadd.f32 %v1625_v48, %v1065_v62  ;;  %v1628_v56 = vadd.f32 %v1627_v54, %v1626_v51  ;;  %v1667_v57 = vpop.f32.mrb[19].mxu1 }
 0x11f   : > { %v1668_v58 = vadd.f32 %v1667_v57, %v1666_v53 }
 0x120   : > { %v1132_v59 = vadd.f32 %v1628_v56, %v1068_v0  ;;  %v1193_v60 = vadd.f32 %v1665_v52, %v1129_v55 }
 0x122   : > { %v1629_v61 = vpop.f32.mrb[20].mxu0  ;;  %v1196_v63 = vadd.f32 %v1668_v58, %v1132_v59 }
 0x123   : > { %v1669_v1 = vpop.f32.mrb[20].mxu1  ;;  %v1630_v50 = vpop.f32.mrb[21].mxu0 }
 0x124   : > { %v1631_v2 = vadd.f32 %v1630_v50, %v1629_v61  ;;  %v1670_v3 = vpop.f32.mrb[21].mxu1  ;;  %v1632_v4 = vpop.f32.mrb[22].mxu0 }
 0x125   : > { %v1671_v5 = vadd.f32 %v1670_v3, %v1669_v1  ;;  %v1672_v6 = vpop.f32.mrb[22].mxu1  ;;  %v1633_v7 = vpop.f32.mrb[23].mxu0 }
 0x126   : > { %v1137_v8 = vadd.f32 %v1631_v2, %v1073_v14  ;;  %v1634_v9 = vadd.f32 %v1633_v7, %v1632_v4  ;;  %v1673_v10 = vpop.f32.mrb[23].mxu1 }
 0x127   : > { %v1674_v11 = vadd.f32 %v1673_v10, %v1672_v6 }
 0x128   : > { %v1140_v62 = vadd.f32 %v1634_v9, %v1076_v16  ;;  %v1201_v12 = vadd.f32 %v1671_v5, %v1137_v8 }
 0x12a   : > { %v1635_v13 = vpop.f32.mrb[24].mxu0  ;;  %v1204_v15 = vadd.f32 %v1674_v11, %v1140_v62 }
 0x12b   : > { %v1675_v0 = vpop.f32.mrb[24].mxu1  ;;  %v1636_v17 = vpop.f32.mrb[25].mxu0 }
 0x12c   : > { %v1637_v18 = vadd.f32 %v1636_v17, %v1635_v13  ;;  %v1676_v19 = vpop.f32.mrb[25].mxu1  ;;  %v1638_v20 = vpop.f32.mrb[26].mxu0 }
 0x12d   : > { %v1677_v21 = vadd.f32 %v1676_v19, %v1675_v0  ;;  %v1678_v22 = vpop.f32.mrb[26].mxu1  ;;  %v1639_v23 = vpop.f32.mrb[27].mxu0 }
 0x12e   : > { %v1145_v24 = vadd.f32 %v1637_v18, %v1081_v30  ;;  %v1640_v25 = vadd.f32 %v1639_v23, %v1638_v20  ;;  %v1679_v26 = vpop.f32.mrb[27].mxu1 }
 0x12f   : > { %v1680_v27 = vadd.f32 %v1679_v26, %v1678_v22 }
 0x130   : > { %v1148_v14 = vadd.f32 %v1640_v25, %v1084_v32  ;;  %v1209_v28 = vadd.f32 %v1677_v21, %v1145_v24 }
 0x132   : > { %v1641_v29 = vpop.f32.mrb[28].mxu0  ;;  %v1212_v16 = vadd.f32 %v1680_v27, %v1148_v14 }
 0x133   : > { %v1681_v31 = vpop.f32.mrb[28].mxu1  ;;  %v1642_v33 = vpop.f32.mrb[29].mxu0 }
 0x134   : > { %v1643_v34 = vadd.f32 %v1642_v33, %v1641_v29  ;;  %v1682_v35 = vpop.f32.mrb[29].mxu1  ;;  %v1644_v36 = vpop.f32.mrb[30].mxu0 }
 0x135   : > { %v1683_v37 = vadd.f32 %v1682_v35, %v1681_v31  ;;  %v1684_v38 = vpop.f32.mrb[30].mxu1  ;;  %v1645_v39 = vpop.f32.mrb[31].mxu0 }
 0x136   : > { %v1153_v40 = vadd.f32 %v1643_v34, %v1089_v44  ;;  %v1685_v41 = vpop.f32.mrb[31].mxu1 }
 0x138   : > { %v1217_v42 = vadd.f32 %v1683_v37, %v1153_v40 }
 0x13b   : > { %v1717_v30 = vpop.f32.mrb[32].mxu0 }
 0x13c   : > { %v1265_v43 = vadd.f32 %v1717_v30, %v1201_v12  ;;  %v1721_v45 = vpop.f32.mrb[32].mxu1  ;;  %v1256_v32 = vpop.f32.mrb[33].mxu0 }
 0x13d   : > { %v1281_v46 = vadd.f32 %v1721_v45, %v1217_v42  ;;  %v1257_v47 = vadd.f32 %v1256_v32, %v1193_v60  ;;  %v1272_v48 = vpop.f32.mrb[33].mxu1  ;;  %v1718_v49 = vpop.f32.mrb[34].mxu0 }
 0x13e   : > { %v1273_v51 = vadd.f32 %v1272_v48, %v1209_v28  ;;  %v1268_v52 = vadd.f32 %v1718_v49, %v1204_v15  ;;  %v1722_v53 = vpop.f32.mrb[34].mxu1  ;;  %v1259_v54 = vpop.f32.mrb[35].mxu0 }
 0x13f   : > { %v1509_v44 = vpack.c.bf16 %v1281_v46, %v1281_v46  ;;  %v1260_v55 = vadd.f32 %v1259_v54, %v1196_v63  ;;  %v1275_v56 = vpop.f32.mrb[35].mxu1 }
 0x140   : > { %v1518_v57 = vpack.c.bf16 %v1268_v52, %v1265_v43  ;;  %v1276_v58 = vadd.f32 %v1275_v56, %v1212_v16 }
 0x141   : > { %1321 = vst [vmem:[%s175_s20 + $0x18] sm:$0xf] %v1509_v44  ;;  %v1513_v59 = vpack.c.bf16 %v1260_v55, %v1257_v47 }
 0x142   : > { %1525 = vst [vmem:[%s175_s20 + $0x8] sm:$0xff] %v1518_v57   ;;  %v1523_v61 = vpack.c.bf16 %v1276_v58, %v1273_v51 }
 0x143   : > { %1514 = vst [vmem:[%s175_s20] sm:$0xff] %v1513_v59  }
 0x144   : > { %1526 = vst [vmem:[%s175_s20 + $0x10] sm:$0xff] %v1523_v61  }
 0x145 PF: > { %s13_s12 = sadd.s32 1, %s1874_s12  }
 0x146   : > { %p10_p4 = scmp.ge.s32.totalorder %s13_s12, 4  }
 0x148   :  { %12 = sbr.rel (!%p10_p4) target bundleno = 1 (0x1), region = 62 }

// kernel: forward.23
= control target key start
LH: loop header
LB: loop body
LE: loop exit
PB: predicated region body
PF: predicated region fallthrough
CT: control target
= control target key end

     0   :  { %s13989_s12 = smov 0   ;;  %s16321_s0 = inlined_call_operand.vmem [shape: bf16[2048,1664], index: 0, kind: input, shape index: {}]   ;;  %s16322_s1 = inlined_call_operand.vmem [shape: bf16[1664,128], index: 1, kind: input, shape index: {}]   ;;  %s16323_s2 = inlined_call_operand.vmem [shape: f32[1,128], index: 2, kind: input, shape index: {}]   ;;  %s16324_s3 = inlined_call_operand.vmem [shape: f32[2048,128], index: 3, kind: output, shape index: {}]  }
   0x1 LB: > { %s10136_s13 = sadd.s32 4294967295, %s13966_s12   ;;  %p10140_p0 = scmp.ge.s32.totalorder %s13966_s12, 1  ;;  %s13966_s12 = sphi %s13989_s12, %s13_s12  }
   0x2   : > { %p139_p1 = scmp.lt.s32.totalorder %s13966_s12, 3 }
   0x4   : > { %p140_p2 = pnand %p10140_p0, %p139_p1 }
   0x6   : > { %143 = sbr.rel (%p140_p2) target bundleno = 1953 (0x7a1), region = 32 }
   0xd   : > { %v12622_v0 = vld [vmem:[%s16322_s1] sm:$0xff]   ;;  %v13968_v1 = vmov 0   ;;  %v12624_v3 = vld [vmem:[%s16322_s1 + $0x8] sm:$0xff]   ;;  %v12626_v5 = vld [vmem:[%s16322_s1 + $0x10] sm:$0xff]   ;;  %s10141_s7 = sshll.u32 %s10136_s13, 7 }
   0xe   : > { %6137 = vmatprep.subr.bf16.mxu1 %v13968_v1  ;;  %7227 = vmatprep.subr.bf16.mxu0 %v13968_v1  ;;  %v12623_v2 = vld [vmem:[%s16322_s1 + $0x100] sm:$0xff]   ;;  %v12625_v4 = vld [vmem:[%s16322_s1 + $0x108] sm:$0xff]   ;;  %v12627_v6 = vld [vmem:[%s16322_s1 + $0x110] sm:$0xff]   ;;  %p165_p3 = scmp.lt.s32.totalorder %s10141_s7, 255 }
   0xf   : > { %6138 = vmatpush1.bf16.msra.mxu1 %v12622_v0  ;;  %7228 = vmatpush1.bf16.msra.mxu0 %v12623_v2  ;;  %v12628_v7 = vld [vmem:[%s16322_s1 + $0x18] sm:$0xff]   ;;  %v12630_v9 = vld [vmem:[%s16322_s1 + $0x20] sm:$0xff]   ;;  %v12632_v11 = vld [vmem:[%s16322_s1 + $0x28] sm:$0xff]  }
  0x10   : > { %6139 = vmatprep.subr.bf16.mxu1 %v13968_v1  ;;  %7229 = vmatprep.subr.bf16.mxu0 %v13968_v1  ;;  %v12629_v8 = vld [vmem:[%s16322_s1 + $0x118] sm:$0xff]   ;;  %v12631_v10 = vld [vmem:[%s16322_s1 + $0x120] sm:$0xff]   ;;  %v12633_v12 = vld [vmem:[%s16322_s1 + $0x128] sm:$0xff]   ;;  %s16520_s7 = smov (!%p165_p3, %s10141_s7), 255 }
  0x11   : > { %v12634_v13 = vld [vmem:[%s16322_s1 + $0x30] sm:$0xff]   ;;  %v12636_v15 = vld [vmem:[%s16322_s1 + $0x38] sm:$0xff]   ;;  %s12612_s19 = smul.u32 52, %s16520_s7  ;;  %v12638_v17 = vld [vmem:[%s16322_s1 + $0x40] sm:$0xff]   ;;  %s10144_s20 = sshll.u32 %s16520_s7, 3 }
  0x12   : > { %v12635_v14 = vld [vmem:[%s16322_s1 + $0x130] sm:$0xff]   ;;  %v12637_v16 = vld [vmem:[%s16322_s1 + $0x138] sm:$0xff]   ;;  %v12639_v18 = vld [vmem:[%s16322_s1 + $0x140] sm:$0xff]   ;;  %s15825_s23 = scalar_lea.vmem %s16324_s3, %s10144_s20 }
  0x13   : > { %6140 = vmatpush1.bf16.msra.mxu1 %v12624_v3  ;;  %7230 = vmatpush1.bf16.msra.mxu0 %v12625_v4  ;;  %s14072_s26 = scalar_lea.vmem %s16321_s0, %s12612_s19  ;;  %v12640_v20 = vld [vmem:[%s16322_s1 + $0x48] sm:$0xff]   ;;  %v12642_v23 = vld [vmem:[%s16322_s1 + $0x50] sm:$0xff]   ;;  %v12644_v25 = vld [vmem:[%s16322_s1 + $0x58] sm:$0xff]  }
  0x14   : > { %6141 = vmatprep.subr.bf16.mxu1 %v13968_v1  ;;  %7231 = vmatprep.subr.bf16.mxu0 %v13968_v1  ;;  %v12656_v19 = vld [vmem:[%s14072_s26 + $0x4] ss:$52 sps:$4 sm:$0xff]   ;;  %v12659_v21 = vld [vmem:[%s14072_s26 + $0x14] ss:$52 sps:$4 sm:$0xff]   ;;  %v12662_v39 = vld [vmem:[%s14072_s26 + $0x6c] ss:$52 sps:$4 sm:$0xff]  }
  0x15   : > { %v12641_v22 = vld [vmem:[%s16322_s1 + $0x148] sm:$0xff]   ;;  %6169 = vmatprep.mubr.bf16.mxu1 %v12656_v19  ;;  %7259 = vmatprep.mubr.bf16.mxu0 %v12659_v21  ;;  %v12643_v24 = vld [vmem:[%s16322_s1 + $0x150] sm:$0xff]   ;;  %v12645_v26 = vld [vmem:[%s16322_s1 + $0x158] sm:$0xff]  }
  0x16   : > { %v12646_v27 = vld [vmem:[%s16322_s1 + $0x60] sm:$0xff]   ;;  %v12648_v29 = vld [vmem:[%s16322_s1 + $0x68] sm:$0xff]   ;;  %v12650_v31 = vld [vmem:[%s16322_s1 + $0x70] sm:$0xff]  }
  0x17   : > { %6142 = vmatpush1.bf16.msra.mxu1 %v12626_v5  ;;  %7232 = vmatpush1.bf16.msra.mxu0 %v12627_v6  ;;  %v12647_v28 = vld [vmem:[%s16322_s1 + $0x160] sm:$0xff]   ;;  %v12649_v30 = vld [vmem:[%s16322_s1 + $0x168] sm:$0xff]   ;;  %v12651_v32 = vld [vmem:[%s16322_s1 + $0x170] sm:$0xff]  }
  0x18   : > { %6143 = vmatprep.subr.bf16.mxu1 %v13968_v1  ;;  %7233 = vmatprep.subr.bf16.mxu0 %v13968_v1  ;;  %v12652_v33 = vld [vmem:[%s16322_s1 + $0x78] sm:$0xff]   ;;  %v12654_v35 = vld [vmem:[%s14072_s26] ss:$52 sps:$4 sm:$0xff]   ;;  %v12657_v36 = vld [vmem:[%s14072_s26 + $0x10] ss:$52 sps:$4 sm:$0xff]  }
  0x19   : > { %v12653_v34 = vld [vmem:[%s16322_s1 + $0x178] sm:$0xff]   ;;  %v12660_v37 = vld [vmem:[%s16322_s1 + $0x180] sm:$0xff]   ;;  %v12690_v41 = vld [vmem:[%s16322_s1 + $0x88] sm:$0xff]  }
  0x1a   : > { %v12661_v38 = vld [vmem:[%s16322_s1 + $0x80] sm:$0xff]   ;;  %v12664_v40 = vld [vmem:[%s14072_s26 + $0x7c] ss:$52 sps:$4 sm:$0xff]   ;;  %v12668_v42 = vld [vmem:[%s16322_s1 + $0x188] sm:$0xff]  }
  0x1b   : > { %6144 = vmatpush1.bf16.msra.mxu1 %v12628_v7  ;;  %7234 = vmatpush1.bf16.msra.mxu0 %v12629_v8  ;;  %v12666_v43 = vld [vmem:[%s14072_s26 + $0x68] ss:$52 sps:$4 sm:$0xff]   ;;  %v12667_v44 = vld [vmem:[%s14072_s26 + $0x78] ss:$52 sps:$4 sm:$0xff]   ;;  %v12675_v47 = vld [vmem:[%s16322_s1 + $0x190] sm:$0xff]  }
  0x1c   : > { %6145 = vmatprep.subr.bf16.mxu1 %v13968_v1  ;;  %7235 = vmatprep.subr.bf16.mxu0 %v13968_v1  ;;  %v12669_v45 = vld [vmem:[%s14072_s26 + $0xd4] ss:$52 sps:$4 sm:$0xff]   ;;  %v12671_v46 = vld [vmem:[%s14072_s26 + $0xe4] ss:$52 sps:$4 sm:$0xff]   ;;  %v12676_v52 = vld [vmem:[%s14072_s26 + $0x13c] ss:$52 sps:$4 sm:$0xff]  }
  0x1d   : > { %v12719_v48 = vld [vmem:[%s16322_s1 + $0x90] sm:$0xff]   ;;  %v12682_v49 = vld [vmem:[%s16322_s1 + $0x198] sm:$0xff]   ;;  %v12678_v53 = vld [vmem:[%s14072_s26 + $0x14c] ss:$52 sps:$4 sm:$0xff]  }
  0x1e   : > { %v12673_v50 = vld [vmem:[%s14072_s26 + $0xd0] ss:$52 sps:$4 sm:$0xff]   ;;  %v12674_v51 = vld [vmem:[%s14072_s26 + $0xe0] ss:$52 sps:$4 sm:$0xff]   ;;  %v12697_v55 = vld [vmem:[%s16322_s1 + $0x1a8] sm:$0xff]  }
  0x1f   : > { %6146 = vmatpush1.bf16.msra.mxu1 %v12630_v9  ;;  %7236 = vmatpush1.bf16.msra.mxu0 %v12631_v10  ;;  %v12689_v54 = vld [vmem:[%s16322_s1 + $0x1a0] sm:$0xff]   ;;  %v12748_v56 = vld [vmem:[%s16322_s1 + $0x98] sm:$0xff]   ;;  %v12685_v60 = vld [vmem:[%s14072_s26 + $0x1b4] ss:$52 sps:$4 sm:$0xff]  }
  0x20   : > { %6147 = vmatprep.subr.bf16.mxu1 %v13968_v1  ;;  %7237 = vmatprep.subr.bf16.mxu0 %v13968_v1  ;;  %v12680_v57 = vld [vmem:[%s14072_s26 + $0x138] ss:$52 sps:$4 sm:$0xff]   ;;  %v12681_v58 = vld [vmem:[%s14072_s26 + $0x148] ss:$52 sps:$4 sm:$0xff]   ;;  %v12704_v61 = vld [vmem:[%s16322_s1 + $0x1b0] sm:$0xff]  }
  0x21   : > { %v12683_v59 = vld [vmem:[%s14072_s26 + $0x1a4] ss:$52 sps:$4 sm:$0xff]   ;;  %v12687_v63 = vld [vmem:[%s14072_s26 + $0x1a0] ss:$52 sps:$4 sm:$0xff]   ;;  %v12693_v3 = vld [vmem:[%s14072_s26 + $0x21c] ss:$52 sps:$4 sm:$0xff]  }
  0x22   : > { %v12711_v62 = vld [vmem:[%s16322_s1 + $0x1b8] sm:$0xff]   ;;  %v12688_v0 = vld [vmem:[%s14072_s26 + $0x1b0] ss:$52 sps:$4 sm:$0xff]   ;;  %v12691_v2 = vld [vmem:[%s14072_s26 + $0x20c] ss:$52 sps:$4 sm:$0xff]  }
  0x23   : > { %6148 = vmatpush1.bf16.msra.mxu1 %v12632_v11  ;;  %7238 = vmatpush1.bf16.msra.mxu0 %v12633_v12  ;;  %v12718_v4 = vld [vmem:[%s16322_s1 + $0x1c0] sm:$0xff]   ;;  %v12726_v5 = vld [vmem:[%s16322_s1 + $0x1c8] sm:$0xff]   ;;  %v12733_v11 = vld [vmem:[%s16322_s1 + $0x1d0] sm:$0xff]  }
  0x24   : > { %6149 = vmatprep.subr.bf16.mxu1 %v13968_v1  ;;  %7239 = vmatprep.subr.bf16.mxu0 %v13968_v1  ;;  %v12777_v6 = vld [vmem:[%s16322_s1 + $0xa0] sm:$0xff]   ;;  %v12695_v7 = vld [vmem:[%s14072_s26 + $0x208] ss:$52 sps:$4 sm:$0xff]   ;;  %v12696_v8 = vld [vmem:[%s14072_s26 + $0x218] ss:$52 sps:$4 sm:$0xff]  }
  0x25   : > { %v12698_v9 = vld [vmem:[%s14072_s26 + $0x274] ss:$52 sps:$4 sm:$0xff]   ;;  %v12700_v10 = vld [vmem:[%s14072_s26 + $0x284] ss:$52 sps:$4 sm:$0xff]  }
  0x26   : > { %v12740_v12 = vld [vmem:[%s16322_s1 + $0x1d8] sm:$0xff]   ;;  %v12755_v19 = vld [vmem:[%s16322_s1 + $0x1e8] sm:$0xff]  }
  0x27   : > { %6150 = vmatpush1.bf16.msra.mxu1 %v12634_v13  ;;  %7240 = vmatpush1.bf16.msra.mxu0 %v12635_v14  ;;  %v12702_v13 = vld [vmem:[%s14072_s26 + $0x270] ss:$52 sps:$4 sm:$0xff]   ;;  %v12703_v14 = vld [vmem:[%s14072_s26 + $0x280] ss:$52 sps:$4 sm:$0xff]   ;;  %v12710_v21 = vld [vmem:[%s14072_s26 + $0x2e8] ss:$52 sps:$4 sm:$0xff]  }
  0x28   : > { %6151 = vmatprep.subr.bf16.mxu1 %v13968_v1  ;;  %7241 = vmatprep.subr.bf16.mxu0 %v13968_v1 }
  0x2b   : > { %6152 = vmatpush1.bf16.msra.mxu1 %v12636_v15  ;;  %7242 = vmatpush1.bf16.msra.mxu0 %v12637_v16  ;;  %v12705_v15 = vld [vmem:[%s14072_s26 + $0x2dc] ss:$52 sps:$4 sm:$0xff]   ;;  %v12707_v16 = vld [vmem:[%s14072_s26 + $0x2ec] ss:$52 sps:$4 sm:$0xff]  }
  0x2c   : > { %6153 = vmatprep.subr.bf16.mxu1 %v13968_v1  ;;  %7243 = vmatprep.subr.bf16.mxu0 %v13968_v1 }
  0x2f   : > { %6154 = vmatpush1.bf16.msra.mxu1 %v12638_v17  ;;  %7244 = vmatpush1.bf16.msra.mxu0 %v12639_v18  ;;  %v12747_v17 = vld [vmem:[%s16322_s1 + $0x1e0] sm:$0xff]   ;;  %v12803_v18 = vld [vmem:[%s16322_s1 + $0xa8] sm:$0xff]  }
  0x30   : > { %6155 = vmatprep.subr.bf16.mxu1 %v13968_v1  ;;  %7245 = vmatprep.subr.bf16.mxu0 %v13968_v1 }
  0x33   : > { %6156 = vmatpush1.bf16.msra.mxu1 %v12640_v20  ;;  %7246 = vmatpush1.bf16.msra.mxu0 %v12641_v22  ;;  %v12709_v20 = vld [vmem:[%s14072_s26 + $0x2d8] ss:$52 sps:$4 sm:$0xff]  }
  0x34   : > { %6157 = vmatprep.subr.bf16.mxu1 %v13968_v1  ;;  %7247 = vmatprep.subr.bf16.mxu0 %v13968_v1  ;;  %v12712_v22 = vld [vmem:[%s14072_s26 + $0x344] ss:$52 sps:$4 sm:$0xff]  }
  0x37   : > { %6158 = vmatpush1.bf16.msra.mxu1 %v12642_v23  ;;  %7248 = vmatpush1.bf16.msra.mxu0 %v12643_v24  ;;  %v12714_v23 = vld [vmem:[%s14072_s26 + $0x354] ss:$52 sps:$4 sm:$0xff]  }
  0x38   : > { %6159 = vmatprep.subr.bf16.mxu1 %v13968_v1  ;;  %7249 = vmatprep.subr.bf16.mxu0 %v13968_v1  ;;  %v12762_v24 = vld [vmem:[%s16322_s1 + $0x1f0] sm:$0xff]  }
  0x3b   : > { %6160 = vmatpush1.bf16.msra.mxu1 %v12644_v25  ;;  %7250 = vmatpush1.bf16.msra.mxu0 %v12645_v26  ;;  %v12716_v25 = vld [vmem:[%s14072_s26 + $0x340] ss:$52 sps:$4 sm:$0xff]   ;;  %v12769_v26 = vld [vmem:[%s16322_s1 + $0x1f8] sm:$0xff]  }
  0x3c   : > { %6161 = vmatprep.subr.bf16.mxu1 %v13968_v1  ;;  %7251 = vmatprep.subr.bf16.mxu0 %v13968_v1 }
  0x3f   : > { %6162 = vmatpush1.bf16.msra.mxu1 %v12646_v27  ;;  %7252 = vmatpush1.bf16.msra.mxu0 %v12647_v28  ;;  %v12717_v27 = vld [vmem:[%s14072_s26 + $0x350] ss:$52 sps:$4 sm:$0xff]   ;;  %v12720_v28 = vld [vmem:[%s14072_s26 + $0x3ac] ss:$52 sps:$4 sm:$0xff]  }
  0x40   : > { %6163 = vmatprep.subr.bf16.mxu1 %v13968_v1  ;;  %7253 = vmatprep.subr.bf16.mxu0 %v13968_v1 }
  0x43   : > { %6164 = vmatpush1.bf16.msra.mxu1 %v12648_v29  ;;  %7254 = vmatpush1.bf16.msra.mxu0 %v12649_v30  ;;  %v12722_v29 = vld [vmem:[%s14072_s26 + $0x3bc] ss:$52 sps:$4 sm:$0xff]  }
  0x44   : > { %6165 = vmatprep.subr.bf16.mxu1 %v13968_v1  ;;  %7255 = vmatprep.subr.bf16.mxu0 %v13968_v1  ;;  %v12829_v30 = vld [vmem:[%s16322_s1 + $0xb0] sm:$0xff]  }
  0x47   : > { %6166 = vmatpush1.bf16.msra.mxu1 %v12650_v31  ;;  %7256 = vmatpush1.bf16.msra.mxu0 %v12651_v32  ;;  %v12724_v31 = vld [vmem:[%s14072_s26 + $0x3a8] ss:$52 sps:$4 sm:$0xff]   ;;  %v12725_v32 = vld [vmem:[%s14072_s26 + $0x3b8] ss:$52 sps:$4 sm:$0xff]  }
  0x48   : > { %6167 = vmatprep.subr.bf16.mxu1 %v13968_v1  ;;  %7257 = vmatprep.subr.bf16.mxu0 %v13968_v1 }
  0x4b   : > { %6168 = vmatpush1.bf16.msra.mxu1 %v12652_v33  ;;  %7258 = vmatpush1.bf16.msra.mxu0 %v12653_v34  ;;  %v12727_v33 = vld [vmem:[%s14072_s26 + $0x414] ss:$52 sps:$4 sm:$0xff]   ;;  %v12729_v34 = vld [vmem:[%s14072_s26 + $0x424] ss:$52 sps:$4 sm:$0xff]  }
  0x4c   : > { %6682 = vmatprep.subr.bf16.mxu1 %v13968_v1  ;;  %7772 = vmatprep.subr.bf16.mxu0 %v13968_v1 }
  0x4e   : > { %6170 = vmatmul.mubr.bf16.vlgmr.msra.gmra.mrb[0].mxu1 %v12654_v35  ;;  %7260 = vmatmul.mubr.bf16.vlgmr.msra.gmra.mrb[0].mxu0 %v12657_v36  ;;  %v12731_v35 = vld [vmem:[%s14072_s26 + $0x410] ss:$52 sps:$4 sm:$0xff]   ;;  %v12732_v36 = vld [vmem:[%s14072_s26 + $0x420] ss:$52 sps:$4 sm:$0xff]  }
  0x4f   : > { %6683 = vmatpush1.bf16.msra.mxu1 %v12661_v38  ;;  %7773 = vmatpush1.bf16.msra.mxu0 %v12660_v37  ;;  %v12734_v37 = vld [vmem:[%s14072_s26 + $0x47c] ss:$52 sps:$4 sm:$0xff]   ;;  %v12736_v38 = vld [vmem:[%s14072_s26 + $0x48c] ss:$52 sps:$4 sm:$0xff]  }
  0x50   : > { %6177 = vmatprep.mubr.bf16.mxu1 %v12662_v39  ;;  %7267 = vmatprep.mubr.bf16.mxu0 %v12664_v40  ;;  %v12738_v39 = vld [vmem:[%s14072_s26 + $0x478] ss:$52 sps:$4 sm:$0xff]   ;;  %v12739_v40 = vld [vmem:[%s14072_s26 + $0x488] ss:$52 sps:$4 sm:$0xff]  }
  0x51   : > { %7774 = vmatprep.subr.bf16.mxu0 %v13968_v1  ;;  %6684 = vmatprep.subr.bf16.mxu1 %v13968_v1 }
  0x53   : > { %6685 = vmatpush1.bf16.msra.mxu1 %v12690_v41  ;;  %7775 = vmatpush1.bf16.msra.mxu0 %v12668_v42  ;;  %v12741_v41 = vld [vmem:[%s14072_s26 + $0x4e4] ss:$52 sps:$4 sm:$0xff]   ;;  %v12743_v42 = vld [vmem:[%s14072_s26 + $0x4f4] ss:$52 sps:$4 sm:$0xff]  }
  0x54   : > { %6686 = vmatprep.subr.bf16.mxu1 %v13968_v1  ;;  %7776 = vmatprep.subr.bf16.mxu0 %v13968_v1 }
  0x56   : > { %6178 = vmatmul.mubr.bf16.gmra.mrb[4].mxu1 %v12666_v43  ;;  %7268 = vmatmul.mubr.bf16.gmra.mrb[4].mxu0 %v12667_v44  ;;  %v12745_v43 = vld [vmem:[%s14072_s26 + $0x4e0] ss:$52 sps:$4 sm:$0xff]   ;;  %v12746_v44 = vld [vmem:[%s14072_s26 + $0x4f0] ss:$52 sps:$4 sm:$0xff]  }
  0x57   : > { %6185 = vmatprep.mubr.bf16.mxu1 %v12669_v45  ;;  %7275 = vmatprep.mubr.bf16.mxu0 %v12671_v46  ;;  %v12749_v45 = vld [vmem:[%s14072_s26 + $0x54c] ss:$52 sps:$4 sm:$0xff]   ;;  %v12751_v46 = vld [vmem:[%s14072_s26 + $0x55c] ss:$52 sps:$4 sm:$0xff]  }
  0x58   : > { %7777 = vmatpush1.bf16.msra.mxu0 %v12675_v47  ;;  %6687 = vmatpush1.bf16.msra.mxu1 %v12719_v48  ;;  %v12855_v47 = vld [vmem:[%s16322_s1 + $0xb8] sm:$0xff]  }
  0x59   : > { %7778 = vmatprep.subr.bf16.mxu0 %v13968_v1  ;;  %6688 = vmatprep.subr.bf16.mxu1 %v13968_v1  ;;  %v12753_v48 = vld [vmem:[%s14072_s26 + $0x548] ss:$52 sps:$4 sm:$0xff]  }
  0x5c   : > { %7779 = vmatpush1.bf16.msra.mxu0 %v12682_v49  ;;  %6689 = vmatpush1.bf16.msra.mxu1 %v12748_v56  ;;  %v12754_v49 = vld [vmem:[%s14072_s26 + $0x558] ss:$52 sps:$4 sm:$0xff]  }
  0x5d   : > { %7780 = vmatprep.subr.bf16.mxu0 %v13968_v1  ;;  %6690 = vmatprep.subr.bf16.mxu1 %v13968_v1  ;;  %v12767_v56 = vld [vmem:[%s14072_s26 + $0x618] ss:$52 sps:$4 sm:$0xff]  }
  0x5e   : > { %6186 = vmatmul.mubr.bf16.gmra.mrb[8].mxu1 %v12673_v50  ;;  %7276 = vmatmul.mubr.bf16.gmra.mrb[8].mxu0 %v12674_v51  ;;  %v12756_v50 = vld [vmem:[%s14072_s26 + $0x5b4] ss:$52 sps:$4 sm:$0xff]   ;;  %v12758_v51 = vld [vmem:[%s14072_s26 + $0x5c4] ss:$52 sps:$4 sm:$0xff]  }
  0x5f   : > { %6193 = vmatprep.mubr.bf16.mxu1 %v12676_v52  ;;  %7283 = vmatprep.mubr.bf16.mxu0 %v12678_v53  ;;  %v12760_v52 = vld [vmem:[%s14072_s26 + $0x5b0] ss:$52 sps:$4 sm:$0xff]   ;;  %v12761_v53 = vld [vmem:[%s14072_s26 + $0x5c0] ss:$52 sps:$4 sm:$0xff]  }
  0x60   : > { %7781 = vmatpush1.bf16.msra.mxu0 %v12689_v54  ;;  %6691 = vmatpush1.bf16.msra.mxu1 %v12777_v6  ;;  %v12763_v54 = vld [vmem:[%s14072_s26 + $0x61c] ss:$52 sps:$4 sm:$0xff]   ;;  %v12784_v6 = vld [vmem:[%s14072_s26 + $0x754] ss:$52 sps:$4 sm:$0xff]  }
  0x61   : > { %7782 = vmatprep.subr.bf16.mxu0 %v13968_v1  ;;  %6692 = vmatprep.subr.bf16.mxu1 %v13968_v1 }
  0x64   : > { %7783 = vmatpush1.bf16.msra.mxu0 %v12697_v55  ;;  %6693 = vmatpush1.bf16.msra.mxu1 %v12803_v18  ;;  %v12765_v55 = vld [vmem:[%s14072_s26 + $0x62c] ss:$52 sps:$4 sm:$0xff]   ;;  %v12798_v18 = vld [vmem:[%s14072_s26 + $0x1bc] ss:$52 sps:$4 sm:$0xff]  }
  0x65   : > { %7784 = vmatprep.subr.bf16.mxu0 %v13968_v1  ;;  %6694 = vmatprep.subr.bf16.mxu1 %v13968_v1 }
  0x66   : > { %6194 = vmatmul.mubr.bf16.gmra.mrb[12].mxu1 %v12680_v57  ;;  %7284 = vmatmul.mubr.bf16.gmra.mrb[12].mxu0 %v12681_v58  ;;  %v12768_v57 = vld [vmem:[%s14072_s26 + $0x628] ss:$52 sps:$4 sm:$0xff]   ;;  %v12770_v58 = vld [vmem:[%s14072_s26 + $0x684] ss:$52 sps:$4 sm:$0xff]  }
  0x67   : > { %6201 = vmatprep.mubr.bf16.mxu1 %v12683_v59  ;;  %7291 = vmatprep.mubr.bf16.mxu0 %v12685_v60  ;;  %v12774_v59 = vld [vmem:[%s14072_s26 + $0x1c] ss:$52 sps:$4 sm:$0xff]   ;;  %v12775_v60 = vld [vmem:[%s14072_s26 + $0x680] ss:$52 sps:$4 sm:$0xff]  }
  0x68   : > { %7785 = vmatpush1.bf16.msra.mxu0 %v12704_v61  ;;  %6695 = vmatpush1.bf16.msra.mxu1 %v12829_v30  ;;  %v12772_v61 = vld [vmem:[%s14072_s26 + $0x18] ss:$52 sps:$4 sm:$0xff]   ;;  %v12815_v30 = vld [vmem:[%s14072_s26 + $0x288] ss:$52 sps:$4 sm:$0xff]  }
  0x69   : > { %7786 = vmatprep.subr.bf16.mxu0 %v13968_v1  ;;  %6696 = vmatprep.subr.bf16.mxu1 %v13968_v1 }
  0x6c   : > { %7787 = vmatpush1.bf16.msra.mxu0 %v12711_v62  ;;  %6697 = vmatpush1.bf16.msra.mxu1 %v12855_v47  ;;  %v12778_v62 = vld [vmem:[%s14072_s26 + $0x6ec] ss:$52 sps:$4 sm:$0xff]   ;;  %v12840_v47 = vld [vmem:[%s14072_s26 + $0xa90] ss:$52 sps:$4 sm:$0xff]  }
  0x6d   : > { %7788 = vmatprep.subr.bf16.mxu0 %v13968_v1  ;;  %6698 = vmatprep.subr.bf16.mxu1 %v13968_v1 }
  0x6e   : > { %6202 = vmatmul.mubr.bf16.gmra.mrb[16].mxu1 %v12687_v63  ;;  %7292 = vmatmul.mubr.bf16.gmra.mrb[16].mxu0 %v12688_v0  ;;  %v12776_v63 = vld [vmem:[%s16322_s1 + $0x200] sm:$0xff]  }
  0x6f   : > { %6209 = vmatprep.mubr.bf16.mxu1 %v12691_v2  ;;  %7299 = vmatprep.mubr.bf16.mxu0 %v12693_v3  ;;  %v12780_v0 = vld [vmem:[%s14072_s26 + $0x84] ss:$52 sps:$4 sm:$0xff]   ;;  %v12782_v3 = vld [vmem:[%s14072_s26 + $0x6e8] ss:$52 sps:$4 sm:$0xff]  }
  0x70   : > { %7789 = vmatpush1.bf16.msra.mxu0 %v12718_v4  ;;  %v12881_v2 = vld [vmem:[%s16322_s1 + $0xc0] sm:$0xff]   ;;  %v12802_v4 = vld [vmem:[%s16322_s1 + $0x208] sm:$0xff]  }
  0x71   : > { %7790 = vmatprep.subr.bf16.mxu0 %v13968_v1  ;;  %6699 = vmatpush1.bf16.msra.mxu1 %v12881_v2  ;;  %v12866_v2 = vld [vmem:[%s14072_s26 + $0xc30] ss:$52 sps:$4 sm:$0xff]  }
  0x72   : > { %6700 = vmatprep.subr.bf16.mxu1 %v13968_v1 }
  0x74   : > { %7791 = vmatpush1.bf16.msra.mxu0 %v12726_v5  ;;  %v12783_v5 = vld [vmem:[%s14072_s26 + $0x80] ss:$52 sps:$4 sm:$0xff]  }
  0x75   : > { %7792 = vmatprep.subr.bf16.mxu0 %v13968_v1 }
  0x76   : > { %6210 = vmatmul.mubr.bf16.gmra.mrb[20].mxu1 %v12695_v7  ;;  %7300 = vmatmul.mubr.bf16.gmra.mrb[20].mxu0 %v12696_v8  ;;  %v12786_v7 = vld [vmem:[%s14072_s26 + $0xec] ss:$52 sps:$4 sm:$0xff]   ;;  %v12828_v8 = vld [vmem:[%s16322_s1 + $0x210] sm:$0xff]  }
  0x77   : > { %6217 = vmatprep.mubr.bf16.mxu1 %v12698_v9  ;;  %7307 = vmatprep.mubr.bf16.mxu0 %v12700_v10  ;;  %v12788_v9 = vld [vmem:[%s14072_s26 + $0x750] ss:$52 sps:$4 sm:$0xff]   ;;  %v12854_v10 = vld [vmem:[%s16322_s1 + $0x218] sm:$0xff]  }
  0x78   : > { %7793 = vmatpush1.bf16.msra.mxu0 %v12733_v11  ;;  %v12789_v11 = vld [vmem:[%s14072_s26 + $0xe8] ss:$52 sps:$4 sm:$0xff]  }
  0x79   : > { %7794 = vmatprep.subr.bf16.mxu0 %v13968_v1 }
  0x7c   : > { %7795 = vmatpush1.bf16.msra.mxu0 %v12740_v12  ;;  %v12790_v12 = vld [vmem:[%s14072_s26 + $0x7bc] ss:$52 sps:$4 sm:$0xff]  }
  0x7d   : > { %7796 = vmatprep.subr.bf16.mxu0 %v13968_v1 }
  0x7e   : > { %6218 = vmatmul.mubr.bf16.gmra.mrb[24].mxu1 %v12702_v13  ;;  %7308 = vmatmul.mubr.bf16.gmra.mrb[24].mxu0 %v12703_v14  ;;  %v12792_v13 = vld [vmem:[%s14072_s26 + $0x154] ss:$52 sps:$4 sm:$0xff]   ;;  %v12880_v14 = vld [vmem:[%s16322_s1 + $0x220] sm:$0xff]  }
  0x7f   : > { %6225 = vmatprep.mubr.bf16.mxu1 %v12705_v15  ;;  %7315 = vmatprep.mubr.bf16.mxu0 %v12707_v16  ;;  %v12794_v15 = vld [vmem:[%s14072_s26 + $0x7b8] ss:$52 sps:$4 sm:$0xff]   ;;  %v12795_v16 = vld [vmem:[%s14072_s26 + $0x150] ss:$52 sps:$4 sm:$0xff]  }
  0x80   : > { %7797 = vmatpush1.bf16.msra.mxu0 %v12747_v17  ;;  %v12796_v17 = vld [vmem:[%s14072_s26 + $0x824] ss:$52 sps:$4 sm:$0xff]  }
  0x81   : > { %7798 = vmatprep.subr.bf16.mxu0 %v13968_v1 }
  0x84   : > { %7799 = vmatpush1.bf16.msra.mxu0 %v12755_v19  ;;  %v12800_v19 = vld [vmem:[%s14072_s26 + $0x820] ss:$52 sps:$4 sm:$0xff]  }
  0x85   : > { %7800 = vmatprep.subr.bf16.mxu0 %v13968_v1 }
  0x86   : > { %6226 = vmatmul.mubr.bf16.gmra.mrb[28].mxu1 %v12709_v20  ;;  %7316 = vmatmul.mubr.bf16.gmra.mrb[28].mxu0 %v12710_v21  ;;  %v12801_v20 = vld [vmem:[%s14072_s26 + $0x1b8] ss:$52 sps:$4 sm:$0xff]  }
  0x87   : > { %6233 = vmatprep.mubr.bf16.mxu1 %v12712_v22  ;;  %7323 = vmatprep.mubr.bf16.mxu0 %v12714_v23  ;;  %v12804_v21 = vld [vmem:[%s14072_s26 + $0x88c] ss:$52 sps:$4 sm:$0xff]   ;;  %v12806_v22 = vld [vmem:[%s14072_s26 + $0x224] ss:$52 sps:$4 sm:$0xff]  }
  0x88   : > { %7801 = vmatpush1.bf16.msra.mxu0 %v12762_v24  ;;  %v12906_v23 = vld [vmem:[%s16322_s1 + $0x228] sm:$0xff]  }
  0x89   : > { %7802 = vmatprep.subr.bf16.mxu0 %v13968_v1  ;;  %v12907_v24 = vld [vmem:[%s16322_s1 + $0xc8] sm:$0xff]  }
  0x8a   : > { %6701 = vmatpush1.bf16.msra.mxu1 %v12907_v24  ;;  %v12898_v24 = vld [vmem:[%s14072_s26 + $0xe38] ss:$52 sps:$4 sm:$0xff]  }
  0x8b   : > { %6702 = vmatprep.subr.bf16.mxu1 %v13968_v1 }
  0x8c   : > { %7803 = vmatpush1.bf16.msra.mxu0 %v12769_v26  ;;  %v12809_v26 = vld [vmem:[%s14072_s26 + $0x220] ss:$52 sps:$4 sm:$0xff]  }
  0x8d   : > { %8317 = vmatprep.subr.bf16.mxu0 %v13968_v1 }
  0x8e   : > { %6234 = vmatmul.mubr.bf16.gmra.mrb[32].mxu1 %v12716_v25  ;;  %7324 = vmatmul.mubr.bf16.gmra.mrb[32].mxu0 %v12717_v27  ;;  %v12808_v25 = vld [vmem:[%s14072_s26 + $0x888] ss:$52 sps:$4 sm:$0xff]  }
  0x8f   : > { %6241 = vmatprep.mubr.bf16.mxu1 %v12720_v28  ;;  %7331 = vmatprep.mubr.bf16.mxu0 %v12722_v29  ;;  %v12810_v27 = vld [vmem:[%s14072_s26 + $0x8f4] ss:$52 sps:$4 sm:$0xff]   ;;  %v12812_v28 = vld [vmem:[%s14072_s26 + $0x28c] ss:$52 sps:$4 sm:$0xff]   ;;  %v12814_v29 = vld [vmem:[%s14072_s26 + $0x8f0] ss:$52 sps:$4 sm:$0xff]  }
  0x96   : > { %6242 = vmatmul.mubr.bf16.gmra.mrb[36].mxu1 %v12724_v31  ;;  %7332 = vmatmul.mubr.bf16.gmra.mrb[36].mxu0 %v12725_v32  ;;  %v12816_v31 = vld [vmem:[%s14072_s26 + $0x95c] ss:$52 sps:$4 sm:$0xff]   ;;  %v12818_v32 = vld [vmem:[%s14072_s26 + $0x2f4] ss:$52 sps:$4 sm:$0xff]  }
  0x97   : > { %6249 = vmatprep.mubr.bf16.mxu1 %v12727_v33  ;;  %7339 = vmatprep.mubr.bf16.mxu0 %v12729_v34  ;;  %v12820_v33 = vld [vmem:[%s14072_s26 + $0x958] ss:$52 sps:$4 sm:$0xff]   ;;  %v12821_v34 = vld [vmem:[%s14072_s26 + $0x2f0] ss:$52 sps:$4 sm:$0xff]  }
  0x9e   : > { %6250 = vmatmul.mubr.bf16.gmra.mrb[40].mxu1 %v12731_v35  ;;  %7340 = vmatmul.mubr.bf16.gmra.mrb[40].mxu0 %v12732_v36  ;;  %v12822_v35 = vld [vmem:[%s14072_s26 + $0x9c4] ss:$52 sps:$4 sm:$0xff]   ;;  %v12824_v36 = vld [vmem:[%s14072_s26 + $0x35c] ss:$52 sps:$4 sm:$0xff]  }
  0x9f   : > { %6257 = vmatprep.mubr.bf16.mxu1 %v12734_v37  ;;  %7347 = vmatprep.mubr.bf16.mxu0 %v12736_v38  ;;  %v12826_v37 = vld [vmem:[%s14072_s26 + $0x9c0] ss:$52 sps:$4 sm:$0xff]   ;;  %v12827_v38 = vld [vmem:[%s14072_s26 + $0x358] ss:$52 sps:$4 sm:$0xff]  }
  0xa6   : > { %6258 = vmatmul.mubr.bf16.gmra.mrb[44].mxu1 %v12738_v39  ;;  %7348 = vmatmul.mubr.bf16.gmra.mrb[44].mxu0 %v12739_v40  ;;  %v12830_v39 = vld [vmem:[%s14072_s26 + $0xa2c] ss:$52 sps:$4 sm:$0xff]   ;;  %v12832_v40 = vld [vmem:[%s14072_s26 + $0x3c4] ss:$52 sps:$4 sm:$0xff]  }
  0xa7   : > { %6265 = vmatprep.mubr.bf16.mxu1 %v12741_v41  ;;  %7355 = vmatprep.mubr.bf16.mxu0 %v12743_v42  ;;  %v12932_v41 = vld [vmem:[%s16322_s1 + $0x230] sm:$0xff]  }
  0xa8   : > { %v12933_v42 = vld [vmem:[%s16322_s1 + $0xd0] sm:$0xff]  }
  0xa9   : > { %6703 = vmatpush1.bf16.msra.mxu1 %v12933_v42  ;;  %v12924_v42 = vld [vmem:[%s14072_s26 + $0xfd8] ss:$52 sps:$4 sm:$0xff]  }
  0xaa   : > { %6704 = vmatprep.subr.bf16.mxu1 %v13968_v1 }
  0xae   : > { %6266 = vmatmul.mubr.bf16.gmra.mrb[48].mxu1 %v12745_v43  ;;  %7356 = vmatmul.mubr.bf16.gmra.mrb[48].mxu0 %v12746_v44  ;;  %v12834_v43 = vld [vmem:[%s14072_s26 + $0xa28] ss:$52 sps:$4 sm:$0xff]   ;;  %v12835_v44 = vld [vmem:[%s14072_s26 + $0x3c0] ss:$52 sps:$4 sm:$0xff]  }
  0xaf   : > { %6273 = vmatprep.mubr.bf16.mxu1 %v12749_v45  ;;  %7363 = vmatprep.mubr.bf16.mxu0 %v12751_v46  ;;  %v12836_v45 = vld [vmem:[%s14072_s26 + $0xa94] ss:$52 sps:$4 sm:$0xff]   ;;  %v12838_v46 = vld [vmem:[%s14072_s26 + $0x42c] ss:$52 sps:$4 sm:$0xff]  }
  0xb6   : > { %6274 = vmatmul.mubr.bf16.gmra.mrb[52].mxu1 %v12753_v48  ;;  %7364 = vmatmul.mubr.bf16.gmra.mrb[52].mxu0 %v12754_v49  ;;  %v12841_v48 = vld [vmem:[%s14072_s26 + $0x428] ss:$52 sps:$4 sm:$0xff]  }
  0xb7   : > { %6281 = vmatprep.mubr.bf16.mxu1 %v12756_v50  ;;  %7371 = vmatprep.mubr.bf16.mxu0 %v12758_v51  ;;  %v12842_v49 = vld [vmem:[%s14072_s26 + $0xafc] ss:$52 sps:$4 sm:$0xff]   ;;  %v12844_v50 = vld [vmem:[%s14072_s26 + $0x494] ss:$52 sps:$4 sm:$0xff]   ;;  %v12846_v51 = vld [vmem:[%s14072_s26 + $0xaf8] ss:$52 sps:$4 sm:$0xff]  }
  0xbe   : > { %6282 = vmatmul.mubr.bf16.gmra.mrb[56].mxu1 %v12760_v52  ;;  %7372 = vmatmul.mubr.bf16.gmra.mrb[56].mxu0 %v12761_v53  ;;  %v12847_v52 = vld [vmem:[%s14072_s26 + $0x490] ss:$52 sps:$4 sm:$0xff]  }
  0xbf   : > { %6289 = vmatprep.mubr.bf16.mxu1 %v12763_v54  ;;  %7379 = vmatprep.mubr.bf16.mxu0 %v12765_v55  ;;  %v12848_v53 = vld [vmem:[%s14072_s26 + $0xb64] ss:$52 sps:$4 sm:$0xff]   ;;  %v12850_v54 = vld [vmem:[%s14072_s26 + $0x4fc] ss:$52 sps:$4 sm:$0xff]   ;;  %v12852_v55 = vld [vmem:[%s14072_s26 + $0xb60] ss:$52 sps:$4 sm:$0xff]  }
  0xc6   : > { %6290 = vmatmul.mubr.bf16.gmra.mrb[60].mxu1 %v12767_v56  ;;  %7380 = vmatmul.mubr.bf16.gmra.mrb[60].mxu0 %v12768_v57  ;;  %v12853_v56 = vld [vmem:[%s14072_s26 + $0x4f8] ss:$52 sps:$4 sm:$0xff]  }
  0xc7   : > { %6297 = vmatprep.mubr.bf16.mxu1 %v12770_v58  ;;  %7804 = vmatprep.mubr.bf16.mxu0 %v12774_v59  ;;  %v12856_v57 = vld [vmem:[%s14072_s26 + $0xbcc] ss:$52 sps:$4 sm:$0xff]   ;;  %v12858_v58 = vld [vmem:[%s14072_s26 + $0x564] ss:$52 sps:$4 sm:$0xff]  }
  0xc8   : > { %v12958_v59 = vld [vmem:[%s16322_s1 + $0x238] sm:$0xff]  }
  0xce   : > { %6298 = vmatmul.mubr.bf16.gmra.mrb[64].mxu1 %v12775_v60  ;;  %7805 = vmatmul.mubr.bf16.vlgmr.msra.gmra.mrb[0].mxu0 %v12772_v61  ;;  %v12959_v60 = vld [vmem:[%s16322_s1 + $0xd8] sm:$0xff]  }
  0xcf   : > { %6305 = vmatprep.mubr.bf16.mxu1 %v12778_v62  ;;  %8318 = vmatpush1.bf16.msra.mxu0 %v12776_v63  ;;  %v12860_v61 = vld [vmem:[%s14072_s26 + $0xbc8] ss:$52 sps:$4 sm:$0xff]   ;;  %v12861_v62 = vld [vmem:[%s14072_s26 + $0x560] ss:$52 sps:$4 sm:$0xff]  }
  0xd0   : > { %7812 = vmatprep.mubr.bf16.mxu0 %v12780_v0  ;;  %8319 = vmatprep.subr.bf16.mxu0 %v13968_v1  ;;  %v12862_v63 = vld [vmem:[%s14072_s26 + $0xc34] ss:$52 sps:$4 sm:$0xff]   ;;  %v12864_v0 = vld [vmem:[%s14072_s26 + $0x5cc] ss:$52 sps:$4 sm:$0xff]  }
  0xd1   : > { %6705 = vmatpush1.bf16.msra.mxu1 %v12959_v60  ;;  %v12950_v60 = vld [vmem:[%s14072_s26 + $0x1178] ss:$52 sps:$4 sm:$0xff]  }
  0xd2   : > { %6706 = vmatprep.subr.bf16.mxu1 %v13968_v1 }
  0xd3   : > { %8320 = vmatpush1.bf16.msra.mxu0 %v12802_v4  ;;  %v12868_v4 = vld [vmem:[%s14072_s26 + $0xc9c] ss:$52 sps:$4 sm:$0xff]  }
  0xd4   : > { %8321 = vmatprep.subr.bf16.mxu0 %v13968_v1 }
  0xd6   : > { %6306 = vmatmul.mubr.bf16.gmra.mrb[68].mxu1 %v12782_v3  ;;  %7813 = vmatmul.mubr.bf16.gmra.mrb[4].mxu0 %v12783_v5  ;;  %v12867_v3 = vld [vmem:[%s14072_s26 + $0x5c8] ss:$52 sps:$4 sm:$0xff]  }
  0xd7   : > { %6313 = vmatprep.mubr.bf16.mxu1 %v12784_v6  ;;  %7820 = vmatprep.mubr.bf16.mxu0 %v12786_v7  ;;  %v12870_v5 = vld [vmem:[%s14072_s26 + $0x634] ss:$52 sps:$4 sm:$0xff]   ;;  %v12872_v6 = vld [vmem:[%s14072_s26 + $0xc98] ss:$52 sps:$4 sm:$0xff]   ;;  %v12873_v7 = vld [vmem:[%s14072_s26 + $0x630] ss:$52 sps:$4 sm:$0xff]  }
  0xd8   : > { %8322 = vmatpush1.bf16.msra.mxu0 %v12828_v8  ;;  %v12874_v8 = vld [vmem:[%s14072_s26 + $0xd04] ss:$52 sps:$4 sm:$0xff]  }
  0xd9   : > { %8323 = vmatprep.subr.bf16.mxu0 %v13968_v1 }
  0xdc   : > { %8324 = vmatpush1.bf16.msra.mxu0 %v12854_v10  ;;  %v12878_v10 = vld [vmem:[%s14072_s26 + $0xd00] ss:$52 sps:$4 sm:$0xff]  }
  0xdd   : > { %8325 = vmatprep.subr.bf16.mxu0 %v13968_v1 }
  0xde   : > { %6314 = vmatmul.mubr.bf16.gmra.mrb[72].mxu1 %v12788_v9  ;;  %7821 = vmatmul.mubr.bf16.gmra.mrb[8].mxu0 %v12789_v11  ;;  %v12876_v9 = vld [vmem:[%s14072_s26 + $0x69c] ss:$52 sps:$4 sm:$0xff]   ;;  %v12879_v11 = vld [vmem:[%s14072_s26 + $0x698] ss:$52 sps:$4 sm:$0xff]  }
  0xdf   : > { %6321 = vmatprep.mubr.bf16.mxu1 %v12790_v12  ;;  %7828 = vmatprep.mubr.bf16.mxu0 %v12792_v13  ;;  %v12882_v12 = vld [vmem:[%s14072_s26 + $0xd6c] ss:$52 sps:$4 sm:$0xff]   ;;  %v12884_v13 = vld [vmem:[%s14072_s26 + $0x704] ss:$52 sps:$4 sm:$0xff]  }
  0xe0   : > { %8326 = vmatpush1.bf16.msra.mxu0 %v12880_v14  ;;  %v12984_v14 = vld [vmem:[%s16322_s1 + $0x240] sm:$0xff]  }
  0xe1   : > { %8327 = vmatprep.subr.bf16.mxu0 %v13968_v1 }
  0xe4   : > { %8328 = vmatpush1.bf16.msra.mxu0 %v12906_v23  ;;  %v12896_v23 = vld [vmem:[%s14072_s26 + $0x7d4] ss:$52 sps:$4 sm:$0xff]  }
  0xe5   : > { %8329 = vmatprep.subr.bf16.mxu0 %v13968_v1 }
  0xe6   : > { %6322 = vmatmul.mubr.bf16.gmra.mrb[76].mxu1 %v12794_v15  ;;  %7829 = vmatmul.mubr.bf16.gmra.mrb[12].mxu0 %v12795_v16  ;;  %v12985_v15 = vld [vmem:[%s16322_s1 + $0xe0] sm:$0xff]   ;;  %v12886_v16 = vld [vmem:[%s14072_s26 + $0xd68] ss:$52 sps:$4 sm:$0xff]  }
  0xe7   : > { %6329 = vmatprep.mubr.bf16.mxu1 %v12796_v17  ;;  %7836 = vmatprep.mubr.bf16.mxu0 %v12798_v18  ;;  %v12887_v17 = vld [vmem:[%s14072_s26 + $0x700] ss:$52 sps:$4 sm:$0xff]  }
  0xe8   : > { %8330 = vmatpush1.bf16.msra.mxu0 %v12932_v41  ;;  %v12888_v18 = vld [vmem:[%s14072_s26 + $0xdd4] ss:$52 sps:$4 sm:$0xff]   ;;  %6707 = vmatpush1.bf16.msra.mxu1 %v12985_v15  ;;  %v12976_v15 = vld [vmem:[%s14072_s26 + $0x1318] ss:$52 sps:$4 sm:$0xff]  }
  0xe9   : > { %8331 = vmatprep.subr.bf16.mxu0 %v13968_v1  ;;  %6708 = vmatprep.subr.bf16.mxu1 %v13968_v1  ;;  %v12922_v41 = vld [vmem:[%s14072_s26 + $0x974] ss:$52 sps:$4 sm:$0xff]  }
  0xec   : > { %8332 = vmatpush1.bf16.msra.mxu0 %v12958_v59  ;;  %v12948_v59 = vld [vmem:[%s14072_s26 + $0xb14] ss:$52 sps:$4 sm:$0xff]  }
  0xed   : > { %8333 = vmatprep.subr.bf16.mxu0 %v13968_v1 }
  0xee   : > { %6330 = vmatmul.mubr.bf16.gmra.mrb[80].mxu1 %v12800_v19  ;;  %7837 = vmatmul.mubr.bf16.gmra.mrb[16].mxu0 %v12801_v20  ;;  %v12890_v19 = vld [vmem:[%s14072_s26 + $0x76c] ss:$52 sps:$4 sm:$0xff]   ;;  %v12892_v20 = vld [vmem:[%s14072_s26 + $0xdd0] ss:$52 sps:$4 sm:$0xff]  }
  0xef   : > { %6337 = vmatprep.mubr.bf16.mxu1 %v12804_v21  ;;  %7844 = vmatprep.mubr.bf16.mxu0 %v12806_v22  ;;  %v12893_v21 = vld [vmem:[%s14072_s26 + $0x768] ss:$52 sps:$4 sm:$0xff]  }
  0xf0   : > { %8334 = vmatpush1.bf16.msra.mxu0 %v12984_v14  ;;  %v12894_v22 = vld [vmem:[%s14072_s26 + $0xe3c] ss:$52 sps:$4 sm:$0xff]   ;;  %v12974_v14 = vld [vmem:[%s14072_s26 + $0xcb4] ss:$52 sps:$4 sm:$0xff]  }
  0xf1   : > { %8335 = vmatprep.subr.bf16.mxu0 %v13968_v1 }
  0xf6   : > { %6338 = vmatmul.mubr.bf16.gmra.mrb[84].mxu1 %v12808_v25  ;;  %7845 = vmatmul.mubr.bf16.gmra.mrb[20].mxu0 %v12809_v26  ;;  %v12899_v25 = vld [vmem:[%s14072_s26 + $0x7d0] ss:$52 sps:$4 sm:$0xff]  }
  0xf7   : > { %6345 = vmatprep.mubr.bf16.mxu1 %v12810_v27  ;;  %7852 = vmatprep.mubr.bf16.mxu0 %v12812_v28  ;;  %v12900_v26 = vld [vmem:[%s14072_s26 + $0xea4] ss:$52 sps:$4 sm:$0xff]   ;;  %v12902_v27 = vld [vmem:[%s14072_s26 + $0x83c] ss:$52 sps:$4 sm:$0xff]   ;;  %v12904_v28 = vld [vmem:[%s14072_s26 + $0xea0] ss:$52 sps:$4 sm:$0xff]  }
  0xfe   : > { %6346 = vmatmul.mubr.bf16.gmra.mrb[88].mxu1 %v12814_v29  ;;  %7853 = vmatmul.mubr.bf16.gmra.mrb[24].mxu0 %v12815_v30  ;;  %v12905_v29 = vld [vmem:[%s14072_s26 + $0x838] ss:$52 sps:$4 sm:$0xff]  }
  0xff   : > { %6353 = vmatprep.mubr.bf16.mxu1 %v12816_v31  ;;  %7860 = vmatprep.mubr.bf16.mxu0 %v12818_v32  ;;  %v12908_v30 = vld [vmem:[%s14072_s26 + $0xf0c] ss:$52 sps:$4 sm:$0xff]   ;;  %v12910_v31 = vld [vmem:[%s14072_s26 + $0x8a4] ss:$52 sps:$4 sm:$0xff]  }
 0x100   : > { %v13010_v32 = vld [vmem:[%s16322_s1 + $0x248] sm:$0xff]  }
 0x101   : > { %8336 = vmatpush1.bf16.msra.mxu0 %v13010_v32  ;;  %v13002_v32 = vld [vmem:[%s14072_s26 + $0x14b8] ss:$52 sps:$4 sm:$0xff]  }
 0x102   : > { %8337 = vmatprep.subr.bf16.mxu0 %v13968_v1 }
 0x106   : > { %6354 = vmatmul.mubr.bf16.gmra.mrb[92].mxu1 %v12820_v33  ;;  %7861 = vmatmul.mubr.bf16.gmra.mrb[28].mxu0 %v12821_v34  ;;  %v13011_v33 = vld [vmem:[%s16322_s1 + $0xe8] sm:$0xff]  }
 0x107   : > { %6361 = vmatprep.mubr.bf16.mxu1 %v12822_v35  ;;  %7868 = vmatprep.mubr.bf16.mxu0 %v12824_v36  ;;  %v12912_v34 = vld [vmem:[%s14072_s26 + $0xf08] ss:$52 sps:$4 sm:$0xff]   ;;  %v12913_v35 = vld [vmem:[%s14072_s26 + $0x8a0] ss:$52 sps:$4 sm:$0xff]  }
 0x108   : > { %v12914_v36 = vld [vmem:[%s14072_s26 + $0xf74] ss:$52 sps:$4 sm:$0xff]   ;;  %6709 = vmatpush1.bf16.msra.mxu1 %v13011_v33  ;;  %v13003_v33 = vld [vmem:[%s14072_s26 + $0xe50] ss:$52 sps:$4 sm:$0xff]  }
 0x109   : > { %6710 = vmatprep.subr.bf16.mxu1 %v13968_v1 }
 0x10e   : > { %6362 = vmatmul.mubr.bf16.gmra.mrb[96].mxu1 %v12826_v37  ;;  %7869 = vmatmul.mubr.bf16.gmra.mrb[32].mxu0 %v12827_v38  ;;  %v12916_v37 = vld [vmem:[%s14072_s26 + $0x90c] ss:$52 sps:$4 sm:$0xff]   ;;  %v12918_v38 = vld [vmem:[%s14072_s26 + $0xf70] ss:$52 sps:$4 sm:$0xff]  }
 0x10f   : > { %6369 = vmatprep.mubr.bf16.mxu1 %v12830_v39  ;;  %7876 = vmatprep.mubr.bf16.mxu0 %v12832_v40  ;;  %v12919_v39 = vld [vmem:[%s14072_s26 + $0x908] ss:$52 sps:$4 sm:$0xff]  }
 0x110   : > { %v12920_v40 = vld [vmem:[%s14072_s26 + $0xfdc] ss:$52 sps:$4 sm:$0xff]  }
 0x116   : > { %6370 = vmatmul.mubr.bf16.gmra.mrb[100].mxu1 %v12834_v43  ;;  %7877 = vmatmul.mubr.bf16.gmra.mrb[36].mxu0 %v12835_v44  ;;  %v12925_v43 = vld [vmem:[%s14072_s26 + $0x970] ss:$52 sps:$4 sm:$0xff]  }
 0x117   : > { %6377 = vmatprep.mubr.bf16.mxu1 %v12836_v45  ;;  %7884 = vmatprep.mubr.bf16.mxu0 %v12838_v46  ;;  %v12926_v44 = vld [vmem:[%s14072_s26 + $0x1044] ss:$52 sps:$4 sm:$0xff]   ;;  %v12928_v45 = vld [vmem:[%s14072_s26 + $0x9dc] ss:$52 sps:$4 sm:$0xff]   ;;  %v12930_v46 = vld [vmem:[%s14072_s26 + $0x1040] ss:$52 sps:$4 sm:$0xff]  }
 0x11e   : > { %6378 = vmatmul.mubr.bf16.gmra.mrb[104].mxu1 %v12840_v47  ;;  %7885 = vmatmul.mubr.bf16.gmra.mrb[40].mxu0 %v12841_v48  ;;  %v12931_v47 = vld [vmem:[%s14072_s26 + $0x9d8] ss:$52 sps:$4 sm:$0xff]  }
 0x11f   : > { %6385 = vmatprep.mubr.bf16.mxu1 %v12842_v49  ;;  %7892 = vmatprep.mubr.bf16.mxu0 %v12844_v50  ;;  %v12934_v48 = vld [vmem:[%s14072_s26 + $0x10ac] ss:$52 sps:$4 sm:$0xff]   ;;  %v12936_v49 = vld [vmem:[%s14072_s26 + $0xa44] ss:$52 sps:$4 sm:$0xff]   ;;  %v13036_v50 = vld [vmem:[%s16322_s1 + $0x250] sm:$0xff]  }
 0x120   : > { %8338 = vmatpush1.bf16.msra.mxu0 %v13036_v50  ;;  %v13029_v50 = vld [vmem:[%s14072_s26 + $0xff0] ss:$52 sps:$4 sm:$0xff]  }
 0x121   : > { %8339 = vmatprep.subr.bf16.mxu0 %v13968_v1 }
 0x126   : > { %6386 = vmatmul.mubr.bf16.gmra.mrb[108].mxu1 %v12846_v51  ;;  %7893 = vmatmul.mubr.bf16.gmra.mrb[44].mxu0 %v12847_v52  ;;  %v13037_v51 = vld [vmem:[%s16322_s1 + $0xf0] sm:$0xff]   ;;  %v12938_v52 = vld [vmem:[%s14072_s26 + $0x10a8] ss:$52 sps:$4 sm:$0xff]  }
 0x127   : > { %6393 = vmatprep.mubr.bf16.mxu1 %v12848_v53  ;;  %7900 = vmatprep.mubr.bf16.mxu0 %v12850_v54  ;;  %v12939_v53 = vld [vmem:[%s14072_s26 + $0xa40] ss:$52 sps:$4 sm:$0xff]  }
 0x128   : > { %v12940_v54 = vld [vmem:[%s14072_s26 + $0x1114] ss:$52 sps:$4 sm:$0xff]   ;;  %6711 = vmatpush1.bf16.msra.mxu1 %v13037_v51  ;;  %v13030_v51 = vld [vmem:[%s14072_s26 + $0x16c4] ss:$52 sps:$4 sm:$0xff]  }
 0x129   : > { %6712 = vmatprep.subr.bf16.mxu1 %v13968_v1 }
 0x12e   : > { %6394 = vmatmul.mubr.bf16.gmra.mrb[112].mxu1 %v12852_v55  ;;  %7901 = vmatmul.mubr.bf16.gmra.mrb[48].mxu0 %v12853_v56  ;;  %v12942_v55 = vld [vmem:[%s14072_s26 + $0xaac] ss:$52 sps:$4 sm:$0xff]   ;;  %v12944_v56 = vld [vmem:[%s14072_s26 + $0x1110] ss:$52 sps:$4 sm:$0xff]  }
 0x12f   : > { %6401 = vmatprep.mubr.bf16.mxu1 %v12856_v57  ;;  %7908 = vmatprep.mubr.bf16.mxu0 %v12858_v58  ;;  %v12945_v57 = vld [vmem:[%s14072_s26 + $0xaa8] ss:$52 sps:$4 sm:$0xff]  }
 0x130   : > { %v12946_v58 = vld [vmem:[%s14072_s26 + $0x117c] ss:$52 sps:$4 sm:$0xff]  }
 0x136   : > { %6402 = vmatmul.mubr.bf16.gmra.mrb[116].mxu1 %v12860_v61  ;;  %7909 = vmatmul.mubr.bf16.gmra.mrb[52].mxu0 %v12861_v62  ;;  %v12951_v61 = vld [vmem:[%s14072_s26 + $0xb10] ss:$52 sps:$4 sm:$0xff]  }
 0x137   : > { %6409 = vmatprep.mubr.bf16.mxu1 %v12862_v63  ;;  %7916 = vmatprep.mubr.bf16.mxu0 %v12864_v0  ;;  %v12952_v62 = vld [vmem:[%s14072_s26 + $0x11e4] ss:$52 sps:$4 sm:$0xff]   ;;  %v12954_v63 = vld [vmem:[%s14072_s26 + $0xb7c] ss:$52 sps:$4 sm:$0xff]   ;;  %v12956_v0 = vld [vmem:[%s14072_s26 + $0x11e0] ss:$52 sps:$4 sm:$0xff]  }
 0x13e   : > { %6410 = vmatmul.mubr.bf16.gmra.mrb[120].mxu1 %v12866_v2  ;;  %7917 = vmatmul.mubr.bf16.gmra.mrb[56].mxu0 %v12867_v3  ;;  %v12957_v2 = vld [vmem:[%s14072_s26 + $0xb78] ss:$52 sps:$4 sm:$0xff]  }
 0x13f   : > { %6417 = vmatprep.mubr.bf16.mxu1 %v12868_v4  ;;  %7924 = vmatprep.mubr.bf16.mxu0 %v12870_v5  ;;  %v12960_v3 = vld [vmem:[%s14072_s26 + $0x124c] ss:$52 sps:$4 sm:$0xff]   ;;  %v12962_v4 = vld [vmem:[%s14072_s26 + $0xbe4] ss:$52 sps:$4 sm:$0xff]  }
 0x140   : > { %v13062_v5 = vld [vmem:[%s16322_s1 + $0x258] sm:$0xff]  }
 0x141   : > { %8340 = vmatpush1.bf16.msra.mxu0 %v13062_v5  ;;  %v13056_v5 = vld [vmem:[%s14072_s26 + $0x1864] ss:$52 sps:$4 sm:$0xff]  }
 0x142   : > { %8341 = vmatprep.subr.bf16.mxu0 %v13968_v1 }
 0x146   : > { %6418 = vmatmul.mubr.bf16.gmra.mrb[124].mxu1 %v12872_v6  ;;  %7925 = vmatmul.mubr.bf16.gmra.mrb[60].mxu0 %v12873_v7  ;;  %v13063_v6 = vld [vmem:[%s16322_s1 + $0xf8] sm:$0xff]  }
 0x147   : > { %6425 = vmatprep.mubr.bf16.mxu1 %v12874_v8  ;;  %7932 = vmatprep.mubr.bf16.mxu0 %v12876_v9  ;;  %v12964_v7 = vld [vmem:[%s14072_s26 + $0x1248] ss:$52 sps:$4 sm:$0xff]   ;;  %v12965_v8 = vld [vmem:[%s14072_s26 + $0xbe0] ss:$52 sps:$4 sm:$0xff]  }
 0x148   : > { %v12966_v9 = vld [vmem:[%s14072_s26 + $0x12b4] ss:$52 sps:$4 sm:$0xff]   ;;  %6713 = vmatpush1.bf16.msra.mxu1 %v13063_v6  ;;  %v13058_v6 = vld [vmem:[%s14072_s26 + $0x11fc] ss:$52 sps:$4 sm:$0xff]  }
 0x149   : > { %11300 = vmatprep.subr.bf16.mxu1 %v13968_v1 }
 0x14e   : > { %6426 = vmatmul.mubr.bf16.gmra.mrb[128].mxu1 %v12878_v10  ;;  %7933 = vmatmul.mubr.bf16.gmra.mrb[64].mxu0 %v12879_v11  ;;  %v12968_v10 = vld [vmem:[%s14072_s26 + $0xc4c] ss:$52 sps:$4 sm:$0xff]   ;;  %v12970_v11 = vld [vmem:[%s14072_s26 + $0x12b0] ss:$52 sps:$4 sm:$0xff]  }
 0x14f   : > { %6433 = vmatprep.mubr.bf16.mxu1 %v12882_v12  ;;  %7940 = vmatprep.mubr.bf16.mxu0 %v12884_v13  ;;  %v12971_v12 = vld [vmem:[%s14072_s26 + $0xc48] ss:$52 sps:$4 sm:$0xff]  }
 0x150   : > { %v12972_v13 = vld [vmem:[%s14072_s26 + $0x131c] ss:$52 sps:$4 sm:$0xff]  }
 0x156   : > { %6434 = vmatmul.mubr.bf16.gmra.mrb[132].mxu1 %v12886_v16  ;;  %7941 = vmatmul.mubr.bf16.gmra.mrb[68].mxu0 %v12887_v17  ;;  %v12977_v16 = vld [vmem:[%s14072_s26 + $0xcb0] ss:$52 sps:$4 sm:$0xff]  }
 0x157   : > { %6441 = vmatprep.mubr.bf16.mxu1 %v12888_v18  ;;  %7948 = vmatprep.mubr.bf16.mxu0 %v12890_v19  ;;  %v12978_v17 = vld [vmem:[%s14072_s26 + $0x1384] ss:$52 sps:$4 sm:$0xff]   ;;  %v12980_v18 = vld [vmem:[%s14072_s26 + $0xd1c] ss:$52 sps:$4 sm:$0xff]   ;;  %v12982_v19 = vld [vmem:[%s14072_s26 + $0x1380] ss:$52 sps:$4 sm:$0xff]  }
 0x15e   : > { %6442 = vmatmul.mubr.bf16.gmra.mrb[136].mxu1 %v12892_v20  ;;  %7949 = vmatmul.mubr.bf16.gmra.mrb[72].mxu0 %v12893_v21  ;;  %v12983_v20 = vld [vmem:[%s14072_s26 + $0xd18] ss:$52 sps:$4 sm:$0xff]  }
 0x15f   : > { %6449 = vmatprep.mubr.bf16.mxu1 %v12894_v22  ;;  %7956 = vmatprep.mubr.bf16.mxu0 %v12896_v23  ;;  %v12986_v21 = vld [vmem:[%s14072_s26 + $0x13ec] ss:$52 sps:$4 sm:$0xff]   ;;  %v12988_v22 = vld [vmem:[%s14072_s26 + $0xd84] ss:$52 sps:$4 sm:$0xff]  }
 0x160   : > { %v13088_v23 = vld [vmem:[%s16322_s1 + $0x260] sm:$0xff]  }
 0x161   : > { %8342 = vmatpush1.bf16.msra.mxu0 %v13088_v23  ;;  %v13085_v23 = vld [vmem:[%s14072_s26 + $0x139c] ss:$52 sps:$4 sm:$0xff]  }
 0x162   : > { %8343 = vmatprep.subr.bf16.mxu0 %v13968_v1 }
 0x166   : > { %6450 = vmatmul.mubr.bf16.gmra.mrb[140].mxu1 %v12898_v24  ;;  %7957 = vmatmul.mubr.bf16.gmra.mrb[76].mxu0 %v12899_v25  ;;  %v12990_v24 = vld [vmem:[%s14072_s26 + $0x13e8] ss:$52 sps:$4 sm:$0xff]   ;;  %v12991_v25 = vld [vmem:[%s14072_s26 + $0xd80] ss:$52 sps:$4 sm:$0xff]  }
 0x167   : > { %6457 = vmatprep.mubr.bf16.mxu1 %v12900_v26  ;;  %7964 = vmatprep.mubr.bf16.mxu0 %v12902_v27  ;;  %v12992_v26 = vld [vmem:[%s14072_s26 + $0x1454] ss:$52 sps:$4 sm:$0xff]   ;;  %v12994_v27 = vld [vmem:[%s14072_s26 + $0xdec] ss:$52 sps:$4 sm:$0xff]  }
 0x16e   : > { %6458 = vmatmul.mubr.bf16.gmra.mrb[144].mxu1 %v12904_v28  ;;  %7965 = vmatmul.mubr.bf16.gmra.mrb[80].mxu0 %v12905_v29  ;;  %v12996_v28 = vld [vmem:[%s14072_s26 + $0x1450] ss:$52 sps:$4 sm:$0xff]   ;;  %v12997_v29 = vld [vmem:[%s14072_s26 + $0xde8] ss:$52 sps:$4 sm:$0xff]  }
 0x16f   : > { %6465 = vmatprep.mubr.bf16.mxu1 %v12908_v30  ;;  %7972 = vmatprep.mubr.bf16.mxu0 %v12910_v31  ;;  %v12998_v30 = vld [vmem:[%s14072_s26 + $0x14bc] ss:$52 sps:$4 sm:$0xff]   ;;  %v13000_v31 = vld [vmem:[%s14072_s26 + $0xe54] ss:$52 sps:$4 sm:$0xff]  }
 0x176   : > { %6466 = vmatmul.mubr.bf16.gmra.mrb[148].mxu1 %v12912_v34  ;;  %7973 = vmatmul.mubr.bf16.gmra.mrb[84].mxu0 %v12913_v35  ;;  %v13004_v34 = vld [vmem:[%s14072_s26 + $0x1524] ss:$52 sps:$4 sm:$0xff]   ;;  %v13006_v35 = vld [vmem:[%s14072_s26 + $0xebc] ss:$52 sps:$4 sm:$0xff]  }
 0x177   : > { %6473 = vmatprep.mubr.bf16.mxu1 %v12914_v36  ;;  %7980 = vmatprep.mubr.bf16.mxu0 %v12916_v37  ;;  %v13008_v36 = vld [vmem:[%s14072_s26 + $0x1520] ss:$52 sps:$4 sm:$0xff]   ;;  %v13009_v37 = vld [vmem:[%s14072_s26 + $0xeb8] ss:$52 sps:$4 sm:$0xff]  }
 0x17e   : > { %6474 = vmatmul.mubr.bf16.gmra.mrb[152].mxu1 %v12918_v38  ;;  %7981 = vmatmul.mubr.bf16.gmra.mrb[88].mxu0 %v12919_v39  ;;  %v13012_v38 = vld [vmem:[%s14072_s26 + $0x158c] ss:$52 sps:$4 sm:$0xff]   ;;  %v13014_v39 = vld [vmem:[%s14072_s26 + $0xf24] ss:$52 sps:$4 sm:$0xff]  }
 0x17f   : > { %6481 = vmatprep.mubr.bf16.mxu1 %v12920_v40  ;;  %7988 = vmatprep.mubr.bf16.mxu0 %v12922_v41  ;;  %v13113_v40 = vld [vmem:[%s16322_s1 + $0x268] sm:$0xff]  }
 0x180   : > { %v13016_v41 = vld [vmem:[%s14072_s26 + $0x1588] ss:$52 sps:$4 sm:$0xff]   ;;  %8344 = vmatpush1.bf16.msra.mxu0 %v13113_v40  ;;  %v13946_v40 = vld [vmem:[%s16322_s1 + $0x120] sm:$0xff]  }
 0x181   : > { %8345 = vmatprep.subr.bf16.mxu0 %v13968_v1 }
 0x186   : > { %6482 = vmatmul.mubr.bf16.gmra.mrb[156].mxu1 %v12924_v42  ;;  %7989 = vmatmul.mubr.bf16.gmra.mrb[92].mxu0 %v12925_v43  ;;  %v13017_v42 = vld [vmem:[%s14072_s26 + $0xf20] ss:$52 sps:$4 sm:$0xff]  }
 0x187   : > { %6489 = vmatprep.mubr.bf16.mxu1 %v12926_v44  ;;  %7996 = vmatprep.mubr.bf16.mxu0 %v12928_v45  ;;  %v13018_v43 = vld [vmem:[%s14072_s26 + $0x15f4] ss:$52 sps:$4 sm:$0xff]   ;;  %v13020_v44 = vld [vmem:[%s14072_s26 + $0xf8c] ss:$52 sps:$4 sm:$0xff]   ;;  %v13022_v45 = vld [vmem:[%s14072_s26 + $0x15f0] ss:$52 sps:$4 sm:$0xff]  }
 0x18e   : > { %6490 = vmatmul.mubr.bf16.gmra.mrb[160].mxu1 %v12930_v46  ;;  %7997 = vmatmul.mubr.bf16.gmra.mrb[96].mxu0 %v12931_v47  ;;  %v13023_v46 = vld [vmem:[%s14072_s26 + $0xf88] ss:$52 sps:$4 sm:$0xff]  }
 0x18f   : > { %6497 = vmatprep.mubr.bf16.mxu1 %v12934_v48  ;;  %8004 = vmatprep.mubr.bf16.mxu0 %v12936_v49  ;;  %v13024_v47 = vld [vmem:[%s14072_s26 + $0x165c] ss:$52 sps:$4 sm:$0xff]   ;;  %v13026_v48 = vld [vmem:[%s14072_s26 + $0xff4] ss:$52 sps:$4 sm:$0xff]   ;;  %v13028_v49 = vld [vmem:[%s14072_s26 + $0x1658] ss:$52 sps:$4 sm:$0xff]  }
 0x196   : > { %6498 = vmatmul.mubr.bf16.gmra.mrb[164].mxu1 %v12938_v52  ;;  %8005 = vmatmul.mubr.bf16.gmra.mrb[100].mxu0 %v12939_v53  ;;  %v13032_v52 = vld [vmem:[%s14072_s26 + $0x105c] ss:$52 sps:$4 sm:$0xff]   ;;  %v13034_v53 = vld [vmem:[%s14072_s26 + $0x16c0] ss:$52 sps:$4 sm:$0xff]  }
 0x197   : > { %6505 = vmatprep.mubr.bf16.mxu1 %v12940_v54  ;;  %8012 = vmatprep.mubr.bf16.mxu0 %v12942_v55  ;;  %v13035_v54 = vld [vmem:[%s14072_s26 + $0x1058] ss:$52 sps:$4 sm:$0xff]  }
 0x198   : > { %v13038_v55 = vld [vmem:[%s14072_s26 + $0x172c] ss:$52 sps:$4 sm:$0xff]  }
 0x19e   : > { %6506 = vmatmul.mubr.bf16.gmra.mrb[168].mxu1 %v12944_v56  ;;  %8013 = vmatmul.mubr.bf16.gmra.mrb[104].mxu0 %v12945_v57  ;;  %v13040_v56 = vld [vmem:[%s14072_s26 + $0x10c4] ss:$52 sps:$4 sm:$0xff]   ;;  %v13138_v57 = vld [vmem:[%s16322_s1 + $0x270] sm:$0xff]  }
 0x19f   : > { %6513 = vmatprep.mubr.bf16.mxu1 %v12946_v58  ;;  %8020 = vmatprep.mubr.bf16.mxu0 %v12948_v59  ;;  %v13042_v58 = vld [vmem:[%s14072_s26 + $0x1728] ss:$52 sps:$4 sm:$0xff]   ;;  %v13043_v59 = vld [vmem:[%s14072_s26 + $0x10c0] ss:$52 sps:$4 sm:$0xff]  }
 0x1a0   : > { %8346 = vmatpush1.bf16.msra.mxu0 %v13138_v57  ;;  %v13951_v57 = vld [vmem:[%s16322_s1 + $0x148] sm:$0xff]  }
 0x1a1   : > { %8347 = vmatprep.subr.bf16.mxu0 %v13968_v1 }
 0x1a6   : > { %6514 = vmatmul.mubr.bf16.gmra.mrb[172].mxu1 %v12950_v60  ;;  %8021 = vmatmul.mubr.bf16.gmra.mrb[108].mxu0 %v12951_v61  ;;  %v13044_v60 = vld [vmem:[%s14072_s26 + $0x1794] ss:$52 sps:$4 sm:$0xff]   ;;  %v13046_v61 = vld [vmem:[%s14072_s26 + $0x112c] ss:$52 sps:$4 sm:$0xff]  }
 0x1a7   : > { %6521 = vmatprep.mubr.bf16.mxu1 %v12952_v62  ;;  %8028 = vmatprep.mubr.bf16.mxu0 %v12954_v63  ;;  %v13048_v62 = vld [vmem:[%s14072_s26 + $0x1790] ss:$52 sps:$4 sm:$0xff]   ;;  %v13049_v63 = vld [vmem:[%s14072_s26 + $0x1128] ss:$52 sps:$4 sm:$0xff]  }
 0x1ae   : > { %6522 = vmatmul.mubr.bf16.gmra.mrb[176].mxu1 %v12956_v0  ;;  %8029 = vmatmul.mubr.bf16.gmra.mrb[112].mxu0 %v12957_v2  ;;  %v13050_v0 = vld [vmem:[%s14072_s26 + $0x17fc] ss:$52 sps:$4 sm:$0xff]   ;;  %v13052_v2 = vld [vmem:[%s14072_s26 + $0x1194] ss:$52 sps:$4 sm:$0xff]  }
 0x1af   : > { %6529 = vmatprep.mubr.bf16.mxu1 %v12960_v3  ;;  %8036 = vmatprep.mubr.bf16.mxu0 %v12962_v4  ;;  %v13054_v3 = vld [vmem:[%s14072_s26 + $0x17f8] ss:$52 sps:$4 sm:$0xff]   ;;  %v13055_v4 = vld [vmem:[%s14072_s26 + $0x1190] ss:$52 sps:$4 sm:$0xff]  }
 0x1b6   : > { %6530 = vmatmul.mubr.bf16.gmra.mrb[180].mxu1 %v12964_v7  ;;  %8037 = vmatmul.mubr.bf16.gmra.mrb[116].mxu0 %v12965_v8  ;;  %v13060_v7 = vld [vmem:[%s14072_s26 + $0x1860] ss:$52 sps:$4 sm:$0xff]   ;;  %v13061_v8 = vld [vmem:[%s14072_s26 + $0x11f8] ss:$52 sps:$4 sm:$0xff]  }
 0x1b7   : > { %6537 = vmatprep.mubr.bf16.mxu1 %v12966_v9  ;;  %8044 = vmatprep.mubr.bf16.mxu0 %v12968_v10  ;;  %v13064_v9 = vld [vmem:[%s14072_s26 + $0x18cc] ss:$52 sps:$4 sm:$0xff]   ;;  %v13066_v10 = vld [vmem:[%s14072_s26 + $0x1264] ss:$52 sps:$4 sm:$0xff]  }
 0x1be   : > { %6538 = vmatmul.mubr.bf16.gmra.mrb[184].mxu1 %v12970_v11  ;;  %8045 = vmatmul.mubr.bf16.gmra.mrb[120].mxu0 %v12971_v12  ;;  %v13163_v11 = vld [vmem:[%s16322_s1 + $0x278] sm:$0xff]  }
 0x1bf   : > { %6545 = vmatprep.mubr.bf16.mxu1 %v12972_v13  ;;  %8052 = vmatprep.mubr.bf16.mxu0 %v12974_v14  ;;  %v13068_v12 = vld [vmem:[%s14072_s26 + $0x18c8] ss:$52 sps:$4 sm:$0xff]   ;;  %v13069_v13 = vld [vmem:[%s14072_s26 + $0x1260] ss:$52 sps:$4 sm:$0xff]  }
 0x1c0   : > { %8348 = vmatpush1.bf16.msra.mxu0 %v13163_v11  ;;  %v13070_v14 = vld [vmem:[%s14072_s26 + $0x1934] ss:$52 sps:$4 sm:$0xff]   ;;  %v13141_v11 = vld [vmem:[%s14072_s26 + $0x1744] ss:$52 sps:$4 sm:$0xff]  }
 0x1c1   : > { %8862 = vmatprep.subr.bf16.mxu0 %v13968_v1 }
 0x1c6   : > { %6546 = vmatmul.mubr.bf16.gmra.mrb[188].mxu1 %v12976_v15  ;;  %8053 = vmatmul.mubr.bf16.gmra.mrb[124].mxu0 %v12977_v16  ;;  %v13072_v15 = vld [vmem:[%s14072_s26 + $0x12cc] ss:$52 sps:$4 sm:$0xff]   ;;  %v13074_v16 = vld [vmem:[%s14072_s26 + $0x1930] ss:$52 sps:$4 sm:$0xff]  }
 0x1c7   : > { %6553 = vmatprep.mubr.bf16.mxu1 %v12978_v17  ;;  %8060 = vmatprep.mubr.bf16.mxu0 %v12980_v18  ;;  %v13075_v17 = vld [vmem:[%s14072_s26 + $0x12c8] ss:$52 sps:$4 sm:$0xff]  }
 0x1c8   : > { %v13076_v18 = vld [vmem:[%s14072_s26 + $0x199c] ss:$52 sps:$4 sm:$0xff]  }
 0x1ce   : > { %6554 = vmatmul.mubr.bf16.gmra.mrb[192].mxu1 %v12982_v19  ;;  %8061 = vmatmul.mubr.bf16.gmra.mrb[128].mxu0 %v12983_v20  ;;  %v13078_v19 = vld [vmem:[%s14072_s26 + $0x1334] ss:$52 sps:$4 sm:$0xff]   ;;  %v13080_v20 = vld [vmem:[%s14072_s26 + $0x1998] ss:$52 sps:$4 sm:$0xff]  }
 0x1cf   : > { %6561 = vmatprep.mubr.bf16.mxu1 %v12986_v21  ;;  %8068 = vmatprep.mubr.bf16.mxu0 %v12988_v22  ;;  %v13081_v21 = vld [vmem:[%s14072_s26 + $0x1330] ss:$52 sps:$4 sm:$0xff]   ;;  %v13084_v22 = vld [vmem:[%s14072_s26 + $0xc] ss:$52 sps:$4 sm:$0xff]  }
 0x1d6   : > { %6562 = vmatmul.mubr.bf16.gmra.mrb[196].mxu1 %v12990_v24  ;;  %8069 = vmatmul.mubr.bf16.gmra.mrb[132].mxu0 %v12991_v25  ;;  %v13082_v24 = vld [vmem:[%s14072_s26 + $0x8] ss:$52 sps:$4 sm:$0xff]   ;;  %v13087_v25 = vld [vmem:[%s14072_s26 + $0x1398] ss:$52 sps:$4 sm:$0xff]  }
 0x1d7   : > { %6569 = vmatprep.mubr.bf16.mxu1 %v12992_v26  ;;  %8076 = vmatprep.mubr.bf16.mxu0 %v12994_v27  ;;  %v13089_v26 = vld [vmem:[%s14072_s26 + $0x74] ss:$52 sps:$4 sm:$0xff]   ;;  %v13091_v27 = vld [vmem:[%s14072_s26 + $0x1404] ss:$52 sps:$4 sm:$0xff]  }
 0x1de   : > { %6570 = vmatmul.mubr.bf16.gmra.mrb[200].mxu1 %v12996_v28  ;;  %8077 = vmatmul.mubr.bf16.gmra.mrb[136].mxu0 %v12997_v29  ;;  %v13942_v28 = vld [vmem:[%s16322_s1 + $0x100] sm:$0xff]  }
 0x1df   : > { %6577 = vmatprep.mubr.bf16.mxu1 %v12998_v30  ;;  %8084 = vmatprep.mubr.bf16.mxu0 %v13000_v31  ;;  %v13093_v29 = vld [vmem:[%s14072_s26 + $0x70] ss:$52 sps:$4 sm:$0xff]   ;;  %v13094_v30 = vld [vmem:[%s14072_s26 + $0x1400] ss:$52 sps:$4 sm:$0xff]  }
 0x1e0   : > { %v13095_v31 = vld [vmem:[%s14072_s26 + $0xdc] ss:$52 sps:$4 sm:$0xff]  }
 0x1e6   : > { %6578 = vmatmul.mubr.bf16.gmra.mrb[204].mxu1 %v13002_v32  ;;  %8085 = vmatmul.mubr.bf16.gmra.mrb[140].mxu0 %v13003_v33  ;;  %v13943_v32 = vld [vmem:[%s16322_s1 + $0x108] sm:$0xff]  }
 0x1e7   : > { %6585 = vmatprep.mubr.bf16.mxu1 %v13004_v34  ;;  %8092 = vmatprep.mubr.bf16.mxu0 %v13006_v35  ;;  %v13097_v33 = vld [vmem:[%s14072_s26 + $0x146c] ss:$52 sps:$4 sm:$0xff]   ;;  %v13944_v34 = vld [vmem:[%s16322_s1 + $0x110] sm:$0xff]  }
 0x1e8   : > { %v13099_v35 = vld [vmem:[%s14072_s26 + $0xd8] ss:$52 sps:$4 sm:$0xff]  }
 0x1ee   : > { %6586 = vmatmul.mubr.bf16.gmra.mrb[208].mxu1 %v13008_v36  ;;  %8093 = vmatmul.mubr.bf16.gmra.mrb[144].mxu0 %v13009_v37  ;;  %v13100_v36 = vld [vmem:[%s14072_s26 + $0x1468] ss:$52 sps:$4 sm:$0xff]   ;;  %v13101_v37 = vld [vmem:[%s14072_s26 + $0x144] ss:$52 sps:$4 sm:$0xff]  }
 0x1ef   : > { %6593 = vmatprep.mubr.bf16.mxu1 %v13012_v38  ;;  %8100 = vmatprep.mubr.bf16.mxu0 %v13014_v39  ;;  %v13103_v38 = vld [vmem:[%s14072_s26 + $0x14d4] ss:$52 sps:$4 sm:$0xff]   ;;  %v13945_v39 = vld [vmem:[%s16322_s1 + $0x118] sm:$0xff]  }
 0x1f6   : > { %6594 = vmatmul.mubr.bf16.gmra.mrb[212].mxu1 %v13016_v41  ;;  %8101 = vmatmul.mubr.bf16.gmra.mrb[148].mxu0 %v13017_v42  ;;  %v13105_v41 = vld [vmem:[%s14072_s26 + $0x140] ss:$52 sps:$4 sm:$0xff]   ;;  %v13106_v42 = vld [vmem:[%s14072_s26 + $0x14d0] ss:$52 sps:$4 sm:$0xff]  }
 0x1f7   : > { %6601 = vmatprep.mubr.bf16.mxu1 %v13018_v43  ;;  %8108 = vmatprep.mubr.bf16.mxu0 %v13020_v44  ;;  %v13107_v43 = vld [vmem:[%s14072_s26 + $0x1ac] ss:$52 sps:$4 sm:$0xff]   ;;  %v13109_v44 = vld [vmem:[%s14072_s26 + $0x153c] ss:$52 sps:$4 sm:$0xff]  }
 0x1fe   : > { %6602 = vmatmul.mubr.bf16.gmra.mrb[216].mxu1 %v13022_v45  ;;  %8109 = vmatmul.mubr.bf16.gmra.mrb[152].mxu0 %v13023_v46  ;;  %v13947_v45 = vld [vmem:[%s16322_s1 + $0x128] sm:$0xff]   ;;  %v13948_v46 = vld [vmem:[%s16322_s1 + $0x130] sm:$0xff]  }
 0x1ff   : > { %6609 = vmatprep.mubr.bf16.mxu1 %v13024_v47  ;;  %8116 = vmatprep.mubr.bf16.mxu0 %v13026_v48  ;;  %v13111_v47 = vld [vmem:[%s14072_s26 + $0x1a8] ss:$52 sps:$4 sm:$0xff]   ;;  %v13112_v48 = vld [vmem:[%s14072_s26 + $0x1538] ss:$52 sps:$4 sm:$0xff]  }
 0x206   : > { %6610 = vmatmul.mubr.bf16.gmra.mrb[220].mxu1 %v13028_v49  ;;  %8117 = vmatmul.mubr.bf16.gmra.mrb[156].mxu0 %v13029_v50  ;;  %v13114_v49 = vld [vmem:[%s14072_s26 + $0x214] ss:$52 sps:$4 sm:$0xff]   ;;  %v13116_v50 = vld [vmem:[%s14072_s26 + $0x15a4] ss:$52 sps:$4 sm:$0xff]  }
 0x207   : > { %6617 = vmatprep.mubr.bf16.mxu1 %v13030_v51  ;;  %8124 = vmatprep.mubr.bf16.mxu0 %v13032_v52  ;;  %v13949_v51 = vld [vmem:[%s16322_s1 + $0x138] sm:$0xff]   ;;  %v13950_v52 = vld [vmem:[%s16322_s1 + $0x140] sm:$0xff]  }
 0x20e   : > { %6618 = vmatmul.mubr.bf16.gmra.mrb[224].mxu1 %v13034_v53  ;;  %8125 = vmatmul.mubr.bf16.gmra.mrb[160].mxu0 %v13035_v54  ;;  %v13118_v53 = vld [vmem:[%s14072_s26 + $0x210] ss:$52 sps:$4 sm:$0xff]   ;;  %v13119_v54 = vld [vmem:[%s14072_s26 + $0x15a0] ss:$52 sps:$4 sm:$0xff]  }
 0x20f   : > { %6625 = vmatprep.mubr.bf16.mxu1 %v13038_v55  ;;  %8132 = vmatprep.mubr.bf16.mxu0 %v13040_v56  ;;  %v13120_v55 = vld [vmem:[%s14072_s26 + $0x27c] ss:$52 sps:$4 sm:$0xff]   ;;  %v13122_v56 = vld [vmem:[%s14072_s26 + $0x160c] ss:$52 sps:$4 sm:$0xff]  }
 0x216   : > { %6626 = vmatmul.mubr.bf16.gmra.mrb[228].mxu1 %v13042_v58  ;;  %8133 = vmatmul.mubr.bf16.gmra.mrb[164].mxu0 %v13043_v59  ;;  %v13952_v58 = vld [vmem:[%s16322_s1 + $0x150] sm:$0xff]   ;;  %v13124_v59 = vld [vmem:[%s14072_s26 + $0x278] ss:$52 sps:$4 sm:$0xff]  }
 0x217   : > { %6633 = vmatprep.mubr.bf16.mxu1 %v13044_v60  ;;  %8140 = vmatprep.mubr.bf16.mxu0 %v13046_v61  ;;  %v13125_v60 = vld [vmem:[%s14072_s26 + $0x1608] ss:$52 sps:$4 sm:$0xff]   ;;  %v13126_v61 = vld [vmem:[%s14072_s26 + $0x2e4] ss:$52 sps:$4 sm:$0xff]  }
 0x21e   : > { %6634 = vmatmul.mubr.bf16.gmra.mrb[232].mxu1 %v13048_v62  ;;  %8141 = vmatmul.mubr.bf16.gmra.mrb[168].mxu0 %v13049_v63  ;;  %v13128_v62 = vld [vmem:[%s14072_s26 + $0x1674] ss:$52 sps:$4 sm:$0xff]   ;;  %v13953_v63 = vld [vmem:[%s16322_s1 + $0x158] sm:$0xff]  }
 0x21f   : > { %6641 = vmatprep.mubr.bf16.mxu1 %v13050_v0  ;;  %8148 = vmatprep.mubr.bf16.mxu0 %v13052_v2  ;;  %v13954_v0 = vld [vmem:[%s16322_s1 + $0x160] sm:$0xff]  }
 0x220   : > { %v13130_v2 = vld [vmem:[%s14072_s26 + $0x2e0] ss:$52 sps:$4 sm:$0xff]  }
 0x226   : > { %6642 = vmatmul.mubr.bf16.gmra.mrb[236].mxu1 %v13054_v3  ;;  %8149 = vmatmul.mubr.bf16.gmra.mrb[172].mxu0 %v13055_v4  ;;  %v13131_v3 = vld [vmem:[%s14072_s26 + $0x1670] ss:$52 sps:$4 sm:$0xff]   ;;  %v13132_v4 = vld [vmem:[%s14072_s26 + $0x34c] ss:$52 sps:$4 sm:$0xff]  }
 0x227   : > { %6649 = vmatprep.mubr.bf16.mxu1 %v13056_v5  ;;  %8156 = vmatprep.mubr.bf16.mxu0 %v13058_v6  ;;  %v13134_v5 = vld [vmem:[%s14072_s26 + $0x16dc] ss:$52 sps:$4 sm:$0xff]   ;;  %v13955_v6 = vld [vmem:[%s16322_s1 + $0x168] sm:$0xff]  }
 0x22e   : > { %6650 = vmatmul.mubr.bf16.gmra.mrb[240].mxu1 %v13060_v7  ;;  %8157 = vmatmul.mubr.bf16.gmra.mrb[176].mxu0 %v13061_v8  ;;  %v13956_v7 = vld [vmem:[%s16322_s1 + $0x170] sm:$0xff]   ;;  %v13136_v8 = vld [vmem:[%s14072_s26 + $0x348] ss:$52 sps:$4 sm:$0xff]  }
 0x22f   : > { %6657 = vmatprep.mubr.bf16.mxu1 %v13064_v9  ;;  %8164 = vmatprep.mubr.bf16.mxu0 %v13066_v10  ;;  %v13137_v9 = vld [vmem:[%s14072_s26 + $0x16d8] ss:$52 sps:$4 sm:$0xff]   ;;  %v13139_v10 = vld [vmem:[%s14072_s26 + $0x3b4] ss:$52 sps:$4 sm:$0xff]  }
 0x236   : > { %6658 = vmatmul.mubr.bf16.gmra.mrb[244].mxu1 %v13068_v12  ;;  %8165 = vmatmul.mubr.bf16.gmra.mrb[180].mxu0 %v13069_v13  ;;  %v13957_v12 = vld [vmem:[%s16322_s1 + $0x178] sm:$0xff]   ;;  %v13143_v13 = vld [vmem:[%s14072_s26 + $0x3b0] ss:$52 sps:$4 sm:$0xff]  }
 0x237   : > { %6665 = vmatprep.mubr.bf16.mxu1 %v13070_v14  ;;  %8172 = vmatprep.mubr.bf16.mxu0 %v13072_v15  ;;  %v13144_v14 = vld [vmem:[%s14072_s26 + $0x1740] ss:$52 sps:$4 sm:$0xff]   ;;  %v13145_v15 = vld [vmem:[%s14072_s26 + $0x41c] ss:$52 sps:$4 sm:$0xff]  }
 0x23e   : > { %6666 = vmatmul.mubr.bf16.gmra.mrb[248].mxu1 %v13074_v16  ;;  %8173 = vmatmul.mubr.bf16.gmra.mrb[184].mxu0 %v13075_v17  ;;  %v13147_v16 = vld [vmem:[%s14072_s26 + $0x17ac] ss:$52 sps:$4 sm:$0xff]  }
 0x23f   : > { %6673 = vmatprep.mubr.bf16.mxu1 %v13076_v18  ;;  %8180 = vmatprep.mubr.bf16.mxu0 %v13078_v19  ;;  %v13149_v17 = vld [vmem:[%s14072_s26 + $0x418] ss:$52 sps:$4 sm:$0xff]   ;;  %v13150_v18 = vld [vmem:[%s14072_s26 + $0x17a8] ss:$52 sps:$4 sm:$0xff]  }
 0x240   : > { %v13151_v19 = vld [vmem:[%s14072_s26 + $0x484] ss:$52 sps:$4 sm:$0xff]  }
 0x246   : > { %6674 = vmatmul.mubr.bf16.gmra.mrb[252].mxu1 %v13080_v20  ;;  %8181 = vmatmul.mubr.bf16.gmra.mrb[188].mxu0 %v13081_v21  ;;  %v13153_v20 = vld [vmem:[%s14072_s26 + $0x1814] ss:$52 sps:$4 sm:$0xff]  }
 0x247   : > { %6714 = vmatprep.mubr.bf16.mxu1 %v13084_v22  ;;  %8188 = vmatprep.mubr.bf16.mxu0 %v13085_v23  ;;  %v13155_v21 = vld [vmem:[%s14072_s26 + $0x480] ss:$52 sps:$4 sm:$0xff]   ;;  %v13156_v22 = vld [vmem:[%s14072_s26 + $0x1810] ss:$52 sps:$4 sm:$0xff]  }
 0x248   : > { %v13157_v23 = vld [vmem:[%s14072_s26 + $0x4ec] ss:$52 sps:$4 sm:$0xff]  }
 0x24e   : > { %6715 = vmatmul.mubr.bf16.vlgmr.msra.gmra.mrb[0].mxu1 %v13082_v24  ;;  %8189 = vmatmul.mubr.bf16.gmra.mrb[192].mxu0 %v13087_v25  ;;  %v13159_v24 = vld [vmem:[%s14072_s26 + $0x187c] ss:$52 sps:$4 sm:$0xff]  }
 0x24f   : > { %11316 = vmatpush1.bf16.msra.mxu1 %v13942_v28  ;;  %6722 = vmatprep.mubr.bf16.mxu1 %v13089_v26  ;;  %v13161_v25 = vld [vmem:[%s14072_s26 + $0x4e8] ss:$52 sps:$4 sm:$0xff]   ;;  %v13162_v26 = vld [vmem:[%s14072_s26 + $0x1878] ss:$52 sps:$4 sm:$0xff]  }
 0x250   : > { %8196 = vmatprep.mubr.bf16.mxu0 %v13091_v27  ;;  %11301 = vmatprep.subr.bf16.mxu1 %v13968_v1  ;;  %v13164_v27 = vld [vmem:[%s14072_s26 + $0x554] ss:$52 sps:$4 sm:$0xff]   ;;  %v13166_v28 = vld [vmem:[%s14072_s26 + $0x18e4] ss:$52 sps:$4 sm:$0xff]  }
 0x253   : > { %11317 = vmatpush1.bf16.msra.mxu1 %v13943_v32  ;;  %v13172_v32 = vld [vmem:[%s14072_s26 + $0x194c] ss:$52 sps:$4 sm:$0xff]  }
 0x254   : > { %11302 = vmatprep.subr.bf16.mxu1 %v13968_v1 }
 0x256   : > { %6723 = vmatmul.mubr.bf16.gmra.mrb[4].mxu1 %v13093_v29  ;;  %8197 = vmatmul.mubr.bf16.gmra.mrb[196].mxu0 %v13094_v30  ;;  %v13168_v29 = vld [vmem:[%s14072_s26 + $0x550] ss:$52 sps:$4 sm:$0xff]   ;;  %v13169_v30 = vld [vmem:[%s14072_s26 + $0x18e0] ss:$52 sps:$4 sm:$0xff]  }
 0x257   : > { %6730 = vmatprep.mubr.bf16.mxu1 %v13095_v31  ;;  %8204 = vmatprep.mubr.bf16.mxu0 %v13097_v33  ;;  %v13170_v31 = vld [vmem:[%s14072_s26 + $0x5bc] ss:$52 sps:$4 sm:$0xff]   ;;  %v13174_v33 = vld [vmem:[%s14072_s26 + $0x5b8] ss:$52 sps:$4 sm:$0xff]  }
 0x258   : > { %11318 = vmatpush1.bf16.msra.mxu1 %v13944_v34  ;;  %v13175_v34 = vld [vmem:[%s14072_s26 + $0x1948] ss:$52 sps:$4 sm:$0xff]  }
 0x259   : > { %11303 = vmatprep.subr.bf16.mxu1 %v13968_v1 }
 0x25c   : > { %11319 = vmatpush1.bf16.msra.mxu1 %v13945_v39  ;;  %v13182_v39 = vld [vmem:[%s14072_s26 + $0x68c] ss:$52 sps:$4 sm:$0xff]  }
 0x25d   : > { %11304 = vmatprep.subr.bf16.mxu1 %v13968_v1 }
 0x25e   : > { %6731 = vmatmul.mubr.bf16.gmra.mrb[8].mxu1 %v13099_v35  ;;  %8205 = vmatmul.mubr.bf16.gmra.mrb[200].mxu0 %v13100_v36  ;;  %v13176_v35 = vld [vmem:[%s14072_s26 + $0x624] ss:$52 sps:$4 sm:$0xff]   ;;  %v13178_v36 = vld [vmem:[%s14072_s26 + $0x19b4] ss:$52 sps:$4 sm:$0xff]  }
 0x25f   : > { %6738 = vmatprep.mubr.bf16.mxu1 %v13101_v37  ;;  %8212 = vmatprep.mubr.bf16.mxu0 %v13103_v38  ;;  %v13180_v37 = vld [vmem:[%s14072_s26 + $0x620] ss:$52 sps:$4 sm:$0xff]   ;;  %v13181_v38 = vld [vmem:[%s14072_s26 + $0x19b0] ss:$52 sps:$4 sm:$0xff]  }
 0x260   : > { %11320 = vmatpush1.bf16.msra.mxu1 %v13946_v40  ;;  %v13186_v40 = vld [vmem:[%s14072_s26 + $0x24] ss:$52 sps:$4 sm:$0xff]  }
 0x261   : > { %11305 = vmatprep.subr.bf16.mxu1 %v13968_v1 }
 0x264   : > { %11321 = vmatpush1.bf16.msra.mxu1 %v13947_v45  ;;  %v13191_v45 = vld [vmem:[%s14072_s26 + $0x8c] ss:$52 sps:$4 sm:$0xff]  }
 0x265   : > { %11306 = vmatprep.subr.bf16.mxu1 %v13968_v1 }
 0x266   : > { %6739 = vmatmul.mubr.bf16.gmra.mrb[12].mxu1 %v13105_v41  ;;  %8213 = vmatmul.mubr.bf16.gmra.mrb[204].mxu0 %v13106_v42  ;;  %v13187_v41 = vld [vmem:[%s14072_s26 + $0x688] ss:$52 sps:$4 sm:$0xff]   ;;  %v13184_v42 = vld [vmem:[%s14072_s26 + $0x20] ss:$52 sps:$4 sm:$0xff]  }
 0x267   : > { %6746 = vmatprep.mubr.bf16.mxu1 %v13107_v43  ;;  %8220 = vmatprep.mubr.bf16.mxu0 %v13109_v44  ;;  %v13189_v43 = vld [vmem:[%s14072_s26 + $0x6f4] ss:$52 sps:$4 sm:$0xff]   ;;  %v13188_v44 = vld [vmem:[%s16322_s1 + $0x280] sm:$0xff]  }
 0x268   : > { %11322 = vmatpush1.bf16.msra.mxu1 %v13948_v46  ;;  %v13213_v46 = vld [vmem:[%s16322_s1 + $0x288] sm:$0xff]  }
 0x269   : > { %11307 = vmatprep.subr.bf16.mxu1 %v13968_v1 }
 0x26c   : > { %11323 = vmatpush1.bf16.msra.mxu1 %v13949_v51  ;;  %v13238_v51 = vld [vmem:[%s16322_s1 + $0x290] sm:$0xff]  }
 0x26d   : > { %11308 = vmatprep.subr.bf16.mxu1 %v13968_v1 }
 0x26e   : > { %6747 = vmatmul.mubr.bf16.gmra.mrb[16].mxu1 %v13111_v47  ;;  %8221 = vmatmul.mubr.bf16.gmra.mrb[208].mxu0 %v13112_v48  ;;  %v13193_v47 = vld [vmem:[%s14072_s26 + $0x6f0] ss:$52 sps:$4 sm:$0xff]   ;;  %v13194_v48 = vld [vmem:[%s14072_s26 + $0x88] ss:$52 sps:$4 sm:$0xff]  }
 0x26f   : > { %6754 = vmatprep.mubr.bf16.mxu1 %v13114_v49  ;;  %8228 = vmatprep.mubr.bf16.mxu0 %v13116_v50  ;;  %v13195_v49 = vld [vmem:[%s14072_s26 + $0x75c] ss:$52 sps:$4 sm:$0xff]   ;;  %v13197_v50 = vld [vmem:[%s14072_s26 + $0xf4] ss:$52 sps:$4 sm:$0xff]  }
 0x270   : > { %11324 = vmatpush1.bf16.msra.mxu1 %v13950_v52  ;;  %v13263_v52 = vld [vmem:[%s16322_s1 + $0x298] sm:$0xff]  }
 0x271   : > { %11309 = vmatprep.subr.bf16.mxu1 %v13968_v1 }
 0x274   : > { %11325 = vmatpush1.bf16.msra.mxu1 %v13951_v57  ;;  %v13288_v57 = vld [vmem:[%s16322_s1 + $0x2a0] sm:$0xff]  }
 0x275   : > { %11310 = vmatprep.subr.bf16.mxu1 %v13968_v1 }
 0x276   : > { %6755 = vmatmul.mubr.bf16.gmra.mrb[20].mxu1 %v13118_v53  ;;  %8229 = vmatmul.mubr.bf16.gmra.mrb[212].mxu0 %v13119_v54  ;;  %v13199_v53 = vld [vmem:[%s14072_s26 + $0x758] ss:$52 sps:$4 sm:$0xff]   ;;  %v13200_v54 = vld [vmem:[%s14072_s26 + $0xf0] ss:$52 sps:$4 sm:$0xff]  }
 0x277   : > { %6762 = vmatprep.mubr.bf16.mxu1 %v13120_v55  ;;  %8236 = vmatprep.mubr.bf16.mxu0 %v13122_v56  ;;  %v13201_v55 = vld [vmem:[%s14072_s26 + $0x7c4] ss:$52 sps:$4 sm:$0xff]   ;;  %v13203_v56 = vld [vmem:[%s14072_s26 + $0x15c] ss:$52 sps:$4 sm:$0xff]  }
 0x278   : > { %11326 = vmatpush1.bf16.msra.mxu1 %v13952_v58  ;;  %v13205_v58 = vld [vmem:[%s14072_s26 + $0x7c0] ss:$52 sps:$4 sm:$0xff]  }
 0x279   : > { %11311 = vmatprep.subr.bf16.mxu1 %v13968_v1 }
 0x27c   : > { %11327 = vmatpush1.bf16.msra.mxu1 %v13953_v63  ;;  %v13212_v63 = vld [vmem:[%s14072_s26 + $0x1c0] ss:$52 sps:$4 sm:$0xff]  }
 0x27d   : > { %11312 = vmatprep.subr.bf16.mxu1 %v13968_v1 }
 0x27e   : > { %6763 = vmatmul.mubr.bf16.gmra.mrb[24].mxu1 %v13124_v59  ;;  %8237 = vmatmul.mubr.bf16.gmra.mrb[216].mxu0 %v13125_v60  ;;  %v13206_v59 = vld [vmem:[%s14072_s26 + $0x158] ss:$52 sps:$4 sm:$0xff]  }
 0x27f   : > { %6770 = vmatprep.mubr.bf16.mxu1 %v13126_v61  ;;  %8244 = vmatprep.mubr.bf16.mxu0 %v13128_v62  ;;  %v13207_v60 = vld [vmem:[%s14072_s26 + $0x82c] ss:$52 sps:$4 sm:$0xff]   ;;  %v13209_v61 = vld [vmem:[%s14072_s26 + $0x1c4] ss:$52 sps:$4 sm:$0xff]   ;;  %v13211_v62 = vld [vmem:[%s14072_s26 + $0x828] ss:$52 sps:$4 sm:$0xff]  }
 0x280   : > { %11328 = vmatpush1.bf16.msra.mxu1 %v13954_v0  ;;  %v13214_v0 = vld [vmem:[%s14072_s26 + $0x894] ss:$52 sps:$4 sm:$0xff]  }
 0x281   : > { %11313 = vmatprep.subr.bf16.mxu1 %v13968_v1 }
 0x284   : > { %11329 = vmatpush1.bf16.msra.mxu1 %v13955_v6  ;;  %v13220_v6 = vld [vmem:[%s14072_s26 + $0x8fc] ss:$52 sps:$4 sm:$0xff]  }
 0x285   : > { %11314 = vmatprep.subr.bf16.mxu1 %v13968_v1 }
 0x286   : > { %6771 = vmatmul.mubr.bf16.gmra.mrb[28].mxu1 %v13130_v2  ;;  %8245 = vmatmul.mubr.bf16.gmra.mrb[220].mxu0 %v13131_v3  ;;  %v13216_v2 = vld [vmem:[%s14072_s26 + $0x22c] ss:$52 sps:$4 sm:$0xff]  }
 0x287   : > { %6778 = vmatprep.mubr.bf16.mxu1 %v13132_v4  ;;  %8252 = vmatprep.mubr.bf16.mxu0 %v13134_v5  ;;  %v13313_v3 = vld [vmem:[%s16322_s1 + $0x2a8] sm:$0xff]   ;;  %v13218_v4 = vld [vmem:[%s14072_s26 + $0x890] ss:$52 sps:$4 sm:$0xff]  }
 0x288   : > { %11330 = vmatpush1.bf16.msra.mxu1 %v13956_v7  ;;  %v13219_v5 = vld [vmem:[%s14072_s26 + $0x228] ss:$52 sps:$4 sm:$0xff]  }
 0x289   : > { %11315 = vmatprep.subr.bf16.mxu1 %v13968_v1  ;;  %v13222_v7 = vld [vmem:[%s14072_s26 + $0x294] ss:$52 sps:$4 sm:$0xff]  }
 0x28c   : > { %11331 = vmatpush1.bf16.msra.mxu1 %v13957_v12  ;;  %v13230_v12 = vld [vmem:[%s14072_s26 + $0x960] ss:$52 sps:$4 sm:$0xff]  }
 0x28e   : > { %6779 = vmatmul.mubr.bf16.gmra.mrb[32].mxu1 %v13136_v8  ;;  %8253 = vmatmul.mubr.bf16.gmra.mrb[224].mxu0 %v13137_v9  ;;  %v13224_v8 = vld [vmem:[%s14072_s26 + $0x8f8] ss:$52 sps:$4 sm:$0xff]   ;;  %v13225_v9 = vld [vmem:[%s14072_s26 + $0x290] ss:$52 sps:$4 sm:$0xff]  }
 0x28f   : > { %6786 = vmatprep.mubr.bf16.mxu1 %v13139_v10  ;;  %8260 = vmatprep.mubr.bf16.mxu0 %v13141_v11  ;;  %v13226_v10 = vld [vmem:[%s14072_s26 + $0x964] ss:$52 sps:$4 sm:$0xff]   ;;  %v13228_v11 = vld [vmem:[%s14072_s26 + $0x2fc] ss:$52 sps:$4 sm:$0xff]  }
 0x296   : > { %6787 = vmatmul.mubr.bf16.gmra.mrb[36].mxu1 %v13143_v13  ;;  %8261 = vmatmul.mubr.bf16.gmra.mrb[228].mxu0 %v13144_v14  ;;  %v13231_v13 = vld [vmem:[%s14072_s26 + $0x2f8] ss:$52 sps:$4 sm:$0xff]  }
 0x297   : > { %6794 = vmatprep.mubr.bf16.mxu1 %v13145_v15  ;;  %8268 = vmatprep.mubr.bf16.mxu0 %v13147_v16  ;;  %v13232_v14 = vld [vmem:[%s14072_s26 + $0x9cc] ss:$52 sps:$4 sm:$0xff]   ;;  %v13234_v15 = vld [vmem:[%s14072_s26 + $0x364] ss:$52 sps:$4 sm:$0xff]   ;;  %v13236_v16 = vld [vmem:[%s14072_s26 + $0x9c8] ss:$52 sps:$4 sm:$0xff]  }
 0x29e   : > { %6795 = vmatmul.mubr.bf16.gmra.mrb[40].mxu1 %v13149_v17  ;;  %8269 = vmatmul.mubr.bf16.gmra.mrb[232].mxu0 %v13150_v18  ;;  %v13237_v17 = vld [vmem:[%s14072_s26 + $0x360] ss:$52 sps:$4 sm:$0xff]  }
 0x29f   : > { %6802 = vmatprep.mubr.bf16.mxu1 %v13151_v19  ;;  %8276 = vmatprep.mubr.bf16.mxu0 %v13153_v20  ;;  %v13239_v18 = vld [vmem:[%s14072_s26 + $0xa34] ss:$52 sps:$4 sm:$0xff]   ;;  %v13241_v19 = vld [vmem:[%s14072_s26 + $0x3cc] ss:$52 sps:$4 sm:$0xff]  }
 0x2a0   : > { %v13338_v20 = vld [vmem:[%s16322_s1 + $0x2b0] sm:$0xff]  }
 0x2a6   : > { %6803 = vmatmul.mubr.bf16.gmra.mrb[44].mxu1 %v13155_v21  ;;  %8277 = vmatmul.mubr.bf16.gmra.mrb[236].mxu0 %v13156_v22  ;;  %v13243_v21 = vld [vmem:[%s14072_s26 + $0xa30] ss:$52 sps:$4 sm:$0xff]   ;;  %v13244_v22 = vld [vmem:[%s14072_s26 + $0x3c8] ss:$52 sps:$4 sm:$0xff]  }
 0x2a7   : > { %6810 = vmatprep.mubr.bf16.mxu1 %v13157_v23  ;;  %8284 = vmatprep.mubr.bf16.mxu0 %v13159_v24  ;;  %v13245_v23 = vld [vmem:[%s14072_s26 + $0xa9c] ss:$52 sps:$4 sm:$0xff]   ;;  %v13247_v24 = vld [vmem:[%s14072_s26 + $0x434] ss:$52 sps:$4 sm:$0xff]  }
 0x2ae   : > { %6811 = vmatmul.mubr.bf16.gmra.mrb[48].mxu1 %v13161_v25  ;;  %8285 = vmatmul.mubr.bf16.gmra.mrb[240].mxu0 %v13162_v26  ;;  %v13249_v25 = vld [vmem:[%s14072_s26 + $0xa98] ss:$52 sps:$4 sm:$0xff]   ;;  %v13250_v26 = vld [vmem:[%s14072_s26 + $0x430] ss:$52 sps:$4 sm:$0xff]  }
 0x2af   : > { %6818 = vmatprep.mubr.bf16.mxu1 %v13164_v27  ;;  %8292 = vmatprep.mubr.bf16.mxu0 %v13166_v28  ;;  %v13251_v27 = vld [vmem:[%s14072_s26 + $0xb04] ss:$52 sps:$4 sm:$0xff]   ;;  %v13253_v28 = vld [vmem:[%s14072_s26 + $0x49c] ss:$52 sps:$4 sm:$0xff]  }
 0x2b6   : > { %6819 = vmatmul.mubr.bf16.gmra.mrb[52].mxu1 %v13168_v29  ;;  %8293 = vmatmul.mubr.bf16.gmra.mrb[244].mxu0 %v13169_v30 }
 0x2b7   : > { %6826 = vmatprep.mubr.bf16.mxu1 %v13170_v31  ;;  %8300 = vmatprep.mubr.bf16.mxu0 %v13172_v32  ;;  %v13255_v31 = vld [vmem:[%s14072_s26 + $0xb00] ss:$52 sps:$4 sm:$0xff]  }
 0x2be   : > { %6827 = vmatmul.mubr.bf16.gmra.mrb[56].mxu1 %v13174_v33  ;;  %8301 = vmatmul.mubr.bf16.gmra.mrb[248].mxu0 %v13175_v34  ;;  %v13256_v33 = vld [vmem:[%s14072_s26 + $0x498] ss:$52 sps:$4 sm:$0xff]  }
 0x2bf   : > { %6834 = vmatprep.mubr.bf16.mxu1 %v13176_v35  ;;  %8308 = vmatprep.mubr.bf16.mxu0 %v13178_v36  ;;  %v13257_v34 = vld [vmem:[%s14072_s26 + $0xb6c] ss:$52 sps:$4 sm:$0xff]   ;;  %v13259_v36 = vld [vmem:[%s14072_s26 + $0x504] ss:$52 sps:$4 sm:$0xff]  }
 0x2c6   : > { %6835 = vmatmul.mubr.bf16.gmra.mrb[60].mxu1 %v13180_v37  ;;  %8309 = vmatmul.mubr.bf16.gmra.mrb[252].mxu0 %v13181_v38 }
 0x2c7   : > { %6842 = vmatprep.mubr.bf16.mxu1 %v13182_v39  ;;  %8349 = vmatprep.mubr.bf16.mxu0 %v13186_v40  ;;  %v13261_v39 = vld [vmem:[%s14072_s26 + $0xb68] ss:$52 sps:$4 sm:$0xff]  }
 0x2ce   : > { %6843 = vmatmul.mubr.bf16.gmra.mrb[64].mxu1 %v13187_v41  ;;  %8350 = vmatmul.mubr.bf16.vlgmr.msra.gmra.mrb[0].mxu0 %v13184_v42  ;;  %v13262_v41 = vld [vmem:[%s14072_s26 + $0x500] ss:$52 sps:$4 sm:$0xff]  }
 0x2cf   : > { %6850 = vmatprep.mubr.bf16.mxu1 %v13189_v43  ;;  %8863 = vmatpush1.bf16.msra.mxu0 %v13188_v44  ;;  %v13264_v42 = vld [vmem:[%s14072_s26 + $0xbd4] ss:$52 sps:$4 sm:$0xff]   ;;  %v13266_v44 = vld [vmem:[%s14072_s26 + $0x56c] ss:$52 sps:$4 sm:$0xff]  }
 0x2d0   : > { %8357 = vmatprep.mubr.bf16.mxu0 %v13191_v45  ;;  %8864 = vmatprep.subr.bf16.mxu0 %v13968_v1  ;;  %v13363_v45 = vld [vmem:[%s16322_s1 + $0x2b8] sm:$0xff]  }
 0x2d3   : > { %8865 = vmatpush1.bf16.msra.mxu0 %v13213_v46 }
 0x2d4   : > { %8866 = vmatprep.subr.bf16.mxu0 %v13968_v1 }
 0x2d6   : > { %6851 = vmatmul.mubr.bf16.gmra.mrb[68].mxu1 %v13193_v47  ;;  %8358 = vmatmul.mubr.bf16.gmra.mrb[4].mxu0 %v13194_v48  ;;  %v13268_v48 = vld [vmem:[%s14072_s26 + $0xbd0] ss:$52 sps:$4 sm:$0xff]  }
 0x2d7   : > { %6858 = vmatprep.mubr.bf16.mxu1 %v13195_v49  ;;  %8365 = vmatprep.mubr.bf16.mxu0 %v13197_v50  ;;  %v13269_v50 = vld [vmem:[%s14072_s26 + $0x568] ss:$52 sps:$4 sm:$0xff]  }
 0x2d8   : > { %8867 = vmatpush1.bf16.msra.mxu0 %v13238_v51  ;;  %v13270_v51 = vld [vmem:[%s14072_s26 + $0xc3c] ss:$52 sps:$4 sm:$0xff]  }
 0x2d9   : > { %8868 = vmatprep.subr.bf16.mxu0 %v13968_v1 }
 0x2dc   : > { %8869 = vmatpush1.bf16.msra.mxu0 %v13263_v52 }
 0x2dd   : > { %8870 = vmatprep.subr.bf16.mxu0 %v13968_v1 }
 0x2de   : > { %6859 = vmatmul.mubr.bf16.gmra.mrb[72].mxu1 %v13199_v53  ;;  %8366 = vmatmul.mubr.bf16.gmra.mrb[8].mxu0 %v13200_v54  ;;  %v13272_v53 = vld [vmem:[%s14072_s26 + $0x5d4] ss:$52 sps:$4 sm:$0xff]  }
 0x2df   : > { %6866 = vmatprep.mubr.bf16.mxu1 %v13201_v55  ;;  %8373 = vmatprep.mubr.bf16.mxu0 %v13203_v56  ;;  %v13274_v56 = vld [vmem:[%s14072_s26 + $0xc38] ss:$52 sps:$4 sm:$0xff]  }
 0x2e0   : > { %8871 = vmatpush1.bf16.msra.mxu0 %v13288_v57 }
 0x2e1   : > { %8872 = vmatprep.subr.bf16.mxu0 %v13968_v1 }
 0x2e4   : > { %8873 = vmatpush1.bf16.msra.mxu0 %v13313_v3  ;;  %v13281_v3 = vld [vmem:[%s14072_s26 + $0x638] ss:$52 sps:$4 sm:$0xff]  }
 0x2e5   : > { %8874 = vmatprep.subr.bf16.mxu0 %v13968_v1 }
 0x2e6   : > { %6867 = vmatmul.mubr.bf16.gmra.mrb[76].mxu1 %v13205_v58  ;;  %8374 = vmatmul.mubr.bf16.gmra.mrb[12].mxu0 %v13206_v59  ;;  %v13275_v58 = vld [vmem:[%s14072_s26 + $0x5d0] ss:$52 sps:$4 sm:$0xff]  }
 0x2e7   : > { %6874 = vmatprep.mubr.bf16.mxu1 %v13207_v60  ;;  %8381 = vmatprep.mubr.bf16.mxu0 %v13209_v61  ;;  %v13276_v59 = vld [vmem:[%s14072_s26 + $0xca4] ss:$52 sps:$4 sm:$0xff]   ;;  %v13278_v61 = vld [vmem:[%s14072_s26 + $0x63c] ss:$52 sps:$4 sm:$0xff]  }
 0x2e8   : > { %8875 = vmatpush1.bf16.msra.mxu0 %v13338_v20  ;;  %v13294_v20 = vld [vmem:[%s14072_s26 + $0x708] ss:$52 sps:$4 sm:$0xff]  }
 0x2e9   : > { %8876 = vmatprep.subr.bf16.mxu0 %v13968_v1 }
 0x2ec   : > { %8877 = vmatpush1.bf16.msra.mxu0 %v13363_v45 }
 0x2ed   : > { %8878 = vmatprep.subr.bf16.mxu0 %v13968_v1 }
 0x2ee   : > { %6875 = vmatmul.mubr.bf16.gmra.mrb[80].mxu1 %v13211_v62  ;;  %8382 = vmatmul.mubr.bf16.gmra.mrb[16].mxu0 %v13212_v63 }
 0x2ef   : > { %6882 = vmatprep.mubr.bf16.mxu1 %v13214_v0  ;;  %8389 = vmatprep.mubr.bf16.mxu0 %v13216_v2  ;;  %v13280_v0 = vld [vmem:[%s14072_s26 + $0xca0] ss:$52 sps:$4 sm:$0xff]  }
 0x2f6   : > { %6883 = vmatmul.mubr.bf16.gmra.mrb[84].mxu1 %v13218_v4  ;;  %8390 = vmatmul.mubr.bf16.gmra.mrb[20].mxu0 %v13219_v5  ;;  %v13282_v4 = vld [vmem:[%s14072_s26 + $0xd0c] ss:$52 sps:$4 sm:$0xff]  }
 0x2f7   : > { %6890 = vmatprep.mubr.bf16.mxu1 %v13220_v6  ;;  %8397 = vmatprep.mubr.bf16.mxu0 %v13222_v7  ;;  %v13284_v6 = vld [vmem:[%s14072_s26 + $0x6a4] ss:$52 sps:$4 sm:$0xff]  }
 0x2fe   : > { %6891 = vmatmul.mubr.bf16.gmra.mrb[88].mxu1 %v13224_v8  ;;  %8398 = vmatmul.mubr.bf16.gmra.mrb[24].mxu0 %v13225_v9  ;;  %v13286_v9 = vld [vmem:[%s14072_s26 + $0xd08] ss:$52 sps:$4 sm:$0xff]  }
 0x2ff   : > { %6898 = vmatprep.mubr.bf16.mxu1 %v13226_v10  ;;  %8405 = vmatprep.mubr.bf16.mxu0 %v13228_v11  ;;  %v13287_v11 = vld [vmem:[%s14072_s26 + $0x6a0] ss:$52 sps:$4 sm:$0xff]  }
 0x306   : > { %6899 = vmatmul.mubr.bf16.gmra.mrb[92].mxu1 %v13230_v12  ;;  %8406 = vmatmul.mubr.bf16.gmra.mrb[28].mxu0 %v13231_v13  ;;  %v13289_v12 = vld [vmem:[%s14072_s26 + $0xd74] ss:$52 sps:$4 sm:$0xff]  }
 0x307   : > { %6906 = vmatprep.mubr.bf16.mxu1 %v13232_v14  ;;  %8413 = vmatprep.mubr.bf16.mxu0 %v13234_v15  ;;  %v13291_v14 = vld [vmem:[%s14072_s26 + $0x70c] ss:$52 sps:$4 sm:$0xff]  }
 0x308   : > { %v13388_v15 = vld [vmem:[%s16322_s1 + $0x2c0] sm:$0xff]  }
 0x309   : > { %8879 = vmatpush1.bf16.msra.mxu0 %v13388_v15 }
 0x30a   : > { %8880 = vmatprep.subr.bf16.mxu0 %v13968_v1 }
 0x30e   : > { %6907 = vmatmul.mubr.bf16.gmra.mrb[96].mxu1 %v13236_v16  ;;  %8414 = vmatmul.mubr.bf16.gmra.mrb[32].mxu0 %v13237_v17 }
 0x30f   : > { %6914 = vmatprep.mubr.bf16.mxu1 %v13239_v18  ;;  %8421 = vmatprep.mubr.bf16.mxu0 %v13241_v19  ;;  %v13293_v18 = vld [vmem:[%s14072_s26 + $0xd70] ss:$52 sps:$4 sm:$0xff]  }
 0x316   : > { %6915 = vmatmul.mubr.bf16.gmra.mrb[100].mxu1 %v13243_v21  ;;  %8422 = vmatmul.mubr.bf16.gmra.mrb[36].mxu0 %v13244_v22  ;;  %v13295_v21 = vld [vmem:[%s14072_s26 + $0xddc] ss:$52 sps:$4 sm:$0xff]  }
 0x317   : > { %6922 = vmatprep.mubr.bf16.mxu1 %v13245_v23  ;;  %8429 = vmatprep.mubr.bf16.mxu0 %v13247_v24  ;;  %v13297_v23 = vld [vmem:[%s14072_s26 + $0x774] ss:$52 sps:$4 sm:$0xff]  }
 0x31e   : > { %6923 = vmatmul.mubr.bf16.gmra.mrb[104].mxu1 %v13249_v25  ;;  %8430 = vmatmul.mubr.bf16.gmra.mrb[40].mxu0 %v13250_v26  ;;  %v13299_v26 = vld [vmem:[%s14072_s26 + $0xdd8] ss:$52 sps:$4 sm:$0xff]  }
 0x31f   : > { %6930 = vmatprep.mubr.bf16.mxu1 %v13251_v27  ;;  %8437 = vmatprep.mubr.bf16.mxu0 %v13253_v28  ;;  %v13300_v28 = vld [vmem:[%s14072_s26 + $0x770] ss:$52 sps:$4 sm:$0xff]  }
 0x321   : > { %v14786_v29 = vpop.f32.mrb[0].mxu1 }
 0x322   : > { %v6718_v30 = vpop.f32.mrb[1].mxu1 }
 0x323   : > { %v14789_v32 = vpop.f32.mrb[2].mxu1  ;;  %v13301_v30 = vld [vmem:[%s14072_s26 + $0xe44] ss:$52 sps:$4 sm:$0xff]  }
 0x324   : > { %v6721_v35 = vpop.f32.mrb[3].mxu1 }
 0x326   : > { %6931 = vmatmul.mubr.bf16.gmra.mrb[108].mxu1 %v13255_v31  ;;  %8438 = vmatmul.mubr.bf16.gmra.mrb[44].mxu0 %v13256_v33  ;;  %v13303_v33 = vld [vmem:[%s14072_s26 + $0x7dc] ss:$52 sps:$4 sm:$0xff]  }
 0x327   : > { %6938 = vmatprep.mubr.bf16.mxu1 %v13257_v34  ;;  %8445 = vmatprep.mubr.bf16.mxu0 %v13259_v36  ;;  %v13305_v36 = vld [vmem:[%s14072_s26 + $0xe40] ss:$52 sps:$4 sm:$0xff]  }
 0x329   : > { %v14794_v37 = vpop.f32.mrb[4].mxu1 }
 0x32a   : > { %v6726_v38 = vpop.f32.mrb[5].mxu1 }
 0x32b   : > { %v14797_v40 = vpop.f32.mrb[6].mxu1 }
 0x32c   : > { %v6729_v43 = vpop.f32.mrb[7].mxu1 }
 0x32d   : > { %v13309_v43 = vld [vmem:[%s14072_s26 + $0x844] ss:$52 sps:$4 sm:$0xff]  }
 0x32e   : > { %6939 = vmatmul.mubr.bf16.gmra.mrb[112].mxu1 %v13261_v39  ;;  %8446 = vmatmul.mubr.bf16.gmra.mrb[48].mxu0 %v13262_v41  ;;  %v13306_v39 = vld [vmem:[%s14072_s26 + $0x7d8] ss:$52 sps:$4 sm:$0xff]  }
 0x32f   : > { %6946 = vmatprep.mubr.bf16.mxu1 %v13264_v42  ;;  %8453 = vmatprep.mubr.bf16.mxu0 %v13266_v44  ;;  %v13307_v41 = vld [vmem:[%s14072_s26 + $0xeac] ss:$52 sps:$4 sm:$0xff]  }
 0x331   : > { %v14805_v46 = vpop.f32.mrb[8].mxu1 }
 0x332   : > { %v6734_v47 = vpop.f32.mrb[9].mxu1 }
 0x333   : > { %v14809_v49 = vpop.f32.mrb[10].mxu1  ;;  %v13311_v47 = vld [vmem:[%s14072_s26 + $0xea8] ss:$52 sps:$4 sm:$0xff]  }
 0x334   : > { %v6737_v52 = vpop.f32.mrb[11].mxu1 }
 0x336   : > { %6947 = vmatmul.mubr.bf16.gmra.mrb[116].mxu1 %v13268_v48  ;;  %8454 = vmatmul.mubr.bf16.gmra.mrb[52].mxu0 %v13269_v50  ;;  %v13312_v50 = vld [vmem:[%s14072_s26 + $0x840] ss:$52 sps:$4 sm:$0xff]  }
 0x337   : > { %6954 = vmatprep.mubr.bf16.mxu1 %v13270_v51  ;;  %8461 = vmatprep.mubr.bf16.mxu0 %v13272_v53  ;;  %v13314_v51 = vld [vmem:[%s14072_s26 + $0xf14] ss:$52 sps:$4 sm:$0xff]   ;;  %v13316_v53 = vld [vmem:[%s14072_s26 + $0x8ac] ss:$52 sps:$4 sm:$0xff]  }
 0x339   : > { %v14814_v54 = vpop.f32.mrb[12].mxu1 }
 0x33a   : > { %v6742_v55 = vpop.f32.mrb[13].mxu1 }
 0x33b   : > { %v14817_v57 = vpop.f32.mrb[14].mxu1  ;;  %v13413_v55 = vld [vmem:[%s16322_s1 + $0x2c8] sm:$0xff]  }
 0x33c   : > { %v6745_v60 = vpop.f32.mrb[15].mxu1  ;;  %8881 = vmatpush1.bf16.msra.mxu0 %v13413_v55 }
 0x33d   : > { %8882 = vmatprep.subr.bf16.mxu0 %v13968_v1 }
 0x33e   : > { %6955 = vmatmul.mubr.bf16.gmra.mrb[120].mxu1 %v13274_v56  ;;  %8462 = vmatmul.mubr.bf16.gmra.mrb[56].mxu0 %v13275_v58 }
 0x33f   : > { %6962 = vmatprep.mubr.bf16.mxu1 %v13276_v59  ;;  %8469 = vmatprep.mubr.bf16.mxu0 %v13278_v61  ;;  %v13318_v59 = vld [vmem:[%s14072_s26 + $0xf10] ss:$52 sps:$4 sm:$0xff]   ;;  %v13319_v61 = vld [vmem:[%s14072_s26 + $0x8a8] ss:$52 sps:$4 sm:$0xff]  }
 0x341   : > { %v14822_v62 = vpop.f32.mrb[16].mxu1 }
 0x342   : > { %v6750_v63 = vpop.f32.mrb[17].mxu1 }
 0x343   : > { %v14825_v2 = vpop.f32.mrb[18].mxu1  ;;  %v13320_v63 = vld [vmem:[%s14072_s26 + $0xf7c] ss:$52 sps:$4 sm:$0xff]  }
 0x344   : > { %v6753_v5 = vpop.f32.mrb[19].mxu1 }
 0x346   : > { %6963 = vmatmul.mubr.bf16.gmra.mrb[124].mxu1 %v13280_v0  ;;  %8470 = vmatmul.mubr.bf16.gmra.mrb[60].mxu0 %v13281_v3  ;;  %v13322_v3 = vld [vmem:[%s14072_s26 + $0x914] ss:$52 sps:$4 sm:$0xff]  }
 0x347   : > { %6970 = vmatprep.mubr.bf16.mxu1 %v13282_v4  ;;  %8477 = vmatprep.mubr.bf16.mxu0 %v13284_v6  ;;  %v13324_v6 = vld [vmem:[%s14072_s26 + $0xf78] ss:$52 sps:$4 sm:$0xff]  }
 0x349   : > { %v14830_v7 = vpop.f32.mrb[20].mxu1 }
 0x34a   : > { %v6758_v8 = vpop.f32.mrb[21].mxu1 }
 0x34b   : > { %v14833_v10 = vpop.f32.mrb[22].mxu1 }
 0x34c   : > { %v6761_v13 = vpop.f32.mrb[23].mxu1 }
 0x34d   : > { %v13328_v13 = vld [vmem:[%s14072_s26 + $0x97c] ss:$52 sps:$4 sm:$0xff]  }
 0x34e   : > { %6971 = vmatmul.mubr.bf16.gmra.mrb[128].mxu1 %v13286_v9  ;;  %8478 = vmatmul.mubr.bf16.gmra.mrb[64].mxu0 %v13287_v11  ;;  %v13325_v9 = vld [vmem:[%s14072_s26 + $0x910] ss:$52 sps:$4 sm:$0xff]  }
 0x34f   : > { %6978 = vmatprep.mubr.bf16.mxu1 %v13289_v12  ;;  %8485 = vmatprep.mubr.bf16.mxu0 %v13291_v14  ;;  %v13326_v11 = vld [vmem:[%s14072_s26 + $0xfe4] ss:$52 sps:$4 sm:$0xff]  }
 0x351   : > { %v14841_v16 = vpop.f32.mrb[24].mxu1 }
 0x352   : > { %v6766_v17 = vpop.f32.mrb[25].mxu1 }
 0x353   : > { %v14845_v19 = vpop.f32.mrb[26].mxu1  ;;  %v13330_v17 = vld [vmem:[%s14072_s26 + $0xfe0] ss:$52 sps:$4 sm:$0xff]  }
 0x354   : > { %v6769_v22 = vpop.f32.mrb[27].mxu1 }
 0x356   : > { %6979 = vmatmul.mubr.bf16.gmra.mrb[132].mxu1 %v13293_v18  ;;  %8486 = vmatmul.mubr.bf16.gmra.mrb[68].mxu0 %v13294_v20  ;;  %v13331_v20 = vld [vmem:[%s14072_s26 + $0x978] ss:$52 sps:$4 sm:$0xff]  }
 0x357   : > { %6986 = vmatprep.mubr.bf16.mxu1 %v13295_v21  ;;  %8493 = vmatprep.mubr.bf16.mxu0 %v13297_v23  ;;  %v13332_v21 = vld [vmem:[%s14072_s26 + $0x104c] ss:$52 sps:$4 sm:$0xff]   ;;  %v13334_v23 = vld [vmem:[%s14072_s26 + $0x9e4] ss:$52 sps:$4 sm:$0xff]  }
 0x359   : > { %v14850_v24 = vpop.f32.mrb[28].mxu1 }
 0x35a   : > { %v6774_v25 = vpop.f32.mrb[29].mxu1 }
 0x35b   : > { %v14853_v27 = vpop.f32.mrb[30].mxu1 }
 0x35c   : > { %v6777_v31 = vpop.f32.mrb[31].mxu1 }
 0x35d   : > { %v13337_v31 = vld [vmem:[%s14072_s26 + $0x9e0] ss:$52 sps:$4 sm:$0xff]  }
 0x35e   : > { %6987 = vmatmul.mubr.bf16.gmra.mrb[136].mxu1 %v13299_v26  ;;  %8494 = vmatmul.mubr.bf16.gmra.mrb[72].mxu0 %v13300_v28  ;;  %v13336_v28 = vld [vmem:[%s14072_s26 + $0x1048] ss:$52 sps:$4 sm:$0xff]  }
 0x35f   : > { %6994 = vmatprep.mubr.bf16.mxu1 %v13301_v30  ;;  %8501 = vmatprep.mubr.bf16.mxu0 %v13303_v33  ;;  %v13339_v33 = vld [vmem:[%s14072_s26 + $0x10b4] ss:$52 sps:$4 sm:$0xff]  }
 0x361   : > { %v14858_v34 = vpop.f32.mrb[32].mxu1 }
 0x362   : > { %v6782_v35 = vpop.f32.mrb[33].mxu1 }
 0x363   : > { %v14861_v38 = vpop.f32.mrb[34].mxu1 }
 0x364   : > { %v6785_v42 = vpop.f32.mrb[35].mxu1 }
 0x366   : > { %6995 = vmatmul.mubr.bf16.gmra.mrb[140].mxu1 %v13305_v36  ;;  %8502 = vmatmul.mubr.bf16.gmra.mrb[76].mxu0 %v13306_v39  ;;  %v13341_v36 = vld [vmem:[%s14072_s26 + $0xa4c] ss:$52 sps:$4 sm:$0xff]   ;;  %v13438_v39 = vld [vmem:[%s16322_s1 + $0x2d0] sm:$0xff]  }
 0x367   : > { %7002 = vmatprep.mubr.bf16.mxu1 %v13307_v41  ;;  %8509 = vmatprep.mubr.bf16.mxu0 %v13309_v43  ;;  %v13343_v43 = vld [vmem:[%s14072_s26 + $0x10b0] ss:$52 sps:$4 sm:$0xff]  }
 0x368   : > { %8883 = vmatpush1.bf16.msra.mxu0 %v13438_v39  ;;  %v13381_v39 = vld [vmem:[%s14072_s26 + $0xcb8] ss:$52 sps:$4 sm:$0xff]  }
 0x369   : > { %v14866_v44 = vpop.f32.mrb[36].mxu1  ;;  %8884 = vmatprep.subr.bf16.mxu0 %v13968_v1 }
 0x36a   : > { %v6790_v45 = vpop.f32.mrb[37].mxu1 }
 0x36b   : > { %v14869_v48 = vpop.f32.mrb[38].mxu1 }
 0x36c   : > { %v6793_v52 = vpop.f32.mrb[39].mxu1 }
 0x36d   : > { %v13347_v52 = vld [vmem:[%s14072_s26 + $0xab4] ss:$52 sps:$4 sm:$0xff]  }
 0x36e   : > { %7003 = vmatmul.mubr.bf16.gmra.mrb[144].mxu1 %v13311_v47  ;;  %8510 = vmatmul.mubr.bf16.gmra.mrb[80].mxu0 %v13312_v50  ;;  %v13344_v47 = vld [vmem:[%s14072_s26 + $0xa48] ss:$52 sps:$4 sm:$0xff]  }
 0x36f   : > { %7010 = vmatprep.mubr.bf16.mxu1 %v13314_v51  ;;  %8517 = vmatprep.mubr.bf16.mxu0 %v13316_v53  ;;  %v13345_v50 = vld [vmem:[%s14072_s26 + $0x111c] ss:$52 sps:$4 sm:$0xff]  }
 0x371   : > { %v14877_v56 = vpop.f32.mrb[40].mxu1 }
 0x372   : > { %v6798_v58 = vpop.f32.mrb[41].mxu1 }
 0x373   : > { %v14881_v60 = vpop.f32.mrb[42].mxu1  ;;  %v13349_v58 = vld [vmem:[%s14072_s26 + $0x1118] ss:$52 sps:$4 sm:$0xff]  }
 0x374   : > { %v6801_v0 = vpop.f32.mrb[43].mxu1 }
 0x376   : > { %7011 = vmatmul.mubr.bf16.gmra.mrb[148].mxu1 %v13318_v59  ;;  %8518 = vmatmul.mubr.bf16.gmra.mrb[84].mxu0 %v13319_v61  ;;  %v13350_v61 = vld [vmem:[%s14072_s26 + $0xab0] ss:$52 sps:$4 sm:$0xff]  }
 0x377   : > { %7018 = vmatprep.mubr.bf16.mxu1 %v13320_v63  ;;  %8525 = vmatprep.mubr.bf16.mxu0 %v13322_v3  ;;  %v13351_v63 = vld [vmem:[%s14072_s26 + $0x1184] ss:$52 sps:$4 sm:$0xff]   ;;  %v13353_v3 = vld [vmem:[%s14072_s26 + $0xb1c] ss:$52 sps:$4 sm:$0xff]  }
 0x379   : > { %v14886_v4 = vpop.f32.mrb[44].mxu1 }
 0x37a   : > { %v6806_v5 = vpop.f32.mrb[45].mxu1 }
 0x37b   : > { %v14889_v8 = vpop.f32.mrb[46].mxu1  ;;  %v13355_v5 = vld [vmem:[%s14072_s26 + $0x1180] ss:$52 sps:$4 sm:$0xff]  }
 0x37c   : > { %v6809_v12 = vpop.f32.mrb[47].mxu1 }
 0x37d   : > { %v13361_v12 = vld [vmem:[%s14072_s26 + $0x11e8] ss:$52 sps:$4 sm:$0xff]  }
 0x37e   : > { %7019 = vmatmul.mubr.bf16.gmra.mrb[152].mxu1 %v13324_v6  ;;  %8526 = vmatmul.mubr.bf16.gmra.mrb[88].mxu0 %v13325_v9  ;;  %v13356_v6 = vld [vmem:[%s14072_s26 + $0xb18] ss:$52 sps:$4 sm:$0xff]  }
 0x37f   : > { %7026 = vmatprep.mubr.bf16.mxu1 %v13326_v11  ;;  %8533 = vmatprep.mubr.bf16.mxu0 %v13328_v13  ;;  %v13357_v9 = vld [vmem:[%s14072_s26 + $0x11ec] ss:$52 sps:$4 sm:$0xff]   ;;  %v13359_v11 = vld [vmem:[%s14072_s26 + $0xb84] ss:$52 sps:$4 sm:$0xff]  }
 0x380   : > { %v13362_v13 = vld [vmem:[%s14072_s26 + $0xb80] ss:$52 sps:$4 sm:$0xff]  }
 0x381   : > { %v14894_v14 = vpop.f32.mrb[48].mxu1 }
 0x382   : > { %v6814_v15 = vpop.f32.mrb[49].mxu1 }
 0x383   : > { %v14897_v18 = vpop.f32.mrb[50].mxu1  ;;  %v13364_v15 = vld [vmem:[%s14072_s26 + $0x1254] ss:$52 sps:$4 sm:$0xff]  }
 0x384   : > { %v6817_v22 = vpop.f32.mrb[51].mxu1 }
 0x385   : > { %v13369_v22 = vld [vmem:[%s14072_s26 + $0xbe8] ss:$52 sps:$4 sm:$0xff]  }
 0x386   : > { %7027 = vmatmul.mubr.bf16.gmra.mrb[156].mxu1 %v13330_v17  ;;  %8534 = vmatmul.mubr.bf16.gmra.mrb[92].mxu0 %v13331_v20  ;;  %v13366_v17 = vld [vmem:[%s14072_s26 + $0xbec] ss:$52 sps:$4 sm:$0xff]   ;;  %v13463_v20 = vld [vmem:[%s16322_s1 + $0x2d8] sm:$0xff]  }
 0x387   : > { %7034 = vmatprep.mubr.bf16.mxu1 %v13332_v21  ;;  %8541 = vmatprep.mubr.bf16.mxu0 %v13334_v23  ;;  %v13368_v21 = vld [vmem:[%s14072_s26 + $0x1250] ss:$52 sps:$4 sm:$0xff]  }
 0x388   : > { %8885 = vmatpush1.bf16.msra.mxu0 %v13463_v20  ;;  %v13370_v23 = vld [vmem:[%s14072_s26 + $0x12bc] ss:$52 sps:$4 sm:$0xff]  }
 0x389   : > { %v14902_v25 = vpop.f32.mrb[52].mxu1  ;;  %8886 = vmatprep.subr.bf16.mxu0 %v13968_v1  ;;  %v13411_v20 = vld [vmem:[%s14072_s26 + $0x1528] ss:$52 sps:$4 sm:$0xff]  }
 0x38a   : > { %v6822_v26 = vpop.f32.mrb[53].mxu1 }
 0x38b   : > { %v14905_v30 = vpop.f32.mrb[54].mxu1  ;;  %v13372_v26 = vld [vmem:[%s14072_s26 + $0xc54] ss:$52 sps:$4 sm:$0xff]  }
 0x38c   : > { %v6825_v35 = vpop.f32.mrb[55].mxu1 }
 0x38d   : > { %v13378_v35 = vld [vmem:[%s14072_s26 + $0xcbc] ss:$52 sps:$4 sm:$0xff]  }
 0x38e   : > { %7035 = vmatmul.mubr.bf16.gmra.mrb[160].mxu1 %v13336_v28  ;;  %8542 = vmatmul.mubr.bf16.gmra.mrb[96].mxu0 %v13337_v31  ;;  %v13374_v28 = vld [vmem:[%s14072_s26 + $0x12b8] ss:$52 sps:$4 sm:$0xff]   ;;  %v13375_v31 = vld [vmem:[%s14072_s26 + $0xc50] ss:$52 sps:$4 sm:$0xff]  }
 0x38f   : > { %7042 = vmatprep.mubr.bf16.mxu1 %v13339_v33  ;;  %8549 = vmatprep.mubr.bf16.mxu0 %v13341_v36  ;;  %v13376_v33 = vld [vmem:[%s14072_s26 + $0x1324] ss:$52 sps:$4 sm:$0xff]   ;;  %v13380_v36 = vld [vmem:[%s14072_s26 + $0x1320] ss:$52 sps:$4 sm:$0xff]  }
 0x391   : > { %v14913_v41 = vpop.f32.mrb[56].mxu1 }
 0x392   : > { %v6830_v42 = vpop.f32.mrb[57].mxu1 }
 0x393   : > { %v14917_v45 = vpop.f32.mrb[58].mxu1  ;;  %v13382_v42 = vld [vmem:[%s14072_s26 + $0x138c] ss:$52 sps:$4 sm:$0xff]  }
 0x394   : > { %v6833_v51 = vpop.f32.mrb[59].mxu1 }
 0x395   : > { %v13389_v51 = vld [vmem:[%s14072_s26 + $0x13f4] ss:$52 sps:$4 sm:$0xff]  }
 0x396   : > { %7043 = vmatmul.mubr.bf16.gmra.mrb[164].mxu1 %v13343_v43  ;;  %8550 = vmatmul.mubr.bf16.gmra.mrb[100].mxu0 %v13344_v47  ;;  %v13384_v43 = vld [vmem:[%s14072_s26 + $0xd24] ss:$52 sps:$4 sm:$0xff]   ;;  %v13386_v47 = vld [vmem:[%s14072_s26 + $0x1388] ss:$52 sps:$4 sm:$0xff]  }
 0x397   : > { %7050 = vmatprep.mubr.bf16.mxu1 %v13345_v50  ;;  %8557 = vmatprep.mubr.bf16.mxu0 %v13347_v52  ;;  %v13387_v50 = vld [vmem:[%s14072_s26 + $0xd20] ss:$52 sps:$4 sm:$0xff]  }
 0x398   : > { %v13391_v52 = vld [vmem:[%s14072_s26 + $0xd8c] ss:$52 sps:$4 sm:$0xff]  }
 0x399   : > { %v14922_v53 = vpop.f32.mrb[60].mxu1 }
 0x39a   : > { %v6838_v55 = vpop.f32.mrb[61].mxu1 }
 0x39b   : > { %v14925_v59 = vpop.f32.mrb[62].mxu1  ;;  %v13488_v55 = vld [vmem:[%s16322_s1 + $0x2e0] sm:$0xff]  }
 0x39c   : > { %v6841_v0 = vpop.f32.mrb[63].mxu1  ;;  %8887 = vmatpush1.bf16.msra.mxu0 %v13488_v55  ;;  %v13436_v55 = vld [vmem:[%s14072_s26 + $0x16c8] ss:$52 sps:$4 sm:$0xff]  }
 0x39d   : > { %8888 = vmatprep.subr.bf16.mxu0 %v13968_v1  ;;  %v13395_v0 = vld [vmem:[%s14072_s26 + $0x145c] ss:$52 sps:$4 sm:$0xff]  }
 0x39e   : > { %7051 = vmatmul.mubr.bf16.gmra.mrb[168].mxu1 %v13349_v58  ;;  %8558 = vmatmul.mubr.bf16.gmra.mrb[104].mxu0 %v13350_v61  ;;  %v14964_v58 = vld [vmem:[%s16322_s1 + $0x300] sm:$0xff]  }
 0x39f   : > { %7058 = vmatprep.mubr.bf16.mxu1 %v13351_v63  ;;  %8565 = vmatprep.mubr.bf16.mxu0 %v13353_v3  ;;  %v13393_v61 = vld [vmem:[%s14072_s26 + $0x13f0] ss:$52 sps:$4 sm:$0xff]   ;;  %v13394_v63 = vld [vmem:[%s14072_s26 + $0xd88] ss:$52 sps:$4 sm:$0xff]  }
 0x3a0   : > { %11156 = vmatprep.subr.bf16.mxu1 %v14964_v58  ;;  %v13397_v3 = vld [vmem:[%s14072_s26 + $0xdf4] ss:$52 sps:$4 sm:$0xff]  }
 0x3a6   : > { %7059 = vmatmul.mubr.bf16.gmra.mrb[172].mxu1 %v13355_v5  ;;  %8566 = vmatmul.mubr.bf16.gmra.mrb[108].mxu0 %v13356_v6  ;;  %v13399_v5 = vld [vmem:[%s14072_s26 + $0x1458] ss:$52 sps:$4 sm:$0xff]   ;;  %v13400_v6 = vld [vmem:[%s14072_s26 + $0xdf0] ss:$52 sps:$4 sm:$0xff]  }
 0x3a7   : > { %7066 = vmatprep.mubr.bf16.mxu1 %v13357_v9  ;;  %8573 = vmatprep.mubr.bf16.mxu0 %v13359_v11  ;;  %v13401_v9 = vld [vmem:[%s14072_s26 + $0x14c4] ss:$52 sps:$4 sm:$0xff]   ;;  %v13403_v11 = vld [vmem:[%s14072_s26 + $0xe5c] ss:$52 sps:$4 sm:$0xff]  }
 0x3ae   : > { %7067 = vmatmul.mubr.bf16.gmra.mrb[176].mxu1 %v13361_v12  ;;  %8574 = vmatmul.mubr.bf16.gmra.mrb[112].mxu0 %v13362_v13  ;;  %v13405_v12 = vld [vmem:[%s14072_s26 + $0x14c0] ss:$52 sps:$4 sm:$0xff]   ;;  %v13406_v13 = vld [vmem:[%s14072_s26 + $0xe58] ss:$52 sps:$4 sm:$0xff]  }
 0x3af   : > { %7074 = vmatprep.mubr.bf16.mxu1 %v13364_v15  ;;  %8581 = vmatprep.mubr.bf16.mxu0 %v13366_v17  ;;  %v13407_v15 = vld [vmem:[%s14072_s26 + $0x152c] ss:$52 sps:$4 sm:$0xff]   ;;  %v13409_v17 = vld [vmem:[%s14072_s26 + $0xec4] ss:$52 sps:$4 sm:$0xff]  }
 0x3b6   : > { %7075 = vmatmul.mubr.bf16.gmra.mrb[180].mxu1 %v13368_v21  ;;  %8582 = vmatmul.mubr.bf16.gmra.mrb[116].mxu0 %v13369_v22  ;;  %v13412_v21 = vld [vmem:[%s14072_s26 + $0xec0] ss:$52 sps:$4 sm:$0xff]  }
 0x3b7   : > { %7082 = vmatprep.mubr.bf16.mxu1 %v13370_v23  ;;  %8589 = vmatprep.mubr.bf16.mxu0 %v13372_v26  ;;  %v13414_v22 = vld [vmem:[%s14072_s26 + $0x1594] ss:$52 sps:$4 sm:$0xff]   ;;  %v13416_v23 = vld [vmem:[%s14072_s26 + $0xf2c] ss:$52 sps:$4 sm:$0xff]  }
 0x3b8   : > { %v13514_v26 = vld [vmem:[%s16322_s1 + $0x2e8] sm:$0xff]  }
 0x3b9   : > { %8889 = vmatpush1.bf16.msra.mxu0 %v13514_v26  ;;  %v13462_v26 = vld [vmem:[%s14072_s26 + $0x1200] ss:$52 sps:$4 sm:$0xff]  }
 0x3ba   : > { %8890 = vmatprep.subr.bf16.mxu0 %v13968_v1 }
 0x3be   : > { %7083 = vmatmul.mubr.bf16.gmra.mrb[184].mxu1 %v13374_v28  ;;  %8590 = vmatmul.mubr.bf16.gmra.mrb[120].mxu0 %v13375_v31  ;;  %v13418_v28 = vld [vmem:[%s14072_s26 + $0x1590] ss:$52 sps:$4 sm:$0xff]   ;;  %v13419_v31 = vld [vmem:[%s14072_s26 + $0xf28] ss:$52 sps:$4 sm:$0xff]  }
 0x3bf   : > { %7090 = vmatprep.mubr.bf16.mxu1 %v13376_v33  ;;  %8597 = vmatprep.mubr.bf16.mxu0 %v13378_v35  ;;  %v13420_v33 = vld [vmem:[%s14072_s26 + $0x15fc] ss:$52 sps:$4 sm:$0xff]   ;;  %v13422_v35 = vld [vmem:[%s14072_s26 + $0xf94] ss:$52 sps:$4 sm:$0xff]  }
 0x3c6   : > { %7091 = vmatmul.mubr.bf16.gmra.mrb[188].mxu1 %v13380_v36  ;;  %8598 = vmatmul.mubr.bf16.gmra.mrb[124].mxu0 %v13381_v39  ;;  %v13424_v36 = vld [vmem:[%s14072_s26 + $0x15f8] ss:$52 sps:$4 sm:$0xff]   ;;  %v13425_v39 = vld [vmem:[%s14072_s26 + $0xf90] ss:$52 sps:$4 sm:$0xff]  }
 0x3c7   : > { %7098 = vmatprep.mubr.bf16.mxu1 %v13382_v42  ;;  %8605 = vmatprep.mubr.bf16.mxu0 %v13384_v43  ;;  %v13426_v42 = vld [vmem:[%s14072_s26 + $0x1664] ss:$52 sps:$4 sm:$0xff]   ;;  %v13428_v43 = vld [vmem:[%s14072_s26 + $0xffc] ss:$52 sps:$4 sm:$0xff]  }
 0x3ce   : > { %7099 = vmatmul.mubr.bf16.gmra.mrb[192].mxu1 %v13386_v47  ;;  %8606 = vmatmul.mubr.bf16.gmra.mrb[128].mxu0 %v13387_v50  ;;  %v13430_v47 = vld [vmem:[%s14072_s26 + $0x1660] ss:$52 sps:$4 sm:$0xff]   ;;  %v13431_v50 = vld [vmem:[%s14072_s26 + $0xff8] ss:$52 sps:$4 sm:$0xff]  }
 0x3cf   : > { %7106 = vmatprep.mubr.bf16.mxu1 %v13389_v51  ;;  %8613 = vmatprep.mubr.bf16.mxu0 %v13391_v52  ;;  %v13432_v51 = vld [vmem:[%s14072_s26 + $0x16cc] ss:$52 sps:$4 sm:$0xff]   ;;  %v13434_v52 = vld [vmem:[%s14072_s26 + $0x1064] ss:$52 sps:$4 sm:$0xff]  }
 0x3d6   : > { %7107 = vmatmul.mubr.bf16.gmra.mrb[196].mxu1 %v13393_v61  ;;  %8614 = vmatmul.mubr.bf16.gmra.mrb[132].mxu0 %v13394_v63  ;;  %v13437_v61 = vld [vmem:[%s14072_s26 + $0x1060] ss:$52 sps:$4 sm:$0xff]  }
 0x3d7   : > { %7114 = vmatprep.mubr.bf16.mxu1 %v13395_v0  ;;  %8621 = vmatprep.mubr.bf16.mxu0 %v13397_v3  ;;  %v13439_v63 = vld [vmem:[%s14072_s26 + $0x1734] ss:$52 sps:$4 sm:$0xff]   ;;  %v13441_v0 = vld [vmem:[%s14072_s26 + $0x10cc] ss:$52 sps:$4 sm:$0xff]  }
 0x3d8   : > { %v13540_v3 = vld [vmem:[%s16322_s1 + $0x2f0] sm:$0xff]  }
 0x3d9   : > { %8891 = vmatpush1.bf16.msra.mxu0 %v13540_v3  ;;  %v13487_v3 = vld [vmem:[%s14072_s26 + $0x13a0] ss:$52 sps:$4 sm:$0xff]  }
 0x3da   : > { %8892 = vmatprep.subr.bf16.mxu0 %v13968_v1  ;;  %v13455_v1 = vld [vmem:[%s14072_s26 + $0x1800] ss:$52 sps:$4 sm:$0xff]  }
 0x3de   : > { %7115 = vmatmul.mubr.bf16.gmra.mrb[200].mxu1 %v13399_v5  ;;  %8622 = vmatmul.mubr.bf16.gmra.mrb[136].mxu0 %v13400_v6  ;;  %v13443_v5 = vld [vmem:[%s14072_s26 + $0x1730] ss:$52 sps:$4 sm:$0xff]   ;;  %v13444_v6 = vld [vmem:[%s14072_s26 + $0x10c8] ss:$52 sps:$4 sm:$0xff]  }
 0x3df   : > { %7122 = vmatprep.mubr.bf16.mxu1 %v13401_v9  ;;  %8629 = vmatprep.mubr.bf16.mxu0 %v13403_v11  ;;  %v13445_v9 = vld [vmem:[%s14072_s26 + $0x179c] ss:$52 sps:$4 sm:$0xff]   ;;  %v13447_v11 = vld [vmem:[%s14072_s26 + $0x1134] ss:$52 sps:$4 sm:$0xff]  }
 0x3e6   : > { %7123 = vmatmul.mubr.bf16.gmra.mrb[204].mxu1 %v13405_v12  ;;  %8630 = vmatmul.mubr.bf16.gmra.mrb[140].mxu0 %v13406_v13  ;;  %v13449_v12 = vld [vmem:[%s14072_s26 + $0x1798] ss:$52 sps:$4 sm:$0xff]   ;;  %v13450_v13 = vld [vmem:[%s14072_s26 + $0x1130] ss:$52 sps:$4 sm:$0xff]  }
 0x3e7   : > { %7130 = vmatprep.mubr.bf16.mxu1 %v13407_v15  ;;  %8637 = vmatprep.mubr.bf16.mxu0 %v13409_v17  ;;  %v13451_v15 = vld [vmem:[%s14072_s26 + $0x1804] ss:$52 sps:$4 sm:$0xff]   ;;  %v13453_v17 = vld [vmem:[%s14072_s26 + $0x119c] ss:$52 sps:$4 sm:$0xff]  }
 0x3ee   : > { %7131 = vmatmul.mubr.bf16.gmra.mrb[208].mxu1 %v13411_v20  ;;  %8638 = vmatmul.mubr.bf16.gmra.mrb[144].mxu0 %v13412_v21  ;;  %v13456_v20 = vld [vmem:[%s14072_s26 + $0x1198] ss:$52 sps:$4 sm:$0xff]  }
 0x3ef   : > { %7138 = vmatprep.mubr.bf16.mxu1 %v13414_v22  ;;  %8645 = vmatprep.mubr.bf16.mxu0 %v13416_v23  ;;  %v13457_v21 = vld [vmem:[%s14072_s26 + $0x186c] ss:$52 sps:$4 sm:$0xff]   ;;  %v13459_v22 = vld [vmem:[%s14072_s26 + $0x1204] ss:$52 sps:$4 sm:$0xff]   ;;  %v13461_v23 = vld [vmem:[%s14072_s26 + $0x1868] ss:$52 sps:$4 sm:$0xff]  }
 0x3f6   : > { %7139 = vmatmul.mubr.bf16.gmra.mrb[212].mxu1 %v13418_v28  ;;  %8646 = vmatmul.mubr.bf16.gmra.mrb[148].mxu0 %v13419_v31  ;;  %v13464_v28 = vld [vmem:[%s14072_s26 + $0x18d4] ss:$52 sps:$4 sm:$0xff]   ;;  %v13466_v31 = vld [vmem:[%s14072_s26 + $0x126c] ss:$52 sps:$4 sm:$0xff]  }
 0x3f7   : > { %7146 = vmatprep.mubr.bf16.mxu1 %v13420_v33  ;;  %8653 = vmatprep.mubr.bf16.mxu0 %v13422_v35  ;;  %v13565_v33 = vld [vmem:[%s16322_s1 + $0x2f8] sm:$0xff]   ;;  %v13468_v35 = vld [vmem:[%s14072_s26 + $0x18d0] ss:$52 sps:$4 sm:$0xff]  }
 0x3f8   : > { %8893 = vmatpush1.bf16.msra.mxu0 %v13565_v33  ;;  %v13512_v33 = vld [vmem:[%s14072_s26 + $0x830] ss:$52 sps:$4 sm:$0xff]  }
 0x3fe   : > { %7147 = vmatmul.mubr.bf16.gmra.mrb[216].mxu1 %v13424_v36  ;;  %8654 = vmatmul.mubr.bf16.gmra.mrb[152].mxu0 %v13425_v39  ;;  %v13469_v36 = vld [vmem:[%s14072_s26 + $0x1268] ss:$52 sps:$4 sm:$0xff]  }
 0x3ff   : > { %7154 = vmatprep.mubr.bf16.mxu1 %v13426_v42  ;;  %8661 = vmatprep.mubr.bf16.mxu0 %v13428_v43  ;;  %v13470_v39 = vld [vmem:[%s14072_s26 + $0x193c] ss:$52 sps:$4 sm:$0xff]   ;;  %v13472_v42 = vld [vmem:[%s14072_s26 + $0x12d4] ss:$52 sps:$4 sm:$0xff]   ;;  %v13474_v43 = vld [vmem:[%s14072_s26 + $0x1938] ss:$52 sps:$4 sm:$0xff]  }
 0x406   : > { %7155 = vmatmul.mubr.bf16.gmra.mrb[220].mxu1 %v13430_v47  ;;  %8662 = vmatmul.mubr.bf16.gmra.mrb[156].mxu0 %v13431_v50  ;;  %v13475_v47 = vld [vmem:[%s14072_s26 + $0x12d0] ss:$52 sps:$4 sm:$0xff]  }
 0x407   : > { %7162 = vmatprep.mubr.bf16.mxu1 %v13432_v51  ;;  %8669 = vmatprep.mubr.bf16.mxu0 %v13434_v52  ;;  %v13476_v50 = vld [vmem:[%s14072_s26 + $0x19a4] ss:$52 sps:$4 sm:$0xff]   ;;  %v13478_v51 = vld [vmem:[%s14072_s26 + $0x133c] ss:$52 sps:$4 sm:$0xff]   ;;  %v13480_v52 = vld [vmem:[%s14072_s26 + $0x19a0] ss:$52 sps:$4 sm:$0xff]  }
 0x40e   : > { %7163 = vmatmul.mubr.bf16.gmra.mrb[224].mxu1 %v13436_v55  ;;  %8670 = vmatmul.mubr.bf16.gmra.mrb[160].mxu0 %v13437_v61  ;;  %v13481_v55 = vld [vmem:[%s14072_s26 + $0x1338] ss:$52 sps:$4 sm:$0xff]   ;;  %v13484_v61 = vld [vmem:[%s14072_s26 + $0x694] ss:$52 sps:$4 sm:$0xff]  }
 0x40f   : > { %7170 = vmatprep.mubr.bf16.mxu1 %v13439_v63  ;;  %8677 = vmatprep.mubr.bf16.mxu0 %v13441_v0  ;;  %v13485_v63 = vld [vmem:[%s14072_s26 + $0x13a4] ss:$52 sps:$4 sm:$0xff]  }
 0x410   : > { %v13482_v0 = vld [vmem:[%s14072_s26 + $0x690] ss:$52 sps:$4 sm:$0xff]  }
 0x416   : > { %7171 = vmatmul.mubr.bf16.gmra.mrb[228].mxu1 %v13443_v5  ;;  %8678 = vmatmul.mubr.bf16.gmra.mrb[164].mxu0 %v13444_v6  ;;  %v13490_v5 = vld [vmem:[%s14072_s26 + $0x6fc] ss:$52 sps:$4 sm:$0xff]   ;;  %v13492_v6 = vld [vmem:[%s14072_s26 + $0x140c] ss:$52 sps:$4 sm:$0xff]  }
 0x417   : > { %7178 = vmatprep.mubr.bf16.mxu1 %v13445_v9  ;;  %8685 = vmatprep.mubr.bf16.mxu0 %v13447_v11  ;;  %v13527_v9 = vld [vmem:[%s16322_s1 + $0x308] sm:$0xff]   ;;  %v13566_v11 = vld [vmem:[%s16322_s1 + $0x310] sm:$0xff]  }
 0x41e   : > { %7179 = vmatmul.mubr.bf16.gmra.mrb[232].mxu1 %v13449_v12  ;;  %8686 = vmatmul.mubr.bf16.gmra.mrb[168].mxu0 %v13450_v13  ;;  %v13494_v12 = vld [vmem:[%s14072_s26 + $0x6f8] ss:$52 sps:$4 sm:$0xff]   ;;  %v13495_v13 = vld [vmem:[%s14072_s26 + $0x1408] ss:$52 sps:$4 sm:$0xff]  }
 0x41f   : > { %7186 = vmatprep.mubr.bf16.mxu1 %v13451_v15  ;;  %8693 = vmatprep.mubr.bf16.mxu0 %v13453_v17  ;;  %v13496_v15 = vld [vmem:[%s14072_s26 + $0x764] ss:$52 sps:$4 sm:$0xff]   ;;  %v13498_v17 = vld [vmem:[%s14072_s26 + $0x1474] ss:$52 sps:$4 sm:$0xff]  }
 0x426   : > { %7187 = vmatmul.mubr.bf16.gmra.mrb[236].mxu1 %v13455_v1  ;;  %8694 = vmatmul.mubr.bf16.gmra.mrb[172].mxu0 %v13456_v20  ;;  %v13501_v1 = vld [vmem:[%s14072_s26 + $0x1470] ss:$52 sps:$4 sm:$0xff]   ;;  %v13502_v20 = vld [vmem:[%s14072_s26 + $0x7cc] ss:$52 sps:$4 sm:$0xff]  }
 0x427   : > { %7194 = vmatprep.mubr.bf16.mxu1 %v13457_v21  ;;  %8701 = vmatprep.mubr.bf16.mxu0 %v13459_v22  ;;  %v13504_v21 = vld [vmem:[%s14072_s26 + $0x14dc] ss:$52 sps:$4 sm:$0xff]  }
 0x428   : > { %v13603_v22 = vld [vmem:[%s16322_s1 + $0x318] sm:$0xff]  }
 0x42e   : > { %7195 = vmatmul.mubr.bf16.gmra.mrb[240].mxu1 %v13461_v23  ;;  %8702 = vmatmul.mubr.bf16.gmra.mrb[176].mxu0 %v13462_v26  ;;  %v13506_v23 = vld [vmem:[%s14072_s26 + $0x7c8] ss:$52 sps:$4 sm:$0xff]   ;;  %v13507_v26 = vld [vmem:[%s14072_s26 + $0x14d8] ss:$52 sps:$4 sm:$0xff]  }
 0x42f   : > { %7202 = vmatprep.mubr.bf16.mxu1 %v13464_v28  ;;  %8709 = vmatprep.mubr.bf16.mxu0 %v13466_v31  ;;  %v13508_v28 = vld [vmem:[%s14072_s26 + $0x834] ss:$52 sps:$4 sm:$0xff]   ;;  %v13510_v31 = vld [vmem:[%s14072_s26 + $0x1544] ss:$52 sps:$4 sm:$0xff]  }
 0x436   : > { %7203 = vmatmul.mubr.bf16.gmra.mrb[244].mxu1 %v13468_v35  ;;  %8710 = vmatmul.mubr.bf16.gmra.mrb[180].mxu0 %v13469_v36  ;;  %v13513_v35 = vld [vmem:[%s14072_s26 + $0x1540] ss:$52 sps:$4 sm:$0xff]   ;;  %v13515_v36 = vld [vmem:[%s14072_s26 + $0x89c] ss:$52 sps:$4 sm:$0xff]  }
 0x437   : > { %7210 = vmatprep.mubr.bf16.mxu1 %v13470_v39  ;;  %8717 = vmatprep.mubr.bf16.mxu0 %v13472_v42  ;;  %v13517_v39 = vld [vmem:[%s14072_s26 + $0x15ac] ss:$52 sps:$4 sm:$0xff]  }
 0x438   : > { %v13519_v42 = vld [vmem:[%s14072_s26 + $0x898] ss:$52 sps:$4 sm:$0xff]  }
 0x43e   : > { %7211 = vmatmul.mubr.bf16.gmra.mrb[248].mxu1 %v13474_v43  ;;  %8718 = vmatmul.mubr.bf16.gmra.mrb[184].mxu0 %v13475_v47  ;;  %v13520_v43 = vld [vmem:[%s14072_s26 + $0x15a8] ss:$52 sps:$4 sm:$0xff]   ;;  %v13521_v47 = vld [vmem:[%s14072_s26 + $0x904] ss:$52 sps:$4 sm:$0xff]  }
 0x43f   : > { %7218 = vmatprep.mubr.bf16.mxu1 %v13476_v50  ;;  %8725 = vmatprep.mubr.bf16.mxu0 %v13478_v51  ;;  %v13523_v50 = vld [vmem:[%s14072_s26 + $0x1614] ss:$52 sps:$4 sm:$0xff]  }
 0x440   : > { %v13525_v51 = vld [vmem:[%s14072_s26 + $0x900] ss:$52 sps:$4 sm:$0xff]  }
 0x446   : > { %7219 = vmatmul.mubr.bf16.gmra.mrb[252].mxu1 %v13480_v52  ;;  %8726 = vmatmul.mubr.bf16.gmra.mrb[188].mxu0 %v13481_v55  ;;  %v13526_v52 = vld [vmem:[%s14072_s26 + $0x1610] ss:$52 sps:$4 sm:$0xff]   ;;  %v13528_v55 = vld [vmem:[%s14072_s26 + $0x96c] ss:$52 sps:$4 sm:$0xff]  }
 0x447   : > { %7387 = vmatprep.mubr.bf16.mxu1 %v13484_v61  ;;  %8733 = vmatprep.mubr.bf16.mxu0 %v13485_v63  ;;  %v13530_v61 = vld [vmem:[%s14072_s26 + $0x167c] ss:$52 sps:$4 sm:$0xff]  }
 0x448   : > { %v13532_v63 = vld [vmem:[%s14072_s26 + $0x968] ss:$52 sps:$4 sm:$0xff]  }
 0x44e   : > { %7388 = vmatmul.mubr.bf16.vlgmr.msra.gmra.mrb[64].mxu1 %v13482_v0  ;;  %8734 = vmatmul.mubr.bf16.gmra.mrb[192].mxu0 %v13487_v3  ;;  %v13533_v0 = vld [vmem:[%s14072_s26 + $0x1678] ss:$52 sps:$4 sm:$0xff]   ;;  %v13534_v3 = vld [vmem:[%s14072_s26 + $0x9d4] ss:$52 sps:$4 sm:$0xff]  }
 0x44f   : > { %11157 = vmatpush3.bf16.msra.mxu1 %v14964_v58  ;;  %7395 = vmatprep.mubr.bf16.mxu1 %v13490_v5  ;;  %v13500_v58 = vld [vmem:[%s14072_s26 + $0x760] ss:$52 sps:$4 sm:$0xff]   ;;  %v13536_v5 = vld [vmem:[%s14072_s26 + $0x16e4] ss:$52 sps:$4 sm:$0xff]  }
 0x450   : > { %8741 = vmatprep.mubr.bf16.mxu0 %v13492_v6  ;;  %11158 = vmatprep.subr.bf16.mxu1 %v13527_v9  ;;  %v13538_v6 = vld [vmem:[%s14072_s26 + $0x9d0] ss:$52 sps:$4 sm:$0xff]  }
 0x453   : > { %11159 = vmatpush3.bf16.msra.mxu1 %v13527_v9  ;;  %v13539_v9 = vld [vmem:[%s14072_s26 + $0x16e0] ss:$52 sps:$4 sm:$0xff]  }
 0x454   : > { %11160 = vmatprep.subr.bf16.mxu1 %v13566_v11 }
 0x456   : > { %7396 = vmatmul.mubr.bf16.gmra.mrb[68].mxu1 %v13494_v12  ;;  %8742 = vmatmul.mubr.bf16.gmra.mrb[196].mxu0 %v13495_v13  ;;  %v13543_v12 = vld [vmem:[%s14072_s26 + $0x174c] ss:$52 sps:$4 sm:$0xff]  }
 0x457   : > { %7403 = vmatprep.mubr.bf16.mxu1 %v13496_v15  ;;  %8749 = vmatprep.mubr.bf16.mxu0 %v13498_v17  ;;  %v13640_v13 = vld [vmem:[%s16322_s1 + $0x320] sm:$0xff]   ;;  %v13545_v15 = vld [vmem:[%s14072_s26 + $0xa38] ss:$52 sps:$4 sm:$0xff]   ;;  %v13546_v17 = vld [vmem:[%s14072_s26 + $0x1748] ss:$52 sps:$4 sm:$0xff]  }
 0x458   : > { %11161 = vmatpush3.bf16.msra.mxu1 %v13566_v11  ;;  %v13541_v11 = vld [vmem:[%s14072_s26 + $0xa3c] ss:$52 sps:$4 sm:$0xff]  }
 0x459   : > { %11162 = vmatprep.subr.bf16.mxu1 %v13603_v22 }
 0x45c   : > { %11163 = vmatpush3.bf16.msra.mxu1 %v13603_v22  ;;  %v13553_v22 = vld [vmem:[%s14072_s26 + $0xb0c] ss:$52 sps:$4 sm:$0xff]  }
 0x45d   : > { %11164 = vmatprep.subr.bf16.mxu1 %v13640_v13 }
 0x45e   : > { %7404 = vmatmul.mubr.bf16.gmra.mrb[72].mxu1 %v13500_v58  ;;  %8750 = vmatmul.mubr.bf16.gmra.mrb[200].mxu0 %v13501_v1  ;;  %v13547_v58 = vld [vmem:[%s14072_s26 + $0xaa4] ss:$52 sps:$4 sm:$0xff]   ;;  %v13549_v1 = vld [vmem:[%s14072_s26 + $0x17b4] ss:$52 sps:$4 sm:$0xff]  }
 0x45f   : > { %7411 = vmatprep.mubr.bf16.mxu1 %v13502_v20  ;;  %8757 = vmatprep.mubr.bf16.mxu0 %v13504_v21  ;;  %v13551_v20 = vld [vmem:[%s14072_s26 + $0xaa0] ss:$52 sps:$4 sm:$0xff]   ;;  %v13552_v21 = vld [vmem:[%s14072_s26 + $0x17b0] ss:$52 sps:$4 sm:$0xff]  }
 0x460   : > { %11165 = vmatpush3.bf16.msra.mxu1 %v13640_v13  ;;  %v13591_v13 = vld [vmem:[%s14072_s26 + $0xd7c] ss:$52 sps:$4 sm:$0xff]  }
 0x466   : > { %7412 = vmatmul.mubr.bf16.gmra.mrb[76].mxu1 %v13506_v23  ;;  %8758 = vmatmul.mubr.bf16.gmra.mrb[204].mxu0 %v13507_v26  ;;  %v13555_v23 = vld [vmem:[%s14072_s26 + $0x181c] ss:$52 sps:$4 sm:$0xff]  }
 0x467   : > { %7419 = vmatprep.mubr.bf16.mxu1 %v13508_v28  ;;  %8765 = vmatprep.mubr.bf16.mxu0 %v13510_v31  ;;  %v13557_v26 = vld [vmem:[%s14072_s26 + $0xb08] ss:$52 sps:$4 sm:$0xff]   ;;  %v13558_v28 = vld [vmem:[%s14072_s26 + $0x1818] ss:$52 sps:$4 sm:$0xff]  }
 0x468   : > { %v13559_v31 = vld [vmem:[%s14072_s26 + $0xb74] ss:$52 sps:$4 sm:$0xff]  }
 0x46e   : > { %7420 = vmatmul.mubr.bf16.gmra.mrb[80].mxu1 %v13512_v33  ;;  %8766 = vmatmul.mubr.bf16.gmra.mrb[208].mxu0 %v13513_v35  ;;  %v13561_v33 = vld [vmem:[%s14072_s26 + $0x1884] ss:$52 sps:$4 sm:$0xff]  }
 0x46f   : > { %7427 = vmatprep.mubr.bf16.mxu1 %v13515_v36  ;;  %8773 = vmatprep.mubr.bf16.mxu0 %v13517_v39  ;;  %v13563_v35 = vld [vmem:[%s14072_s26 + $0xb70] ss:$52 sps:$4 sm:$0xff]   ;;  %v13564_v36 = vld [vmem:[%s14072_s26 + $0x1880] ss:$52 sps:$4 sm:$0xff]  }
 0x470   : > { %v13567_v39 = vld [vmem:[%s14072_s26 + $0xbdc] ss:$52 sps:$4 sm:$0xff]  }
 0x476   : > { %7428 = vmatmul.mubr.bf16.gmra.mrb[84].mxu1 %v13519_v42  ;;  %8774 = vmatmul.mubr.bf16.gmra.mrb[212].mxu0 %v13520_v43  ;;  %v13569_v42 = vld [vmem:[%s14072_s26 + $0x18ec] ss:$52 sps:$4 sm:$0xff]  }
 0x477   : > { %7435 = vmatprep.mubr.bf16.mxu1 %v13521_v47  ;;  %8781 = vmatprep.mubr.bf16.mxu0 %v13523_v50  ;;  %v13571_v43 = vld [vmem:[%s14072_s26 + $0xbd8] ss:$52 sps:$4 sm:$0xff]   ;;  %v13572_v47 = vld [vmem:[%s14072_s26 + $0x18e8] ss:$52 sps:$4 sm:$0xff]  }
 0x478   : > { %v13573_v50 = vld [vmem:[%s14072_s26 + $0xc44] ss:$52 sps:$4 sm:$0xff]  }
 0x47e   : > { %7436 = vmatmul.mubr.bf16.gmra.mrb[88].mxu1 %v13525_v51  ;;  %8782 = vmatmul.mubr.bf16.gmra.mrb[216].mxu0 %v13526_v52  ;;  %v13575_v51 = vld [vmem:[%s14072_s26 + $0x1954] ss:$52 sps:$4 sm:$0xff]  }
 0x47f   : > { %7443 = vmatprep.mubr.bf16.mxu1 %v13528_v55  ;;  %8789 = vmatprep.mubr.bf16.mxu0 %v13530_v61  ;;  %v13577_v52 = vld [vmem:[%s14072_s26 + $0xc40] ss:$52 sps:$4 sm:$0xff]   ;;  %v13578_v55 = vld [vmem:[%s14072_s26 + $0x1950] ss:$52 sps:$4 sm:$0xff]  }
 0x480   : > { %v13579_v61 = vld [vmem:[%s14072_s26 + $0xcac] ss:$52 sps:$4 sm:$0xff]  }
 0x486   : > { %7444 = vmatmul.mubr.bf16.gmra.mrb[92].mxu1 %v13532_v63  ;;  %8790 = vmatmul.mubr.bf16.gmra.mrb[220].mxu0 %v13533_v0  ;;  %v13581_v63 = vld [vmem:[%s14072_s26 + $0x19bc] ss:$52 sps:$4 sm:$0xff]   ;;  %v13677_v0 = vld [vmem:[%s16322_s1 + $0x328] sm:$0xff]  }
 0x487   : > { %7451 = vmatprep.mubr.bf16.mxu1 %v13534_v3  ;;  %8797 = vmatprep.mubr.bf16.mxu0 %v13536_v5  ;;  %v13583_v3 = vld [vmem:[%s14072_s26 + $0xca8] ss:$52 sps:$4 sm:$0xff]   ;;  %v13584_v5 = vld [vmem:[%s14072_s26 + $0x19b8] ss:$52 sps:$4 sm:$0xff]  }
 0x488   : > { %11166 = vmatprep.subr.bf16.mxu1 %v13677_v0 }
 0x489   : > { %11167 = vmatpush3.bf16.msra.mxu1 %v13677_v0  ;;  %v13628_v0 = vld [vmem:[%s14072_s26 + $0xfec] ss:$52 sps:$4 sm:$0xff]  }
 0x48e   : > { %7452 = vmatmul.mubr.bf16.gmra.mrb[96].mxu1 %v13538_v6  ;;  %8798 = vmatmul.mubr.bf16.gmra.mrb[224].mxu0 %v13539_v9  ;;  %v13585_v6 = vld [vmem:[%s14072_s26 + $0xd14] ss:$52 sps:$4 sm:$0xff]   ;;  %v13589_v9 = vld [vmem:[%s14072_s26 + $0x2c] ss:$52 sps:$4 sm:$0xff]  }
 0x48f   : > { %7459 = vmatprep.mubr.bf16.mxu1 %v13541_v11  ;;  %8805 = vmatprep.mubr.bf16.mxu0 %v13543_v12  ;;  %v13590_v11 = vld [vmem:[%s14072_s26 + $0xd10] ss:$52 sps:$4 sm:$0xff]   ;;  %v13587_v12 = vld [vmem:[%s14072_s26 + $0x28] ss:$52 sps:$4 sm:$0xff]  }
 0x496   : > { %7460 = vmatmul.mubr.bf16.gmra.mrb[100].mxu1 %v13545_v15  ;;  %8806 = vmatmul.mubr.bf16.gmra.mrb[228].mxu0 %v13546_v17  ;;  %v13593_v15 = vld [vmem:[%s14072_s26 + $0x94] ss:$52 sps:$4 sm:$0xff]   ;;  %v13595_v17 = vld [vmem:[%s14072_s26 + $0xd78] ss:$52 sps:$4 sm:$0xff]  }
 0x497   : > { %7467 = vmatprep.mubr.bf16.mxu1 %v13547_v58  ;;  %8813 = vmatprep.mubr.bf16.mxu0 %v13549_v1  ;;  %v13596_v58 = vld [vmem:[%s14072_s26 + $0x90] ss:$52 sps:$4 sm:$0xff]  }
 0x498   : > { %v13597_v1 = vld [vmem:[%s14072_s26 + $0xde4] ss:$52 sps:$4 sm:$0xff]  }
 0x49e   : > { %7468 = vmatmul.mubr.bf16.gmra.mrb[104].mxu1 %v13551_v20  ;;  %8814 = vmatmul.mubr.bf16.gmra.mrb[232].mxu0 %v13552_v21  ;;  %v13599_v20 = vld [vmem:[%s14072_s26 + $0xfc] ss:$52 sps:$4 sm:$0xff]   ;;  %v13601_v21 = vld [vmem:[%s14072_s26 + $0xde0] ss:$52 sps:$4 sm:$0xff]  }
 0x49f   : > { %7475 = vmatprep.mubr.bf16.mxu1 %v13553_v22  ;;  %8821 = vmatprep.mubr.bf16.mxu0 %v13555_v23  ;;  %v13602_v22 = vld [vmem:[%s14072_s26 + $0xf8] ss:$52 sps:$4 sm:$0xff]  }
 0x4a0   : > { %v13604_v23 = vld [vmem:[%s14072_s26 + $0xe4c] ss:$52 sps:$4 sm:$0xff]  }
 0x4a6   : > { %7476 = vmatmul.mubr.bf16.gmra.mrb[108].mxu1 %v13557_v26  ;;  %8822 = vmatmul.mubr.bf16.gmra.mrb[236].mxu0 %v13558_v28  ;;  %v13606_v26 = vld [vmem:[%s14072_s26 + $0x164] ss:$52 sps:$4 sm:$0xff]   ;;  %v13608_v28 = vld [vmem:[%s14072_s26 + $0xe48] ss:$52 sps:$4 sm:$0xff]  }
 0x4a7   : > { %7483 = vmatprep.mubr.bf16.mxu1 %v13559_v31  ;;  %8829 = vmatprep.mubr.bf16.mxu0 %v13561_v33  ;;  %v13609_v31 = vld [vmem:[%s14072_s26 + $0x160] ss:$52 sps:$4 sm:$0xff]  }
 0x4a8   : > { %v13610_v33 = vld [vmem:[%s14072_s26 + $0xeb4] ss:$52 sps:$4 sm:$0xff]  }
 0x4ae   : > { %7484 = vmatmul.mubr.bf16.gmra.mrb[112].mxu1 %v13563_v35  ;;  %8830 = vmatmul.mubr.bf16.gmra.mrb[240].mxu0 %v13564_v36  ;;  %v13612_v35 = vld [vmem:[%s14072_s26 + $0x1cc] ss:$52 sps:$4 sm:$0xff]   ;;  %v13614_v36 = vld [vmem:[%s14072_s26 + $0xeb0] ss:$52 sps:$4 sm:$0xff]  }
 0x4af   : > { %7491 = vmatprep.mubr.bf16.mxu1 %v13567_v39  ;;  %8837 = vmatprep.mubr.bf16.mxu0 %v13569_v42  ;;  %v13615_v39 = vld [vmem:[%s14072_s26 + $0x1c8] ss:$52 sps:$4 sm:$0xff]  }
 0x4b0   : > { %v13616_v42 = vld [vmem:[%s14072_s26 + $0xf1c] ss:$52 sps:$4 sm:$0xff]  }
 0x4b6   : > { %7492 = vmatmul.mubr.bf16.gmra.mrb[116].mxu1 %v13571_v43  ;;  %8838 = vmatmul.mubr.bf16.gmra.mrb[244].mxu0 %v13572_v47  ;;  %v13618_v43 = vld [vmem:[%s14072_s26 + $0x234] ss:$52 sps:$4 sm:$0xff]  }
 0x4b7   : > { %7499 = vmatprep.mubr.bf16.mxu1 %v13573_v50  ;;  %8845 = vmatprep.mubr.bf16.mxu0 %v13575_v51  ;;  %v13714_v47 = vld [vmem:[%s16322_s1 + $0x330] sm:$0xff]   ;;  %v13620_v50 = vld [vmem:[%s14072_s26 + $0xf18] ss:$52 sps:$4 sm:$0xff]  }
 0x4b8   : > { %11168 = vmatprep.subr.bf16.mxu1 %v13714_v47  ;;  %v13621_v51 = vld [vmem:[%s14072_s26 + $0x230] ss:$52 sps:$4 sm:$0xff]  }
 0x4b9   : > { %11169 = vmatpush3.bf16.msra.mxu1 %v13714_v47 }
 0x4be   : > { %7500 = vmatmul.mubr.bf16.gmra.mrb[120].mxu1 %v13577_v52  ;;  %8846 = vmatmul.mubr.bf16.gmra.mrb[248].mxu0 %v13578_v55  ;;  %v13622_v52 = vld [vmem:[%s14072_s26 + $0xf84] ss:$52 sps:$4 sm:$0xff]   ;;  %v13624_v55 = vld [vmem:[%s14072_s26 + $0x29c] ss:$52 sps:$4 sm:$0xff]  }
 0x4bf   : > { %7507 = vmatprep.mubr.bf16.mxu1 %v13579_v61  ;;  %8853 = vmatprep.mubr.bf16.mxu0 %v13581_v63  ;;  %v13626_v61 = vld [vmem:[%s14072_s26 + $0xf80] ss:$52 sps:$4 sm:$0xff]   ;;  %v13627_v63 = vld [vmem:[%s14072_s26 + $0x298] ss:$52 sps:$4 sm:$0xff]  }
 0x4c6   : > { %7508 = vmatmul.mubr.bf16.gmra.mrb[124].mxu1 %v13583_v3  ;;  %8854 = vmatmul.mubr.bf16.gmra.mrb[252].mxu0 %v13584_v5  ;;  %v13630_v3 = vld [vmem:[%s14072_s26 + $0x304] ss:$52 sps:$4 sm:$0xff]   ;;  %v13632_v5 = vld [vmem:[%s14072_s26 + $0xfe8] ss:$52 sps:$4 sm:$0xff]  }
 0x4c7   : > { %7515 = vmatprep.mubr.bf16.mxu1 %v13585_v6  ;;  %8894 = vmatprep.mubr.bf16.mxu0 %v13589_v9  ;;  %v13633_v6 = vld [vmem:[%s14072_s26 + $0x300] ss:$52 sps:$4 sm:$0xff]  }
 0x4c8   : > { %v13634_v9 = vld [vmem:[%s14072_s26 + $0x1054] ss:$52 sps:$4 sm:$0xff]  }
 0x4ce   : > { %7516 = vmatmul.mubr.bf16.gmra.mrb[128].mxu1 %v13590_v11  ;;  %8895 = vmatmul.mubr.bf16.vlgmr.msra.gmra.mrb[0].mxu0 %v13587_v12  ;;  %v13636_v11 = vld [vmem:[%s14072_s26 + $0x36c] ss:$52 sps:$4 sm:$0xff]   ;;  %v13638_v12 = vld [vmem:[%s14072_s26 + $0x1050] ss:$52 sps:$4 sm:$0xff]  }
 0x4cf   : > { %7523 = vmatprep.mubr.bf16.mxu1 %v13591_v13  ;;  %8902 = vmatprep.mubr.bf16.mxu0 %v13593_v15  ;;  %v13639_v13 = vld [vmem:[%s14072_s26 + $0x368] ss:$52 sps:$4 sm:$0xff]  }
 0x4d0   : > { %v13641_v15 = vld [vmem:[%s14072_s26 + $0x10bc] ss:$52 sps:$4 sm:$0xff]  }
 0x4d6   : > { %7524 = vmatmul.mubr.bf16.gmra.mrb[132].mxu1 %v13595_v17  ;;  %8903 = vmatmul.mubr.bf16.gmra.mrb[4].mxu0 %v13596_v58  ;;  %v13643_v17 = vld [vmem:[%s14072_s26 + $0x3d4] ss:$52 sps:$4 sm:$0xff]   ;;  %v13645_v58 = vld [vmem:[%s14072_s26 + $0x10b8] ss:$52 sps:$4 sm:$0xff]  }
 0x4d7   : > { %7531 = vmatprep.mubr.bf16.mxu1 %v13597_v1  ;;  %8910 = vmatprep.mubr.bf16.mxu0 %v13599_v20  ;;  %v13646_v1 = vld [vmem:[%s14072_s26 + $0x3d0] ss:$52 sps:$4 sm:$0xff]  }
 0x4d8   : > { %v13647_v20 = vld [vmem:[%s14072_s26 + $0x1124] ss:$52 sps:$4 sm:$0xff]  }
 0x4de   : > { %7532 = vmatmul.mubr.bf16.gmra.mrb[136].mxu1 %v13601_v21  ;;  %8911 = vmatmul.mubr.bf16.gmra.mrb[8].mxu0 %v13602_v22  ;;  %v13649_v21 = vld [vmem:[%s14072_s26 + $0x43c] ss:$52 sps:$4 sm:$0xff]   ;;  %v13651_v22 = vld [vmem:[%s14072_s26 + $0x1120] ss:$52 sps:$4 sm:$0xff]  }
 0x4df   : > { %7539 = vmatprep.mubr.bf16.mxu1 %v13604_v23  ;;  %8918 = vmatprep.mubr.bf16.mxu0 %v13606_v26  ;;  %v13652_v23 = vld [vmem:[%s14072_s26 + $0x438] ss:$52 sps:$4 sm:$0xff]  }
 0x4e0   : > { %v13653_v26 = vld [vmem:[%s14072_s26 + $0x118c] ss:$52 sps:$4 sm:$0xff]  }
 0x4e6   : > { %7540 = vmatmul.mubr.bf16.gmra.mrb[140].mxu1 %v13608_v28  ;;  %8919 = vmatmul.mubr.bf16.gmra.mrb[12].mxu0 %v13609_v31  ;;  %v13655_v28 = vld [vmem:[%s14072_s26 + $0x4a4] ss:$52 sps:$4 sm:$0xff]  }
 0x4e7   : > { %7547 = vmatprep.mubr.bf16.mxu1 %v13610_v33  ;;  %8926 = vmatprep.mubr.bf16.mxu0 %v13612_v35  ;;  %v13751_v31 = vld [vmem:[%s16322_s1 + $0x338] sm:$0xff]  }
 0x4e8   : > { %11170 = vmatprep.subr.bf16.mxu1 %v13751_v31 }
 0x4e9   : > { %11171 = vmatpush3.bf16.msra.mxu1 %v13751_v31  ;;  %v13680_v31 = vld [vmem:[%s14072_s26 + $0x644] ss:$52 sps:$4 sm:$0xff]  }
 0x4ee   : > { %7548 = vmatmul.mubr.bf16.gmra.mrb[144].mxu1 %v13614_v36  ;;  %8927 = vmatmul.mubr.bf16.gmra.mrb[16].mxu0 %v13615_v39  ;;  %v13657_v36 = vld [vmem:[%s14072_s26 + $0x1188] ss:$52 sps:$4 sm:$0xff]  }
 0x4ef   : > { %7555 = vmatprep.mubr.bf16.mxu1 %v13616_v42  ;;  %8934 = vmatprep.mubr.bf16.mxu0 %v13618_v43  ;;  %v13658_v42 = vld [vmem:[%s14072_s26 + $0x4a0] ss:$52 sps:$4 sm:$0xff]  }
 0x4f0   : > { %v13659_v43 = vld [vmem:[%s14072_s26 + $0x11f4] ss:$52 sps:$4 sm:$0xff]  }
 0x4f6   : > { %7556 = vmatmul.mubr.bf16.gmra.mrb[148].mxu1 %v13620_v50  ;;  %8935 = vmatmul.mubr.bf16.gmra.mrb[20].mxu0 %v13621_v51  ;;  %v13661_v50 = vld [vmem:[%s14072_s26 + $0x50c] ss:$52 sps:$4 sm:$0xff]  }
 0x4f7   : > { %7563 = vmatprep.mubr.bf16.mxu1 %v13622_v52  ;;  %8942 = vmatprep.mubr.bf16.mxu0 %v13624_v55  ;;  %v13663_v55 = vld [vmem:[%s14072_s26 + $0x11f0] ss:$52 sps:$4 sm:$0xff]  }
 0x4fe   : > { %7564 = vmatmul.mubr.bf16.gmra.mrb[152].mxu1 %v13626_v61  ;;  %8943 = vmatmul.mubr.bf16.gmra.mrb[24].mxu0 %v13627_v63  ;;  %v13664_v63 = vld [vmem:[%s14072_s26 + $0x508] ss:$52 sps:$4 sm:$0xff]  }
 0x4ff   : > { %7571 = vmatprep.mubr.bf16.mxu1 %v13628_v0  ;;  %8950 = vmatprep.mubr.bf16.mxu0 %v13630_v3  ;;  %v13665_v0 = vld [vmem:[%s14072_s26 + $0x125c] ss:$52 sps:$4 sm:$0xff]  }
 0x506   : > { %7572 = vmatmul.mubr.bf16.gmra.mrb[156].mxu1 %v13632_v5  ;;  %8951 = vmatmul.mubr.bf16.gmra.mrb[28].mxu0 %v13633_v6  ;;  %v13667_v5 = vld [vmem:[%s14072_s26 + $0x574] ss:$52 sps:$4 sm:$0xff]  }
 0x507   : > { %7579 = vmatprep.mubr.bf16.mxu1 %v13634_v9  ;;  %8958 = vmatprep.mubr.bf16.mxu0 %v13636_v11  ;;  %v13669_v11 = vld [vmem:[%s14072_s26 + $0x1258] ss:$52 sps:$4 sm:$0xff]  }
 0x50e   : > { %7580 = vmatmul.mubr.bf16.gmra.mrb[160].mxu1 %v13638_v12  ;;  %8959 = vmatmul.mubr.bf16.gmra.mrb[32].mxu0 %v13639_v13  ;;  %v13670_v13 = vld [vmem:[%s14072_s26 + $0x570] ss:$52 sps:$4 sm:$0xff]  }
 0x50f   : > { %7587 = vmatprep.mubr.bf16.mxu1 %v13641_v15  ;;  %8966 = vmatprep.mubr.bf16.mxu0 %v13643_v17  ;;  %v13671_v15 = vld [vmem:[%s14072_s26 + $0x12c4] ss:$52 sps:$4 sm:$0xff]  }
 0x516   : > { %7588 = vmatmul.mubr.bf16.gmra.mrb[164].mxu1 %v13645_v58  ;;  %8967 = vmatmul.mubr.bf16.gmra.mrb[36].mxu0 %v13646_v1  ;;  %v13673_v58 = vld [vmem:[%s14072_s26 + $0x5dc] ss:$52 sps:$4 sm:$0xff]  }
 0x517   : > { %7595 = vmatprep.mubr.bf16.mxu1 %v13647_v20  ;;  %8974 = vmatprep.mubr.bf16.mxu0 %v13649_v21  ;;  %v13675_v21 = vld [vmem:[%s14072_s26 + $0x12c0] ss:$52 sps:$4 sm:$0xff]  }
 0x51e   : > { %7596 = vmatmul.mubr.bf16.gmra.mrb[168].mxu1 %v13651_v22  ;;  %8975 = vmatmul.mubr.bf16.gmra.mrb[40].mxu0 %v13652_v23  ;;  %v13676_v23 = vld [vmem:[%s14072_s26 + $0x5d8] ss:$52 sps:$4 sm:$0xff]  }
 0x51f   : > { %7603 = vmatprep.mubr.bf16.mxu1 %v13653_v26  ;;  %8982 = vmatprep.mubr.bf16.mxu0 %v13655_v28  ;;  %v13678_v26 = vld [vmem:[%s14072_s26 + $0x132c] ss:$52 sps:$4 sm:$0xff]  }
 0x521   : > { %v15169_v33 = vpop.f32.mrb[64].mxu1 }
 0x522   : > { %v7391_v35 = vpop.f32.mrb[65].mxu1 }
 0x523   : > { %v15172_v39 = vpop.f32.mrb[66].mxu1 }
 0x524   : > { %v7394_v47 = vpop.f32.mrb[67].mxu1 }
 0x525   : > { %v13683_v47 = vld [vmem:[%s14072_s26 + $0x640] ss:$52 sps:$4 sm:$0xff]  }
 0x526   : > { %7604 = vmatmul.mubr.bf16.gmra.mrb[172].mxu1 %v13657_v36  ;;  %8983 = vmatmul.mubr.bf16.gmra.mrb[44].mxu0 %v13658_v42  ;;  %v13682_v42 = vld [vmem:[%s14072_s26 + $0x1328] ss:$52 sps:$4 sm:$0xff]  }
 0x527   : > { %7611 = vmatprep.mubr.bf16.mxu1 %v13659_v43  ;;  %8990 = vmatprep.mubr.bf16.mxu0 %v13661_v50  ;;  %v13684_v50 = vld [vmem:[%s14072_s26 + $0x1394] ss:$52 sps:$4 sm:$0xff]  }
 0x529   : > { %v15177_v51 = vpop.f32.mrb[68].mxu1 }
 0x52a   : > { %v7399_v52 = vpop.f32.mrb[69].mxu1 }
 0x52b   : > { %v15180_v61 = vpop.f32.mrb[70].mxu1 }
 0x52c   : > { %v7402_v3 = vpop.f32.mrb[71].mxu1 }
 0x52d   : > { %v13688_v3 = vld [vmem:[%s14072_s26 + $0x1390] ss:$52 sps:$4 sm:$0xff]  }
 0x52e   : > { %7612 = vmatmul.mubr.bf16.gmra.mrb[176].mxu1 %v13663_v55  ;;  %8991 = vmatmul.mubr.bf16.gmra.mrb[48].mxu0 %v13664_v63  ;;  %v13686_v55 = vld [vmem:[%s14072_s26 + $0x6ac] ss:$52 sps:$4 sm:$0xff]  }
 0x52f   : > { %7619 = vmatprep.mubr.bf16.mxu1 %v13665_v0  ;;  %8998 = vmatprep.mubr.bf16.mxu0 %v13667_v5 }
 0x531   : > { %v15185_v6 = vpop.f32.mrb[72].mxu1 }
 0x532   : > { %v7407_v9 = vpop.f32.mrb[73].mxu1 }
 0x533   : > { %v15188_v12 = vpop.f32.mrb[74].mxu1  ;;  %v13689_v9 = vld [vmem:[%s14072_s26 + $0x6a8] ss:$52 sps:$4 sm:$0xff]  }
 0x534   : > { %v7410_v17 = vpop.f32.mrb[75].mxu1 }
 0x536   : > { %7620 = vmatmul.mubr.bf16.gmra.mrb[180].mxu1 %v13669_v11  ;;  %8999 = vmatmul.mubr.bf16.gmra.mrb[52].mxu0 %v13670_v13  ;;  %v13690_v11 = vld [vmem:[%s14072_s26 + $0x13fc] ss:$52 sps:$4 sm:$0xff]  }
 0x537   : > { %7627 = vmatprep.mubr.bf16.mxu1 %v13671_v15  ;;  %9006 = vmatprep.mubr.bf16.mxu0 %v13673_v58  ;;  %v13692_v15 = vld [vmem:[%s14072_s26 + $0x714] ss:$52 sps:$4 sm:$0xff]  }
 0x539   : > { %v15193_v1 = vpop.f32.mrb[76].mxu1 }
 0x53a   : > { %v7415_v20 = vpop.f32.mrb[77].mxu1 }
 0x53b   : > { %v15196_v22 = vpop.f32.mrb[78].mxu1  ;;  %v13694_v20 = vld [vmem:[%s14072_s26 + $0x13f8] ss:$52 sps:$4 sm:$0xff]  }
 0x53c   : > { %v7418_v28 = vpop.f32.mrb[79].mxu1 }
 0x53e   : > { %7628 = vmatmul.mubr.bf16.gmra.mrb[184].mxu1 %v13675_v21  ;;  %9007 = vmatmul.mubr.bf16.gmra.mrb[56].mxu0 %v13676_v23  ;;  %v13695_v23 = vld [vmem:[%s14072_s26 + $0x710] ss:$52 sps:$4 sm:$0xff]  }
 0x53f   : > { %7635 = vmatprep.mubr.bf16.mxu1 %v13678_v26  ;;  %9014 = vmatprep.mubr.bf16.mxu0 %v13680_v31  ;;  %v13696_v26 = vld [vmem:[%s14072_s26 + $0x1464] ss:$52 sps:$4 sm:$0xff]   ;;  %v13698_v31 = vld [vmem:[%s14072_s26 + $0x77c] ss:$52 sps:$4 sm:$0xff]  }
 0x541   : > { %v15201_v35 = vpop.f32.mrb[80].mxu1 }
 0x542   : > { %v7423_v36 = vpop.f32.mrb[81].mxu1 }
 0x543   : > { %v15204_v43 = vpop.f32.mrb[82].mxu1 }
 0x544   : > { %v7426_v52 = vpop.f32.mrb[83].mxu1 }
 0x545   : > { %v13701_v52 = vld [vmem:[%s14072_s26 + $0x778] ss:$52 sps:$4 sm:$0xff]  }
 0x546   : > { %7636 = vmatmul.mubr.bf16.gmra.mrb[188].mxu1 %v13682_v42  ;;  %9015 = vmatmul.mubr.bf16.gmra.mrb[60].mxu0 %v13683_v47  ;;  %v13700_v47 = vld [vmem:[%s14072_s26 + $0x1460] ss:$52 sps:$4 sm:$0xff]  }
 0x547   : > { %7643 = vmatprep.mubr.bf16.mxu1 %v13684_v50  ;;  %9022 = vmatprep.mubr.bf16.mxu0 %v13686_v55  ;;  %v13702_v55 = vld [vmem:[%s14072_s26 + $0x14cc] ss:$52 sps:$4 sm:$0xff]  }
 0x549   : > { %v15209_v63 = vpop.f32.mrb[84].mxu1 }
 0x54a   : > { %v7431_v0 = vpop.f32.mrb[85].mxu1 }
 0x54b   : > { %v15212_v5 = vpop.f32.mrb[86].mxu1 }
 0x54c   : > { %v7434_v13 = vpop.f32.mrb[87].mxu1 }
 0x54d   : > { %v13706_v13 = vld [vmem:[%s14072_s26 + $0x14c8] ss:$52 sps:$4 sm:$0xff]  }
 0x54e   : > { %7644 = vmatmul.mubr.bf16.gmra.mrb[192].mxu1 %v13688_v3  ;;  %9023 = vmatmul.mubr.bf16.gmra.mrb[64].mxu0 %v13689_v9  ;;  %v13704_v3 = vld [vmem:[%s14072_s26 + $0x7e4] ss:$52 sps:$4 sm:$0xff]  }
 0x54f   : > { %7651 = vmatprep.mubr.bf16.mxu1 %v13690_v11  ;;  %9030 = vmatprep.mubr.bf16.mxu0 %v13692_v15 }
 0x551   : > { %v15217_v17 = vpop.f32.mrb[88].mxu1 }
 0x552   : > { %v7439_v58 = vpop.f32.mrb[89].mxu1 }
 0x553   : > { %v15220_v21 = vpop.f32.mrb[90].mxu1  ;;  %v13707_v58 = vld [vmem:[%s14072_s26 + $0x7e0] ss:$52 sps:$4 sm:$0xff]  }
 0x554   : > { %v7442_v28 = vpop.f32.mrb[91].mxu1 }
 0x556   : > { %7652 = vmatmul.mubr.bf16.gmra.mrb[196].mxu1 %v13694_v20  ;;  %9031 = vmatmul.mubr.bf16.gmra.mrb[68].mxu0 %v13695_v23  ;;  %v13708_v20 = vld [vmem:[%s14072_s26 + $0x1534] ss:$52 sps:$4 sm:$0xff]  }
 0x557   : > { %7659 = vmatprep.mubr.bf16.mxu1 %v13696_v26  ;;  %9038 = vmatprep.mubr.bf16.mxu0 %v13698_v31  ;;  %v13710_v26 = vld [vmem:[%s14072_s26 + $0x84c] ss:$52 sps:$4 sm:$0xff]  }
 0x559   : > { %v15225_v36 = vpop.f32.mrb[92].mxu1 }
 0x55a   : > { %v7447_v42 = vpop.f32.mrb[93].mxu1 }
 0x55b   : > { %v15228_v50 = vpop.f32.mrb[94].mxu1  ;;  %v13712_v42 = vld [vmem:[%s14072_s26 + $0x1530] ss:$52 sps:$4 sm:$0xff]  }
 0x55c   : > { %v7450_v0 = vpop.f32.mrb[95].mxu1 }
 0x55e   : > { %7660 = vmatmul.mubr.bf16.gmra.mrb[200].mxu1 %v13700_v47  ;;  %9039 = vmatmul.mubr.bf16.gmra.mrb[72].mxu0 %v13701_v52  ;;  %v13713_v52 = vld [vmem:[%s14072_s26 + $0x848] ss:$52 sps:$4 sm:$0xff]  }
 0x55f   : > { %7667 = vmatprep.mubr.bf16.mxu1 %v13702_v55  ;;  %9046 = vmatprep.mubr.bf16.mxu0 %v13704_v3  ;;  %v13715_v55 = vld [vmem:[%s14072_s26 + $0x159c] ss:$52 sps:$4 sm:$0xff]   ;;  %v13717_v3 = vld [vmem:[%s14072_s26 + $0x8b4] ss:$52 sps:$4 sm:$0xff]  }
 0x561   : > { %v15233_v9 = vpop.f32.mrb[96].mxu1 }
 0x562   : > { %v7455_v11 = vpop.f32.mrb[97].mxu1 }
 0x563   : > { %v15236_v15 = vpop.f32.mrb[98].mxu1 }
 0x564   : > { %16325 = vst [vmem:[#allocation2_spill] sm:$0xff] %v15236_v15  ;;  %v7458_v23 = vpop.f32.mrb[99].mxu1 }
 0x565   : > { %v13720_v23 = vld [vmem:[%s14072_s26 + $0x8b0] ss:$52 sps:$4 sm:$0xff]  }
 0x566   : > { %7668 = vmatmul.mubr.bf16.gmra.mrb[204].mxu1 %v13706_v13  ;;  %9047 = vmatmul.mubr.bf16.gmra.mrb[76].mxu0 %v13707_v58  ;;  %v13719_v58 = vld [vmem:[%s14072_s26 + $0x1598] ss:$52 sps:$4 sm:$0xff]  }
 0x567   : > { %7675 = vmatprep.mubr.bf16.mxu1 %v13708_v20  ;;  %9054 = vmatprep.mubr.bf16.mxu0 %v13710_v26  ;;  %v13721_v26 = vld [vmem:[%s14072_s26 + $0x1604] ss:$52 sps:$4 sm:$0xff]  }
 0x569   : > { %v15241_v28 = vpop.f32.mrb[100].mxu1 }
 0x56a   : > { %16326 = vst [vmem:[#allocation3_spill] sm:$0xff] %v15241_v28  ;;  %v7463_v31 = vpop.f32.mrb[101].mxu1 }
 0x56b   : > { %v15244_v47 = vpop.f32.mrb[102].mxu1 }
 0x56c   : > { %16327 = vst [vmem:[#allocation4_spill] sm:$0xff] %v15244_v47  ;;  %v7466_v0 = vpop.f32.mrb[103].mxu1  ;;  %v13723_v47 = vld [vmem:[%s14072_s26 + $0x91c] ss:$52 sps:$4 sm:$0xff]  }
 0x56e   : > { %7676 = vmatmul.mubr.bf16.gmra.mrb[208].mxu1 %v13712_v42  ;;  %9055 = vmatmul.mubr.bf16.gmra.mrb[80].mxu0 %v13713_v52 }
 0x56f   : > { %7683 = vmatprep.mubr.bf16.mxu1 %v13715_v55  ;;  %9062 = vmatprep.mubr.bf16.mxu0 %v13717_v3  ;;  %v13725_v55 = vld [vmem:[%s14072_s26 + $0x1600] ss:$52 sps:$4 sm:$0xff]   ;;  %v13726_v3 = vld [vmem:[%s14072_s26 + $0x918] ss:$52 sps:$4 sm:$0xff]  }
 0x571   : > { %v15249_v11 = vpop.f32.mrb[104].mxu1 }
 0x572   : > { %16328 = vst [vmem:[#allocation5_spill] sm:$0xff] %v15249_v11  ;;  %v7471_v13 = vpop.f32.mrb[105].mxu1  ;;  %v13729_v11 = vld [vmem:[%s14072_s26 + $0x984] ss:$52 sps:$4 sm:$0xff]  }
 0x573   : > { %v15252_v20 = vpop.f32.mrb[106].mxu1  ;;  %v13727_v13 = vld [vmem:[%s14072_s26 + $0x166c] ss:$52 sps:$4 sm:$0xff]  }
 0x574   : > { %16329 = vst [vmem:[#allocation6_spill] sm:$0xff] %v15252_v20  ;;  %v7474_v31 = vpop.f32.mrb[107].mxu1 }
 0x575   : > { %v13732_v31 = vld [vmem:[%s14072_s26 + $0x980] ss:$52 sps:$4 sm:$0xff]  }
 0x576   : > { %7684 = vmatmul.mubr.bf16.gmra.mrb[212].mxu1 %v13719_v58  ;;  %9063 = vmatmul.mubr.bf16.gmra.mrb[84].mxu0 %v13720_v23  ;;  %v13731_v23 = vld [vmem:[%s14072_s26 + $0x1668] ss:$52 sps:$4 sm:$0xff]  }
 0x577   : > { %7691 = vmatprep.mubr.bf16.mxu1 %v13721_v26  ;;  %9070 = vmatprep.mubr.bf16.mxu0 %v13723_v47 }
 0x579   : > { %v15257_v42 = vpop.f32.mrb[108].mxu1 }
 0x57a   : > { %16330 = vst [vmem:[#allocation7_spill] sm:$0xff] %v15257_v42  ;;  %v7479_v52 = vpop.f32.mrb[109].mxu1  ;;  %v13735_v42 = vld [vmem:[%s14072_s26 + $0x9ec] ss:$52 sps:$4 sm:$0xff]  }
 0x57b   : > { %v15260_v0 = vpop.f32.mrb[110].mxu1  ;;  %v13733_v52 = vld [vmem:[%s14072_s26 + $0x16d4] ss:$52 sps:$4 sm:$0xff]  }
 0x57c   : > { %16331 = vst [vmem:[#allocation8_spill] sm:$0xff] %v15260_v0  ;;  %v7482_v20 = vpop.f32.mrb[111].mxu1 }
 0x57e   : > { %7692 = vmatmul.mubr.bf16.gmra.mrb[216].mxu1 %v13725_v55  ;;  %9071 = vmatmul.mubr.bf16.gmra.mrb[88].mxu0 %v13726_v3  ;;  %v13737_v55 = vld [vmem:[%s14072_s26 + $0x16d0] ss:$52 sps:$4 sm:$0xff]  }
 0x57f   : > { %7699 = vmatprep.mubr.bf16.mxu1 %v13727_v13  ;;  %9078 = vmatprep.mubr.bf16.mxu0 %v13729_v11  ;;  %v13738_v13 = vld [vmem:[%s14072_s26 + $0x9e8] ss:$52 sps:$4 sm:$0xff]  }
 0x581   : > { %v15265_v58 = vpop.f32.mrb[112].mxu1 }
 0x582   : > { %16332 = vst [vmem:[#allocation9_spill] sm:$0xff] %v15265_v58  ;;  %v7487_v47 = vpop.f32.mrb[113].mxu1  ;;  %v13741_v58 = vld [vmem:[%s14072_s26 + $0xa54] ss:$52 sps:$4 sm:$0xff]  }
 0x583   : > { %v15268_v26 = vpop.f32.mrb[114].mxu1  ;;  %v13739_v47 = vld [vmem:[%s14072_s26 + $0x173c] ss:$52 sps:$4 sm:$0xff]  }
 0x584   : > { %16333 = vst [vmem:[#allocation10_spill] sm:$0xff] %v15268_v26  ;;  %v7490_v0 = vpop.f32.mrb[115].mxu1 }
 0x586   : > { %7700 = vmatmul.mubr.bf16.gmra.mrb[220].mxu1 %v13731_v23  ;;  %9079 = vmatmul.mubr.bf16.gmra.mrb[92].mxu0 %v13732_v31  ;;  %v13743_v23 = vld [vmem:[%s14072_s26 + $0x1738] ss:$52 sps:$4 sm:$0xff]  }
 0x587   : > { %7707 = vmatprep.mubr.bf16.mxu1 %v13733_v52  ;;  %9086 = vmatprep.mubr.bf16.mxu0 %v13735_v42  ;;  %v13744_v52 = vld [vmem:[%s14072_s26 + $0xa50] ss:$52 sps:$4 sm:$0xff]  }
 0x589   : > { %v15273_v20 = vpop.f32.mrb[116].mxu1 }
 0x58a   : > { %16334 = vst [vmem:[#allocation11_spill] sm:$0xff] %v15273_v20  ;;  %v7495_v11 = vpop.f32.mrb[117].mxu1  ;;  %v13747_v20 = vld [vmem:[%s14072_s26 + $0xabc] ss:$52 sps:$4 sm:$0xff]  }
 0x58b   : > { %v15276_v3 = vpop.f32.mrb[118].mxu1  ;;  %v13745_v11 = vld [vmem:[%s14072_s26 + $0x17a4] ss:$52 sps:$4 sm:$0xff]  }
 0x58c   : > { %16335 = vst [vmem:[#allocation12_spill] sm:$0xff] %v15276_v3  ;;  %v7498_v26 = vpop.f32.mrb[119].mxu1 }
 0x58e   : > { %7708 = vmatmul.mubr.bf16.gmra.mrb[224].mxu1 %v13737_v55  ;;  %9087 = vmatmul.mubr.bf16.gmra.mrb[96].mxu0 %v13738_v13  ;;  %v13749_v55 = vld [vmem:[%s14072_s26 + $0x17a0] ss:$52 sps:$4 sm:$0xff]  }
 0x58f   : > { %7715 = vmatprep.mubr.bf16.mxu1 %v13739_v47  ;;  %9094 = vmatprep.mubr.bf16.mxu0 %v13741_v58  ;;  %v13750_v47 = vld [vmem:[%s14072_s26 + $0xab8] ss:$52 sps:$4 sm:$0xff]  }
 0x591   : > { %v15281_v0 = vpop.f32.mrb[120].mxu1 }
 0x592   : > { %16336 = vst [vmem:[#allocation13_spill] sm:$0xff] %v15281_v0  ;;  %v7503_v42 = vpop.f32.mrb[121].mxu1 }
 0x593   : > { %v15284_v31 = vpop.f32.mrb[122].mxu1  ;;  %v13752_v42 = vld [vmem:[%s14072_s26 + $0x180c] ss:$52 sps:$4 sm:$0xff]  }
 0x594   : > { %16337 = vst [vmem:[#allocation14_spill] sm:$0xff] %v15284_v31  ;;  %v7506_v3 = vpop.f32.mrb[123].mxu1  ;;  %v13754_v31 = vld [vmem:[%s14072_s26 + $0xb24] ss:$52 sps:$4 sm:$0xff]  }
 0x595   : > { %v15300_v3 = vld [vmem:[%s16323_s2] ss:$0 sm:$0xff] }
 0x596   : > { %7716 = vmatmul.mubr.bf16.gmra.mrb[228].mxu1 %v13743_v23  ;;  %9095 = vmatmul.mubr.bf16.gmra.mrb[100].mxu0 %v13744_v52  ;;  %v11332_v23 = vadd.f32 %v15300_v3, %v14786_v29 }
 0x597   : > { %7723 = vmatprep.mubr.bf16.mxu1 %v13745_v11  ;;  %9102 = vmatprep.mubr.bf16.mxu0 %v13747_v20  ;;  %v13756_v11 = vld [vmem:[%s14072_s26 + $0x1808] ss:$52 sps:$4 sm:$0xff]  }
 0x599   : > { %v15289_v26 = vpop.f32.mrb[124].mxu1 }
 0x59a   : > { %16338 = vst [vmem:[#allocation15_spill] sm:$0xff] %v15289_v26  ;;  %v7511_v58 = vpop.f32.mrb[125].mxu1  ;;  %v11334_v26 = vadd.f32 %v15300_v3, %v14789_v32  ;;  %v11336_v32 = vadd.f32 %v15300_v3, %v14794_v37 }
 0x59b   : > { %v15292_v13 = vpop.f32.mrb[126].mxu1 }
 0x59c   : > { %16339 = vst [vmem:[#allocation16_spill] sm:$0xff] %v15292_v13  ;;  %v7514_v0 = vpop.f32.mrb[127].mxu1 }
 0x59e   : > { %7724 = vmatmul.mubr.bf16.gmra.mrb[232].mxu1 %v13749_v55  ;;  %9103 = vmatmul.mubr.bf16.gmra.mrb[104].mxu0 %v13750_v47  ;;  %v13757_v47 = vld [vmem:[%s14072_s26 + $0xb20] ss:$52 sps:$4 sm:$0xff]  }
 0x59f   : > { %7731 = vmatprep.mubr.bf16.mxu1 %v13752_v42  ;;  %9110 = vmatprep.mubr.bf16.mxu0 %v13754_v31  ;;  %v13758_v42 = vld [vmem:[%s14072_s26 + $0x1874] ss:$52 sps:$4 sm:$0xff]  }
 0x5a1   : > { %v15302_v20 = vpop.f32.mrb[128].mxu1  ;;  %v8896_v52 = vpop.f32.mrb[0].mxu0 }
 0x5a2   : > { %16340 = vst [vmem:[#allocation17_spill] sm:$0xff] %v15302_v20  ;;  %v7519_v0 = vpop.f32.mrb[129].mxu1  ;;  %v15307_v58 = vadd.f32 %v11332_v23, %v8896_v52  ;;  %v8898_v55 = vpop.f32.mrb[1].mxu0  ;;  %v13760_v20 = vld [vmem:[%s14072_s26 + $0xb8c] ss:$52 sps:$4 sm:$0xff]  }
 0x5a3   : > { %v15309_v13 = vpop.f32.mrb[130].mxu1  ;;  %v8899_v31 = vpop.f32.mrb[2].mxu0  ;;  %v13762_v55 = vld [vmem:[%s14072_s26 + $0x1870] ss:$52 sps:$4 sm:$0xff]  }
 0x5a4   : > { %16341 = vst [vmem:[#allocation18_spill] sm:$0xff] %v15307_v58  ;;  %v7522_v28 = vpop.f32.mrb[131].mxu1  ;;  %v15316_v15 = vadd.f32 %v11334_v26, %v8899_v31  ;;  %v8901_v29 = vpop.f32.mrb[3].mxu0 }
 0x5a5   : > { %v13766_v29 = vld [vmem:[%s14072_s26 + $0xbf4] ss:$52 sps:$4 sm:$0xff]  }
 0x5a6   : > { %7732 = vmatmul.mubr.bf16.gmra.mrb[236].mxu1 %v13756_v11  ;;  %9111 = vmatmul.mubr.bf16.gmra.mrb[108].mxu0 %v13757_v47  ;;  %v11338_v11 = vadd.f32 %v15300_v3, %v14797_v40  ;;  %v13763_v47 = vld [vmem:[%s14072_s26 + $0xb88] ss:$52 sps:$4 sm:$0xff]   ;;  %v11340_v40 = vadd.f32 %v15300_v3, %v14805_v46 }
 0x5a7   : > { %7739 = vmatprep.mubr.bf16.mxu1 %v13758_v42  ;;  %9118 = vmatprep.mubr.bf16.mxu0 %v13760_v20  ;;  %v13764_v42 = vld [vmem:[%s14072_s26 + $0x18dc] ss:$52 sps:$4 sm:$0xff]  }
 0x5a9   : > { %v15318_v23 = vpop.f32.mrb[132].mxu1  ;;  %v8904_v52 = vpop.f32.mrb[4].mxu0 }
 0x5aa   : > { %16342 = vst [vmem:[#allocation19_spill] sm:$0xff] %v15318_v23  ;;  %v7527_v0 = vpop.f32.mrb[133].mxu1  ;;  %v15323_v28 = vadd.f32 %v11336_v32, %v8904_v52  ;;  %v8906_v58 = vpop.f32.mrb[5].mxu0 }
 0x5ab   : > { %v15325_v26 = vpop.f32.mrb[134].mxu1  ;;  %v8907_v20 = vpop.f32.mrb[6].mxu0  ;;  %v13768_v0 = vld [vmem:[%s14072_s26 + $0x18d8] ss:$52 sps:$4 sm:$0xff]  }
 0x5ac   : > { %16343 = vst [vmem:[#allocation20_spill] sm:$0xff] %v15325_v26  ;;  %v7530_v31 = vpop.f32.mrb[135].mxu1  ;;  %v15332_v23 = vadd.f32 %v11338_v11, %v8907_v20  ;;  %v8909_v37 = vpop.f32.mrb[7].mxu0 }
 0x5ad   : > { %v13772_v37 = vld [vmem:[%s14072_s26 + $0xc5c] ss:$52 sps:$4 sm:$0xff]  }
 0x5ae   : > { %7740 = vmatmul.mubr.bf16.gmra.mrb[240].mxu1 %v13762_v55  ;;  %9119 = vmatmul.mubr.bf16.gmra.mrb[112].mxu0 %v13763_v47  ;;  %v11342_v55 = vadd.f32 %v15300_v3, %v14809_v49  ;;  %v13769_v47 = vld [vmem:[%s14072_s26 + $0xbf0] ss:$52 sps:$4 sm:$0xff]   ;;  %v11344_v49 = vadd.f32 %v15300_v3, %v14814_v54 }
 0x5af   : > { %7747 = vmatprep.mubr.bf16.mxu1 %v13764_v42  ;;  %9126 = vmatprep.mubr.bf16.mxu0 %v13766_v29  ;;  %v13770_v42 = vld [vmem:[%s14072_s26 + $0x1944] ss:$52 sps:$4 sm:$0xff]  }
 0x5b1   : > { %v15334_v58 = vpop.f32.mrb[136].mxu1  ;;  %v8912_v32 = vpop.f32.mrb[8].mxu0 }
 0x5b2   : > { %16344 = vst [vmem:[#allocation21_spill] sm:$0xff] %v15334_v58  ;;  %v7535_v52 = vpop.f32.mrb[137].mxu1  ;;  %v15339_v31 = vadd.f32 %v11340_v40, %v8912_v32  ;;  %v8914_v26 = vpop.f32.mrb[9].mxu0 }
 0x5b3   : > { %v15341_v11 = vpop.f32.mrb[138].mxu1  ;;  %v8915_v20 = vpop.f32.mrb[10].mxu0  ;;  %v13774_v52 = vld [vmem:[%s14072_s26 + $0x1940] ss:$52 sps:$4 sm:$0xff]  }
 0x5b4   : > { %16345 = vst [vmem:[#allocation22_spill] sm:$0xff] %v15341_v11  ;;  %v7538_v29 = vpop.f32.mrb[139].mxu1  ;;  %v15348_v58 = vadd.f32 %v11342_v55, %v8915_v20  ;;  %v8917_v46 = vpop.f32.mrb[11].mxu0 }
 0x5b5   : > { %v13778_v46 = vld [vmem:[%s14072_s26 + $0xcc4] ss:$52 sps:$4 sm:$0xff]  }
 0x5b6   : > { %7748 = vmatmul.mubr.bf16.gmra.mrb[244].mxu1 %v13768_v0  ;;  %9127 = vmatmul.mubr.bf16.gmra.mrb[116].mxu0 %v13769_v47  ;;  %v11346_v0 = vadd.f32 %v15300_v3, %v14817_v57  ;;  %v13775_v47 = vld [vmem:[%s14072_s26 + $0xc58] ss:$52 sps:$4 sm:$0xff]   ;;  %v11348_v57 = vadd.f32 %v15300_v3, %v14822_v62 }
 0x5b7   : > { %7755 = vmatprep.mubr.bf16.mxu1 %v13770_v42  ;;  %9134 = vmatprep.mubr.bf16.mxu0 %v13772_v37  ;;  %v13776_v42 = vld [vmem:[%s14072_s26 + $0x19ac] ss:$52 sps:$4 sm:$0xff]  }
 0x5b9   : > { %v15350_v26 = vpop.f32.mrb[140].mxu1  ;;  %v8920_v40 = vpop.f32.mrb[12].mxu0 }
 0x5ba   : > { %16346 = vst [vmem:[#allocation23_spill] sm:$0xff] %v15350_v26  ;;  %v7543_v32 = vpop.f32.mrb[141].mxu1  ;;  %v15355_v29 = vadd.f32 %v11344_v49, %v8920_v40  ;;  %v8922_v11 = vpop.f32.mrb[13].mxu0 }
 0x5bb   : > { %v15357_v55 = vpop.f32.mrb[142].mxu1  ;;  %v8923_v20 = vpop.f32.mrb[14].mxu0  ;;  %v13780_v32 = vld [vmem:[%s14072_s26 + $0x19a8] ss:$52 sps:$4 sm:$0xff]  }
 0x5bc   : > { %16347 = vst [vmem:[#allocation24_spill] sm:$0xff] %v15357_v55  ;;  %v7546_v37 = vpop.f32.mrb[143].mxu1  ;;  %v15364_v26 = vadd.f32 %v11346_v0, %v8923_v20  ;;  %v8925_v54 = vpop.f32.mrb[15].mxu0 }
 0x5bd   : > { %v13782_v54 = vld [vmem:[%s14072_s26 + $0xd2c] ss:$52 sps:$4 sm:$0xff]  }
 0x5be   : > { %7756 = vmatmul.mubr.bf16.gmra.mrb[248].mxu1 %v13774_v52  ;;  %9135 = vmatmul.mubr.bf16.gmra.mrb[120].mxu0 %v13775_v47  ;;  %v11350_v52 = vadd.f32 %v15300_v3, %v14825_v2  ;;  %v13781_v47 = vld [vmem:[%s14072_s26 + $0xcc0] ss:$52 sps:$4 sm:$0xff]   ;;  %v11352_v2 = vadd.f32 %v15300_v3, %v14830_v7 }
 0x5bf   : > { %7763 = vmatprep.mubr.bf16.mxu1 %v13776_v42  ;;  %9142 = vmatprep.mubr.bf16.mxu0 %v13778_v46  ;;  %v13784_v42 = vld [vmem:[%s14072_s26 + $0x30] ss:$52 sps:$4 sm:$0xff]  }
 0x5c1   : > { %v15366_v11 = vpop.f32.mrb[144].mxu1  ;;  %v8928_v49 = vpop.f32.mrb[16].mxu0 }
 0x5c2   : > { %16348 = vst [vmem:[#allocation25_spill] sm:$0xff] %v15366_v11  ;;  %v7551_v40 = vpop.f32.mrb[145].mxu1  ;;  %v15371_v37 = vadd.f32 %v11348_v57, %v8928_v49  ;;  %v8930_v55 = vpop.f32.mrb[17].mxu0 }
 0x5c3   : > { %v15373_v0 = vpop.f32.mrb[146].mxu1  ;;  %v8931_v20 = vpop.f32.mrb[18].mxu0  ;;  %v13786_v40 = vld [vmem:[%s14072_s26 + $0x98] ss:$52 sps:$4 sm:$0xff]  }
 0x5c4   : > { %16349 = vst [vmem:[#allocation26_spill] sm:$0xff] %v15373_v0  ;;  %v7554_v46 = vpop.f32.mrb[147].mxu1  ;;  %v15380_v11 = vadd.f32 %v11350_v52, %v8931_v20  ;;  %v8933_v62 = vpop.f32.mrb[19].mxu0 }
 0x5c5   : > { %v13787_v62 = vld [vmem:[%s14072_s26 + $0xd94] ss:$52 sps:$4 sm:$0xff]  }
 0x5c6   : > { %7764 = vmatmul.mubr.bf16.gmra.mrb[252].mxu1 %v13780_v32  ;;  %9143 = vmatmul.mubr.bf16.gmra.mrb[124].mxu0 %v13781_v47  ;;  %v11354_v32 = vadd.f32 %v15300_v3, %v14833_v10  ;;  %v13785_v47 = vld [vmem:[%s14072_s26 + $0xd28] ss:$52 sps:$4 sm:$0xff]   ;;  %v11356_v10 = vadd.f32 %v15300_v3, %v14841_v16 }
 0x5c7   : > { %11172 = vmatprep.mubr.bf16.mxu1 %v13784_v42  ;;  %9150 = vmatprep.mubr.bf16.mxu0 %v13782_v54  ;;  %v13789_v42 = vld [vmem:[%s14072_s26 + $0x100] ss:$52 sps:$4 sm:$0xff]  }
 0x5c9   : > { %v15382_v55 = vpop.f32.mrb[148].mxu1  ;;  %v8936_v57 = vpop.f32.mrb[20].mxu0 }
 0x5ca   : > { %16350 = vst [vmem:[#allocation27_spill] sm:$0xff] %v15382_v55  ;;  %v7559_v49 = vpop.f32.mrb[149].mxu1  ;;  %v15387_v46 = vadd.f32 %v11352_v2, %v8936_v57  ;;  %v8938_v0 = vpop.f32.mrb[21].mxu0 }
 0x5cb   : > { %v15389_v52 = vpop.f32.mrb[150].mxu1  ;;  %v8939_v20 = vpop.f32.mrb[22].mxu0  ;;  %v13791_v49 = vld [vmem:[%s14072_s26 + $0x168] ss:$52 sps:$4 sm:$0xff]  }
 0x5cc   : > { %16351 = vst [vmem:[#allocation28_spill] sm:$0xff] %v15389_v52  ;;  %v7562_v54 = vpop.f32.mrb[151].mxu1  ;;  %v15396_v55 = vadd.f32 %v11354_v32, %v8939_v20  ;;  %v8941_v7 = vpop.f32.mrb[23].mxu0 }
 0x5cd   : > { %v13792_v7 = vld [vmem:[%s14072_s26 + $0xdfc] ss:$52 sps:$4 sm:$0xff]  }
 0x5ce   : > { %11173 = vmatmul.mubr.bf16.vlgmr.msra.gmra.mrb[0].mxu1 %v13786_v40  ;;  %9151 = vmatmul.mubr.bf16.gmra.mrb[128].mxu0 %v13785_v47  ;;  %v11358_v40 = vadd.f32 %v15300_v3, %v14845_v19  ;;  %v13790_v47 = vld [vmem:[%s14072_s26 + $0xd90] ss:$52 sps:$4 sm:$0xff]   ;;  %v11360_v19 = vadd.f32 %v15300_v3, %v14850_v24 }
 0x5cf   : > { %11176 = vmatprep.mubr.bf16.mxu1 %v13789_v42  ;;  %9158 = vmatprep.mubr.bf16.mxu0 %v13787_v62  ;;  %v13794_v42 = vld [vmem:[%s14072_s26 + $0x1d0] ss:$52 sps:$4 sm:$0xff]  }
 0x5d1   : > { %v15398_v0 = vpop.f32.mrb[152].mxu1  ;;  %v8944_v2 = vpop.f32.mrb[24].mxu0 }
 0x5d2   : > { %16352 = vst [vmem:[#allocation29_spill] sm:$0xff] %v15398_v0  ;;  %v7567_v57 = vpop.f32.mrb[153].mxu1  ;;  %v15403_v54 = vadd.f32 %v11356_v10, %v8944_v2  ;;  %v8946_v52 = vpop.f32.mrb[25].mxu0 }
 0x5d3   : > { %v15405_v32 = vpop.f32.mrb[154].mxu1  ;;  %v8947_v20 = vpop.f32.mrb[26].mxu0  ;;  %v13796_v57 = vld [vmem:[%s14072_s26 + $0x238] ss:$52 sps:$4 sm:$0xff]  }
 0x5d4   : > { %16353 = vst [vmem:[#allocation30_spill] sm:$0xff] %v15405_v32  ;;  %v7570_v62 = vpop.f32.mrb[155].mxu1  ;;  %v15412_v0 = vadd.f32 %v11358_v40, %v8947_v20  ;;  %v8949_v16 = vpop.f32.mrb[27].mxu0 }
 0x5d5   : > { %v13797_v16 = vld [vmem:[%s14072_s26 + $0xe64] ss:$52 sps:$4 sm:$0xff]  }
 0x5d6   : > { %11177 = vmatmul.mubr.bf16.gmra.mrb[4].mxu1 %v13791_v49  ;;  %9159 = vmatmul.mubr.bf16.gmra.mrb[132].mxu0 %v13790_v47  ;;  %v11362_v49 = vadd.f32 %v15300_v3, %v14853_v27  ;;  %v13795_v47 = vld [vmem:[%s14072_s26 + $0xdf8] ss:$52 sps:$4 sm:$0xff]   ;;  %v11364_v27 = vadd.f32 %v15300_v3, %v14858_v34 }
 0x5d7   : > { %11180 = vmatprep.mubr.bf16.mxu1 %v13794_v42  ;;  %9166 = vmatprep.mubr.bf16.mxu0 %v13792_v7  ;;  %v13799_v42 = vld [vmem:[%s14072_s26 + $0x2a0] ss:$52 sps:$4 sm:$0xff]  }
 0x5d9   : > { %v15414_v52 = vpop.f32.mrb[156].mxu1  ;;  %v8952_v10 = vpop.f32.mrb[28].mxu0 }
 0x5da   : > { %16354 = vst [vmem:[#allocation31_spill] sm:$0xff] %v15414_v52  ;;  %v7575_v2 = vpop.f32.mrb[157].mxu1  ;;  %v15419_v62 = vadd.f32 %v11360_v19, %v8952_v10  ;;  %v8954_v32 = vpop.f32.mrb[29].mxu0 }
 0x5db   : > { %v15421_v40 = vpop.f32.mrb[158].mxu1  ;;  %v8955_v20 = vpop.f32.mrb[30].mxu0  ;;  %v13801_v2 = vld [vmem:[%s14072_s26 + $0x308] ss:$52 sps:$4 sm:$0xff]  }
 0x5dc   : > { %16355 = vst [vmem:[#allocation32_spill] sm:$0xff] %v15421_v40  ;;  %v7578_v7 = vpop.f32.mrb[159].mxu1  ;;  %v15428_v52 = vadd.f32 %v11362_v49, %v8955_v20  ;;  %v8957_v24 = vpop.f32.mrb[31].mxu0 }
 0x5dd   : > { %v13802_v24 = vld [vmem:[%s14072_s26 + $0xecc] ss:$52 sps:$4 sm:$0xff]  }
 0x5de   : > { %11181 = vmatmul.mubr.bf16.gmra.mrb[8].mxu1 %v13796_v57  ;;  %9167 = vmatmul.mubr.bf16.gmra.mrb[136].mxu0 %v13795_v47  ;;  %v11366_v57 = vadd.f32 %v15300_v3, %v14861_v38  ;;  %v13800_v47 = vld [vmem:[%s14072_s26 + $0xe60] ss:$52 sps:$4 sm:$0xff]   ;;  %v11368_v38 = vadd.f32 %v15300_v3, %v14866_v44 }
 0x5df   : > { %11184 = vmatprep.mubr.bf16.mxu1 %v13799_v42  ;;  %9174 = vmatprep.mubr.bf16.mxu0 %v13797_v16  ;;  %v13804_v42 = vld [vmem:[%s14072_s26 + $0x370] ss:$52 sps:$4 sm:$0xff]  }
 0x5e1   : > { %v15430_v32 = vpop.f32.mrb[160].mxu1  ;;  %v8960_v19 = vpop.f32.mrb[32].mxu0 }
 0x5e2   : > { %16356 = vst [vmem:[#allocation33_spill] sm:$0xff] %v15430_v32  ;;  %v7583_v10 = vpop.f32.mrb[161].mxu1  ;;  %v15435_v7 = vadd.f32 %v11364_v27, %v8960_v19  ;;  %v8962_v40 = vpop.f32.mrb[33].mxu0 }
 0x5e3   : > { %v15437_v49 = vpop.f32.mrb[162].mxu1  ;;  %v8963_v20 = vpop.f32.mrb[34].mxu0  ;;  %v13806_v10 = vld [vmem:[%s14072_s26 + $0x3d8] ss:$52 sps:$4 sm:$0xff]  }
 0x5e4   : > { %16357 = vst [vmem:[#allocation34_spill] sm:$0xff] %v15437_v49  ;;  %v7586_v16 = vpop.f32.mrb[163].mxu1  ;;  %v15444_v32 = vadd.f32 %v11366_v57, %v8963_v20  ;;  %v8965_v34 = vpop.f32.mrb[35].mxu0 }
 0x5e5   : > { %v13807_v34 = vld [vmem:[%s14072_s26 + $0xf34] ss:$52 sps:$4 sm:$0xff]  }
 0x5e6   : > { %11185 = vmatmul.mubr.bf16.gmra.mrb[12].mxu1 %v13801_v2  ;;  %9175 = vmatmul.mubr.bf16.gmra.mrb[140].mxu0 %v13800_v47  ;;  %v11370_v2 = vadd.f32 %v15300_v3, %v14869_v48  ;;  %v13805_v47 = vld [vmem:[%s14072_s26 + $0xec8] ss:$52 sps:$4 sm:$0xff]   ;;  %v11372_v48 = vadd.f32 %v15300_v3, %v14877_v56 }
 0x5e7   : > { %11188 = vmatprep.mubr.bf16.mxu1 %v13804_v42  ;;  %9182 = vmatprep.mubr.bf16.mxu0 %v13802_v24  ;;  %v13809_v42 = vld [vmem:[%s14072_s26 + $0x440] ss:$52 sps:$4 sm:$0xff]  }
 0x5e9   : > { %v15446_v40 = vpop.f32.mrb[164].mxu1  ;;  %v8968_v27 = vpop.f32.mrb[36].mxu0 }
 0x5ea   : > { %16358 = vst [vmem:[#allocation35_spill] sm:$0xff] %v15446_v40  ;;  %v7591_v19 = vpop.f32.mrb[165].mxu1  ;;  %v15451_v16 = vadd.f32 %v11368_v38, %v8968_v27  ;;  %v8970_v49 = vpop.f32.mrb[37].mxu0 }
 0x5eb   : > { %v15453_v57 = vpop.f32.mrb[166].mxu1  ;;  %v8971_v20 = vpop.f32.mrb[38].mxu0  ;;  %v13811_v19 = vld [vmem:[%s14072_s26 + $0x4a8] ss:$52 sps:$4 sm:$0xff]  }
 0x5ec   : > { %16359 = vst [vmem:[#allocation36_spill] sm:$0xff] %v15453_v57  ;;  %v7594_v24 = vpop.f32.mrb[167].mxu1  ;;  %v15460_v40 = vadd.f32 %v11370_v2, %v8971_v20  ;;  %v8973_v44 = vpop.f32.mrb[39].mxu0 }
 0x5ed   : > { %v13812_v44 = vld [vmem:[%s14072_s26 + $0xf9c] ss:$52 sps:$4 sm:$0xff]  }
 0x5ee   : > { %11189 = vmatmul.mubr.bf16.gmra.mrb[16].mxu1 %v13806_v10  ;;  %9183 = vmatmul.mubr.bf16.gmra.mrb[144].mxu0 %v13805_v47  ;;  %v11374_v10 = vadd.f32 %v15300_v3, %v14881_v60  ;;  %v13810_v47 = vld [vmem:[%s14072_s26 + $0xf30] ss:$52 sps:$4 sm:$0xff]   ;;  %v11376_v60 = vadd.f32 %v15300_v3, %v14886_v4 }
 0x5ef   : > { %11192 = vmatprep.mubr.bf16.mxu1 %v13809_v42  ;;  %9190 = vmatprep.mubr.bf16.mxu0 %v13807_v34  ;;  %v13814_v42 = vld [vmem:[%s14072_s26 + $0x510] ss:$52 sps:$4 sm:$0xff]  }
 0x5f1   : > { %v15462_v49 = vpop.f32.mrb[168].mxu1  ;;  %v8976_v38 = vpop.f32.mrb[40].mxu0 }
 0x5f2   : > { %16360 = vst [vmem:[#allocation37_spill] sm:$0xff] %v15462_v49  ;;  %v7599_v27 = vpop.f32.mrb[169].mxu1  ;;  %v15467_v24 = vadd.f32 %v11372_v48, %v8976_v38  ;;  %v8978_v57 = vpop.f32.mrb[41].mxu0 }
 0x5f3   : > { %v15469_v2 = vpop.f32.mrb[170].mxu1  ;;  %v8979_v20 = vpop.f32.mrb[42].mxu0  ;;  %v13816_v27 = vld [vmem:[%s14072_s26 + $0x578] ss:$52 sps:$4 sm:$0xff]  }
 0x5f4   : > { %16361 = vst [vmem:[#allocation38_spill] sm:$0xff] %v15469_v2  ;;  %v7602_v34 = vpop.f32.mrb[171].mxu1  ;;  %v15476_v49 = vadd.f32 %v11374_v10, %v8979_v20  ;;  %v8981_v56 = vpop.f32.mrb[43].mxu0 }
 0x5f5   : > { %v13817_v56 = vld [vmem:[%s14072_s26 + $0x1004] ss:$52 sps:$4 sm:$0xff]  }
 0x5f6   : > { %11193 = vmatmul.mubr.bf16.gmra.mrb[20].mxu1 %v13811_v19  ;;  %9191 = vmatmul.mubr.bf16.gmra.mrb[148].mxu0 %v13810_v47  ;;  %v11378_v19 = vadd.f32 %v15300_v3, %v14889_v8  ;;  %v13815_v47 = vld [vmem:[%s14072_s26 + $0xf98] ss:$52 sps:$4 sm:$0xff]   ;;  %v11380_v8 = vadd.f32 %v15300_v3, %v14894_v14 }
 0x5f7   : > { %11196 = vmatprep.mubr.bf16.mxu1 %v13814_v42  ;;  %9198 = vmatprep.mubr.bf16.mxu0 %v13812_v44  ;;  %v13819_v42 = vld [vmem:[%s14072_s26 + $0x5e0] ss:$52 sps:$4 sm:$0xff]  }
 0x5f9   : > { %v15478_v57 = vpop.f32.mrb[172].mxu1  ;;  %v8984_v48 = vpop.f32.mrb[44].mxu0 }
 0x5fa   : > { %16362 = vst [vmem:[#allocation39_spill] sm:$0xff] %v15478_v57  ;;  %v7607_v38 = vpop.f32.mrb[173].mxu1  ;;  %v15483_v34 = vadd.f32 %v11376_v60, %v8984_v48  ;;  %v8986_v2 = vpop.f32.mrb[45].mxu0 }
 0x5fb   : > { %v15485_v10 = vpop.f32.mrb[174].mxu1  ;;  %v8987_v20 = vpop.f32.mrb[46].mxu0  ;;  %v13821_v38 = vld [vmem:[%s14072_s26 + $0x648] ss:$52 sps:$4 sm:$0xff]  }
 0x5fc   : > { %16363 = vst [vmem:[#allocation40_spill] sm:$0xff] %v15485_v10  ;;  %v7610_v44 = vpop.f32.mrb[175].mxu1  ;;  %v15492_v57 = vadd.f32 %v11378_v19, %v8987_v20  ;;  %v8989_v4 = vpop.f32.mrb[47].mxu0 }
 0x5fd   : > { %v13822_v4 = vld [vmem:[%s14072_s26 + $0x106c] ss:$52 sps:$4 sm:$0xff]  }
 0x5fe   : > { %11197 = vmatmul.mubr.bf16.gmra.mrb[24].mxu1 %v13816_v27  ;;  %9199 = vmatmul.mubr.bf16.gmra.mrb[152].mxu0 %v13815_v47  ;;  %v11382_v27 = vadd.f32 %v15300_v3, %v14897_v18  ;;  %v13820_v47 = vld [vmem:[%s14072_s26 + $0x1000] ss:$52 sps:$4 sm:$0xff]   ;;  %v11384_v18 = vadd.f32 %v15300_v3, %v14902_v25 }
 0x5ff   : > { %11200 = vmatprep.mubr.bf16.mxu1 %v13819_v42  ;;  %9206 = vmatprep.mubr.bf16.mxu0 %v13817_v56  ;;  %v13824_v42 = vld [vmem:[%s14072_s26 + $0x6b0] ss:$52 sps:$4 sm:$0xff]  }
 0x601   : > { %v15494_v2 = vpop.f32.mrb[176].mxu1  ;;  %v8992_v60 = vpop.f32.mrb[48].mxu0 }
 0x602   : > { %16364 = vst [vmem:[#allocation41_spill] sm:$0xff] %v15494_v2  ;;  %v7615_v48 = vpop.f32.mrb[177].mxu1  ;;  %v15499_v44 = vadd.f32 %v11380_v8, %v8992_v60  ;;  %v8994_v10 = vpop.f32.mrb[49].mxu0 }
 0x603   : > { %v15501_v19 = vpop.f32.mrb[178].mxu1  ;;  %v8995_v20 = vpop.f32.mrb[50].mxu0  ;;  %v13826_v48 = vld [vmem:[%s14072_s26 + $0x718] ss:$52 sps:$4 sm:$0xff]  }
 0x604   : > { %16365 = vst [vmem:[#allocation42_spill] sm:$0xff] %v15501_v19  ;;  %v7618_v56 = vpop.f32.mrb[179].mxu1  ;;  %v15508_v2 = vadd.f32 %v11382_v27, %v8995_v20  ;;  %v8997_v14 = vpop.f32.mrb[51].mxu0 }
 0x605   : > { %v13827_v14 = vld [vmem:[%s14072_s26 + $0x10d4] ss:$52 sps:$4 sm:$0xff]  }
 0x606   : > { %11201 = vmatmul.mubr.bf16.gmra.mrb[28].mxu1 %v13821_v38  ;;  %9207 = vmatmul.mubr.bf16.gmra.mrb[156].mxu0 %v13820_v47  ;;  %v11386_v38 = vadd.f32 %v15300_v3, %v14905_v30  ;;  %v13825_v47 = vld [vmem:[%s14072_s26 + $0x1068] ss:$52 sps:$4 sm:$0xff]   ;;  %v11388_v30 = vadd.f32 %v15300_v3, %v14913_v41 }
 0x607   : > { %11204 = vmatprep.mubr.bf16.mxu1 %v13824_v42  ;;  %9214 = vmatprep.mubr.bf16.mxu0 %v13822_v4  ;;  %v13829_v42 = vld [vmem:[%s14072_s26 + $0x780] ss:$52 sps:$4 sm:$0xff]  }
 0x609   : > { %v15510_v10 = vpop.f32.mrb[180].mxu1  ;;  %v9000_v8 = vpop.f32.mrb[52].mxu0 }
 0x60a   : > { %16366 = vst [vmem:[#allocation43_spill] sm:$0xff] %v15510_v10  ;;  %v7623_v60 = vpop.f32.mrb[181].mxu1  ;;  %v15515_v56 = vadd.f32 %v11384_v18, %v9000_v8  ;;  %v9002_v19 = vpop.f32.mrb[53].mxu0 }
 0x60b   : > { %v15517_v27 = vpop.f32.mrb[182].mxu1  ;;  %v9003_v20 = vpop.f32.mrb[54].mxu0  ;;  %v13831_v60 = vld [vmem:[%s14072_s26 + $0x7e8] ss:$52 sps:$4 sm:$0xff]  }
 0x60c   : > { %16367 = vst [vmem:[#allocation44_spill] sm:$0xff] %v15517_v27  ;;  %v7626_v4 = vpop.f32.mrb[183].mxu1  ;;  %v15524_v10 = vadd.f32 %v11386_v38, %v9003_v20  ;;  %v9005_v25 = vpop.f32.mrb[55].mxu0 }
 0x60d   : > { %v13832_v25 = vld [vmem:[%s14072_s26 + $0x113c] ss:$52 sps:$4 sm:$0xff]  }
 0x60e   : > { %11205 = vmatmul.mubr.bf16.gmra.mrb[32].mxu1 %v13826_v48  ;;  %9215 = vmatmul.mubr.bf16.gmra.mrb[160].mxu0 %v13825_v47  ;;  %v11390_v48 = vadd.f32 %v15300_v3, %v14917_v45  ;;  %v13830_v47 = vld [vmem:[%s14072_s26 + $0x10d0] ss:$52 sps:$4 sm:$0xff]   ;;  %v11392_v45 = vadd.f32 %v15300_v3, %v14922_v53 }
 0x60f   : > { %11208 = vmatprep.mubr.bf16.mxu1 %v13829_v42  ;;  %9222 = vmatprep.mubr.bf16.mxu0 %v13827_v14  ;;  %v13834_v42 = vld [vmem:[%s14072_s26 + $0x850] ss:$52 sps:$4 sm:$0xff]  }
 0x611   : > { %v15526_v19 = vpop.f32.mrb[184].mxu1  ;;  %v9008_v18 = vpop.f32.mrb[56].mxu0 }
 0x612   : > { %16368 = vst [vmem:[#allocation45_spill] sm:$0xff] %v15526_v19  ;;  %v7631_v8 = vpop.f32.mrb[185].mxu1  ;;  %v15531_v4 = vadd.f32 %v11388_v30, %v9008_v18  ;;  %v9010_v27 = vpop.f32.mrb[57].mxu0 }
 0x613   : > { %v15533_v38 = vpop.f32.mrb[186].mxu1  ;;  %v9011_v20 = vpop.f32.mrb[58].mxu0  ;;  %v13836_v8 = vld [vmem:[%s14072_s26 + $0x8b8] ss:$52 sps:$4 sm:$0xff]  }
 0x614   : > { %16369 = vst [vmem:[#allocation46_spill] sm:$0xff] %v15533_v38  ;;  %v7634_v14 = vpop.f32.mrb[187].mxu1  ;;  %v15540_v19 = vadd.f32 %v11390_v48, %v9011_v20  ;;  %v9013_v41 = vpop.f32.mrb[59].mxu0 }
 0x615   : > { %v13837_v41 = vld [vmem:[%s14072_s26 + $0x11a4] ss:$52 sps:$4 sm:$0xff]  }
 0x616   : > { %11209 = vmatmul.mubr.bf16.gmra.mrb[36].mxu1 %v13831_v60  ;;  %9223 = vmatmul.mubr.bf16.gmra.mrb[164].mxu0 %v13830_v47  ;;  %v11394_v60 = vadd.f32 %v15300_v3, %v14925_v59  ;;  %v13835_v47 = vld [vmem:[%s14072_s26 + $0x1138] ss:$52 sps:$4 sm:$0xff]   ;;  %v11396_v59 = vadd.f32 %v15300_v3, %v15169_v33 }
 0x617   : > { %11212 = vmatprep.mubr.bf16.mxu1 %v13834_v42  ;;  %9230 = vmatprep.mubr.bf16.mxu0 %v13832_v25  ;;  %v13839_v42 = vld [vmem:[%s14072_s26 + $0x920] ss:$52 sps:$4 sm:$0xff]  }
 0x619   : > { %v15542_v27 = vpop.f32.mrb[188].mxu1  ;;  %v9016_v30 = vpop.f32.mrb[60].mxu0 }
 0x61a   : > { %16370 = vst [vmem:[#allocation47_spill] sm:$0xff] %v15542_v27  ;;  %v7639_v18 = vpop.f32.mrb[189].mxu1  ;;  %v15547_v14 = vadd.f32 %v11392_v45, %v9016_v30  ;;  %v9018_v38 = vpop.f32.mrb[61].mxu0 }
 0x61b   : > { %v15549_v48 = vpop.f32.mrb[190].mxu1  ;;  %v9019_v20 = vpop.f32.mrb[62].mxu0  ;;  %v13841_v18 = vld [vmem:[%s14072_s26 + $0x988] ss:$52 sps:$4 sm:$0xff]  }
 0x61c   : > { %16371 = vst [vmem:[#allocation48_spill] sm:$0xff] %v15549_v48  ;;  %v7642_v25 = vpop.f32.mrb[191].mxu1  ;;  %v15556_v27 = vadd.f32 %v11394_v60, %v9019_v20  ;;  %v9021_v53 = vpop.f32.mrb[63].mxu0 }
 0x61d   : > { %v13842_v53 = vld [vmem:[%s14072_s26 + $0x120c] ss:$52 sps:$4 sm:$0xff]  }
 0x61e   : > { %11213 = vmatmul.mubr.bf16.gmra.mrb[40].mxu1 %v13836_v8  ;;  %9231 = vmatmul.mubr.bf16.gmra.mrb[168].mxu0 %v13835_v47  ;;  %v11398_v8 = vadd.f32 %v15300_v3, %v15172_v39  ;;  %v13840_v47 = vld [vmem:[%s14072_s26 + $0x11a0] ss:$52 sps:$4 sm:$0xff]   ;;  %v11400_v39 = vadd.f32 %v15300_v3, %v15177_v51 }
 0x61f   : > { %11216 = vmatprep.mubr.bf16.mxu1 %v13839_v42  ;;  %9238 = vmatprep.mubr.bf16.mxu0 %v13837_v41  ;;  %v13844_v42 = vld [vmem:[%s14072_s26 + $0x9f0] ss:$52 sps:$4 sm:$0xff]  }
 0x621   : > { %v15558_v38 = vpop.f32.mrb[192].mxu1  ;;  %v9024_v45 = vpop.f32.mrb[64].mxu0 }
 0x622   : > { %16372 = vst [vmem:[#allocation49_spill] sm:$0xff] %v15558_v38  ;;  %v7647_v30 = vpop.f32.mrb[193].mxu1  ;;  %v15563_v25 = vadd.f32 %v11396_v59, %v9024_v45  ;;  %v9026_v48 = vpop.f32.mrb[65].mxu0 }
 0x623   : > { %v15565_v60 = vpop.f32.mrb[194].mxu1  ;;  %v9027_v20 = vpop.f32.mrb[66].mxu0  ;;  %v13846_v30 = vld [vmem:[%s14072_s26 + $0xa58] ss:$52 sps:$4 sm:$0xff]  }
 0x624   : > { %16373 = vst [vmem:[#allocation50_spill] sm:$0xff] %v15565_v60  ;;  %v7650_v41 = vpop.f32.mrb[195].mxu1  ;;  %v15572_v38 = vadd.f32 %v11398_v8, %v9027_v20  ;;  %v9029_v33 = vpop.f32.mrb[67].mxu0 }
 0x625   : > { %v13847_v33 = vld [vmem:[%s14072_s26 + $0x1274] ss:$52 sps:$4 sm:$0xff]  }
 0x626   : > { %11217 = vmatmul.mubr.bf16.gmra.mrb[44].mxu1 %v13841_v18  ;;  %9239 = vmatmul.mubr.bf16.gmra.mrb[172].mxu0 %v13840_v47  ;;  %v11402_v18 = vadd.f32 %v15300_v3, %v15180_v61  ;;  %v13845_v47 = vld [vmem:[%s14072_s26 + $0x1208] ss:$52 sps:$4 sm:$0xff]   ;;  %v11404_v61 = vadd.f32 %v15300_v3, %v15185_v6 }
 0x627   : > { %11220 = vmatprep.mubr.bf16.mxu1 %v13844_v42  ;;  %9246 = vmatprep.mubr.bf16.mxu0 %v13842_v53  ;;  %v13849_v42 = vld [vmem:[%s14072_s26 + $0xac0] ss:$52 sps:$4 sm:$0xff]  }
 0x629   : > { %v15574_v48 = vpop.f32.mrb[196].mxu1  ;;  %v9032_v59 = vpop.f32.mrb[68].mxu0 }
 0x62a   : > { %16374 = vst [vmem:[#allocation51_spill] sm:$0xff] %v15574_v48  ;;  %v7655_v45 = vpop.f32.mrb[197].mxu1  ;;  %v15579_v41 = vadd.f32 %v11400_v39, %v9032_v59  ;;  %v9034_v60 = vpop.f32.mrb[69].mxu0 }
 0x62b   : > { %v15581_v8 = vpop.f32.mrb[198].mxu1  ;;  %v9035_v20 = vpop.f32.mrb[70].mxu0  ;;  %v13851_v45 = vld [vmem:[%s14072_s26 + $0xb28] ss:$52 sps:$4 sm:$0xff]  }
 0x62c   : > { %16375 = vst [vmem:[#allocation52_spill] sm:$0xff] %v15581_v8  ;;  %v7658_v53 = vpop.f32.mrb[199].mxu1  ;;  %v15588_v48 = vadd.f32 %v11402_v18, %v9035_v20  ;;  %v9037_v51 = vpop.f32.mrb[71].mxu0 }
 0x62d   : > { %v13852_v51 = vld [vmem:[%s14072_s26 + $0x12dc] ss:$52 sps:$4 sm:$0xff]  }
 0x62e   : > { %11221 = vmatmul.mubr.bf16.gmra.mrb[48].mxu1 %v13846_v30  ;;  %9247 = vmatmul.mubr.bf16.gmra.mrb[176].mxu0 %v13845_v47  ;;  %v11406_v30 = vadd.f32 %v15300_v3, %v15188_v12  ;;  %v13850_v47 = vld [vmem:[%s14072_s26 + $0x1270] ss:$52 sps:$4 sm:$0xff]   ;;  %v11408_v12 = vadd.f32 %v15300_v3, %v15193_v1 }
 0x62f   : > { %11224 = vmatprep.mubr.bf16.mxu1 %v13849_v42  ;;  %9254 = vmatprep.mubr.bf16.mxu0 %v13847_v33  ;;  %v13854_v42 = vld [vmem:[%s14072_s26 + $0xb90] ss:$52 sps:$4 sm:$0xff]  }
 0x631   : > { %v15590_v60 = vpop.f32.mrb[200].mxu1  ;;  %v9040_v39 = vpop.f32.mrb[72].mxu0 }
 0x632   : > { %16376 = vst [vmem:[#allocation53_spill] sm:$0xff] %v15590_v60  ;;  %v7663_v59 = vpop.f32.mrb[201].mxu1  ;;  %v15595_v53 = vadd.f32 %v11404_v61, %v9040_v39  ;;  %v9042_v8 = vpop.f32.mrb[73].mxu0 }
 0x633   : > { %v15597_v18 = vpop.f32.mrb[202].mxu1  ;;  %v9043_v20 = vpop.f32.mrb[74].mxu0  ;;  %v13856_v59 = vld [vmem:[%s14072_s26 + $0xbf8] ss:$52 sps:$4 sm:$0xff]  }
 0x634   : > { %16377 = vst [vmem:[#allocation54_spill] sm:$0xff] %v15597_v18  ;;  %v7666_v33 = vpop.f32.mrb[203].mxu1  ;;  %v15604_v60 = vadd.f32 %v11406_v30, %v9043_v20  ;;  %v9045_v6 = vpop.f32.mrb[75].mxu0 }
 0x635   : > { %v13857_v6 = vld [vmem:[%s14072_s26 + $0x1344] ss:$52 sps:$4 sm:$0xff]  }
 0x636   : > { %11225 = vmatmul.mubr.bf16.gmra.mrb[52].mxu1 %v13851_v45  ;;  %9255 = vmatmul.mubr.bf16.gmra.mrb[180].mxu0 %v13850_v47  ;;  %v11410_v45 = vadd.f32 %v15300_v3, %v15196_v22  ;;  %v13855_v47 = vld [vmem:[%s14072_s26 + $0x12d8] ss:$52 sps:$4 sm:$0xff]   ;;  %v11412_v22 = vadd.f32 %v15300_v3, %v15201_v35 }
 0x637   : > { %11228 = vmatprep.mubr.bf16.mxu1 %v13854_v42  ;;  %9262 = vmatprep.mubr.bf16.mxu0 %v13852_v51  ;;  %v13859_v42 = vld [vmem:[%s14072_s26 + $0xc60] ss:$52 sps:$4 sm:$0xff]  }
 0x639   : > { %v15606_v8 = vpop.f32.mrb[204].mxu1  ;;  %v9048_v61 = vpop.f32.mrb[76].mxu0 }
 0x63a   : > { %16378 = vst [vmem:[#allocation55_spill] sm:$0xff] %v15606_v8  ;;  %v7671_v39 = vpop.f32.mrb[205].mxu1  ;;  %v15611_v33 = vadd.f32 %v11408_v12, %v9048_v61  ;;  %v9050_v18 = vpop.f32.mrb[77].mxu0 }
 0x63b   : > { %v15613_v30 = vpop.f32.mrb[206].mxu1  ;;  %v9051_v20 = vpop.f32.mrb[78].mxu0  ;;  %v13861_v39 = vld [vmem:[%s14072_s26 + $0xcc8] ss:$52 sps:$4 sm:$0xff]  }
 0x63c   : > { %16379 = vst [vmem:[#allocation56_spill] sm:$0xff] %v15613_v30  ;;  %v7674_v51 = vpop.f32.mrb[207].mxu1  ;;  %v15620_v8 = vadd.f32 %v11410_v45, %v9051_v20  ;;  %v9053_v1 = vpop.f32.mrb[79].mxu0 }
 0x63d   : > { %v13862_v1 = vld [vmem:[%s14072_s26 + $0x13ac] ss:$52 sps:$4 sm:$0xff]  }
 0x63e   : > { %11229 = vmatmul.mubr.bf16.gmra.mrb[56].mxu1 %v13856_v59  ;;  %9263 = vmatmul.mubr.bf16.gmra.mrb[184].mxu0 %v13855_v47  ;;  %v11414_v59 = vadd.f32 %v15300_v3, %v15204_v43  ;;  %v13860_v47 = vld [vmem:[%s14072_s26 + $0x1340] ss:$52 sps:$4 sm:$0xff]   ;;  %v11416_v43 = vadd.f32 %v15300_v3, %v15209_v63 }
 0x63f   : > { %11232 = vmatprep.mubr.bf16.mxu1 %v13859_v42  ;;  %9270 = vmatprep.mubr.bf16.mxu0 %v13857_v6  ;;  %v13864_v42 = vld [vmem:[%s14072_s26 + $0xd30] ss:$52 sps:$4 sm:$0xff]  }
 0x641   : > { %v15622_v18 = vpop.f32.mrb[208].mxu1  ;;  %v9056_v12 = vpop.f32.mrb[80].mxu0 }
 0x642   : > { %16380 = vst [vmem:[#allocation57_spill] sm:$0xff] %v15622_v18  ;;  %v7679_v61 = vpop.f32.mrb[209].mxu1  ;;  %v15627_v51 = vadd.f32 %v11412_v22, %v9056_v12  ;;  %v9058_v30 = vpop.f32.mrb[81].mxu0 }
 0x643   : > { %v15629_v45 = vpop.f32.mrb[210].mxu1  ;;  %v9059_v20 = vpop.f32.mrb[82].mxu0  ;;  %v13866_v61 = vld [vmem:[%s14072_s26 + $0xd98] ss:$52 sps:$4 sm:$0xff]  }
 0x644   : > { %16381 = vst [vmem:[#allocation58_spill] sm:$0xff] %v15629_v45  ;;  %v7682_v6 = vpop.f32.mrb[211].mxu1  ;;  %v15636_v18 = vadd.f32 %v11414_v59, %v9059_v20  ;;  %v9061_v35 = vpop.f32.mrb[83].mxu0 }
 0x645   : > { %v13867_v35 = vld [vmem:[%s14072_s26 + $0x1414] ss:$52 sps:$4 sm:$0xff]  }
 0x646   : > { %11233 = vmatmul.mubr.bf16.gmra.mrb[60].mxu1 %v13861_v39  ;;  %9271 = vmatmul.mubr.bf16.gmra.mrb[188].mxu0 %v13860_v47  ;;  %v11418_v39 = vadd.f32 %v15300_v3, %v15212_v5  ;;  %v13865_v47 = vld [vmem:[%s14072_s26 + $0x13a8] ss:$52 sps:$4 sm:$0xff]   ;;  %v11420_v5 = vadd.f32 %v15300_v3, %v15217_v17 }
 0x647   : > { %11236 = vmatprep.mubr.bf16.mxu1 %v13864_v42  ;;  %9278 = vmatprep.mubr.bf16.mxu0 %v13862_v1  ;;  %v13869_v42 = vld [vmem:[%s14072_s26 + $0xe00] ss:$52 sps:$4 sm:$0xff]  }
 0x649   : > { %v15638_v30 = vpop.f32.mrb[212].mxu1  ;;  %v9064_v22 = vpop.f32.mrb[84].mxu0 }
 0x64a   : > { %16382 = vst [vmem:[#allocation59_spill] sm:$0xff] %v15638_v30  ;;  %v7687_v12 = vpop.f32.mrb[213].mxu1  ;;  %v15643_v6 = vadd.f32 %v11416_v43, %v9064_v22  ;;  %v9066_v45 = vpop.f32.mrb[85].mxu0 }
 0x64b   : > { %v15645_v59 = vpop.f32.mrb[214].mxu1  ;;  %v9067_v20 = vpop.f32.mrb[86].mxu0  ;;  %v13871_v12 = vld [vmem:[%s14072_s26 + $0xe68] ss:$52 sps:$4 sm:$0xff]  }
 0x64c   : > { %16383 = vst [vmem:[#allocation60_spill] sm:$0xff] %v15645_v59  ;;  %v7690_v1 = vpop.f32.mrb[215].mxu1  ;;  %v15652_v30 = vadd.f32 %v11418_v39, %v9067_v20  ;;  %v9069_v63 = vpop.f32.mrb[87].mxu0 }
 0x64d   : > { %v13872_v63 = vld [vmem:[%s14072_s26 + $0x147c] ss:$52 sps:$4 sm:$0xff]  }
 0x64e   : > { %11237 = vmatmul.mubr.bf16.gmra.mrb[64].mxu1 %v13866_v61  ;;  %9279 = vmatmul.mubr.bf16.gmra.mrb[192].mxu0 %v13865_v47  ;;  %v11422_v61 = vadd.f32 %v15300_v3, %v15220_v21  ;;  %v13870_v47 = vld [vmem:[%s14072_s26 + $0x1410] ss:$52 sps:$4 sm:$0xff]   ;;  %v11424_v21 = vadd.f32 %v15300_v3, %v15225_v36 }
 0x64f   : > { %11240 = vmatprep.mubr.bf16.mxu1 %v13869_v42  ;;  %9286 = vmatprep.mubr.bf16.mxu0 %v13867_v35  ;;  %v13874_v42 = vld [vmem:[%s14072_s26 + $0xed0] ss:$52 sps:$4 sm:$0xff]  }
 0x651   : > { %v15654_v45 = vpop.f32.mrb[216].mxu1  ;;  %v9072_v43 = vpop.f32.mrb[88].mxu0 }
 0x652   : > { %16384 = vst [vmem:[#allocation61_spill] sm:$0xff] %v15654_v45  ;;  %v7695_v22 = vpop.f32.mrb[217].mxu1  ;;  %v15659_v1 = vadd.f32 %v11420_v5, %v9072_v43  ;;  %v9074_v59 = vpop.f32.mrb[89].mxu0 }
 0x653   : > { %v15661_v39 = vpop.f32.mrb[218].mxu1  ;;  %v9075_v20 = vpop.f32.mrb[90].mxu0  ;;  %v13876_v22 = vld [vmem:[%s14072_s26 + $0xf38] ss:$52 sps:$4 sm:$0xff]  }
 0x654   : > { %16385 = vst [vmem:[#allocation62_spill] sm:$0xff] %v15661_v39  ;;  %v7698_v35 = vpop.f32.mrb[219].mxu1  ;;  %v15668_v45 = vadd.f32 %v11422_v61, %v9075_v20  ;;  %v9077_v17 = vpop.f32.mrb[91].mxu0 }
 0x655   : > { %v13877_v17 = vld [vmem:[%s14072_s26 + $0x14e4] ss:$52 sps:$4 sm:$0xff]  }
 0x656   : > { %16386 = vst [vmem:[#allocation63_spill] sm:$0xff] %v15668_v45  ;;  %11241 = vmatmul.mubr.bf16.gmra.mrb[68].mxu1 %v13871_v12  ;;  %9287 = vmatmul.mubr.bf16.gmra.mrb[196].mxu0 %v13870_v47  ;;  %v11426_v12 = vadd.f32 %v15300_v3, %v15228_v50  ;;  %v13875_v47 = vld [vmem:[%s14072_s26 + $0x1478] ss:$52 sps:$4 sm:$0xff]   ;;  %v11428_v50 = vadd.f32 %v15300_v3, %v15233_v9 }
 0x657   : > { %11244 = vmatprep.mubr.bf16.mxu1 %v13874_v42  ;;  %9294 = vmatprep.mubr.bf16.mxu0 %v13872_v63  ;;  %v13879_v42 = vld [vmem:[%s14072_s26 + $0xfa0] ss:$52 sps:$4 sm:$0xff]  }
 0x659   : > { %v15670_v59 = vpop.f32.mrb[220].mxu1  ;;  %v9080_v5 = vpop.f32.mrb[92].mxu0 }
 0x65a   : > { %16387 = vst [vmem:[#allocation64_spill] sm:$0xff] %v15670_v59  ;;  %v7703_v43 = vpop.f32.mrb[221].mxu1  ;;  %v15675_v35 = vadd.f32 %v11424_v21, %v9080_v5  ;;  %v9082_v39 = vpop.f32.mrb[93].mxu0 }
 0x65b   : > { %v15677_v61 = vpop.f32.mrb[222].mxu1  ;;  %v9083_v20 = vpop.f32.mrb[94].mxu0  ;;  %v13881_v43 = vld [vmem:[%s14072_s26 + $0x1008] ss:$52 sps:$4 sm:$0xff]  }
 0x65c   : > { %16388 = vst [vmem:[#allocation65_spill] sm:$0xff] %v15677_v61  ;;  %v7706_v63 = vpop.f32.mrb[223].mxu1  ;;  %v15684_v59 = vadd.f32 %v11426_v12, %v9083_v20  ;;  %v9085_v36 = vpop.f32.mrb[95].mxu0  ;;  %v16393_v20 = vld [vmem:[#allocation2_spill] sm:$0xff] }
 0x65e   : > { %16389 = vst [vmem:[#allocation66_spill] sm:$0xff] %v15684_v59  ;;  %11245 = vmatmul.mubr.bf16.gmra.mrb[72].mxu1 %v13876_v22  ;;  %9295 = vmatmul.mubr.bf16.gmra.mrb[200].mxu0 %v13875_v47  ;;  %v11430_v22 = vadd.f32 %v15300_v3, %v16393_v20  ;;  %v13880_v47 = vld [vmem:[%s14072_s26 + $0x14e0] ss:$52 sps:$4 sm:$0xff]  }
 0x65f   : > { %11248 = vmatprep.mubr.bf16.mxu1 %v13879_v42  ;;  %9302 = vmatprep.mubr.bf16.mxu0 %v13877_v17  ;;  %v13884_v42 = vld [vmem:[%s14072_s26 + $0x1070] ss:$52 sps:$4 sm:$0xff]  }
 0x661   : > { %v15686_v39 = vpop.f32.mrb[224].mxu1  ;;  %v9088_v21 = vpop.f32.mrb[96].mxu0 }
 0x662   : > { %16390 = vst [vmem:[#allocation67_spill] sm:$0xff] %v15686_v39  ;;  %v7711_v5 = vpop.f32.mrb[225].mxu1  ;;  %v15691_v63 = vadd.f32 %v11428_v50, %v9088_v21  ;;  %v9090_v61 = vpop.f32.mrb[97].mxu0  ;;  %v13882_v39 = vld [vmem:[%s14072_s26 + $0x154c] ss:$52 sps:$4 sm:$0xff]  }
 0x663   : > { %v15693_v12 = vpop.f32.mrb[226].mxu1  ;;  %v9091_v17 = vpop.f32.mrb[98].mxu0  ;;  %v16396_v50 = vld [vmem:[#allocation3_spill] sm:$0xff] }
 0x664   : > { %16391 = vst [vmem:[#allocation68_spill] sm:$0xff] %v15691_v63  ;;  %16392 = vst [vmem:[#allocation69_spill] sm:$0xff] %v15693_v12  ;;  %v7714_v36 = vpop.f32.mrb[227].mxu1  ;;  %v15700_v45 = vadd.f32 %v11430_v22, %v9091_v17  ;;  %v9093_v9 = vpop.f32.mrb[99].mxu0  ;;  %v11432_v21 = vadd.f32 %v15300_v3, %v16396_v50  ;;  %v13886_v12 = vld [vmem:[%s14072_s26 + $0x10d8] ss:$52 sps:$4 sm:$0xff]  }
 0x665   : > { %v13889_v9 = vld [vmem:[%s14072_s26 + $0x1140] ss:$52 sps:$4 sm:$0xff]   ;;  %v13891_v63 = vld [vmem:[%s14072_s26 + $0x11a8] ss:$52 sps:$4 sm:$0xff]  }
 0x666   : > { %16394 = vst [vmem:[#allocation2_spill] sm:$0xff] %v15700_v45  ;;  %11249 = vmatmul.mubr.bf16.gmra.mrb[76].mxu1 %v13881_v43  ;;  %9303 = vmatmul.mubr.bf16.gmra.mrb[204].mxu0 %v13880_v47  ;;  %v15714_v43 = vld [vmem:[%s16323_s2] ss:$0 sm:$0xff]  ;;  %v16399_v47 = vld [vmem:[#allocation4_spill] sm:$0xff] }
 0x667   : > { %11252 = vmatprep.mubr.bf16.mxu1 %v13884_v42  ;;  %9310 = vmatprep.mubr.bf16.mxu0 %v13882_v39  ;;  %v11434_v39 = vadd.f32 %v15714_v43, %v16399_v47  ;;  %v13885_v42 = vld [vmem:[%s14072_s26 + $0x1548] ss:$52 sps:$4 sm:$0xff]  }
 0x669   : > { %v15702_v61 = vpop.f32.mrb[228].mxu1  ;;  %v9096_v5 = vpop.f32.mrb[100].mxu0 }
 0x66a   : > { %16395 = vst [vmem:[#allocation70_spill] sm:$0xff] %v15702_v61  ;;  %v7719_v20 = vpop.f32.mrb[229].mxu1  ;;  %v15707_v36 = vadd.f32 %v11432_v21, %v9096_v5  ;;  %v9098_v22 = vpop.f32.mrb[101].mxu0 }
 0x66b   : > { %v15709_v17 = vpop.f32.mrb[230].mxu1  ;;  %v9099_v3 = vpop.f32.mrb[102].mxu0  ;;  %v13887_v20 = vld [vmem:[%s14072_s26 + $0x15b4] ss:$52 sps:$4 sm:$0xff]  }
 0x66c   : > { %16397 = vst [vmem:[#allocation3_spill] sm:$0xff] %v15707_v36  ;;  %16398 = vst [vmem:[#allocation71_spill] sm:$0xff] %v15709_v17  ;;  %v7722_v50 = vpop.f32.mrb[231].mxu1  ;;  %v15721_v21 = vadd.f32 %v11434_v39, %v9099_v3  ;;  %v9101_v5 = vpop.f32.mrb[103].mxu0  ;;  %v16402_v17 = vld [vmem:[#allocation5_spill] sm:$0xff]  ;;  %v16405_v3 = vld [vmem:[#allocation6_spill] sm:$0xff] }
 0x66d   : > { %v11436_v47 = vadd.f32 %v15714_v43, %v16402_v17 }
 0x66e   : > { %16400 = vst [vmem:[#allocation4_spill] sm:$0xff] %v15721_v21  ;;  %11253 = vmatmul.mubr.bf16.gmra.mrb[80].mxu1 %v13886_v12  ;;  %9311 = vmatmul.mubr.bf16.gmra.mrb[208].mxu0 %v13885_v42  ;;  %v11438_v12 = vadd.f32 %v15714_v43, %v16405_v3  ;;  %v13890_v42 = vld [vmem:[%s14072_s26 + $0x15b0] ss:$52 sps:$4 sm:$0xff]  }
 0x66f   : > { %11256 = vmatprep.mubr.bf16.mxu1 %v13889_v9  ;;  %9318 = vmatprep.mubr.bf16.mxu0 %v13887_v20  ;;  %v13894_v9 = vld [vmem:[%s14072_s26 + $0x1210] ss:$52 sps:$4 sm:$0xff]  }
 0x671   : > { %v15723_v22 = vpop.f32.mrb[232].mxu1  ;;  %v9104_v61 = vpop.f32.mrb[104].mxu0 }
 0x672   : > { %16401 = vst [vmem:[#allocation72_spill] sm:$0xff] %v15723_v22  ;;  %v7727_v45 = vpop.f32.mrb[233].mxu1  ;;  %v15728_v50 = vadd.f32 %v11436_v47, %v9104_v61  ;;  %v9106_v36 = vpop.f32.mrb[105].mxu0  ;;  %v13892_v22 = vld [vmem:[%s14072_s26 + $0x161c] ss:$52 sps:$4 sm:$0xff]  }
 0x673   : > { %v15730_v39 = vpop.f32.mrb[234].mxu1  ;;  %v9107_v20 = vpop.f32.mrb[106].mxu0  ;;  %v16408_v36 = vld [vmem:[#allocation7_spill] sm:$0xff] }
 0x674   : > { %16403 = vst [vmem:[#allocation5_spill] sm:$0xff] %v15728_v50  ;;  %16404 = vst [vmem:[#allocation73_spill] sm:$0xff] %v15730_v39  ;;  %v7730_v5 = vpop.f32.mrb[235].mxu1  ;;  %v15737_v21 = vadd.f32 %v11438_v12, %v9107_v20  ;;  %v9109_v45 = vpop.f32.mrb[107].mxu0  ;;  %v11440_v17 = vadd.f32 %v15714_v43, %v16408_v36  ;;  %v13896_v39 = vld [vmem:[%s14072_s26 + $0x1278] ss:$52 sps:$4 sm:$0xff]  }
 0x675   : > { %v16411_v20 = vld [vmem:[#allocation8_spill] sm:$0xff] }
 0x676   : > { %16406 = vst [vmem:[#allocation6_spill] sm:$0xff] %v15737_v21  ;;  %11257 = vmatmul.mubr.bf16.gmra.mrb[84].mxu1 %v13891_v63  ;;  %9319 = vmatmul.mubr.bf16.gmra.mrb[212].mxu0 %v13890_v42  ;;  %v11442_v63 = vadd.f32 %v15714_v43, %v16411_v20  ;;  %v13895_v42 = vld [vmem:[%s14072_s26 + $0x1618] ss:$52 sps:$4 sm:$0xff]  }
 0x677   : > { %11260 = vmatprep.mubr.bf16.mxu1 %v13894_v9  ;;  %9326 = vmatprep.mubr.bf16.mxu0 %v13892_v22  ;;  %v13899_v9 = vld [vmem:[%s14072_s26 + $0x12e0] ss:$52 sps:$4 sm:$0xff]  }
 0x679   : > { %v15739_v61 = vpop.f32.mrb[236].mxu1  ;;  %v9112_v47 = vpop.f32.mrb[108].mxu0 }
 0x67a   : > { %16407 = vst [vmem:[#allocation74_spill] sm:$0xff] %v15739_v61  ;;  %v7735_v3 = vpop.f32.mrb[237].mxu1  ;;  %v15744_v5 = vadd.f32 %v11440_v17, %v9112_v47  ;;  %v9114_v50 = vpop.f32.mrb[109].mxu0  ;;  %v13897_v61 = vld [vmem:[%s14072_s26 + $0x1684] ss:$52 sps:$4 sm:$0xff]  }
 0x67b   : > { %v15746_v12 = vpop.f32.mrb[238].mxu1  ;;  %v9115_v22 = vpop.f32.mrb[110].mxu0  ;;  %v16414_v17 = vld [vmem:[#allocation9_spill] sm:$0xff] }
 0x67c   : > { %16409 = vst [vmem:[#allocation7_spill] sm:$0xff] %v15744_v5  ;;  %16410 = vst [vmem:[#allocation75_spill] sm:$0xff] %v15746_v12  ;;  %v7738_v45 = vpop.f32.mrb[239].mxu1  ;;  %v15753_v21 = vadd.f32 %v11442_v63, %v9115_v22  ;;  %v9117_v36 = vpop.f32.mrb[111].mxu0  ;;  %v11444_v47 = vadd.f32 %v15714_v43, %v16414_v17  ;;  %v13901_v12 = vld [vmem:[%s14072_s26 + $0x1348] ss:$52 sps:$4 sm:$0xff]  }
 0x67d   : > { %v16417_v22 = vld [vmem:[#allocation10_spill] sm:$0xff] }
 0x67e   : > { %16412 = vst [vmem:[#allocation8_spill] sm:$0xff] %v15753_v21  ;;  %11261 = vmatmul.mubr.bf16.gmra.mrb[88].mxu1 %v13896_v39  ;;  %9327 = vmatmul.mubr.bf16.gmra.mrb[216].mxu0 %v13895_v42  ;;  %v11446_v39 = vadd.f32 %v15714_v43, %v16417_v22  ;;  %v13900_v42 = vld [vmem:[%s14072_s26 + $0x1680] ss:$52 sps:$4 sm:$0xff]  }
 0x67f   : > { %11264 = vmatprep.mubr.bf16.mxu1 %v13899_v9  ;;  %9334 = vmatprep.mubr.bf16.mxu0 %v13897_v61  ;;  %v13904_v9 = vld [vmem:[%s14072_s26 + $0x13b0] ss:$52 sps:$4 sm:$0xff]  }
 0x681   : > { %v15755_v50 = vpop.f32.mrb[240].mxu1  ;;  %v9120_v3 = vpop.f32.mrb[112].mxu0 }
 0x682   : > { %16413 = vst [vmem:[#allocation76_spill] sm:$0xff] %v15755_v50  ;;  %v7743_v20 = vpop.f32.mrb[241].mxu1  ;;  %v15760_v45 = vadd.f32 %v11444_v47, %v9120_v3  ;;  %v9122_v5 = vpop.f32.mrb[113].mxu0  ;;  %v13902_v50 = vld [vmem:[%s14072_s26 + $0x16ec] ss:$52 sps:$4 sm:$0xff]  }
 0x683   : > { %v15762_v63 = vpop.f32.mrb[242].mxu1  ;;  %v9123_v61 = vpop.f32.mrb[114].mxu0  ;;  %v16420_v47 = vld [vmem:[#allocation11_spill] sm:$0xff] }
 0x684   : > { %16415 = vst [vmem:[#allocation9_spill] sm:$0xff] %v15760_v45  ;;  %16416 = vst [vmem:[#allocation77_spill] sm:$0xff] %v15762_v63  ;;  %v7746_v36 = vpop.f32.mrb[243].mxu1  ;;  %v15769_v21 = vadd.f32 %v11446_v39, %v9123_v61  ;;  %v9125_v17 = vpop.f32.mrb[115].mxu0  ;;  %v11448_v3 = vadd.f32 %v15714_v43, %v16420_v47  ;;  %v13906_v63 = vld [vmem:[%s14072_s26 + $0x1418] ss:$52 sps:$4 sm:$0xff]  }
 0x685   : > { %v16423_v61 = vld [vmem:[#allocation12_spill] sm:$0xff] }
 0x686   : > { %16418 = vst [vmem:[#allocation10_spill] sm:$0xff] %v15769_v21  ;;  %11265 = vmatmul.mubr.bf16.gmra.mrb[92].mxu1 %v13901_v12  ;;  %9335 = vmatmul.mubr.bf16.gmra.mrb[220].mxu0 %v13900_v42  ;;  %v11450_v12 = vadd.f32 %v15714_v43, %v16423_v61  ;;  %v13905_v42 = vld [vmem:[%s14072_s26 + $0x16e8] ss:$52 sps:$4 sm:$0xff]  }
 0x687   : > { %11268 = vmatprep.mubr.bf16.mxu1 %v13904_v9  ;;  %9342 = vmatprep.mubr.bf16.mxu0 %v13902_v50  ;;  %v13909_v9 = vld [vmem:[%s14072_s26 + $0x1480] ss:$52 sps:$4 sm:$0xff]  }
 0x689   : > { %v15771_v5 = vpop.f32.mrb[244].mxu1  ;;  %v9128_v20 = vpop.f32.mrb[116].mxu0 }
 0x68a   : > { %16419 = vst [vmem:[#allocation78_spill] sm:$0xff] %v15771_v5  ;;  %v7751_v22 = vpop.f32.mrb[245].mxu1  ;;  %v15776_v36 = vadd.f32 %v11448_v3, %v9128_v20  ;;  %v9130_v45 = vpop.f32.mrb[117].mxu0  ;;  %v13907_v5 = vld [vmem:[%s14072_s26 + $0x1754] ss:$52 sps:$4 sm:$0xff]   ;;  %v16426_v3 = vld [vmem:[#allocation13_spill] sm:$0xff] }
 0x68b   : > { %v15778_v39 = vpop.f32.mrb[246].mxu1  ;;  %v9131_v50 = vpop.f32.mrb[118].mxu0  ;;  %v11452_v20 = vadd.f32 %v15714_v43, %v16426_v3 }
 0x68c   : > { %16421 = vst [vmem:[#allocation11_spill] sm:$0xff] %v15776_v36  ;;  %16422 = vst [vmem:[#allocation79_spill] sm:$0xff] %v15778_v39  ;;  %v7754_v17 = vpop.f32.mrb[247].mxu1  ;;  %v15785_v21 = vadd.f32 %v11450_v12, %v9131_v50  ;;  %v9133_v47 = vpop.f32.mrb[119].mxu0  ;;  %v13911_v39 = vld [vmem:[%s14072_s26 + $0x14e8] ss:$52 sps:$4 sm:$0xff]  }
 0x68d   : > { %v16429_v50 = vld [vmem:[#allocation14_spill] sm:$0xff] }
 0x68e   : > { %16424 = vst [vmem:[#allocation12_spill] sm:$0xff] %v15785_v21  ;;  %11269 = vmatmul.mubr.bf16.gmra.mrb[96].mxu1 %v13906_v63  ;;  %9343 = vmatmul.mubr.bf16.gmra.mrb[224].mxu0 %v13905_v42  ;;  %v11454_v63 = vadd.f32 %v15714_v43, %v16429_v50  ;;  %v13910_v42 = vld [vmem:[%s14072_s26 + $0x1750] ss:$52 sps:$4 sm:$0xff]  }
 0x68f   : > { %11272 = vmatprep.mubr.bf16.mxu1 %v13909_v9  ;;  %9350 = vmatprep.mubr.bf16.mxu0 %v13907_v5  ;;  %v13914_v9 = vld [vmem:[%s14072_s26 + $0x1550] ss:$52 sps:$4 sm:$0xff]  }
 0x691   : > { %v15787_v45 = vpop.f32.mrb[248].mxu1  ;;  %v9136_v22 = vpop.f32.mrb[120].mxu0 }
 0x692   : > { %16425 = vst [vmem:[#allocation80_spill] sm:$0xff] %v15787_v45  ;;  %v7759_v61 = vpop.f32.mrb[249].mxu1  ;;  %v15792_v17 = vadd.f32 %v11452_v20, %v9136_v22  ;;  %v9138_v36 = vpop.f32.mrb[121].mxu0  ;;  %v13912_v45 = vld [vmem:[%s14072_s26 + $0x17bc] ss:$52 sps:$4 sm:$0xff]   ;;  %v16432_v20 = vld [vmem:[#allocation15_spill] sm:$0xff] }
 0x693   : > { %v15794_v12 = vpop.f32.mrb[250].mxu1  ;;  %v9139_v5 = vpop.f32.mrb[122].mxu0  ;;  %v11456_v22 = vadd.f32 %v15714_v43, %v16432_v20 }
 0x694   : > { %16427 = vst [vmem:[#allocation13_spill] sm:$0xff] %v15792_v17  ;;  %16428 = vst [vmem:[#allocation81_spill] sm:$0xff] %v15794_v12  ;;  %v7762_v47 = vpop.f32.mrb[251].mxu1  ;;  %v15801_v21 = vadd.f32 %v11454_v63, %v9139_v5  ;;  %v9141_v3 = vpop.f32.mrb[123].mxu0 }
 0x695   : > { %v13916_v47 = vld [vmem:[%s14072_s26 + $0x15b8] ss:$52 sps:$4 sm:$0xff]   ;;  %v16435_v3 = vld [vmem:[#allocation16_spill] sm:$0xff] }
 0x696   : > { %16430 = vst [vmem:[#allocation14_spill] sm:$0xff] %v15801_v21  ;;  %11273 = vmatmul.mubr.bf16.gmra.mrb[100].mxu1 %v13911_v39  ;;  %9351 = vmatmul.mubr.bf16.gmra.mrb[228].mxu0 %v13910_v42  ;;  %v11458_v39 = vadd.f32 %v15714_v43, %v16435_v3  ;;  %v13915_v42 = vld [vmem:[%s14072_s26 + $0x17b8] ss:$52 sps:$4 sm:$0xff]   ;;  %v13921_v3 = vld [vmem:[%s14072_s26 + $0x1688] ss:$52 sps:$4 sm:$0xff]  }
 0x697   : > { %11276 = vmatprep.mubr.bf16.mxu1 %v13914_v9  ;;  %9358 = vmatprep.mubr.bf16.mxu0 %v13912_v45  ;;  %v13919_v9 = vld [vmem:[%s14072_s26 + $0x1620] ss:$52 sps:$4 sm:$0xff]   ;;  %v13917_v21 = vld [vmem:[%s14072_s26 + $0x1824] ss:$52 sps:$4 sm:$0xff]  }
 0x699   : > { %v15803_v36 = vpop.f32.mrb[252].mxu1  ;;  %v9144_v61 = vpop.f32.mrb[124].mxu0 }
 0x69a   : > { %16431 = vst [vmem:[#allocation82_spill] sm:$0xff] %v15803_v36  ;;  %v7767_v50 = vpop.f32.mrb[253].mxu1  ;;  %v15808_v12 = vadd.f32 %v11456_v22, %v9144_v61  ;;  %v9146_v63 = vpop.f32.mrb[125].mxu0  ;;  %v16437_v22 = vld [vmem:[#allocation17_spill] sm:$0xff] }
 0x69b   : > { %v15810_v5 = vpop.f32.mrb[254].mxu1  ;;  %v9147_v45 = vpop.f32.mrb[126].mxu0  ;;  %v11460_v61 = vadd.f32 %v15714_v43, %v16437_v22  ;;  %v13920_v22 = vld [vmem:[%s14072_s26 + $0x1820] ss:$52 sps:$4 sm:$0xff]  }
 0x69c   : > { %16433 = vst [vmem:[#allocation15_spill] sm:$0xff] %v15808_v12  ;;  %16434 = vst [vmem:[#allocation83_spill] sm:$0xff] %v15810_v5  ;;  %v7770_v36 = vpop.f32.mrb[255].mxu1  ;;  %v15817_v17 = vadd.f32 %v11458_v39, %v9147_v45  ;;  %v9149_v20 = vpop.f32.mrb[127].mxu0  ;;  %v13924_v5 = vld [vmem:[%s14072_s26 + $0x16f0] ss:$52 sps:$4 sm:$0xff]  }
 0x69e   : > { %16436 = vst [vmem:[#allocation16_spill] sm:$0xff] %v15817_v17  ;;  %11277 = vmatmul.mubr.bf16.gmra.mrb[104].mxu1 %v13916_v47  ;;  %9359 = vmatmul.mubr.bf16.gmra.mrb[232].mxu0 %v13915_v42 }
 0x69f   : > { %11280 = vmatprep.mubr.bf16.mxu1 %v13919_v9  ;;  %9366 = vmatprep.mubr.bf16.mxu0 %v13917_v21  ;;  %v11462_v21 = vadd.f32 %v15714_v43, %v15309_v13  ;;  %v16438_v9 = vld [vmem:[#allocation18_spill] sm:$0xff] }
 0x6a1   : > { %v11174_v36 = vpop.f32.mrb[0].mxu1  ;;  %v9152_v50 = vpop.f32.mrb[128].mxu0 }
 0x6a2   : > { %v9450_v47 = vadd.f32 %v15323_v28, %v11174_v36  ;;  %v9441_v63 = vpop.f32.mrb[1].mxu1  ;;  %v15831_v39 = vadd.f32 %v11460_v61, %v9152_v50  ;;  %v9154_v42 = vpop.f32.mrb[129].mxu0  ;;  %v13922_v36 = vld [vmem:[%s14072_s26 + $0x188c] ss:$52 sps:$4 sm:$0xff]  }
 0x6a3   : > { %v9442_v45 = vadd.f32 %v16438_v9, %v9441_v63  ;;  %v11175_v20 = vpop.f32.mrb[2].mxu1  ;;  %v9155_v17 = vpop.f32.mrb[130].mxu0  ;;  %v16439_v50 = vld [vmem:[#allocation19_spill] sm:$0xff] }
 0x6a4   : > { %9954 = vst [vmem:[%s15825_s23 + $0x10] sm:$0xff] %v9450_v47  ;;  %v9453_v12 = vadd.f32 %v15332_v23, %v11175_v20  ;;  %v9444_v28 = vpop.f32.mrb[3].mxu1  ;;  %v15840_v59 = vadd.f32 %v11462_v21, %v9155_v17  ;;  %v9157_v13 = vpop.f32.mrb[131].mxu0  ;;  %v11464_v23 = vadd.f32 %v15714_v43, %v16439_v50  ;;  %v13925_v20 = vld [vmem:[%s14072_s26 + $0x1888] ss:$52 sps:$4 sm:$0xff]  }
 0x6a5   : > { %9952 = vst [vmem:[%s15825_s23] sm:$0xff] %v9442_v45  ;;  %v9445_v61 = vadd.f32 %v15316_v15, %v9444_v28  ;;  %v13926_v15 = vld [vmem:[%s14072_s26 + $0x1758] ss:$52 sps:$4 sm:$0xff]   ;;  %v13927_v13 = vld [vmem:[%s14072_s26 + $0x18f4] ss:$52 sps:$4 sm:$0xff]  }
 0x6a6   : > { %9955 = vst [vmem:[%s15825_s23 + $0x18] sm:$0xff] %v9453_v12  ;;  %11281 = vmatmul.mubr.bf16.gmra.mrb[108].mxu1 %v13921_v3  ;;  %9367 = vmatmul.mubr.bf16.gmra.mrb[236].mxu0 %v13920_v22  ;;  %v16440_v12 = vld [vmem:[#allocation20_spill] sm:$0xff] }
 0x6a7   : > { %9953 = vst [vmem:[%s15825_s23 + $0x8] sm:$0xff] %v9445_v61  ;;  %11284 = vmatprep.mubr.bf16.mxu1 %v13924_v5  ;;  %9374 = vmatprep.mubr.bf16.mxu0 %v13922_v36  ;;  %v11466_v3 = vadd.f32 %v15714_v43, %v16440_v12  ;;  %v13929_v22 = vld [vmem:[%s14072_s26 + $0x17c0] ss:$52 sps:$4 sm:$0xff]  }
 0x6a8   : > { %v16442_v12 = vld [vmem:[#allocation22_spill] sm:$0xff] }
 0x6a9   : > { %v11178_v47 = vpop.f32.mrb[4].mxu1  ;;  %v9160_v63 = vpop.f32.mrb[132].mxu0 }
 0x6aa   : > { %v9466_v17 = vadd.f32 %v15355_v29, %v11178_v47  ;;  %v9457_v21 = vpop.f32.mrb[5].mxu1  ;;  %v15851_v42 = vadd.f32 %v11464_v23, %v9160_v63  ;;  %v9162_v9 = vpop.f32.mrb[133].mxu0 }
 0x6ab   : > { %v9458_v5 = vadd.f32 %v15339_v31, %v9457_v21  ;;  %v11179_v45 = vpop.f32.mrb[6].mxu1  ;;  %v9163_v28 = vpop.f32.mrb[134].mxu0  ;;  %v16441_v31 = vld [vmem:[#allocation21_spill] sm:$0xff] }
 0x6ac   : > { %9958 = vst [vmem:[%s15825_s23 + $0x30] sm:$0xff] %v9466_v17  ;;  %v9469_v36 = vadd.f32 %v15364_v26, %v11179_v45  ;;  %v9460_v29 = vpop.f32.mrb[7].mxu1  ;;  %v15860_v61 = vadd.f32 %v11466_v3, %v9163_v28  ;;  %v9165_v50 = vpop.f32.mrb[135].mxu0  ;;  %v11468_v26 = vadd.f32 %v15714_v43, %v16441_v31 }
 0x6ad   : > { %9956 = vst [vmem:[%s15825_s23 + $0x20] sm:$0xff] %v9458_v5  ;;  %v9461_v23 = vadd.f32 %v15348_v58, %v9460_v29  ;;  %v13931_v58 = vld [vmem:[%s14072_s26 + $0x1828] ss:$52 sps:$4 sm:$0xff]  }
 0x6ae   : > { %9959 = vst [vmem:[%s15825_s23 + $0x38] sm:$0xff] %v9469_v36  ;;  %11285 = vmatmul.mubr.bf16.gmra.mrb[112].mxu1 %v13926_v15  ;;  %9375 = vmatmul.mubr.bf16.gmra.mrb[240].mxu0 %v13925_v20  ;;  %v11470_v15 = vadd.f32 %v15714_v43, %v16442_v12  ;;  %v13930_v20 = vld [vmem:[%s14072_s26 + $0x18f0] ss:$52 sps:$4 sm:$0xff]  }
 0x6af   : > { %9957 = vst [vmem:[%s15825_s23 + $0x28] sm:$0xff] %v9461_v23  ;;  %11288 = vmatprep.mubr.bf16.mxu1 %v13929_v22  ;;  %9382 = vmatprep.mubr.bf16.mxu0 %v13927_v13  ;;  %v13934_v22 = vld [vmem:[%s14072_s26 + $0x1890] ss:$52 sps:$4 sm:$0xff]  }
 0x6b0   : > { %v13932_v29 = vld [vmem:[%s14072_s26 + $0x195c] ss:$52 sps:$4 sm:$0xff]  }
 0x6b1   : > { %v11182_v47 = vpop.f32.mrb[8].mxu1  ;;  %v9168_v63 = vpop.f32.mrb[136].mxu0 }
 0x6b2   : > { %v9482_v17 = vadd.f32 %v15387_v46, %v11182_v47  ;;  %v9473_v21 = vpop.f32.mrb[9].mxu1  ;;  %v15871_v3 = vadd.f32 %v11468_v26, %v9168_v63  ;;  %v9170_v9 = vpop.f32.mrb[137].mxu0 }
 0x6b3   : > { %v9474_v5 = vadd.f32 %v15371_v37, %v9473_v21  ;;  %v11183_v45 = vpop.f32.mrb[10].mxu1  ;;  %v9171_v28 = vpop.f32.mrb[138].mxu0  ;;  %v16443_v37 = vld [vmem:[#allocation23_spill] sm:$0xff] }
 0x6b4   : > { %9962 = vst [vmem:[%s15825_s23 + $0x50] sm:$0xff] %v9482_v17  ;;  %v9485_v36 = vadd.f32 %v15396_v55, %v11183_v45  ;;  %v9476_v46 = vpop.f32.mrb[11].mxu1  ;;  %v15880_v13 = vadd.f32 %v11470_v15, %v9171_v28  ;;  %v9173_v50 = vpop.f32.mrb[139].mxu0  ;;  %v11472_v55 = vadd.f32 %v15714_v43, %v16443_v37  ;;  %v16444_v17 = vld [vmem:[#allocation24_spill] sm:$0xff]  ;;  %v13937_v28 = vld [vmem:[%s14072_s26 + $0x19c4] ss:$52 sps:$4 sm:$0xff]  }
 0x6b5   : > { %9960 = vst [vmem:[%s15825_s23 + $0x40] sm:$0xff] %v9474_v5  ;;  %v9477_v23 = vadd.f32 %v15380_v11, %v9476_v46  ;;  %v13936_v11 = vld [vmem:[%s14072_s26 + $0x18f8] ss:$52 sps:$4 sm:$0xff]   ;;  %v11474_v21 = vadd.f32 %v15714_v43, %v16444_v17  ;;  %v13939_v45 = vld [vmem:[%s14072_s26 + $0x1960] ss:$52 sps:$4 sm:$0xff]  }
 0x6b6   : > { %9963 = vst [vmem:[%s15825_s23 + $0x58] sm:$0xff] %v9485_v36  ;;  %11289 = vmatmul.mubr.bf16.gmra.mrb[116].mxu1 %v13931_v58  ;;  %9383 = vmatmul.mubr.bf16.gmra.mrb[244].mxu0 %v13930_v20  ;;  %v13935_v5 = vld [vmem:[%s14072_s26 + $0x1958] ss:$52 sps:$4 sm:$0xff]  }
 0x6b7   : > { %9961 = vst [vmem:[%s15825_s23 + $0x48] sm:$0xff] %v9477_v23  ;;  %11292 = vmatprep.mubr.bf16.mxu1 %v13934_v22  ;;  %9390 = vmatprep.mubr.bf16.mxu0 %v13932_v29 }
 0x6b9   : > { %v11186_v31 = vpop.f32.mrb[12].mxu1  ;;  %v9176_v26 = vpop.f32.mrb[140].mxu0 }
 0x6ba   : > { %v9498_v47 = vadd.f32 %v15419_v62, %v11186_v31  ;;  %v9489_v63 = vpop.f32.mrb[13].mxu1  ;;  %v15891_v58 = vadd.f32 %v11472_v55, %v9176_v26  ;;  %v9178_v12 = vpop.f32.mrb[141].mxu0  ;;  %v13941_v31 = vld [vmem:[%s14072_s26 + $0x19c8] ss:$52 sps:$4 sm:$0xff]  }
 0x6bb   : > { %v9490_v15 = vadd.f32 %v15403_v54, %v9489_v63  ;;  %v11187_v9 = vpop.f32.mrb[14].mxu1  ;;  %v9179_v20 = vpop.f32.mrb[142].mxu0  ;;  %v16445_v54 = vld [vmem:[#allocation25_spill] sm:$0xff] }
 0x6bc   : > { %9966 = vst [vmem:[%s15825_s23 + $0x70] sm:$0xff] %v9498_v47  ;;  %v9501_v22 = vadd.f32 %v15428_v52, %v11187_v9  ;;  %v9492_v62 = vpop.f32.mrb[15].mxu1  ;;  %v15900_v36 = vadd.f32 %v11474_v21, %v9179_v20  ;;  %v9181_v46 = vpop.f32.mrb[143].mxu0  ;;  %v11476_v52 = vadd.f32 %v15714_v43, %v16445_v54  ;;  %v13940_v21 = vld [vmem:[%s14072_s26 + $0x19c0] ss:$52 sps:$4 sm:$0xff]  }
 0x6bd   : > { %9964 = vst [vmem:[%s15825_s23 + $0x60] sm:$0xff] %v9490_v15  ;;  %v9493_v29 = vadd.f32 %v15412_v0, %v9492_v62  ;;  %v16446_v0 = vld [vmem:[#allocation26_spill] sm:$0xff]  ;;  %v16448_v46 = vld [vmem:[#allocation28_spill] sm:$0xff] }
 0x6be   : > { %9967 = vst [vmem:[%s15825_s23 + $0x78] sm:$0xff] %v9501_v22  ;;  %11293 = vmatmul.mubr.bf16.gmra.mrb[120].mxu1 %v13936_v11  ;;  %9391 = vmatmul.mubr.bf16.gmra.mrb[248].mxu0 %v13935_v5  ;;  %v11478_v26 = vadd.f32 %v15714_v43, %v16446_v0 }
 0x6bf   : > { %9965 = vst [vmem:[%s15825_s23 + $0x68] sm:$0xff] %v9493_v29  ;;  %11296 = vmatprep.mubr.bf16.mxu1 %v13939_v45  ;;  %9398 = vmatprep.mubr.bf16.mxu0 %v13937_v28  ;;  %v11482_v29 = vadd.f32 %v15714_v43, %v16448_v46 }
 0x6c1   : > { %v11190_v50 = vpop.f32.mrb[16].mxu1  ;;  %v9184_v23 = vpop.f32.mrb[144].mxu0 }
 0x6c2   : > { %v9514_v37 = vadd.f32 %v15451_v16, %v11190_v50  ;;  %v9505_v55 = vpop.f32.mrb[17].mxu1  ;;  %v15911_v47 = vadd.f32 %v11476_v52, %v9184_v23  ;;  %v9186_v63 = vpop.f32.mrb[145].mxu0 }
 0x6c3   : > { %v9506_v11 = vadd.f32 %v15435_v7, %v9505_v55  ;;  %v11191_v17 = vpop.f32.mrb[18].mxu1  ;;  %v9187_v12 = vpop.f32.mrb[146].mxu0  ;;  %v16447_v7 = vld [vmem:[#allocation27_spill] sm:$0xff] }
 0x6c4   : > { %9970 = vst [vmem:[%s15825_s23 + $0x90] sm:$0xff] %v9514_v37  ;;  %v9517_v15 = vadd.f32 %v15460_v40, %v11191_v17  ;;  %v9508_v9 = vpop.f32.mrb[19].mxu1  ;;  %v15918_v16 = vadd.f32 %v11478_v26, %v9187_v12  ;;  %v9189_v5 = vpop.f32.mrb[147].mxu0  ;;  %v11480_v20 = vadd.f32 %v15714_v43, %v16447_v7  ;;  %v16449_v26 = vld [vmem:[#allocation29_spill] sm:$0xff] }
 0x6c5   : > { %9968 = vst [vmem:[%s15825_s23 + $0x80] sm:$0xff] %v9506_v11  ;;  %v9509_v45 = vadd.f32 %v15444_v32, %v9508_v9  ;;  %v11484_v63 = vadd.f32 %v15714_v43, %v16449_v26 }
 0x6c6   : > { %9971 = vst [vmem:[%s15825_s23 + $0x98] sm:$0xff] %v9517_v15  ;;  %11297 = vmatmul.mubr.bf16.gmra.mrb[124].mxu1 %v13941_v31  ;;  %9399 = vmatmul.mubr.bf16.gmra.mrb[252].mxu0 %v13940_v21  ;;  %v16450_v21 = vld [vmem:[#allocation30_spill] sm:$0xff] }
 0x6c7   : > { %9969 = vst [vmem:[%s15825_s23 + $0x88] sm:$0xff] %v9509_v45  ;;  %v11486_v12 = vadd.f32 %v15714_v43, %v16450_v21  ;;  %v16454_v21 = vld [vmem:[#allocation34_spill] sm:$0xff] }
 0x6c9   : > { %v11194_v22 = vpop.f32.mrb[20].mxu1  ;;  %v9192_v62 = vpop.f32.mrb[148].mxu0 }
 0x6ca   : > { %v9530_v40 = vadd.f32 %v15483_v34, %v11194_v22  ;;  %v9521_v28 = vpop.f32.mrb[21].mxu1  ;;  %v15928_v54 = vadd.f32 %v11480_v20, %v9192_v62  ;;  %v9194_v32 = vpop.f32.mrb[149].mxu0 }
 0x6cb   : > { %v9522_v52 = vadd.f32 %v15467_v24, %v9521_v28  ;;  %v11195_v50 = vpop.f32.mrb[22].mxu1  ;;  %v9195_v23 = vpop.f32.mrb[150].mxu0  ;;  %v16452_v32 = vld [vmem:[#allocation32_spill] sm:$0xff] }
 0x6cc   : > { %9974 = vst [vmem:[%s15825_s23 + $0xb0] sm:$0xff] %v9530_v40  ;;  %v9533_v37 = vadd.f32 %v15492_v57, %v11195_v50  ;;  %v9524_v55 = vpop.f32.mrb[23].mxu1  ;;  %v15934_v31 = vadd.f32 %v11482_v29, %v9195_v23  ;;  %v9197_v34 = vpop.f32.mrb[151].mxu0  ;;  %v16451_v40 = vld [vmem:[#allocation31_spill] sm:$0xff] }
 0x6cd   : > { %9972 = vst [vmem:[%s15825_s23 + $0xa0] sm:$0xff] %v9522_v52  ;;  %v9525_v0 = vadd.f32 %v15476_v49, %v9524_v55  ;;  %v11488_v28 = vadd.f32 %v15714_v43, %v16451_v40  ;;  %v11490_v52 = vadd.f32 %v15714_v43, %v16452_v32  ;;  %v16455_v40 = vld [vmem:[#allocation35_spill] sm:$0xff] }
 0x6ce   : > { %9975 = vst [vmem:[%s15825_s23 + $0xb8] sm:$0xff] %v9533_v37 }
 0x6cf   : > { %9973 = vst [vmem:[%s15825_s23 + $0xa8] sm:$0xff] %v9525_v0 }
 0x6d1   : > { %v11198_v24 = vpop.f32.mrb[24].mxu1  ;;  %v9200_v11 = vpop.f32.mrb[152].mxu0 }
 0x6d2   : > { %v9546_v17 = vadd.f32 %v15515_v56, %v11198_v24  ;;  %v9537_v57 = vpop.f32.mrb[25].mxu1  ;;  %v15944_v15 = vadd.f32 %v11484_v63, %v9200_v11  ;;  %v9202_v9 = vpop.f32.mrb[153].mxu0  ;;  %v16453_v24 = vld [vmem:[#allocation33_spill] sm:$0xff] }
 0x6d3   : > { %v9538_v49 = vadd.f32 %v15499_v44, %v9537_v57  ;;  %v11199_v5 = vpop.f32.mrb[26].mxu1  ;;  %v9203_v45 = vpop.f32.mrb[154].mxu0  ;;  %v11492_v11 = vadd.f32 %v15714_v43, %v16453_v24 }
 0x6d4   : > { %9978 = vst [vmem:[%s15825_s23 + $0xd0] sm:$0xff] %v9546_v17  ;;  %v9549_v7 = vadd.f32 %v15524_v10, %v11199_v5  ;;  %v9540_v20 = vpop.f32.mrb[27].mxu1  ;;  %v15950_v22 = vadd.f32 %v11486_v12, %v9203_v45  ;;  %v9205_v56 = vpop.f32.mrb[155].mxu0  ;;  %v11494_v12 = vadd.f32 %v15714_v43, %v16454_v21 }
 0x6d5   : > { %9976 = vst [vmem:[%s15825_s23 + $0xc0] sm:$0xff] %v9538_v49  ;;  %v9541_v62 = vadd.f32 %v15508_v2, %v9540_v20 }
 0x6d6   : > { %9979 = vst [vmem:[%s15825_s23 + $0xd8] sm:$0xff] %v9549_v7 }
 0x6d7   : > { %9977 = vst [vmem:[%s15825_s23 + $0xc8] sm:$0xff] %v9541_v62 }
 0x6d9   : > { %v11202_v44 = vpop.f32.mrb[28].mxu1  ;;  %v9208_v46 = vpop.f32.mrb[156].mxu0 }
 0x6da   : > { %v9562_v29 = vadd.f32 %v15547_v14, %v11202_v44  ;;  %v9553_v10 = vpop.f32.mrb[29].mxu1  ;;  %v15960_v50 = vadd.f32 %v11488_v28, %v9208_v46  ;;  %v9210_v23 = vpop.f32.mrb[157].mxu0  ;;  %v11496_v28 = vadd.f32 %v15714_v43, %v16455_v40  ;;  %v16460_v40 = vld [vmem:[#allocation40_spill] sm:$0xff] }
 0x6db   : > { %v9554_v2 = vadd.f32 %v15531_v4, %v9553_v10  ;;  %v11203_v37 = vpop.f32.mrb[30].mxu1  ;;  %v9211_v55 = vpop.f32.mrb[158].mxu0 }
 0x6dc   : > { %9982 = vst [vmem:[%s15825_s23 + $0xf0] sm:$0xff] %v9562_v29  ;;  %v9565_v34 = vadd.f32 %v15556_v27, %v11203_v37  ;;  %v9556_v0 = vpop.f32.mrb[31].mxu1  ;;  %v15966_v26 = vadd.f32 %v11490_v52, %v9211_v55  ;;  %v9213_v14 = vpop.f32.mrb[159].mxu0  ;;  %v16456_v29 = vld [vmem:[#allocation36_spill] sm:$0xff] }
 0x6dd   : > { %9980 = vst [vmem:[%s15825_s23 + $0xe0] sm:$0xff] %v9554_v2  ;;  %v9557_v63 = vadd.f32 %v15540_v19, %v9556_v0  ;;  %v11498_v10 = vadd.f32 %v15714_v43, %v16456_v29  ;;  %v16457_v14 = vld [vmem:[#allocation37_spill] sm:$0xff]  ;;  %v16461_v29 = vld [vmem:[#allocation66_spill] sm:$0xff] }
 0x6de   : > { %9983 = vst [vmem:[%s15825_s23 + $0xf8] sm:$0xff] %v9565_v34 }
 0x6df   : > { %9981 = vst [vmem:[%s15825_s23 + $0xe8] sm:$0xff] %v9557_v63  ;;  %v11500_v63 = vadd.f32 %v15714_v43, %v16457_v14 }
 0x6e1   : > { %v11206_v4 = vpop.f32.mrb[32].mxu1  ;;  %v9216_v17 = vpop.f32.mrb[160].mxu0 }
 0x6e2   : > { %v9578_v57 = vadd.f32 %v15579_v41, %v11206_v4  ;;  %v9569_v27 = vpop.f32.mrb[33].mxu1  ;;  %v15976_v9 = vadd.f32 %v11492_v11, %v9216_v17  ;;  %v9218_v49 = vpop.f32.mrb[161].mxu0  ;;  %v16458_v4 = vld [vmem:[#allocation38_spill] sm:$0xff] }
 0x6e3   : > { %v9570_v19 = vadd.f32 %v15563_v25, %v9569_v27  ;;  %v11207_v5 = vpop.f32.mrb[34].mxu1  ;;  %v9219_v45 = vpop.f32.mrb[162].mxu0  ;;  %v11502_v17 = vadd.f32 %v15714_v43, %v16458_v4  ;;  %v16466_v4 = vld [vmem:[#allocation68_spill] sm:$0xff] }
 0x6e4   : > { %9986 = vst [vmem:[%s15825_s23 + $0x110] sm:$0xff] %v9578_v57  ;;  %v9581_v7 = vadd.f32 %v15588_v48, %v11207_v5  ;;  %v9572_v20 = vpop.f32.mrb[35].mxu1  ;;  %v15982_v56 = vadd.f32 %v11494_v12, %v9219_v45  ;;  %v9221_v41 = vpop.f32.mrb[163].mxu0 }
 0x6e5   : > { %9984 = vst [vmem:[%s15825_s23 + $0x100] sm:$0xff] %v9570_v19  ;;  %v9573_v62 = vadd.f32 %v15572_v38, %v9572_v20 }
 0x6e6   : > { %9987 = vst [vmem:[%s15825_s23 + $0x118] sm:$0xff] %v9581_v7  ;;  %v16459_v7 = vld [vmem:[#allocation39_spill] sm:$0xff] }
 0x6e7   : > { %9985 = vst [vmem:[%s15825_s23 + $0x108] sm:$0xff] %v9573_v62  ;;  %v11504_v20 = vadd.f32 %v15714_v43, %v16459_v7 }
 0x6e9   : > { %v11210_v25 = vpop.f32.mrb[36].mxu1  ;;  %v9224_v44 = vpop.f32.mrb[164].mxu0 }
 0x6ea   : > { %v9594_v46 = vadd.f32 %v15611_v33, %v11210_v25  ;;  %v9585_v48 = vpop.f32.mrb[37].mxu1  ;;  %v15992_v32 = vadd.f32 %v11496_v28, %v9224_v44  ;;  %v9226_v52 = vpop.f32.mrb[165].mxu0  ;;  %v11506_v28 = vadd.f32 %v15714_v43, %v16460_v40 }
 0x6eb   : > { %v9586_v38 = vadd.f32 %v15595_v53, %v9585_v48  ;;  %v11211_v23 = vpop.f32.mrb[38].mxu1  ;;  %v9227_v2 = vpop.f32.mrb[166].mxu0 }
 0x6ec   : > { %9990 = vst [vmem:[%s15825_s23 + $0x130] sm:$0xff] %v9594_v46  ;;  %v9597_v37 = vadd.f32 %v15620_v8, %v11211_v23  ;;  %v9588_v55 = vpop.f32.mrb[39].mxu1  ;;  %v15998_v34 = vadd.f32 %v11498_v10, %v9227_v2  ;;  %v9229_v33 = vpop.f32.mrb[167].mxu0  ;;  %v16462_v23 = vld [vmem:[#allocation63_spill] sm:$0xff] }
 0x6ed   : > { %9988 = vst [vmem:[%s15825_s23 + $0x120] sm:$0xff] %v9586_v38  ;;  %v9589_v0 = vadd.f32 %v15604_v60, %v9588_v55 }
 0x6ee   : > { %9991 = vst [vmem:[%s15825_s23 + $0x138] sm:$0xff] %v9597_v37  ;;  %v16463_v37 = vld [vmem:[#allocation41_spill] sm:$0xff] }
 0x6ef   : > { %9989 = vst [vmem:[%s15825_s23 + $0x128] sm:$0xff] %v9589_v0  ;;  %v11508_v55 = vadd.f32 %v15714_v43, %v16463_v37  ;;  %v16464_v0 = vld [vmem:[#allocation3_spill] sm:$0xff] }
 0x6f1   : > { %v11214_v53 = vpop.f32.mrb[40].mxu1  ;;  %v9232_v24 = vpop.f32.mrb[168].mxu0 }
 0x6f2   : > { %v9610_v11 = vadd.f32 %v15643_v6, %v11214_v53  ;;  %v9601_v8 = vpop.f32.mrb[41].mxu1  ;;  %v16008_v57 = vadd.f32 %v11500_v63, %v9232_v24  ;;  %v9234_v27 = vpop.f32.mrb[169].mxu0  ;;  %v16465_v53 = vld [vmem:[#allocation42_spill] sm:$0xff] }
 0x6f3   : > { %v9602_v60 = vadd.f32 %v15627_v51, %v9601_v8  ;;  %v11215_v21 = vpop.f32.mrb[42].mxu1  ;;  %v9235_v12 = vpop.f32.mrb[170].mxu0  ;;  %v11510_v24 = vadd.f32 %v15714_v43, %v16465_v53 }
 0x6f4   : > { %9994 = vst [vmem:[%s15825_s23 + $0x150] sm:$0xff] %v9610_v11  ;;  %v9613_v49 = vadd.f32 %v15652_v30, %v11215_v21  ;;  %v9604_v19 = vpop.f32.mrb[43].mxu1  ;;  %v16014_v5 = vadd.f32 %v11502_v17, %v9235_v12  ;;  %v9237_v6 = vpop.f32.mrb[171].mxu0  ;;  %v16467_v21 = vld [vmem:[#allocation4_spill] sm:$0xff] }
 0x6f5   : > { %9992 = vst [vmem:[%s15825_s23 + $0x140] sm:$0xff] %v9602_v60  ;;  %v9605_v45 = vadd.f32 %v15636_v18, %v9604_v19 }
 0x6f6   : > { %9995 = vst [vmem:[%s15825_s23 + $0x158] sm:$0xff] %v9613_v49 }
 0x6f7   : > { %9993 = vst [vmem:[%s15825_s23 + $0x148] sm:$0xff] %v9605_v45  ;;  %v16468_v45 = vld [vmem:[#allocation2_spill] sm:$0xff] }
 0x6f9   : > { %v11218_v51 = vpop.f32.mrb[44].mxu1  ;;  %v9240_v41 = vpop.f32.mrb[172].mxu0 }
 0x6fa   : > { %v9626_v62 = vadd.f32 %v15675_v35, %v11218_v51  ;;  %v9617_v30 = vpop.f32.mrb[45].mxu1  ;;  %v16024_v25 = vadd.f32 %v11504_v20, %v9240_v41  ;;  %v9242_v44 = vpop.f32.mrb[173].mxu0  ;;  %v16469_v20 = vld [vmem:[#allocation43_spill] sm:$0xff] }
 0x6fb   : > { %v9618_v18 = vadd.f32 %v15659_v1, %v9617_v30  ;;  %v11219_v46 = vpop.f32.mrb[46].mxu1  ;;  %v9243_v48 = vpop.f32.mrb[174].mxu0  ;;  %v11512_v51 = vadd.f32 %v15714_v43, %v16469_v20  ;;  %v16470_v30 = vld [vmem:[#allocation7_spill] sm:$0xff]  ;;  %v16471_v44 = vld [vmem:[#allocation44_spill] sm:$0xff] }
 0x6fc   : > { %9998 = vst [vmem:[%s15825_s23 + $0x170] sm:$0xff] %v9626_v62  ;;  %v9629_v10 = vadd.f32 %v16461_v29, %v11219_v46  ;;  %v9620_v52 = vpop.f32.mrb[47].mxu1  ;;  %v16030_v38 = vadd.f32 %v11506_v28, %v9243_v48  ;;  %v9245_v35 = vpop.f32.mrb[175].mxu0  ;;  %v16472_v29 = vld [vmem:[#allocation5_spill] sm:$0xff]  ;;  %v16479_v20 = vld [vmem:[#allocation12_spill] sm:$0xff] }
 0x6fd   : > { %9996 = vst [vmem:[%s15825_s23 + $0x160] sm:$0xff] %v9618_v18  ;;  %v9621_v2 = vadd.f32 %v16462_v23, %v9620_v52  ;;  %v11514_v18 = vadd.f32 %v15714_v43, %v16471_v44  ;;  %v16473_v23 = vld [vmem:[#allocation8_spill] sm:$0xff]  ;;  %v16481_v44 = vld [vmem:[#allocation47_spill] sm:$0xff] }
 0x6fe   : > { %9999 = vst [vmem:[%s15825_s23 + $0x178] sm:$0xff] %v9629_v10 }
 0x6ff   : > { %9997 = vst [vmem:[%s15825_s23 + $0x168] sm:$0xff] %v9621_v2 }
 0x701   : > { %v11222_v1 = vpop.f32.mrb[48].mxu1  ;;  %v9248_v33 = vpop.f32.mrb[176].mxu0 }
 0x702   : > { %v9642_v14 = vadd.f32 %v16464_v0, %v11222_v1  ;;  %v9633_v63 = vpop.f32.mrb[49].mxu1  ;;  %v16040_v11 = vadd.f32 %v11508_v55, %v9248_v33  ;;  %v9250_v8 = vpop.f32.mrb[177].mxu0  ;;  %v16474_v33 = vld [vmem:[#allocation6_spill] sm:$0xff] }
 0x703   : > { %v9634_v17 = vadd.f32 %v16466_v4, %v9633_v63  ;;  %v11223_v27 = vpop.f32.mrb[50].mxu1  ;;  %v9251_v60 = vpop.f32.mrb[178].mxu0  ;;  %v16476_v8 = vld [vmem:[#allocation11_spill] sm:$0xff] }
 0x704   : > { %10002 = vst [vmem:[%s15825_s23 + $0x190] sm:$0xff] %v9642_v14  ;;  %v9645_v12 = vadd.f32 %v16467_v21, %v11223_v27  ;;  %v9636_v49 = vpop.f32.mrb[51].mxu1  ;;  %v16046_v19 = vadd.f32 %v11510_v24, %v9251_v60  ;;  %v9253_v6 = vpop.f32.mrb[179].mxu0  ;;  %v16475_v14 = vld [vmem:[#allocation45_spill] sm:$0xff]  ;;  %v16477_v27 = vld [vmem:[#allocation46_spill] sm:$0xff] }
 0x705   : > { %10000 = vst [vmem:[%s15825_s23 + $0x180] sm:$0xff] %v9634_v17  ;;  %v9637_v7 = vadd.f32 %v16468_v45, %v9636_v49  ;;  %v11516_v63 = vadd.f32 %v15714_v43, %v16475_v14  ;;  %v11518_v60 = vadd.f32 %v15714_v43, %v16477_v27  ;;  %v16478_v49 = vld [vmem:[#allocation9_spill] sm:$0xff]  ;;  %v16486_v27 = vld [vmem:[#allocation14_spill] sm:$0xff] }
 0x706   : > { %10003 = vst [vmem:[%s15825_s23 + $0x198] sm:$0xff] %v9645_v12 }
 0x707   : > { %10001 = vst [vmem:[%s15825_s23 + $0x188] sm:$0xff] %v9637_v7 }
 0x709   : > { %v11226_v41 = vpop.f32.mrb[52].mxu1  ;;  %v9256_v62 = vpop.f32.mrb[180].mxu0 }
 0x70a   : > { %v9658_v40 = vadd.f32 %v16470_v30, %v11226_v41  ;;  %v9649_v28 = vpop.f32.mrb[53].mxu1  ;;  %v16056_v46 = vadd.f32 %v11512_v51, %v9256_v62  ;;  %v9258_v48 = vpop.f32.mrb[181].mxu0 }
 0x70b   : > { %v9650_v10 = vadd.f32 %v16472_v29, %v9649_v28  ;;  %v11227_v52 = vpop.f32.mrb[54].mxu1  ;;  %v9259_v35 = vpop.f32.mrb[182].mxu0 }
 0x70c   : > { %10006 = vst [vmem:[%s15825_s23 + $0x1b0] sm:$0xff] %v9658_v40  ;;  %v9661_v2 = vadd.f32 %v16473_v23, %v11227_v52  ;;  %v9652_v37 = vpop.f32.mrb[55].mxu1  ;;  %v16062_v55 = vadd.f32 %v11514_v18, %v9259_v35  ;;  %v9261_v1 = vpop.f32.mrb[183].mxu0  ;;  %v16480_v40 = vld [vmem:[#allocation10_spill] sm:$0xff]  ;;  %v11520_v18 = vadd.f32 %v15714_v43, %v16481_v44  ;;  %v16483_v23 = vld [vmem:[#allocation48_spill] sm:$0xff] }
 0x70d   : > { %10004 = vst [vmem:[%s15825_s23 + $0x1a0] sm:$0xff] %v9650_v10  ;;  %v9653_v0 = vadd.f32 %v16474_v33, %v9652_v37  ;;  %v16482_v10 = vld [vmem:[#allocation15_spill] sm:$0xff]  ;;  %v16484_v33 = vld [vmem:[#allocation13_spill] sm:$0xff] }
 0x70e   : > { %10007 = vst [vmem:[%s15825_s23 + $0x1b8] sm:$0xff] %v9661_v2  ;;  %v11522_v2 = vadd.f32 %v15714_v43, %v16483_v23 }
 0x70f   : > { %10005 = vst [vmem:[%s15825_s23 + $0x1a8] sm:$0xff] %v9653_v0 }
 0x711   : > { %v11230_v53 = vpop.f32.mrb[56].mxu1  ;;  %v9264_v24 = vpop.f32.mrb[184].mxu0 }
 0x712   : > { %v9674_v4 = vadd.f32 %v16476_v8, %v11230_v53  ;;  %v9665_v17 = vpop.f32.mrb[57].mxu1  ;;  %v16072_v21 = vadd.f32 %v11516_v63, %v9264_v24  ;;  %v9266_v12 = vpop.f32.mrb[185].mxu0  ;;  %v16485_v53 = vld [vmem:[#allocation16_spill] sm:$0xff] }
 0x713   : > { %v9666_v6 = vadd.f32 %v16478_v49, %v9665_v17  ;;  %v11231_v45 = vpop.f32.mrb[58].mxu1  ;;  %v9267_v7 = vpop.f32.mrb[186].mxu0  ;;  %v16487_v12 = vld [vmem:[#allocation49_spill] sm:$0xff] }
 0x714   : > { %10010 = vst [vmem:[%s15825_s23 + $0x1d0] sm:$0xff] %v9674_v4  ;;  %v9677_v51 = vadd.f32 %v16479_v20, %v11231_v45  ;;  %v9668_v41 = vpop.f32.mrb[59].mxu1  ;;  %v16078_v62 = vadd.f32 %v11518_v60, %v9267_v7  ;;  %v9269_v30 = vpop.f32.mrb[187].mxu0  ;;  %v11524_v49 = vadd.f32 %v15714_v43, %v16487_v12  ;;  %v16491_v12 = vld [vmem:[#allocation53_spill] sm:$0xff] }
 0x715   : > { %10008 = vst [vmem:[%s15825_s23 + $0x1c0] sm:$0xff] %v9666_v6  ;;  %v9669_v28 = vadd.f32 %v16480_v40, %v9668_v41 }
 0x716   : > { %10011 = vst [vmem:[%s15825_s23 + $0x1d8] sm:$0xff] %v9677_v51  ;;  %v16488_v51 = vld [vmem:[#allocation50_spill] sm:$0xff] }
 0x717   : > { %10009 = vst [vmem:[%s15825_s23 + $0x1c8] sm:$0xff] %v9669_v28  ;;  %v11526_v41 = vadd.f32 %v15714_v43, %v16488_v51 }
 0x719   : > { %v11234_v48 = vpop.f32.mrb[60].mxu1  ;;  %v9272_v29 = vpop.f32.mrb[188].mxu0 }
 0x71a   : > { %v9690_v52 = vadd.f32 %v16482_v10, %v11234_v48  ;;  %v9681_v35 = vpop.f32.mrb[61].mxu1  ;;  %v16088_v37 = vadd.f32 %v11520_v18, %v9272_v29  ;;  %v9274_v1 = vpop.f32.mrb[189].mxu0 }
 0x71b   : > { %v9682_v0 = vadd.f32 %v16484_v33, %v9681_v35  ;;  %v11235_v14 = vpop.f32.mrb[62].mxu1  ;;  %v9275_v63 = vpop.f32.mrb[190].mxu0  ;;  %v16489_v35 = vld [vmem:[#allocation51_spill] sm:$0xff]  ;;  %v16121_v33 = vld [vmem:[%s16323_s2] ss:$0 sm:$0xff] }
 0x71c   : > { %10014 = vst [vmem:[%s15825_s23 + $0x1f0] sm:$0xff] %v9690_v52  ;;  %v9693_v24 = vadd.f32 %v16485_v53, %v11235_v14  ;;  %v9684_v8 = vpop.f32.mrb[63].mxu1  ;;  %v16094_v4 = vadd.f32 %v11522_v2, %v9275_v63  ;;  %v9277_v17 = vpop.f32.mrb[191].mxu0  ;;  %v11528_v23 = vadd.f32 %v15714_v43, %v16489_v35 }
 0x71d   : > { %10012 = vst [vmem:[%s15825_s23 + $0x1e0] sm:$0xff] %v9682_v0  ;;  %v9685_v60 = vadd.f32 %v16486_v27, %v9684_v8  ;;  %v16490_v0 = vld [vmem:[#allocation52_spill] sm:$0xff] }
 0x71e   : > { %10015 = vst [vmem:[%s15825_s23 + $0x1f8] sm:$0xff] %v9693_v24 }
 0x71f   : > { %10013 = vst [vmem:[%s15825_s23 + $0x1e8] sm:$0xff] %v9685_v60 }
 0x721   : > { %v11238_v6 = vpop.f32.mrb[64].mxu1  ;;  %v9280_v45 = vpop.f32.mrb[192].mxu0 }
 0x722   : > { %v9706_v7 = vadd.f32 %v15851_v42, %v11238_v6  ;;  %v9697_v20 = vpop.f32.mrb[65].mxu1  ;;  %v16104_v30 = vadd.f32 %v11524_v49, %v9280_v45  ;;  %v9282_v40 = vpop.f32.mrb[193].mxu0  ;;  %v11532_v49 = vadd.f32 %v16121_v33, %v16491_v12  ;;  %v16496_v12 = vld [vmem:[#allocation58_spill] sm:$0xff] }
 0x723   : > { %v9698_v28 = vadd.f32 %v15831_v39, %v9697_v20  ;;  %v11239_v44 = vpop.f32.mrb[66].mxu1  ;;  %v9283_v18 = vpop.f32.mrb[194].mxu0 }
 0x724   : > { %10018 = vst [vmem:[%s15825_s23 + $0x210] sm:$0xff] %v9706_v7  ;;  %v9709_v48 = vadd.f32 %v15860_v61, %v11239_v44  ;;  %v9700_v29 = vpop.f32.mrb[67].mxu1  ;;  %v16110_v10 = vadd.f32 %v11526_v41, %v9283_v18  ;;  %v9285_v42 = vpop.f32.mrb[195].mxu0  ;;  %v16492_v7 = vld [vmem:[#allocation54_spill] sm:$0xff] }
 0x725   : > { %10016 = vst [vmem:[%s15825_s23 + $0x200] sm:$0xff] %v9698_v28  ;;  %v9701_v52 = vadd.f32 %v15840_v59, %v9700_v29  ;;  %v11530_v59 = vadd.f32 %v16121_v33, %v16490_v0  ;;  %v11534_v20 = vadd.f32 %v16121_v33, %v16492_v7  ;;  %v16493_v42 = vld [vmem:[#allocation55_spill] sm:$0xff] }
 0x726   : > { %10019 = vst [vmem:[%s15825_s23 + $0x218] sm:$0xff] %v9709_v48 }
 0x727   : > { %10017 = vst [vmem:[%s15825_s23 + $0x208] sm:$0xff] %v9701_v52  ;;  %v11536_v52 = vadd.f32 %v16121_v33, %v16493_v42 }
 0x729   : > { %v11242_v39 = vpop.f32.mrb[68].mxu1  ;;  %v9288_v2 = vpop.f32.mrb[196].mxu0 }
 0x72a   : > { %v9722_v1 = vadd.f32 %v15891_v58, %v11242_v39  ;;  %v9713_v61 = vpop.f32.mrb[69].mxu1  ;;  %v16125_v14 = vadd.f32 %v11528_v23, %v9288_v2  ;;  %v9290_v63 = vpop.f32.mrb[197].mxu0  ;;  %v16494_v39 = vld [vmem:[#allocation56_spill] sm:$0xff] }
 0x72b   : > { %v9714_v43 = vadd.f32 %v15871_v3, %v9713_v61  ;;  %v11243_v53 = vpop.f32.mrb[70].mxu1  ;;  %v9291_v24 = vpop.f32.mrb[198].mxu0  ;;  %v11538_v2 = vadd.f32 %v16121_v33, %v16494_v39 }
 0x72c   : > { %10022 = vst [vmem:[%s15825_s23 + $0x230] sm:$0xff] %v9722_v1  ;;  %v9725_v58 = vadd.f32 %v15900_v36, %v11243_v53  ;;  %v9716_v8 = vpop.f32.mrb[71].mxu1  ;;  %v16131_v17 = vadd.f32 %v11530_v59, %v9291_v24  ;;  %v9293_v27 = vpop.f32.mrb[199].mxu0 }
 0x72d   : > { %10020 = vst [vmem:[%s15825_s23 + $0x220] sm:$0xff] %v9714_v43  ;;  %v9717_v60 = vadd.f32 %v15880_v13, %v9716_v8 }
 0x72e   : > { %10023 = vst [vmem:[%s15825_s23 + $0x238] sm:$0xff] %v9725_v58  ;;  %v16495_v58 = vld [vmem:[#allocation57_spill] sm:$0xff] }
 0x72f   : > { %10021 = vst [vmem:[%s15825_s23 + $0x228] sm:$0xff] %v9717_v60  ;;  %v11540_v8 = vadd.f32 %v16121_v33, %v16495_v58 }
 0x731   : > { %v11246_v3 = vpop.f32.mrb[72].mxu1  ;;  %v9296_v6 = vpop.f32.mrb[200].mxu0 }
 0x732   : > { %v9738_v45 = vadd.f32 %v15928_v54, %v11246_v3  ;;  %v9729_v36 = vpop.f32.mrb[73].mxu1  ;;  %v16141_v51 = vadd.f32 %v11532_v49, %v9296_v6  ;;  %v9298_v41 = vpop.f32.mrb[201].mxu0  ;;  %v11542_v49 = vadd.f32 %v16121_v33, %v16496_v12  ;;  %v16501_v12 = vld [vmem:[#allocation64_spill] sm:$0xff] }
 0x733   : > { %v9730_v13 = vadd.f32 %v15911_v47, %v9729_v36  ;;  %v11247_v40 = vpop.f32.mrb[74].mxu1  ;;  %v9299_v28 = vpop.f32.mrb[202].mxu0 }
 0x734   : > { %10026 = vst [vmem:[%s15825_s23 + $0x250] sm:$0xff] %v9738_v45  ;;  %v9741_v44 = vadd.f32 %v15934_v31, %v11247_v40  ;;  %v9732_v18 = vpop.f32.mrb[75].mxu1  ;;  %v16147_v48 = vadd.f32 %v11534_v20, %v9299_v28  ;;  %v9301_v54 = vpop.f32.mrb[203].mxu0  ;;  %v16497_v40 = vld [vmem:[#allocation59_spill] sm:$0xff] }
 0x735   : > { %10024 = vst [vmem:[%s15825_s23 + $0x240] sm:$0xff] %v9730_v13  ;;  %v9733_v29 = vadd.f32 %v15918_v16, %v9732_v18  ;;  %v11544_v28 = vadd.f32 %v16121_v33, %v16497_v40  ;;  %v16498_v54 = vld [vmem:[#allocation60_spill] sm:$0xff] }
 0x736   : > { %10027 = vst [vmem:[%s15825_s23 + $0x258] sm:$0xff] %v9741_v44 }
 0x737   : > { %10025 = vst [vmem:[%s15825_s23 + $0x248] sm:$0xff] %v9733_v29  ;;  %v11546_v29 = vadd.f32 %v16121_v33, %v16498_v54 }
 0x739   : > { %v11250_v47 = vpop.f32.mrb[76].mxu1  ;;  %v9304_v35 = vpop.f32.mrb[204].mxu0 }
 0x73a   : > { %v9754_v23 = vadd.f32 %v15960_v50, %v11250_v47  ;;  %v9745_v31 = vpop.f32.mrb[77].mxu1  ;;  %v16157_v1 = vadd.f32 %v11536_v52, %v9304_v35  ;;  %v9306_v61 = vpop.f32.mrb[205].mxu0 }
 0x73b   : > { %v9746_v16 = vadd.f32 %v15944_v15, %v9745_v31  ;;  %v11251_v0 = vpop.f32.mrb[78].mxu1  ;;  %v9307_v59 = vpop.f32.mrb[206].mxu0  ;;  %v16499_v61 = vld [vmem:[#allocation61_spill] sm:$0xff] }
 0x73c   : > { %10030 = vst [vmem:[%s15825_s23 + $0x270] sm:$0xff] %v9754_v23  ;;  %v9757_v63 = vadd.f32 %v15966_v26, %v11251_v0  ;;  %v9748_v43 = vpop.f32.mrb[79].mxu1  ;;  %v16163_v53 = vadd.f32 %v11538_v2, %v9307_v59  ;;  %v9309_v50 = vpop.f32.mrb[207].mxu0 }
 0x73d   : > { %10028 = vst [vmem:[%s15825_s23 + $0x260] sm:$0xff] %v9746_v16  ;;  %v9749_v24 = vadd.f32 %v15950_v22, %v9748_v43  ;;  %v11548_v16 = vadd.f32 %v16121_v33, %v16499_v61 }
 0x73e   : > { %10031 = vst [vmem:[%s15825_s23 + $0x278] sm:$0xff] %v9757_v63  ;;  %v16500_v63 = vld [vmem:[#allocation62_spill] sm:$0xff] }
 0x73f   : > { %10029 = vst [vmem:[%s15825_s23 + $0x268] sm:$0xff] %v9749_v24  ;;  %v11550_v43 = vadd.f32 %v16121_v33, %v16500_v63  ;;  %v16506_v63 = vld [vmem:[#allocation71_spill] sm:$0xff] }
 0x741   : > { %v11254_v15 = vpop.f32.mrb[80].mxu1  ;;  %v9312_v27 = vpop.f32.mrb[208].mxu0 }
 0x742   : > { %v9770_v60 = vadd.f32 %v15992_v32, %v11254_v15  ;;  %v9761_v26 = vpop.f32.mrb[81].mxu1  ;;  %v16173_v3 = vadd.f32 %v11540_v8, %v9312_v27  ;;  %v9314_v6 = vpop.f32.mrb[209].mxu0 }
 0x743   : > { %v9762_v22 = vadd.f32 %v15976_v9, %v9761_v26  ;;  %v11255_v45 = vpop.f32.mrb[82].mxu1  ;;  %v9315_v36 = vpop.f32.mrb[210].mxu0 }
 0x744   : > { %10034 = vst [vmem:[%s15825_s23 + $0x290] sm:$0xff] %v9770_v60  ;;  %v9773_v7 = vadd.f32 %v15998_v34, %v11255_v45  ;;  %v9764_v20 = vpop.f32.mrb[83].mxu1  ;;  %v16179_v41 = vadd.f32 %v11542_v49, %v9315_v36  ;;  %v9317_v32 = vpop.f32.mrb[211].mxu0  ;;  %v11552_v49 = vadd.f32 %v16121_v33, %v16501_v12  ;;  %v16502_v45 = vld [vmem:[#allocation65_spill] sm:$0xff]  ;;  %v16507_v12 = vld [vmem:[#allocation72_spill] sm:$0xff] }
 0x745   : > { %10032 = vst [vmem:[%s15825_s23 + $0x280] sm:$0xff] %v9762_v22  ;;  %v9765_v13 = vadd.f32 %v15982_v56, %v9764_v20  ;;  %v11554_v36 = vadd.f32 %v16121_v33, %v16502_v45 }
 0x746   : > { %10035 = vst [vmem:[%s15825_s23 + $0x298] sm:$0xff] %v9773_v7 }
 0x747   : > { %10033 = vst [vmem:[%s15825_s23 + $0x288] sm:$0xff] %v9765_v13 }
 0x749   : > { %v11258_v9 = vpop.f32.mrb[84].mxu1  ;;  %v9320_v44 = vpop.f32.mrb[212].mxu0 }
 0x74a   : > { %v9786_v18 = vadd.f32 %v16024_v25, %v11258_v9  ;;  %v9777_v34 = vpop.f32.mrb[85].mxu1  ;;  %v16189_v42 = vadd.f32 %v11544_v28, %v9320_v44  ;;  %v9322_v52 = vpop.f32.mrb[213].mxu0 }
 0x74b   : > { %v9778_v56 = vadd.f32 %v16008_v57, %v9777_v34  ;;  %v11259_v47 = vpop.f32.mrb[86].mxu1  ;;  %v9323_v35 = vpop.f32.mrb[214].mxu0  ;;  %v16504_v52 = vld [vmem:[#allocation69_spill] sm:$0xff] }
 0x74c   : > { %10038 = vst [vmem:[%s15825_s23 + $0x2b0] sm:$0xff] %v9786_v18  ;;  %v9789_v23 = vadd.f32 %v16030_v38, %v11259_v47  ;;  %v9780_v31 = vpop.f32.mrb[87].mxu1  ;;  %v16195_v39 = vadd.f32 %v11546_v29, %v9323_v35  ;;  %v9325_v25 = vpop.f32.mrb[215].mxu0  ;;  %v16503_v18 = vld [vmem:[#allocation67_spill] sm:$0xff] }
 0x74d   : > { %10036 = vst [vmem:[%s15825_s23 + $0x2a0] sm:$0xff] %v9778_v56  ;;  %v9781_v2 = vadd.f32 %v16014_v5, %v9780_v31  ;;  %v11556_v34 = vadd.f32 %v16121_v33, %v16503_v18  ;;  %v11558_v56 = vadd.f32 %v16121_v33, %v16504_v52 }
 0x74e   : > { %10039 = vst [vmem:[%s15825_s23 + $0x2b8] sm:$0xff] %v9789_v23 }
 0x74f   : > { %10037 = vst [vmem:[%s15825_s23 + $0x2a8] sm:$0xff] %v9781_v2 }
 0x751   : > { %v11262_v57 = vpop.f32.mrb[88].mxu1  ;;  %v9328_v0 = vpop.f32.mrb[216].mxu0 }
 0x752   : > { %v9802_v59 = vadd.f32 %v16056_v46, %v11262_v57  ;;  %v9793_v38 = vpop.f32.mrb[89].mxu1  ;;  %v16205_v50 = vadd.f32 %v11548_v16, %v9328_v0  ;;  %v9330_v24 = vpop.f32.mrb[217].mxu0  ;;  %v16505_v57 = vld [vmem:[#allocation70_spill] sm:$0xff] }
 0x753   : > { %v9794_v5 = vadd.f32 %v16040_v11, %v9793_v38  ;;  %v11263_v58 = vpop.f32.mrb[90].mxu1  ;;  %v9331_v8 = vpop.f32.mrb[218].mxu0  ;;  %v11560_v0 = vadd.f32 %v16121_v33, %v16505_v57 }
 0x754   : > { %10042 = vst [vmem:[%s15825_s23 + $0x2d0] sm:$0xff] %v9802_v59  ;;  %v9805_v15 = vadd.f32 %v16062_v55, %v11263_v58  ;;  %v9796_v27 = vpop.f32.mrb[91].mxu1  ;;  %v16211_v60 = vadd.f32 %v11550_v43, %v9331_v8  ;;  %v9333_v46 = vpop.f32.mrb[219].mxu0  ;;  %v11562_v43 = vadd.f32 %v16121_v33, %v16506_v63 }
 0x755   : > { %10040 = vst [vmem:[%s15825_s23 + $0x2c0] sm:$0xff] %v9794_v5  ;;  %v9797_v26 = vadd.f32 %v16046_v19, %v9796_v27 }
 0x756   : > { %10043 = vst [vmem:[%s15825_s23 + $0x2d8] sm:$0xff] %v9805_v15 }
 0x757   : > { %10041 = vst [vmem:[%s15825_s23 + $0x2c8] sm:$0xff] %v9797_v26 }
 0x759   : > { %v11266_v11 = vpop.f32.mrb[92].mxu1  ;;  %v9336_v6 = vpop.f32.mrb[220].mxu0 }
 0x75a   : > { %v9818_v22 = vadd.f32 %v16088_v37, %v11266_v11  ;;  %v9809_v55 = vpop.f32.mrb[93].mxu1  ;;  %v16221_v7 = vadd.f32 %v11552_v49, %v9336_v6  ;;  %v9338_v20 = vpop.f32.mrb[221].mxu0  ;;  %v11564_v49 = vadd.f32 %v16121_v33, %v16507_v12 }
 0x75b   : > { %v9810_v19 = vadd.f32 %v16072_v21, %v9809_v55  ;;  %v11267_v32 = vpop.f32.mrb[94].mxu1  ;;  %v9339_v13 = vpop.f32.mrb[222].mxu0 }
 0x75c   : > { %10046 = vst [vmem:[%s15825_s23 + $0x2f0] sm:$0xff] %v9818_v22  ;;  %v9821_v40 = vadd.f32 %v16094_v4, %v11267_v32  ;;  %v9812_v28 = vpop.f32.mrb[95].mxu1  ;;  %v16227_v9 = vadd.f32 %v11554_v36, %v9339_v13  ;;  %v9341_v37 = vpop.f32.mrb[223].mxu0  ;;  %v16508_v22 = vld [vmem:[#allocation73_spill] sm:$0xff] }
 0x75d   : > { %10044 = vst [vmem:[%s15825_s23 + $0x2e0] sm:$0xff] %v9810_v19  ;;  %v9813_v44 = vadd.f32 %v16078_v62, %v9812_v28  ;;  %v11566_v55 = vadd.f32 %v16121_v33, %v16508_v22  ;;  %v16509_v37 = vld [vmem:[#allocation74_spill] sm:$0xff] }
 0x75e   : > { %10047 = vst [vmem:[%s15825_s23 + $0x2f8] sm:$0xff] %v9821_v40 }
 0x75f   : > { %10045 = vst [vmem:[%s15825_s23 + $0x2e8] sm:$0xff] %v9813_v44  ;;  %v11568_v44 = vadd.f32 %v16121_v33, %v16509_v37 }
 0x761   : > { %v11270_v21 = vpop.f32.mrb[96].mxu1  ;;  %v9344_v54 = vpop.f32.mrb[224].mxu0 }
 0x762   : > { %v9834_v29 = vadd.f32 %v16125_v14, %v11270_v21  ;;  %v9825_v4 = vpop.f32.mrb[97].mxu1  ;;  %v16237_v47 = vadd.f32 %v11556_v34, %v9344_v54  ;;  %v9346_v35 = vpop.f32.mrb[225].mxu0  ;;  %v16510_v21 = vld [vmem:[#allocation75_spill] sm:$0xff] }
 0x763   : > { %v9826_v62 = vadd.f32 %v16104_v30, %v9825_v4  ;;  %v11271_v23 = vpop.f32.mrb[98].mxu1  ;;  %v9347_v31 = vpop.f32.mrb[226].mxu0  ;;  %v11570_v54 = vadd.f32 %v16121_v33, %v16510_v21 }
 0x764   : > { %10050 = vst [vmem:[%s15825_s23 + $0x310] sm:$0xff] %v9834_v29  ;;  %v9837_v25 = vadd.f32 %v16131_v17, %v11271_v23  ;;  %v9828_v2 = vpop.f32.mrb[99].mxu1  ;;  %v16243_v61 = vadd.f32 %v11558_v56, %v9347_v31  ;;  %v9349_v14 = vpop.f32.mrb[227].mxu0 }
 0x765   : > { %10048 = vst [vmem:[%s15825_s23 + $0x300] sm:$0xff] %v9826_v62  ;;  %v9829_v16 = vadd.f32 %v16110_v10, %v9828_v2 }
 0x766   : > { %10051 = vst [vmem:[%s15825_s23 + $0x318] sm:$0xff] %v9837_v25  ;;  %v16511_v25 = vld [vmem:[#allocation76_spill] sm:$0xff] }
 0x767   : > { %10049 = vst [vmem:[%s15825_s23 + $0x308] sm:$0xff] %v9829_v16  ;;  %v11572_v2 = vadd.f32 %v16121_v33, %v16511_v25 }
 0x769   : > { %v11274_v30 = vpop.f32.mrb[100].mxu1  ;;  %v9352_v59 = vpop.f32.mrb[228].mxu0 }
 0x76a   : > { %v9850_v38 = vadd.f32 %v16157_v1, %v11274_v30  ;;  %v9841_v17 = vpop.f32.mrb[101].mxu1  ;;  %v11561_v24 = vadd.f32 %v11560_v0, %v9352_v59  ;;  %v9354_v5 = vpop.f32.mrb[229].mxu0 }
 0x76b   : > { %v9842_v10 = vadd.f32 %v16141_v51, %v9841_v17  ;;  %v11275_v58 = vpop.f32.mrb[102].mxu1  ;;  %v9355_v8 = vpop.f32.mrb[230].mxu0 }
 0x76c   : > { %10054 = vst [vmem:[%s15825_s23 + $0x330] sm:$0xff] %v9850_v38  ;;  %v9853_v15 = vadd.f32 %v16163_v53, %v11275_v58  ;;  %v9844_v27 = vpop.f32.mrb[103].mxu1  ;;  %v11563_v46 = vadd.f32 %v11562_v43, %v9355_v8  ;;  %v9357_v26 = vpop.f32.mrb[231].mxu0  ;;  %v16513_v58 = vld [vmem:[#allocation78_spill] sm:$0xff] }
 0x76d   : > { %10052 = vst [vmem:[%s15825_s23 + $0x320] sm:$0xff] %v9842_v10  ;;  %v9845_v1 = vadd.f32 %v16147_v48, %v9844_v27  ;;  %v11576_v8 = vadd.f32 %v16121_v33, %v16513_v58 }
 0x76e   : > { %10055 = vst [vmem:[%s15825_s23 + $0x338] sm:$0xff] %v9853_v15 }
 0x76f   : > { %10053 = vst [vmem:[%s15825_s23 + $0x328] sm:$0xff] %v9845_v1 }
 0x771   : > { %v11278_v11 = vpop.f32.mrb[104].mxu1  ;;  %v9360_v51 = vpop.f32.mrb[232].mxu0 }
 0x772   : > { %v9866_v6 = vadd.f32 %v16189_v42, %v11278_v11  ;;  %v9857_v53 = vpop.f32.mrb[105].mxu1  ;;  %v11565_v45 = vadd.f32 %v11564_v49, %v9360_v51  ;;  %v9362_v36 = vpop.f32.mrb[233].mxu0 }
 0x773   : > { %v9858_v48 = vadd.f32 %v16173_v3, %v9857_v53  ;;  %v11279_v20 = vpop.f32.mrb[106].mxu1  ;;  %v9363_v19 = vpop.f32.mrb[234].mxu0 }
 0x774   : > { %10058 = vst [vmem:[%s15825_s23 + $0x350] sm:$0xff] %v9866_v6  ;;  %v9869_v32 = vadd.f32 %v16195_v39, %v11279_v20  ;;  %v9860_v13 = vpop.f32.mrb[107].mxu1  ;;  %v11567_v40 = vadd.f32 %v11566_v55, %v9363_v19  ;;  %v9365_v28 = vpop.f32.mrb[235].mxu0 }
 0x775   : > { %10056 = vst [vmem:[%s15825_s23 + $0x340] sm:$0xff] %v9858_v48  ;;  %v9861_v42 = vadd.f32 %v16179_v41, %v9860_v13  ;;  %v16515_v48 = vld [vmem:[#allocation80_spill] sm:$0xff]  ;;  %v16516_v28 = vld [vmem:[#allocation81_spill] sm:$0xff] }
 0x776   : > { %10059 = vst [vmem:[%s15825_s23 + $0x358] sm:$0xff] %v9869_v32  ;;  %v11580_v20 = vadd.f32 %v16121_v33, %v16515_v48 }
 0x777   : > { %10057 = vst [vmem:[%s15825_s23 + $0x348] sm:$0xff] %v9861_v42  ;;  %v11582_v42 = vadd.f32 %v16121_v33, %v16516_v28 }
 0x779   : > { %v11282_v18 = vpop.f32.mrb[108].mxu1  ;;  %v9368_v3 = vpop.f32.mrb[236].mxu0 }
 0x77a   : > { %v9882_v34 = vadd.f32 %v16221_v7, %v11282_v18  ;;  %v9873_v39 = vpop.f32.mrb[109].mxu1  ;;  %v11569_v29 = vadd.f32 %v11568_v44, %v9368_v3  ;;  %v9370_v4 = vpop.f32.mrb[237].mxu0 }
 0x77b   : > { %v9874_v41 = vadd.f32 %v16205_v50, %v9873_v39  ;;  %v11283_v52 = vpop.f32.mrb[110].mxu1  ;;  %v9371_v56 = vpop.f32.mrb[238].mxu0  ;;  %v16517_v4 = vld [vmem:[#allocation82_spill] sm:$0xff] }
 0x77c   : > { %10062 = vst [vmem:[%s15825_s23 + $0x370] sm:$0xff] %v9882_v34  ;;  %v9885_v35 = vadd.f32 %v16227_v9, %v11283_v52  ;;  %v9876_v62 = vpop.f32.mrb[111].mxu1  ;;  %v11571_v23 = vadd.f32 %v11570_v54, %v9371_v56  ;;  %v9373_v31 = vpop.f32.mrb[239].mxu0  ;;  %v16512_v9 = vld [vmem:[#allocation77_spill] sm:$0xff] }
 0x77d   : > { %10060 = vst [vmem:[%s15825_s23 + $0x360] sm:$0xff] %v9874_v41  ;;  %v9877_v7 = vadd.f32 %v16211_v60, %v9876_v62  ;;  %v11574_v0 = vadd.f32 %v16121_v33, %v16512_v9  ;;  %v11584_v41 = vadd.f32 %v16121_v33, %v16517_v4  ;;  %v16518_v62 = vld [vmem:[#allocation83_spill] sm:$0xff] }
 0x77e   : > { %10063 = vst [vmem:[%s15825_s23 + $0x378] sm:$0xff] %v9885_v35 }
 0x77f   : > { %10061 = vst [vmem:[%s15825_s23 + $0x368] sm:$0xff] %v9877_v7 }
 0x781   : > { %v11286_v14 = vpop.f32.mrb[112].mxu1  ;;  %v9376_v50 = vpop.f32.mrb[240].mxu0 }
 0x782   : > { %v9898_v16 = vadd.f32 %v11561_v24, %v11286_v14  ;;  %v9889_v57 = vpop.f32.mrb[113].mxu1  ;;  %v11573_v30 = vadd.f32 %v11572_v2, %v9376_v50  ;;  %v9378_v59 = vpop.f32.mrb[241].mxu0 }
 0x783   : > { %v9890_v38 = vadd.f32 %v16237_v47, %v9889_v57  ;;  %v11287_v60 = vpop.f32.mrb[114].mxu1  ;;  %v9379_v17 = vpop.f32.mrb[242].mxu0 }
 0x784   : > { %10066 = vst [vmem:[%s15825_s23 + $0x390] sm:$0xff] %v9898_v16  ;;  %v9901_v63 = vadd.f32 %v11563_v46, %v11287_v60  ;;  %v9892_v43 = vpop.f32.mrb[115].mxu1  ;;  %v11575_v5 = vadd.f32 %v11574_v0, %v9379_v17  ;;  %v9381_v10 = vpop.f32.mrb[243].mxu0  ;;  %v16514_v46 = vld [vmem:[#allocation79_spill] sm:$0xff] }
 0x785   : > { %10064 = vst [vmem:[%s15825_s23 + $0x380] sm:$0xff] %v9890_v38  ;;  %v9893_v24 = vadd.f32 %v16243_v61, %v9892_v43  ;;  %v11578_v1 = vadd.f32 %v16121_v33, %v16514_v46 }
 0x786   : > { %10067 = vst [vmem:[%s15825_s23 + $0x398] sm:$0xff] %v9901_v63 }
 0x787   : > { %10065 = vst [vmem:[%s15825_s23 + $0x388] sm:$0xff] %v9893_v24 }
 0x789   : > { %v11290_v15 = vpop.f32.mrb[116].mxu1  ;;  %v9384_v27 = vpop.f32.mrb[244].mxu0 }
 0x78a   : > { %v9914_v47 = vadd.f32 %v11569_v29, %v11290_v15  ;;  %v9905_v26 = vpop.f32.mrb[117].mxu1  ;;  %v11577_v12 = vadd.f32 %v11576_v8, %v9384_v27  ;;  %v9386_v49 = vpop.f32.mrb[245].mxu0 }
 0x78b   : > { %v9906_v11 = vadd.f32 %v11565_v45, %v9905_v26  ;;  %v11291_v51 = vpop.f32.mrb[118].mxu1  ;;  %v9387_v61 = vpop.f32.mrb[246].mxu0 }
 0x78c   : > { %10070 = vst [vmem:[%s15825_s23 + $0x3b0] sm:$0xff] %v9914_v47  ;;  %v9917_v6 = vadd.f32 %v11571_v23, %v11291_v51  ;;  %v9908_v53 = vpop.f32.mrb[119].mxu1  ;;  %v11579_v22 = vadd.f32 %v11578_v1, %v9387_v61  ;;  %v9389_v55 = vpop.f32.mrb[247].mxu0  ;;  %v11586_v23 = vadd.f32 %v16121_v33, %v16518_v62 }
 0x78d   : > { %10068 = vst [vmem:[%s15825_s23 + $0x3a0] sm:$0xff] %v9906_v11  ;;  %v9909_v36 = vadd.f32 %v11567_v40, %v9908_v53 }
 0x78e   : > { %10071 = vst [vmem:[%s15825_s23 + $0x3b8] sm:$0xff] %v9917_v6 }
 0x78f   : > { %10069 = vst [vmem:[%s15825_s23 + $0x3a8] sm:$0xff] %v9909_v36 }
 0x791   : > { %v11294_v19 = vpop.f32.mrb[120].mxu1  ;;  %v9392_v32 = vpop.f32.mrb[248].mxu0 }
 0x792   : > { %v9930_v45 = vadd.f32 %v11577_v12, %v11294_v19  ;;  %v9921_v13 = vpop.f32.mrb[121].mxu1  ;;  %v11581_v37 = vadd.f32 %v11580_v20, %v9392_v32  ;;  %v9394_v44 = vpop.f32.mrb[249].mxu0 }
 0x793   : > { %v9922_v18 = vadd.f32 %v11573_v30, %v9921_v13  ;;  %v11295_v3 = vpop.f32.mrb[122].mxu1  ;;  %v9395_v40 = vpop.f32.mrb[250].mxu0 }
 0x794   : > { %10074 = vst [vmem:[%s15825_s23 + $0x3d0] sm:$0xff] %v9930_v45  ;;  %v9933_v34 = vadd.f32 %v11579_v22, %v11295_v3  ;;  %v9924_v39 = vpop.f32.mrb[123].mxu1  ;;  %v11583_v21 = vadd.f32 %v11582_v42, %v9395_v40  ;;  %v9397_v54 = vpop.f32.mrb[251].mxu0 }
 0x795   : > { %10072 = vst [vmem:[%s15825_s23 + $0x3c0] sm:$0xff] %v9922_v18  ;;  %v9925_v29 = vadd.f32 %v11575_v5, %v9924_v39 }
 0x796   : > { %10075 = vst [vmem:[%s15825_s23 + $0x3d8] sm:$0xff] %v9933_v34 }
 0x797   : > { %10073 = vst [vmem:[%s15825_s23 + $0x3c8] sm:$0xff] %v9925_v29 }
 0x799   : > { %v11298_v52 = vpop.f32.mrb[124].mxu1  ;;  %v9400_v56 = vpop.f32.mrb[252].mxu0 }
 0x79a   : > { %v9937_v35 = vpop.f32.mrb[125].mxu1  ;;  %v11585_v31 = vadd.f32 %v11584_v41, %v9400_v56  ;;  %v9402_v7 = vpop.f32.mrb[253].mxu0 }
 0x79b   : > { %v9938_v25 = vadd.f32 %v11581_v37, %v9937_v35  ;;  %v11299_v2 = vpop.f32.mrb[126].mxu1  ;;  %v9403_v14 = vpop.f32.mrb[254].mxu0 }
 0x79c   : > { %v9940_v50 = vpop.f32.mrb[127].mxu1  ;;  %v9946_v16 = vadd.f32 %v11585_v31, %v11298_v52  ;;  %v11587_v57 = vadd.f32 %v11586_v23, %v9403_v14  ;;  %v9405_v9 = vpop.f32.mrb[255].mxu0 }
 0x79d   : > { %10076 = vst [vmem:[%s15825_s23 + $0x3e0] sm:$0xff] %v9938_v25  ;;  %v9941_v0 = vadd.f32 %v11583_v21, %v9940_v50 }
 0x79e   : > { %10078 = vst [vmem:[%s15825_s23 + $0x3f0] sm:$0xff] %v9946_v16  ;;  %v9949_v30 = vadd.f32 %v11587_v57, %v11299_v2 }
 0x79f   : > { %10077 = vst [vmem:[%s15825_s23 + $0x3e8] sm:$0xff] %v9941_v0 }
 0x7a0   : > { %10079 = vst [vmem:[%s15825_s23 + $0x3f8] sm:$0xff] %v9949_v30 }
 0x7a1 PF: > { %s13_s12 = sadd.s32 1, %s13966_s12  }
 0x7a2   : > { %p10_p4 = scmp.ge.s32.totalorder %s13_s12, 4  }
 0x7a4   :  { %12 = sbr.rel (!%p10_p4) target bundleno = 1 (0x1), region = 62 }

</bundles_post_ra>
